<compile_context>
chip_gen: v7x
topology: tpu7x:2x2x1
jax: 0.10.0
libtpu: 0.0.40
codegen_flags: <defaults>
</compile_context>

<pallas_src>
import jax
import jax.numpy as jnp
import numpy as np
from jax.experimental import pallas as pl
from jax.experimental.pallas import tpu as pltpu


def classify_head_kernel(x_ref, w1_ref, b1_ref, w2_ref, b2_ref, o_ref, acc_ref):
    # x_ref  : (B_blk, c1, HW_tile) f32   -- native NCHW slab, HW on lanes
    # w1_ref : (C_, c1)  bf16             -- fused 1x1-conv + BN weight
    # b1_ref : (C_, 1)   f32              -- fused BN bias (column)
    # w2_ref : (c2, C_)  bf16             -- Linear weight with 1/HW folded in
    # b2_ref : (c2, 1)   f32              -- Linear bias (column)
    # o_ref  : (1, c2, B_blk) f32         -- per-batch-block output slab
    # acc_ref: (C_, B_blk) f32 scratch    -- streaming global-avg-pool accumulator
    j = pl.program_id(1)                  # HW-tile (reduction) index
    b_blk = x_ref.shape[0]

    @pl.when(j == 0)
    def _init():
        acc_ref[...] = jnp.zeros_like(acc_ref)

    w1 = w1_ref[...]                      # resident across the HW sweep
    b1 = b1_ref[...]

    for b in range(b_blk):                # static unroll; B_blk is small
        xb = x_ref[b].astype(jnp.bfloat16)                               # (c1, HW_tile)
        h = jnp.dot(w1, xb, preferred_element_type=jnp.float32) + b1     # (C_, HW_tile) f32
        # SiLU via a single transcendental: x*sigmoid(x) == 0.5*x*(1 + tanh(x/2))
        h = 0.5 * h * (1.0 + jnp.tanh(0.5 * h))
        acc_ref[:, b:b + 1] += jnp.sum(h, axis=-1, keepdims=True)        # (C_, 1)

    @pl.when(j == pl.num_programs(1) - 1)
    def _finalize():
        pooled = acc_ref[...].astype(jnp.bfloat16)                       # (C_, B_blk)
        out = jnp.dot(w2_ref[...], pooled,
                      preferred_element_type=jnp.float32) + b2_ref[...]  # (c2, B_blk)
        o_ref[0] = out.astype(o_ref.dtype)


def _pick_hw_tile(hw, requested):
    # Last block dim must be a multiple of 128 or the full extent.
    if requested and hw % requested == 0 and (requested % 128 == 0 or requested == hw):
        return requested
    return 128 if hw % 128 == 0 else hw


def _pick_batch_block(n, requested):
    b = max(1, min(requested, n))
    while n % b:
        b -= 1
    return b


def classify_head(x_nchw, w1_fused, b1_fused, lin_w, lin_b, *,
                  hw_tile=128, batch_block=8):
    """x_nchw: (N, c1, H, W) float32 (native NCHW). Returns (N, c2) float32.

    w1_fused: (C_, c1)  fused Conv2d(1x1, bias=False) + BatchNorm2d weight
    b1_fused: (C_,)     fused BN bias
    lin_w   : (c2, C_)  Linear weight
    lin_b   : (c2,)     Linear bias
    """
    N, c1, H, W = x_nchw.shape
    HW = H * W
    C_ = w1_fused.shape[0]
    c2 = lin_w.shape[0]

    hw_t = _pick_hw_tile(HW, hw_tile)
    b_blk = _pick_batch_block(N, batch_block)
    nb = N // b_blk
    hwb = HW // hw_t

    # Native layout: NCHW -> (N, c1, HW) is a free reshape -- no transpose,
    # no extra HBM round trip of the activation tensor.
    x = x_nchw.reshape(N, c1, HW)

    # Parameter prep (tiny, one-time): bf16 matmul operands; 1/HW (the pool
    # mean) is folded into the head weight so the kernel never divides by HW.
    w1_bf = w1_fused.astype(jnp.bfloat16)                    # (C_, c1)
    b1_col = b1_fused.reshape(C_, 1).astype(jnp.float32)
    w2_bf = (lin_w * (1.0 / HW)).astype(jnp.bfloat16)        # (c2, C_)
    b2_col = lin_b.reshape(c2, 1).astype(jnp.float32)

    out3 = pl.pallas_call(
        classify_head_kernel,
        out_shape=jax.ShapeDtypeStruct((nb, c2, b_blk), jnp.float32),
        grid_spec=pltpu.PrefetchScalarGridSpec(
            num_scalar_prefetch=0,
            grid=(nb, hwb),                       # (batch blocks, HW reduction tiles)
            in_specs=[
                pl.BlockSpec((b_blk, c1, hw_t), lambda i, j: (i, 0, j)),
                pl.BlockSpec((C_, c1), lambda i, j: (0, 0)),
                pl.BlockSpec((C_, 1), lambda i, j: (0, 0)),
                pl.BlockSpec((c2, C_), lambda i, j: (0, 0)),
                pl.BlockSpec((c2, 1), lambda i, j: (0, 0)),
            ],
            out_specs=pl.BlockSpec((1, c2, b_blk), lambda i, j: (i, 0, 0)),
            scratch_shapes=[pltpu.VMEM((C_, b_blk), jnp.float32)],
        ),
        compiler_params=pltpu.CompilerParams(
            dimension_semantics=("parallel", "arbitrary"),
            vmem_limit_bytes=32 * 1024 * 1024,
        ),
    )(x, w1_bf, b1_col, w2_bf, b2_col)

    # (nb, c2, b_blk) -> (N, c2): a tiny fixup on the final logits only.
    return jnp.transpose(out3, (0, 2, 1)).reshape(N, c2)


def make_params(key, c1, c_, c2, bn_eps=1e-5):
    """Deterministic init; fuse Conv2d(1x1, bias=False) + BatchNorm2d (eval)."""
    k_conv, k_g, k_b, k_m, k_v, k_lw, k_lb = jax.random.split(key, 7)
    conv_w = jax.random.normal(k_conv, (c_, c1), jnp.float32) * 0.1     # (C_, c1)
    gamma = 1.0 + 0.1 * jax.random.normal(k_g, (c_,), jnp.float32)
    beta = 0.1 * jax.random.normal(k_b, (c_,), jnp.float32)
    rmean = 0.1 * jax.random.normal(k_m, (c_,), jnp.float32)
    rvar = jnp.abs(1.0 + 0.1 * jax.random.normal(k_v, (c_,), jnp.float32))
    scale = gamma / jnp.sqrt(rvar + bn_eps)                             # (C_,)
    w1_fused = conv_w * scale[:, None]                                  # (C_, c1)
    b1_fused = beta - rmean * scale                                     # (C_,)
    lin_w = jax.random.normal(k_lw, (c2, c_), jnp.float32) * 0.02       # (c2, C_)
    lin_b = 0.01 * jax.random.normal(k_lb, (c2,), jnp.float32)
    return w1_fused, b1_fused, lin_w, lin_b


def reference(x_nchw, w1_fused, b1_fused, lin_w, lin_b):
    """Pure-f32 JAX reference of the PyTorch module (eval mode)."""
    h = jnp.einsum('oc,nchw->nohw', w1_fused, x_nchw) + b1_fused[None, :, None, None]
    h = h * jax.nn.sigmoid(h)                   # SiLU
    pooled = jnp.mean(h, axis=(2, 3))           # AdaptiveAvgPool2d(1) + flatten
    return pooled @ lin_w.T + lin_b[None, :]    # Dropout(p=0.0) is identity


if __name__ == "__main__":
    N, c1, H, W = 2, 4, 16, 16
    C_, c2 = 1280, 8
    key = jax.random.PRNGKey(0)
    kx, kp = jax.random.split(key)
    x = jax.random.normal(kx, (N, c1, H, W), jnp.float32)
    w1_fused, b1_fused, lin_w, lin_b = make_params(kp, c1, C_, c2)

    out = classify_head(x, w1_fused, b1_fused, lin_w, lin_b)
    out = jax.block_until_ready(out)

    ref = reference(x, w1_fused, b1_fused, lin_w, lin_b)
    assert out.shape == (N, c2)
    # bf16 matmul operands (f32 accumulation) -> loosen the pure-f32 tolerance.
    assert np.allclose(np.asarray(out), np.asarray(ref), atol=2e-2, rtol=2e-2), (
        float(np.max(np.abs(np.asarray(out) - np.asarray(ref)))))
    print("KERNEL_OK")
</pallas_src>

<mosaic_0001>
module attributes {stable_mosaic.version = 11 : i64} {
  func.func @classify_head_kernel(%arg0: i32, %arg1: i32, %arg2: memref<2x4x128xf32, #tpu.memory_space<vmem>>, %arg3: memref<1280x4xbf16, #tpu.memory_space<vmem>>, %arg4: memref<1280x1xf32, #tpu.memory_space<vmem>>, %arg5: memref<8x1280xbf16, #tpu.memory_space<vmem>>, %arg6: memref<8x1xf32, #tpu.memory_space<vmem>>, %arg7: memref<1x8x2xf32, #tpu.memory_space<vmem>>, %arg8: memref<1280x2xf32, #tpu.memory_space<vmem>>) attributes {dimension_semantics = [#tpu.dimension_semantics<parallel>, #tpu.dimension_semantics<arbitrary>], iteration_bounds = array<i64: 1, 2>, scalar_prefetch = 0 : i64, scratch_operands = 1 : i64, tpu.core_type = #tpu.core_type<tc>, window_params = [{transform_indices = @transform_0, window_bounds = array<i64: 2, 4, 128>}, {pipeline_mode = #tpu.pipeline_mode<synchronous>, transform_indices = @transform_1, window_bounds = array<i64: 1280, 4>}, {pipeline_mode = #tpu.pipeline_mode<synchronous>, transform_indices = @transform_2, window_bounds = array<i64: 1280, 1>}, {pipeline_mode = #tpu.pipeline_mode<synchronous>, transform_indices = @transform_3, window_bounds = array<i64: 8, 1280>}, {pipeline_mode = #tpu.pipeline_mode<synchronous>, transform_indices = @transform_4, window_bounds = array<i64: 8, 1>}, {transform_indices = @transform_5, window_bounds = array<i64: 1, 8, 2>}]} {
    %c0_i32 = arith.constant 0 : i32
    %0 = arith.cmpi eq, %arg1, %c0_i32 : i32
    %1 = arith.extui %0 : i1 to i32
    %c0_i32_0 = arith.constant 0 : i32
    %2 = arith.cmpi ne, %1, %c0_i32_0 : i32
    scf.if %2 {
      %cst_27 = arith.constant 0.000000e+00 : f32
      %46 = vector.broadcast %cst_27 : f32 to vector<1280x2xf32>
      %c0_28 = arith.constant 0 : index
      %c0_29 = arith.constant 0 : index
      %47 = vector.load %arg8[%c0_28, %c0_29] : memref<1280x2xf32, #tpu.memory_space<vmem>>, vector<1280x2xf32>
      tpu.vector_store %arg8[%c0_28, %c0_29], %46 {strides = array<i32>} : memref<1280x2xf32, #tpu.memory_space<vmem>>, vector<1280x2xf32>,
    } else {
    }
    %c0 = arith.constant 0 : index
    %c0_1 = arith.constant 0 : index
    %3 = vector.load %arg3[%c0, %c0_1] : memref<1280x4xbf16, #tpu.memory_space<vmem>>, vector<1280x4xbf16>
    %c0_2 = arith.constant 0 : index
    %c0_3 = arith.constant 0 : index
    %4 = vector.load %arg4[%c0_2, %c0_3] : memref<1280x1xf32, #tpu.memory_space<vmem>>, vector<1280x1xf32>
    %c0_4 = arith.constant 0 : index
    %c0_5 = arith.constant 0 : index
    %c0_6 = arith.constant 0 : index
    %5 = vector.load %arg2[%c0_4, %c0_5, %c0_6] : memref<2x4x128xf32, #tpu.memory_space<vmem>>, vector<1x4x128xf32>
    %6 = vector.shape_cast %5 : vector<1x4x128xf32> to vector<4x128xf32>
    %7 = arith.truncf %6 : vector<4x128xf32> to vector<4x128xbf16>
    %cst = arith.constant dense<0.000000e+00> : vector<1280x128xf32>
    %8 = tpu.matmul %3, %7, %cst {dimension_numbers = #tpu.dot_dimension_numbers<[1], [0], [0], [1], [0, 0, 1, 1], [], []>} : vector<1280x4xbf16>, vector<4x128xbf16>, vector<1280x128xf32> -> vector<1280x128xf32>
    %9 = vector.broadcast %4 : vector<1280x1xf32> to vector<1280x128xf32>
    %10 = arith.addf %8, %9 : vector<1280x128xf32>
    %cst_7 = arith.constant 5.000000e-01 : f32
    %11 = vector.broadcast %cst_7 : f32 to vector<1280x128xf32>
    %12 = arith.mulf %11, %10 : vector<1280x128xf32>
    %cst_8 = arith.constant 5.000000e-01 : f32
    %13 = vector.broadcast %cst_8 : f32 to vector<1280x128xf32>
    %14 = arith.mulf %13, %10 : vector<1280x128xf32>
    %15 = math.tanh %14 : vector<1280x128xf32>
    %cst_9 = arith.constant 1.000000e+00 : f32
    %16 = vector.broadcast %cst_9 : f32 to vector<1280x128xf32>
    %17 = arith.addf %16, %15 : vector<1280x128xf32>
    %18 = arith.mulf %12, %17 : vector<1280x128xf32>
    %c0_10 = arith.constant 0 : index
    %c0_11 = arith.constant 0 : index
    %19 = vector.load %arg8[%c0_10, %c0_11] : memref<1280x2xf32, #tpu.memory_space<vmem>>, vector<1280x1xf32>
    %cst_12 = arith.constant dense<0.000000e+00> : vector<1280xf32>
    %20 = vector.multi_reduction <add>, %18, %cst_12 [1] : vector<1280x128xf32> to vector<1280xf32>
    %21 = vector.shape_cast %20 : vector<1280xf32> to vector<1280x1xf32>
    %22 = arith.addf %19, %21 : vector<1280x1xf32>
    %c0_13 = arith.constant 0 : index
    %c0_14 = arith.constant 0 : index
    %23 = vector.load %arg8[%c0_13, %c0_14] : memref<1280x2xf32, #tpu.memory_space<vmem>>, vector<1280x1xf32>
    tpu.vector_store %arg8[%c0_13, %c0_14], %22 {strides = array<i32>} : memref<1280x2xf32, #tpu.memory_space<vmem>>, vector<1280x1xf32>,
    %c1 = arith.constant 1 : index
    %c0_15 = arith.constant 0 : index
    %c0_16 = arith.constant 0 : index
    %24 = vector.load %arg2[%c1, %c0_15, %c0_16] : memref<2x4x128xf32, #tpu.memory_space<vmem>>, vector<1x4x128xf32>
    %25 = vector.shape_cast %24 : vector<1x4x128xf32> to vector<4x128xf32>
    %26 = arith.truncf %25 : vector<4x128xf32> to vector<4x128xbf16>
    %cst_17 = arith.constant dense<0.000000e+00> : vector<1280x128xf32>
    %27 = tpu.matmul %3, %26, %cst_17 {dimension_numbers = #tpu.dot_dimension_numbers<[1], [0], [0], [1], [0, 0, 1, 1], [], []>} : vector<1280x4xbf16>, vector<4x128xbf16>, vector<1280x128xf32> -> vector<1280x128xf32>
    %28 = vector.broadcast %4 : vector<1280x1xf32> to vector<1280x128xf32>
    %29 = arith.addf %27, %28 : vector<1280x128xf32>
    %cst_18 = arith.constant 5.000000e-01 : f32
    %30 = vector.broadcast %cst_18 : f32 to vector<1280x128xf32>
    %31 = arith.mulf %30, %29 : vector<1280x128xf32>
    %cst_19 = arith.constant 5.000000e-01 : f32
    %32 = vector.broadcast %cst_19 : f32 to vector<1280x128xf32>
    %33 = arith.mulf %32, %29 : vector<1280x128xf32>
    %34 = math.tanh %33 : vector<1280x128xf32>
    %cst_20 = arith.constant 1.000000e+00 : f32
    %35 = vector.broadcast %cst_20 : f32 to vector<1280x128xf32>
    %36 = arith.addf %35, %34 : vector<1280x128xf32>
    %37 = arith.mulf %31, %36 : vector<1280x128xf32>
    %c0_21 = arith.constant 0 : index
    %c1_22 = arith.constant 1 : index
    %38 = vector.load %arg8[%c0_21, %c1_22] : memref<1280x2xf32, #tpu.memory_space<vmem>>, vector<1280x1xf32>
    %cst_23 = arith.constant dense<0.000000e+00> : vector<1280xf32>
    %39 = vector.multi_reduction <add>, %37, %cst_23 [1] : vector<1280x128xf32> to vector<1280xf32>
    %40 = vector.shape_cast %39 : vector<1280xf32> to vector<1280x1xf32>
    %41 = arith.addf %38, %40 : vector<1280x1xf32>
    %c0_24 = arith.constant 0 : index
    %c1_25 = arith.constant 1 : index
    %42 = vector.load %arg8[%c0_24, %c1_25] : memref<1280x2xf32, #tpu.memory_space<vmem>>, vector<1280x1xf32>
    tpu.vector_store %arg8[%c0_24, %c1_25], %41 {strides = array<i32>} : memref<1280x2xf32, #tpu.memory_space<vmem>>, vector<1280x1xf32>,
    %c1_i32 = arith.constant 1 : i32
    %43 = arith.cmpi eq, %arg1, %c1_i32 : i32
    %44 = arith.extui %43 : i1 to i32
    %c0_i32_26 = arith.constant 0 : i32
    %45 = arith.cmpi ne, %44, %c0_i32_26 : i32
    scf.if %45 {
      %c0_27 = arith.constant 0 : index
      %c0_28 = arith.constant 0 : index
      %46 = vector.load %arg8[%c0_27, %c0_28] : memref<1280x2xf32, #tpu.memory_space<vmem>>, vector<1280x2xf32>
      %47 = arith.truncf %46 : vector<1280x2xf32> to vector<1280x2xbf16>
      %c0_29 = arith.constant 0 : index
      %c0_30 = arith.constant 0 : index
      %48 = vector.load %arg5[%c0_29, %c0_30] : memref<8x1280xbf16, #tpu.memory_space<vmem>>, vector<8x1280xbf16>
      %cst_31 = arith.constant dense<0.000000e+00> : vector<8x2xf32>
      %49 = tpu.matmul %48, %47, %cst_31 {dimension_numbers = #tpu.dot_dimension_numbers<[1], [0], [0], [1], [0, 0, 1, 1], [], []>} : vector<8x1280xbf16>, vector<1280x2xbf16>, vector<8x2xf32> -> vector<8x2xf32>
      %c0_32 = arith.constant 0 : index
      %c0_33 = arith.constant 0 : index
      %50 = vector.load %arg6[%c0_32, %c0_33] : memref<8x1xf32, #tpu.memory_space<vmem>>, vector<8x1xf32>
      %51 = vector.broadcast %50 : vector<8x1xf32> to vector<8x2xf32>
      %52 = arith.addf %49, %51 : vector<8x2xf32>
      %c0_34 = arith.constant 0 : index
      %c0_35 = arith.constant 0 : index
      %c0_36 = arith.constant 0 : index
      %53 = vector.load %arg7[%c0_34, %c0_35, %c0_36] : memref<1x8x2xf32, #tpu.memory_space<vmem>>, vector<1x8x2xf32>
      %54 = vector.shape_cast %53 : vector<1x8x2xf32> to vector<8x2xf32>
      %55 = vector.shape_cast %52 : vector<8x2xf32> to vector<1x8x2xf32>
      tpu.vector_store %arg7[%c0_34, %c0_35, %c0_36], %55 {strides = array<i32>} : memref<1x8x2xf32, #tpu.memory_space<vmem>>, vector<1x8x2xf32>,
    } else {
    }
    return
  }
  func.func @transform_0(%arg0: i32, %arg1: i32) -> (i32, i32, i32) {
    %c0_i32 = arith.constant 0 : i32
    %c0_i32_0 = arith.constant 0 : i32
    return %arg0, %c0_i32, %arg1 : i32, i32, i32
  }
  func.func @transform_1(%arg0: i32, %arg1: i32) -> (i32, i32) {
    %c0_i32 = arith.constant 0 : i32
    %c0_i32_0 = arith.constant 0 : i32
    %c0_i32_1 = arith.constant 0 : i32
    return %c0_i32, %c0_i32_0 : i32, i32
  }
  func.func @transform_2(%arg0: i32, %arg1: i32) -> (i32, i32) {
    %c0_i32 = arith.constant 0 : i32
    %c0_i32_0 = arith.constant 0 : i32
    %c0_i32_1 = arith.constant 0 : i32
    return %c0_i32, %c0_i32_0 : i32, i32
  }
  func.func @transform_3(%arg0: i32, %arg1: i32) -> (i32, i32) {
    %c0_i32 = arith.constant 0 : i32
    %c0_i32_0 = arith.constant 0 : i32
    %c0_i32_1 = arith.constant 0 : i32
    return %c0_i32, %c0_i32_0 : i32, i32
  }
  func.func @transform_4(%arg0: i32, %arg1: i32) -> (i32, i32) {
    %c0_i32 = arith.constant 0 : i32
    %c0_i32_0 = arith.constant 0 : i32
    %c0_i32_1 = arith.constant 0 : i32
    return %c0_i32, %c0_i32_0 : i32, i32
  }
  func.func @transform_5(%arg0: i32, %arg1: i32) -> (i32, i32, i32) {
    %c0_i32 = arith.constant 0 : i32
    %c0_i32_0 = arith.constant 0 : i32
    %c0_i32_1 = arith.constant 0 : i32
    return %arg0, %c0_i32, %c0_i32_0 : i32, i32, i32
  }
}

</mosaic_0001>

<bundles_post_ra>
// kernel: tpu_custom_call.1
= control target key start
LH: loop header
LB: loop body
LE: loop exit
PB: predicated region body
PF: predicated region fallthrough
CT: control target
= control target key end

     0   :  { %s8722_s18 = smov 0   ;;  %s8724_s19 = smov 0   ;;  %s13505_s0 = inlined_call_operand.vmem [shape: f32[2,4,256], index: 0, kind: input, shape index: {}]   ;;  %s13506_s1 = inlined_call_operand.vmem [shape: bf16[1280,4], index: 1, kind: input, shape index: {}]   ;;  %s13507_s2 = inlined_call_operand.vmem [shape: f32[1280,1], index: 2, kind: input, shape index: {}]   ;;  %s13508_s3 = inlined_call_operand.vmem [shape: bf16[8,1280], index: 3, kind: input, shape index: {}]   ;;  %s13509_s4 = inlined_call_operand.vmem [shape: f32[8,1], index: 4, kind: input, shape index: {}]   ;;  %s13510_s5 = inlined_call_operand.vmem [shape: f32[1,8,2], index: 5, kind: output, shape index: {}]  }
   0x1   :  { %s8726_s20 = smov 0   ;;  %s8728_s21 = smov 0  }
   0x2   :  { %s8730_s22 = smov 0  }
   0x3 LB: > { %s24_s23 = sadd.s32 1, %s8683_s21  ;;  %p43_p1 = scmp.ne.s32.totalorder %s8675_s19, %s8671_s18  ;;  %s8687_s22 = sphi %s8730_s22, %s15_s22   ;;  %s8683_s21 = sphi %s8728_s21, %s14664_s21   ;;  %s8679_s20 = sphi %s8726_s20, %s14663_s20   ;;  %s8675_s19 = sphi %s8724_s19, %s14662_s19   ;;  %s8671_s18 = sphi %s8722_s18, %s14661_s18  }
   0x4   : > { %p25_p0 = scmp.ge.s32.totalorder %s24_s23, 2  ;;  %p44_p2 = scmp.eq.s32.totalorder %s8687_s22, 0 }
   0x5   : > { %s36_s25 = sadd.s32 1, %s8675_s19  ;;  %p7014_p5 = scmp.ge.s32.totalorder %s8687_s22, 2 }
   0x6   : > { %s14666_s23 = smov (%p25_p0, %s24_s23), 0  ;;  %p45_p3 = por %p44_p2, %p43_p1 }
   0x7   : > { %s32_s24 = ssub.s32 %s8683_s21, %s14666_s23  ;;  %191 = sbr.rel (%p7014_p5) target bundleno = 21 (0x15), region = 32 }
   0x8   : > { %p34_p4 = scmp.eq.s32.totalorder %s32_s24, 0 }
   0xa   : > { %s8757_s26 = scalar_select %p34_p4, %s8675_s19, %s36_s25  }
   0xe   : > { %194 = sbr.rel (!%p45_p3) target bundleno = 21 (0x15), region = 36  ;;  %s196_s27 = sand.u32 (%p45_p3), 1, %s8675_s19  }
   0xf   : > { %s7016_s28 = sshll.u32 (%p45_p3), %s8683_s21, 2  ;;  %s7015_s29 = sshll.u32 (%p45_p3), %s196_s27, 3 }
  0x10   : > { %s203_s7 = scalar_lea.vmem (%p45_p3), %s13505_s0, %s7016_s28  ;;  %s198_s8 = scalar_lea.vmem (%p45_p3), [#allocation3], %s7015_s29 }
  0x11   : > { %v219_v0 = vld [vmem:[%s203_s7] sm:$0xf] (%p45_p3)  ;;  %v221_v1 = vld [vmem:[%s203_s7 + $0x8] sm:$0xf] (%p45_p3) }
  0x12   : > { %220 = vst [vmem:[%s198_s8] sm:$0xf] (%p45_p3), %v219_v0  ;;  %222 = vst [vmem:[%s198_s8 + $0x4] sm:$0xf] (%p45_p3), %v221_v1 }
  0x15 PF: > { %p7017_p6 = scmp.ge.s32.totalorder %s8687_s22, 1  ;;  %p248_p7 = scmp.lt.s32.totalorder %s8687_s22, 3 }
  0x17   : > { %p249_p8 = pnand %p7017_p6, %p248_p7 }
  0x19   : > { %252 = sbr.rel (%p249_p8) target bundleno = 1555 (0x613), region = 77 }
  0x20   : > { %s255_s9 = sand.u32 1, %s8671_s18   ;;  %p7019_p9 = scmp.ne.s32.totalorder %s8679_s20, 0 }
  0x21   : > { %s8768_s10 = sshll.u32 %s255_s9, 3  ;;  %vm291_vm0 = vcmask (!%p7019_p9), 15360   ;;  %v8689_v2 = vmov (!%p7019_p9), 0.0  }
  0x22   : > { %s257_s11 = scalar_lea.vmem [#allocation3], %s8768_s10  ;;  %290 = sbr.rel (%p7019_p9) target bundleno = 114 (0x72), region = 85  ;;  %292 = vst.msk [vmem:[#allocation2] sm:$0xff] (!%p7019_p9), %vm291_vm0, %v8689_v2  ;;  %293 = vst.msk [vmem:[#allocation2 + $0x8] sm:$0xff] (!%p7019_p9), %vm291_vm0, %v8689_v2 }
  0x23   : > { %294 = vst.msk [vmem:[#allocation2 + $0x10] sm:$0xff] (!%p7019_p9), %vm291_vm0, %v8689_v2  ;;  %295 = vst.msk [vmem:[#allocation2 + $0x18] sm:$0xff] (!%p7019_p9), %vm291_vm0, %v8689_v2 }
  0x24   : > { %296 = vst.msk [vmem:[#allocation2 + $0x20] sm:$0xff] (!%p7019_p9), %vm291_vm0, %v8689_v2  ;;  %297 = vst.msk [vmem:[#allocation2 + $0x28] sm:$0xff] (!%p7019_p9), %vm291_vm0, %v8689_v2 }
  0x25   : > { %298 = vst.msk [vmem:[#allocation2 + $0x30] sm:$0xff] (!%p7019_p9), %vm291_vm0, %v8689_v2  ;;  %299 = vst.msk [vmem:[#allocation2 + $0x38] sm:$0xff] (!%p7019_p9), %vm291_vm0, %v8689_v2 }
  0x26   : > { %300 = vst.msk [vmem:[#allocation2 + $0x40] sm:$0xff] (!%p7019_p9), %vm291_vm0, %v8689_v2  ;;  %301 = vst.msk [vmem:[#allocation2 + $0x48] sm:$0xff] (!%p7019_p9), %vm291_vm0, %v8689_v2 }
  0x27   : > { %302 = vst.msk [vmem:[#allocation2 + $0x50] sm:$0xff] (!%p7019_p9), %vm291_vm0, %v8689_v2  ;;  %303 = vst.msk [vmem:[#allocation2 + $0x58] sm:$0xff] (!%p7019_p9), %vm291_vm0, %v8689_v2 }
  0x28   : > { %304 = vst.msk [vmem:[#allocation2 + $0x60] sm:$0xff] (!%p7019_p9), %vm291_vm0, %v8689_v2  ;;  %305 = vst.msk [vmem:[#allocation2 + $0x68] sm:$0xff] (!%p7019_p9), %vm291_vm0, %v8689_v2 }
  0x29   : > { %306 = vst.msk [vmem:[#allocation2 + $0x70] sm:$0xff] %vm291_vm0, %v8689_v2  ;;  %307 = vst.msk [vmem:[#allocation2 + $0x78] sm:$0xff] %vm291_vm0, %v8689_v2 }
  0x2a   : > { %308 = vst.msk [vmem:[#allocation2 + $0x80] sm:$0xff] %vm291_vm0, %v8689_v2  ;;  %309 = vst.msk [vmem:[#allocation2 + $0x88] sm:$0xff] %vm291_vm0, %v8689_v2 }
  0x2b   : > { %310 = vst.msk [vmem:[#allocation2 + $0x90] sm:$0xff] %vm291_vm0, %v8689_v2  ;;  %311 = vst.msk [vmem:[#allocation2 + $0x98] sm:$0xff] %vm291_vm0, %v8689_v2 }
  0x2c   : > { %312 = vst.msk [vmem:[#allocation2 + $0xa0] sm:$0xff] %vm291_vm0, %v8689_v2  ;;  %313 = vst.msk [vmem:[#allocation2 + $0xa8] sm:$0xff] %vm291_vm0, %v8689_v2 }
  0x2d   : > { %314 = vst.msk [vmem:[#allocation2 + $0xb0] sm:$0xff] %vm291_vm0, %v8689_v2  ;;  %315 = vst.msk [vmem:[#allocation2 + $0xb8] sm:$0xff] %vm291_vm0, %v8689_v2 }
  0x2e   : > { %316 = vst.msk [vmem:[#allocation2 + $0xc0] sm:$0xff] %vm291_vm0, %v8689_v2  ;;  %317 = vst.msk [vmem:[#allocation2 + $0xc8] sm:$0xff] %vm291_vm0, %v8689_v2 }
  0x2f   : > { %318 = vst.msk [vmem:[#allocation2 + $0xd0] sm:$0xff] %vm291_vm0, %v8689_v2  ;;  %319 = vst.msk [vmem:[#allocation2 + $0xd8] sm:$0xff] %vm291_vm0, %v8689_v2 }
  0x30   : > { %320 = vst.msk [vmem:[#allocation2 + $0xe0] sm:$0xff] %vm291_vm0, %v8689_v2  ;;  %321 = vst.msk [vmem:[#allocation2 + $0xe8] sm:$0xff] %vm291_vm0, %v8689_v2 }
  0x31   : > { %322 = vst.msk [vmem:[#allocation2 + $0xf0] sm:$0xff] %vm291_vm0, %v8689_v2  ;;  %323 = vst.msk [vmem:[#allocation2 + $0xf8] sm:$0xff] %vm291_vm0, %v8689_v2 }
  0x32   : > { %324 = vst.msk [vmem:[#allocation2 + $0x100] sm:$0xff] %vm291_vm0, %v8689_v2  ;;  %325 = vst.msk [vmem:[#allocation2 + $0x108] sm:$0xff] %vm291_vm0, %v8689_v2 }
  0x33   : > { %326 = vst.msk [vmem:[#allocation2 + $0x110] sm:$0xff] %vm291_vm0, %v8689_v2  ;;  %327 = vst.msk [vmem:[#allocation2 + $0x118] sm:$0xff] %vm291_vm0, %v8689_v2 }
  0x34   : > { %328 = vst.msk [vmem:[#allocation2 + $0x120] sm:$0xff] %vm291_vm0, %v8689_v2  ;;  %329 = vst.msk [vmem:[#allocation2 + $0x128] sm:$0xff] %vm291_vm0, %v8689_v2 }
  0x35   : > { %330 = vst.msk [vmem:[#allocation2 + $0x130] sm:$0xff] %vm291_vm0, %v8689_v2  ;;  %331 = vst.msk [vmem:[#allocation2 + $0x138] sm:$0xff] %vm291_vm0, %v8689_v2 }
  0x36   : > { %332 = vst.msk [vmem:[#allocation2 + $0x140] sm:$0xff] %vm291_vm0, %v8689_v2  ;;  %333 = vst.msk [vmem:[#allocation2 + $0x148] sm:$0xff] %vm291_vm0, %v8689_v2 }
  0x37   : > { %334 = vst.msk [vmem:[#allocation2 + $0x150] sm:$0xff] %vm291_vm0, %v8689_v2  ;;  %335 = vst.msk [vmem:[#allocation2 + $0x158] sm:$0xff] %vm291_vm0, %v8689_v2 }
  0x38   : > { %336 = vst.msk [vmem:[#allocation2 + $0x160] sm:$0xff] %vm291_vm0, %v8689_v2  ;;  %337 = vst.msk [vmem:[#allocation2 + $0x168] sm:$0xff] %vm291_vm0, %v8689_v2 }
  0x39   : > { %338 = vst.msk [vmem:[#allocation2 + $0x170] sm:$0xff] %vm291_vm0, %v8689_v2  ;;  %339 = vst.msk [vmem:[#allocation2 + $0x178] sm:$0xff] %vm291_vm0, %v8689_v2 }
  0x3a   : > { %340 = vst.msk [vmem:[#allocation2 + $0x180] sm:$0xff] %vm291_vm0, %v8689_v2  ;;  %341 = vst.msk [vmem:[#allocation2 + $0x188] sm:$0xff] %vm291_vm0, %v8689_v2 }
  0x3b   : > { %342 = vst.msk [vmem:[#allocation2 + $0x190] sm:$0xff] %vm291_vm0, %v8689_v2  ;;  %343 = vst.msk [vmem:[#allocation2 + $0x198] sm:$0xff] %vm291_vm0, %v8689_v2 }
  0x3c   : > { %344 = vst.msk [vmem:[#allocation2 + $0x1a0] sm:$0xff] %vm291_vm0, %v8689_v2  ;;  %345 = vst.msk [vmem:[#allocation2 + $0x1a8] sm:$0xff] %vm291_vm0, %v8689_v2 }
  0x3d   : > { %346 = vst.msk [vmem:[#allocation2 + $0x1b0] sm:$0xff] %vm291_vm0, %v8689_v2  ;;  %347 = vst.msk [vmem:[#allocation2 + $0x1b8] sm:$0xff] %vm291_vm0, %v8689_v2 }
  0x3e   : > { %348 = vst.msk [vmem:[#allocation2 + $0x1c0] sm:$0xff] %vm291_vm0, %v8689_v2  ;;  %349 = vst.msk [vmem:[#allocation2 + $0x1c8] sm:$0xff] %vm291_vm0, %v8689_v2 }
  0x3f   : > { %350 = vst.msk [vmem:[#allocation2 + $0x1d0] sm:$0xff] %vm291_vm0, %v8689_v2  ;;  %351 = vst.msk [vmem:[#allocation2 + $0x1d8] sm:$0xff] %vm291_vm0, %v8689_v2 }
  0x40   : > { %352 = vst.msk [vmem:[#allocation2 + $0x1e0] sm:$0xff] %vm291_vm0, %v8689_v2  ;;  %353 = vst.msk [vmem:[#allocation2 + $0x1e8] sm:$0xff] %vm291_vm0, %v8689_v2 }
  0x41   : > { %354 = vst.msk [vmem:[#allocation2 + $0x1f0] sm:$0xff] %vm291_vm0, %v8689_v2  ;;  %355 = vst.msk [vmem:[#allocation2 + $0x1f8] sm:$0xff] %vm291_vm0, %v8689_v2 }
  0x42   : > { %356 = vst.msk [vmem:[#allocation2 + $0x200] sm:$0xff] %vm291_vm0, %v8689_v2  ;;  %357 = vst.msk [vmem:[#allocation2 + $0x208] sm:$0xff] %vm291_vm0, %v8689_v2 }
  0x43   : > { %358 = vst.msk [vmem:[#allocation2 + $0x210] sm:$0xff] %vm291_vm0, %v8689_v2  ;;  %359 = vst.msk [vmem:[#allocation2 + $0x218] sm:$0xff] %vm291_vm0, %v8689_v2 }
  0x44   : > { %360 = vst.msk [vmem:[#allocation2 + $0x220] sm:$0xff] %vm291_vm0, %v8689_v2  ;;  %361 = vst.msk [vmem:[#allocation2 + $0x228] sm:$0xff] %vm291_vm0, %v8689_v2 }
  0x45   : > { %362 = vst.msk [vmem:[#allocation2 + $0x230] sm:$0xff] %vm291_vm0, %v8689_v2  ;;  %363 = vst.msk [vmem:[#allocation2 + $0x238] sm:$0xff] %vm291_vm0, %v8689_v2 }
  0x46   : > { %364 = vst.msk [vmem:[#allocation2 + $0x240] sm:$0xff] %vm291_vm0, %v8689_v2  ;;  %365 = vst.msk [vmem:[#allocation2 + $0x248] sm:$0xff] %vm291_vm0, %v8689_v2 }
  0x47   : > { %366 = vst.msk [vmem:[#allocation2 + $0x250] sm:$0xff] %vm291_vm0, %v8689_v2  ;;  %367 = vst.msk [vmem:[#allocation2 + $0x258] sm:$0xff] %vm291_vm0, %v8689_v2 }
  0x48   : > { %368 = vst.msk [vmem:[#allocation2 + $0x260] sm:$0xff] %vm291_vm0, %v8689_v2  ;;  %369 = vst.msk [vmem:[#allocation2 + $0x268] sm:$0xff] %vm291_vm0, %v8689_v2 }
  0x49   : > { %370 = vst.msk [vmem:[#allocation2 + $0x270] sm:$0xff] %vm291_vm0, %v8689_v2  ;;  %371 = vst.msk [vmem:[#allocation2 + $0x278] sm:$0xff] %vm291_vm0, %v8689_v2 }
  0x4a   : > { %372 = vst.msk [vmem:[#allocation2 + $0x280] sm:$0xff] %vm291_vm0, %v8689_v2  ;;  %373 = vst.msk [vmem:[#allocation2 + $0x288] sm:$0xff] %vm291_vm0, %v8689_v2 }
  0x4b   : > { %374 = vst.msk [vmem:[#allocation2 + $0x290] sm:$0xff] %vm291_vm0, %v8689_v2  ;;  %375 = vst.msk [vmem:[#allocation2 + $0x298] sm:$0xff] %vm291_vm0, %v8689_v2 }
  0x4c   : > { %376 = vst.msk [vmem:[#allocation2 + $0x2a0] sm:$0xff] %vm291_vm0, %v8689_v2  ;;  %377 = vst.msk [vmem:[#allocation2 + $0x2a8] sm:$0xff] %vm291_vm0, %v8689_v2 }
  0x4d   : > { %378 = vst.msk [vmem:[#allocation2 + $0x2b0] sm:$0xff] %vm291_vm0, %v8689_v2  ;;  %379 = vst.msk [vmem:[#allocation2 + $0x2b8] sm:$0xff] %vm291_vm0, %v8689_v2 }
  0x4e   : > { %380 = vst.msk [vmem:[#allocation2 + $0x2c0] sm:$0xff] %vm291_vm0, %v8689_v2  ;;  %381 = vst.msk [vmem:[#allocation2 + $0x2c8] sm:$0xff] %vm291_vm0, %v8689_v2 }
  0x4f   : > { %382 = vst.msk [vmem:[#allocation2 + $0x2d0] sm:$0xff] %vm291_vm0, %v8689_v2  ;;  %383 = vst.msk [vmem:[#allocation2 + $0x2d8] sm:$0xff] %vm291_vm0, %v8689_v2 }
  0x50   : > { %384 = vst.msk [vmem:[#allocation2 + $0x2e0] sm:$0xff] %vm291_vm0, %v8689_v2  ;;  %385 = vst.msk [vmem:[#allocation2 + $0x2e8] sm:$0xff] %vm291_vm0, %v8689_v2 }
  0x51   : > { %386 = vst.msk [vmem:[#allocation2 + $0x2f0] sm:$0xff] %vm291_vm0, %v8689_v2  ;;  %387 = vst.msk [vmem:[#allocation2 + $0x2f8] sm:$0xff] %vm291_vm0, %v8689_v2 }
  0x52   : > { %388 = vst.msk [vmem:[#allocation2 + $0x300] sm:$0xff] %vm291_vm0, %v8689_v2  ;;  %389 = vst.msk [vmem:[#allocation2 + $0x308] sm:$0xff] %vm291_vm0, %v8689_v2 }
  0x53   : > { %390 = vst.msk [vmem:[#allocation2 + $0x310] sm:$0xff] %vm291_vm0, %v8689_v2  ;;  %391 = vst.msk [vmem:[#allocation2 + $0x318] sm:$0xff] %vm291_vm0, %v8689_v2 }
  0x54   : > { %392 = vst.msk [vmem:[#allocation2 + $0x320] sm:$0xff] %vm291_vm0, %v8689_v2  ;;  %393 = vst.msk [vmem:[#allocation2 + $0x328] sm:$0xff] %vm291_vm0, %v8689_v2 }
  0x55   : > { %394 = vst.msk [vmem:[#allocation2 + $0x330] sm:$0xff] %vm291_vm0, %v8689_v2  ;;  %395 = vst.msk [vmem:[#allocation2 + $0x338] sm:$0xff] %vm291_vm0, %v8689_v2 }
  0x56   : > { %396 = vst.msk [vmem:[#allocation2 + $0x340] sm:$0xff] %vm291_vm0, %v8689_v2  ;;  %397 = vst.msk [vmem:[#allocation2 + $0x348] sm:$0xff] %vm291_vm0, %v8689_v2 }
  0x57   : > { %398 = vst.msk [vmem:[#allocation2 + $0x350] sm:$0xff] %vm291_vm0, %v8689_v2  ;;  %399 = vst.msk [vmem:[#allocation2 + $0x358] sm:$0xff] %vm291_vm0, %v8689_v2 }
  0x58   : > { %400 = vst.msk [vmem:[#allocation2 + $0x360] sm:$0xff] %vm291_vm0, %v8689_v2  ;;  %401 = vst.msk [vmem:[#allocation2 + $0x368] sm:$0xff] %vm291_vm0, %v8689_v2 }
  0x59   : > { %402 = vst.msk [vmem:[#allocation2 + $0x370] sm:$0xff] %vm291_vm0, %v8689_v2  ;;  %403 = vst.msk [vmem:[#allocation2 + $0x378] sm:$0xff] %vm291_vm0, %v8689_v2 }
  0x5a   : > { %404 = vst.msk [vmem:[#allocation2 + $0x380] sm:$0xff] %vm291_vm0, %v8689_v2  ;;  %405 = vst.msk [vmem:[#allocation2 + $0x388] sm:$0xff] %vm291_vm0, %v8689_v2 }
  0x5b   : > { %406 = vst.msk [vmem:[#allocation2 + $0x390] sm:$0xff] %vm291_vm0, %v8689_v2  ;;  %407 = vst.msk [vmem:[#allocation2 + $0x398] sm:$0xff] %vm291_vm0, %v8689_v2 }
  0x5c   : > { %408 = vst.msk [vmem:[#allocation2 + $0x3a0] sm:$0xff] %vm291_vm0, %v8689_v2  ;;  %409 = vst.msk [vmem:[#allocation2 + $0x3a8] sm:$0xff] %vm291_vm0, %v8689_v2 }
  0x5d   : > { %410 = vst.msk [vmem:[#allocation2 + $0x3b0] sm:$0xff] %vm291_vm0, %v8689_v2  ;;  %411 = vst.msk [vmem:[#allocation2 + $0x3b8] sm:$0xff] %vm291_vm0, %v8689_v2 }
  0x5e   : > { %412 = vst.msk [vmem:[#allocation2 + $0x3c0] sm:$0xff] %vm291_vm0, %v8689_v2  ;;  %413 = vst.msk [vmem:[#allocation2 + $0x3c8] sm:$0xff] %vm291_vm0, %v8689_v2 }
  0x5f   : > { %414 = vst.msk [vmem:[#allocation2 + $0x3d0] sm:$0xff] %vm291_vm0, %v8689_v2  ;;  %415 = vst.msk [vmem:[#allocation2 + $0x3d8] sm:$0xff] %vm291_vm0, %v8689_v2 }
  0x60   : > { %416 = vst.msk [vmem:[#allocation2 + $0x3e0] sm:$0xff] %vm291_vm0, %v8689_v2  ;;  %417 = vst.msk [vmem:[#allocation2 + $0x3e8] sm:$0xff] %vm291_vm0, %v8689_v2 }
  0x61   : > { %418 = vst.msk [vmem:[#allocation2 + $0x3f0] sm:$0xff] %vm291_vm0, %v8689_v2  ;;  %419 = vst.msk [vmem:[#allocation2 + $0x3f8] sm:$0xff] %vm291_vm0, %v8689_v2 }
  0x62   : > { %420 = vst.msk [vmem:[#allocation2 + $0x400] sm:$0xff] %vm291_vm0, %v8689_v2  ;;  %421 = vst.msk [vmem:[#allocation2 + $0x408] sm:$0xff] %vm291_vm0, %v8689_v2 }
  0x63   : > { %422 = vst.msk [vmem:[#allocation2 + $0x410] sm:$0xff] %vm291_vm0, %v8689_v2  ;;  %423 = vst.msk [vmem:[#allocation2 + $0x418] sm:$0xff] %vm291_vm0, %v8689_v2 }
  0x64   : > { %424 = vst.msk [vmem:[#allocation2 + $0x420] sm:$0xff] %vm291_vm0, %v8689_v2  ;;  %425 = vst.msk [vmem:[#allocation2 + $0x428] sm:$0xff] %vm291_vm0, %v8689_v2 }
  0x65   : > { %426 = vst.msk [vmem:[#allocation2 + $0x430] sm:$0xff] %vm291_vm0, %v8689_v2  ;;  %427 = vst.msk [vmem:[#allocation2 + $0x438] sm:$0xff] %vm291_vm0, %v8689_v2 }
  0x66   : > { %428 = vst.msk [vmem:[#allocation2 + $0x440] sm:$0xff] %vm291_vm0, %v8689_v2  ;;  %429 = vst.msk [vmem:[#allocation2 + $0x448] sm:$0xff] %vm291_vm0, %v8689_v2 }
  0x67   : > { %430 = vst.msk [vmem:[#allocation2 + $0x450] sm:$0xff] %vm291_vm0, %v8689_v2  ;;  %431 = vst.msk [vmem:[#allocation2 + $0x458] sm:$0xff] %vm291_vm0, %v8689_v2 }
  0x68   : > { %432 = vst.msk [vmem:[#allocation2 + $0x460] sm:$0xff] %vm291_vm0, %v8689_v2  ;;  %433 = vst.msk [vmem:[#allocation2 + $0x468] sm:$0xff] %vm291_vm0, %v8689_v2 }
  0x69   : > { %434 = vst.msk [vmem:[#allocation2 + $0x470] sm:$0xff] %vm291_vm0, %v8689_v2  ;;  %435 = vst.msk [vmem:[#allocation2 + $0x478] sm:$0xff] %vm291_vm0, %v8689_v2 }
  0x6a   : > { %436 = vst.msk [vmem:[#allocation2 + $0x480] sm:$0xff] %vm291_vm0, %v8689_v2  ;;  %437 = vst.msk [vmem:[#allocation2 + $0x488] sm:$0xff] %vm291_vm0, %v8689_v2 }
  0x6b   : > { %438 = vst.msk [vmem:[#allocation2 + $0x490] sm:$0xff] %vm291_vm0, %v8689_v2  ;;  %439 = vst.msk [vmem:[#allocation2 + $0x498] sm:$0xff] %vm291_vm0, %v8689_v2 }
  0x6c   : > { %440 = vst.msk [vmem:[#allocation2 + $0x4a0] sm:$0xff] %vm291_vm0, %v8689_v2  ;;  %441 = vst.msk [vmem:[#allocation2 + $0x4a8] sm:$0xff] %vm291_vm0, %v8689_v2 }
  0x6d   : > { %442 = vst.msk [vmem:[#allocation2 + $0x4b0] sm:$0xff] %vm291_vm0, %v8689_v2  ;;  %443 = vst.msk [vmem:[#allocation2 + $0x4b8] sm:$0xff] %vm291_vm0, %v8689_v2 }
  0x6e   : > { %444 = vst.msk [vmem:[#allocation2 + $0x4c0] sm:$0xff] %vm291_vm0, %v8689_v2  ;;  %445 = vst.msk [vmem:[#allocation2 + $0x4c8] sm:$0xff] %vm291_vm0, %v8689_v2 }
  0x6f   : > { %446 = vst.msk [vmem:[#allocation2 + $0x4d0] sm:$0xff] %vm291_vm0, %v8689_v2  ;;  %447 = vst.msk [vmem:[#allocation2 + $0x4d8] sm:$0xff] %vm291_vm0, %v8689_v2 }
  0x70   : > { %448 = vst.msk [vmem:[#allocation2 + $0x4e0] sm:$0xff] %vm291_vm0, %v8689_v2  ;;  %449 = vst.msk [vmem:[#allocation2 + $0x4e8] sm:$0xff] %vm291_vm0, %v8689_v2 }
  0x71   : > { %450 = vst.msk [vmem:[#allocation2 + $0x4f0] sm:$0xff] %vm291_vm0, %v8689_v2  ;;  %451 = vst.msk [vmem:[#allocation2 + $0x4f8] sm:$0xff] %vm291_vm0, %v8689_v2 }
  0x72 PF: > { %v614_v3 = vld [vmem:[%s13507_s2 + $0x10] sm:$0xff]  ;;  %v612_v4 = vld [vmem:[%s13507_s2] sm:$0xff]  ;;  %vm2215_vm1 = vcmask 1041408   ;;  %v8690_v6 = vmov 0   ;;  %v615_v9 = vld [vmem:[%s13507_s2 + $0x18] sm:$0xff]  ;;  %vm1974_vm2 = vcmask 31744  }
  0x73   : > { %v772_v5 = vld [vmem:[%s257_s11] sm:$0xf]  ;;  %7917 = vset.pattern.permute.xlu1 %v8690_v6  ;;  %7916 = vset.pattern.permute.xlu0 %v8690_v6  ;;  %v7180_v8 = vld [vmem:[%s257_s11 + $0x4] sm:$0xf]  ;;  %v7920_v16 = vld [vmem:[%s13506_s1 + $0x10] sm:$0xff]   ;;  %vm4172_vm3 = vcmask 7168  }
  0x74   : > { %v773_v7 = vpack.c.bf16 %v772_v5, %v772_v5  ;;  %v613_v10 = vld [vmem:[%s13507_s2 + $0x8] sm:$0xff]  ;;  %786 = vperm.xlu1 %7917, %v614_v3   ;;  %776 = vperm.xlu0 %7916, %v612_v4   ;;  %v4335_v11 = vpack.c.bf16 %v7180_v8, %v7180_v8  ;;  %v7918_v12 = vld [vmem:[%s13506_s1] sm:$0xff]   ;;  %v619_v19 = vld [vmem:[%s13507_s2 + $0x38] sm:$0xff]  ;;  %vm6292_vm4 = vcmask 15368   ;;  %p7261_p10 = scmp.ne.s32.totalorder %s8679_s20, 1 }
  0x75   : > { %v7919_v14 = vld [vmem:[%s13506_s1 + $0x8] sm:$0xff]   ;;  %7549 = vmatprep.mubr.msk.bf16.mxu0 %vm1974_vm2, %v7918_v12  ;;  %7711 = vmatprep.mubr.msk.bf16.mxu1 %vm1974_vm2, %v7918_v12  ;;  %v616_v18 = vld [vmem:[%s13507_s2 + $0x20] sm:$0xff]  ;;  %v618_v20 = vld [vmem:[%s13507_s2 + $0x30] sm:$0xff]  ;;  %vm6943_vm5 = vcmask (!%p7261_p10), 15360  }
  0x76   : > { %7871 = vmatprep.subr.msk.bf16.mxu0 %vm2215_vm1, %v773_v7  ;;  %v2217_v13 = vsel %vm2215_vm1, %v773_v7, 0  ;;  %7872 = vmatprep.subr.msk.bf16.mxu1 %vm2215_vm1, %v4335_v11  ;;  %v4337_v15 = vsel %vm2215_vm1, %v4335_v11, 0  ;;  %v617_v17 = vld [vmem:[%s13507_s2 + $0x28] sm:$0xff]  ;;  %v7921_v21 = vld [vmem:[%s13506_s1 + $0x18] sm:$0xff]   ;;  %v7922_v22 = vld [vmem:[%s13506_s1 + $0x20] sm:$0xff]  }
  0x77   : > { %7548 = vmatpush3.bf16.msra.mxu0 %v2217_v13  ;;  %7710 = vmatpush3.bf16.msra.mxu1 %v4337_v15  ;;  %v621_v23 = vld [vmem:[%s13507_s2 + $0x48] sm:$0xff]  ;;  %v620_v24 = vld [vmem:[%s13507_s2 + $0x40] sm:$0xff]  ;;  %v623_v25 = vld [vmem:[%s13507_s2 + $0x58] sm:$0xff] }
  0x78   : > { %791 = vperm.xlu1 %7917, %v615_v9   ;;  %781 = vperm.xlu0 %7916, %v613_v10   ;;  %v622_v26 = vld [vmem:[%s13507_s2 + $0x50] sm:$0xff]  ;;  %v7923_v27 = vld [vmem:[%s13506_s1 + $0x28] sm:$0xff]   ;;  %v624_v30 = vld [vmem:[%s13507_s2 + $0x60] sm:$0xff] }
  0x79   : > { %v7924_v28 = vld [vmem:[%s13506_s1 + $0x30] sm:$0xff]   ;;  %v625_v29 = vld [vmem:[%s13507_s2 + $0x68] sm:$0xff]  ;;  %v627_v31 = vld [vmem:[%s13507_s2 + $0x78] sm:$0xff] }
  0x7a   : > { %7550 = vmatmul.mubr.msk.bf16.vlgmr.msra.gmra.mrb[0].mxu0 %vm1974_vm2, %v7919_v14  ;;  %7712 = vmatmul.mubr.msk.bf16.vlgmr.msra.gmra.mrb[0].mxu1 %vm1974_vm2, %v7919_v14  ;;  %v626_v32 = vld [vmem:[%s13507_s2 + $0x70] sm:$0xff]  ;;  %v7925_v33 = vld [vmem:[%s13506_s1 + $0x38] sm:$0xff]   ;;  %v7926_v34 = vld [vmem:[%s13506_s1 + $0x40] sm:$0xff]  }
  0x7b   : > { %7553 = vmatprep.mubr.msk.bf16.mxu0 %vm1974_vm2, %v7920_v16  ;;  %7715 = vmatprep.mubr.msk.bf16.mxu1 %vm1974_vm2, %v7920_v16  ;;  %v629_v35 = vld [vmem:[%s13507_s2 + $0x88] sm:$0xff]  ;;  %v628_v36 = vld [vmem:[%s13507_s2 + $0x80] sm:$0xff]  ;;  %v631_v37 = vld [vmem:[%s13507_s2 + $0x98] sm:$0xff] }
  0x7c   : > { %801 = vperm.xlu1 %7917, %v617_v17   ;;  %796 = vperm.xlu0 %7916, %v616_v18   ;;  %v630_v38 = vld [vmem:[%s13507_s2 + $0x90] sm:$0xff]  ;;  %v7927_v39 = vld [vmem:[%s13506_s1 + $0x48] sm:$0xff]   ;;  %v632_v42 = vld [vmem:[%s13507_s2 + $0xa0] sm:$0xff] }
  0x7d   : > { %v7928_v40 = vld [vmem:[%s13506_s1 + $0x50] sm:$0xff]   ;;  %v633_v41 = vld [vmem:[%s13507_s2 + $0xa8] sm:$0xff]  ;;  %v635_v43 = vld [vmem:[%s13507_s2 + $0xb8] sm:$0xff] }
  0x7e   : > { %v634_v44 = vld [vmem:[%s13507_s2 + $0xb0] sm:$0xff]  ;;  %v7929_v45 = vld [vmem:[%s13506_s1 + $0x58] sm:$0xff]   ;;  %v7930_v46 = vld [vmem:[%s13506_s1 + $0x60] sm:$0xff]  }
  0x7f   : > { %v637_v47 = vld [vmem:[%s13507_s2 + $0xc8] sm:$0xff]  ;;  %v636_v48 = vld [vmem:[%s13507_s2 + $0xc0] sm:$0xff]  ;;  %v639_v49 = vld [vmem:[%s13507_s2 + $0xd8] sm:$0xff] }
  0x80   : > { %811 = vperm.xlu1 %7917, %v619_v19   ;;  %806 = vperm.xlu0 %7916, %v618_v20   ;;  %v638_v50 = vld [vmem:[%s13507_s2 + $0xd0] sm:$0xff]  ;;  %v7931_v51 = vld [vmem:[%s13506_s1 + $0x68] sm:$0xff]   ;;  %v640_v54 = vld [vmem:[%s13507_s2 + $0xe0] sm:$0xff] }
  0x81   : > { %v7932_v52 = vld [vmem:[%s13506_s1 + $0x70] sm:$0xff]   ;;  %v641_v53 = vld [vmem:[%s13507_s2 + $0xe8] sm:$0xff]  ;;  %v643_v55 = vld [vmem:[%s13507_s2 + $0xf8] sm:$0xff] }
  0x82   : > { %7554 = vmatmul.mubr.msk.bf16.gmra.mrb[4].mxu0 %vm1974_vm2, %v7921_v21  ;;  %7716 = vmatmul.mubr.msk.bf16.gmra.mrb[4].mxu1 %vm1974_vm2, %v7921_v21  ;;  %v642_v56 = vld [vmem:[%s13507_s2 + $0xf0] sm:$0xff]  ;;  %v7933_v57 = vld [vmem:[%s13506_s1 + $0x78] sm:$0xff]   ;;  %v7934_v58 = vld [vmem:[%s13506_s1 + $0x80] sm:$0xff]  }
  0x83   : > { %7557 = vmatprep.mubr.msk.bf16.mxu0 %vm1974_vm2, %v7922_v22  ;;  %7719 = vmatprep.mubr.msk.bf16.mxu1 %vm1974_vm2, %v7922_v22  ;;  %v645_v59 = vld [vmem:[%s13507_s2 + $0x108] sm:$0xff]  ;;  %v644_v60 = vld [vmem:[%s13507_s2 + $0x100] sm:$0xff]  ;;  %v647_v61 = vld [vmem:[%s13507_s2 + $0x118] sm:$0xff] }
  0x84   : > { %821 = vperm.xlu1 %7917, %v621_v23   ;;  %816 = vperm.xlu0 %7916, %v620_v24   ;;  %v646_v62 = vld [vmem:[%s13507_s2 + $0x110] sm:$0xff]  ;;  %v7935_v63 = vld [vmem:[%s13506_s1 + $0x88] sm:$0xff]   ;;  %v648_v2 = vld [vmem:[%s13507_s2 + $0x120] sm:$0xff] }
  0x85   : > { %v7936_v0 = vld [vmem:[%s13506_s1 + $0x90] sm:$0xff]   ;;  %v649_v1 = vld [vmem:[%s13507_s2 + $0x128] sm:$0xff]  ;;  %v651_v3 = vld [vmem:[%s13507_s2 + $0x138] sm:$0xff] }
  0x86   : > { %v650_v4 = vld [vmem:[%s13507_s2 + $0x130] sm:$0xff]  ;;  %v7937_v5 = vld [vmem:[%s13506_s1 + $0x98] sm:$0xff]   ;;  %v7938_v6 = vld [vmem:[%s13506_s1 + $0xa0] sm:$0xff]  }
  0x87   : > { %v653_v7 = vld [vmem:[%s13507_s2 + $0x148] sm:$0xff]  ;;  %v652_v8 = vld [vmem:[%s13507_s2 + $0x140] sm:$0xff]  ;;  %v655_v9 = vld [vmem:[%s13507_s2 + $0x158] sm:$0xff] }
  0x88   : > { %831 = vperm.xlu1 %7917, %v623_v25   ;;  %826 = vperm.xlu0 %7916, %v622_v26   ;;  %v654_v10 = vld [vmem:[%s13507_s2 + $0x150] sm:$0xff]  ;;  %v7939_v11 = vld [vmem:[%s13506_s1 + $0xa8] sm:$0xff]   ;;  %v656_v14 = vld [vmem:[%s13507_s2 + $0x160] sm:$0xff] }
  0x89   : > { %v7940_v12 = vld [vmem:[%s13506_s1 + $0xb0] sm:$0xff]   ;;  %v657_v13 = vld [vmem:[%s13507_s2 + $0x168] sm:$0xff]  ;;  %v659_v15 = vld [vmem:[%s13507_s2 + $0x178] sm:$0xff] }
  0x8a   : > { %7558 = vmatmul.mubr.msk.bf16.gmra.mrb[8].mxu0 %vm1974_vm2, %v7923_v27  ;;  %7720 = vmatmul.mubr.msk.bf16.gmra.mrb[8].mxu1 %vm1974_vm2, %v7923_v27  ;;  %v658_v16 = vld [vmem:[%s13507_s2 + $0x170] sm:$0xff]  ;;  %v7941_v17 = vld [vmem:[%s13506_s1 + $0xb8] sm:$0xff]   ;;  %v7942_v18 = vld [vmem:[%s13506_s1 + $0xc0] sm:$0xff]  }
  0x8b   : > { %7561 = vmatprep.mubr.msk.bf16.mxu0 %vm1974_vm2, %v7924_v28  ;;  %7723 = vmatprep.mubr.msk.bf16.mxu1 %vm1974_vm2, %v7924_v28  ;;  %v661_v19 = vld [vmem:[%s13507_s2 + $0x188] sm:$0xff]  ;;  %v660_v20 = vld [vmem:[%s13507_s2 + $0x180] sm:$0xff]  ;;  %v663_v21 = vld [vmem:[%s13507_s2 + $0x198] sm:$0xff] }
  0x8c   : > { %841 = vperm.xlu1 %7917, %v625_v29   ;;  %836 = vperm.xlu0 %7916, %v624_v30   ;;  %v662_v22 = vld [vmem:[%s13507_s2 + $0x190] sm:$0xff]  ;;  %v7943_v23 = vld [vmem:[%s13506_s1 + $0xc8] sm:$0xff]   ;;  %v664_v26 = vld [vmem:[%s13507_s2 + $0x1a0] sm:$0xff] }
  0x8d   : > { %v7944_v24 = vld [vmem:[%s13506_s1 + $0xd0] sm:$0xff]   ;;  %v665_v25 = vld [vmem:[%s13507_s2 + $0x1a8] sm:$0xff]  ;;  %v667_v27 = vld [vmem:[%s13507_s2 + $0x1b8] sm:$0xff] }
  0x8e   : > { %v666_v28 = vld [vmem:[%s13507_s2 + $0x1b0] sm:$0xff]  ;;  %v7945_v29 = vld [vmem:[%s13506_s1 + $0xd8] sm:$0xff]   ;;  %v7946_v30 = vld [vmem:[%s13506_s1 + $0xe0] sm:$0xff]  }
  0x90   : > { %851 = vperm.xlu1 %7917, %v627_v31   ;;  %846 = vperm.xlu0 %7916, %v626_v32   ;;  %v669_v31 = vld [vmem:[%s13507_s2 + $0x1c8] sm:$0xff]  ;;  %v668_v32 = vld [vmem:[%s13507_s2 + $0x1c0] sm:$0xff] }
  0x92   : > { %7562 = vmatmul.mubr.msk.bf16.gmra.mrb[12].mxu0 %vm1974_vm2, %v7925_v33  ;;  %7724 = vmatmul.mubr.msk.bf16.gmra.mrb[12].mxu1 %vm1974_vm2, %v7925_v33  ;;  %v671_v33 = vld [vmem:[%s13507_s2 + $0x1d8] sm:$0xff] }
  0x93   : > { %7565 = vmatprep.mubr.msk.bf16.mxu0 %vm1974_vm2, %v7926_v34  ;;  %7727 = vmatprep.mubr.msk.bf16.mxu1 %vm1974_vm2, %v7926_v34  ;;  %v670_v34 = vld [vmem:[%s13507_s2 + $0x1d0] sm:$0xff] }
  0x94   : > { %861 = vperm.xlu1 %7917, %v629_v35   ;;  %856 = vperm.xlu0 %7916, %v628_v36   ;;  %v7947_v35 = vld [vmem:[%s13506_s1 + $0xe8] sm:$0xff]   ;;  %v7948_v36 = vld [vmem:[%s13506_s1 + $0xf0] sm:$0xff]  }
  0x98   : > { %871 = vperm.xlu1 %7917, %v631_v37   ;;  %866 = vperm.xlu0 %7916, %v630_v38   ;;  %v673_v37 = vld [vmem:[%s13507_s2 + $0x1e8] sm:$0xff]  ;;  %v672_v38 = vld [vmem:[%s13507_s2 + $0x1e0] sm:$0xff] }
  0x9a   : > { %7566 = vmatmul.mubr.msk.bf16.gmra.mrb[16].mxu0 %vm1974_vm2, %v7927_v39  ;;  %7728 = vmatmul.mubr.msk.bf16.gmra.mrb[16].mxu1 %vm1974_vm2, %v7927_v39  ;;  %v675_v39 = vld [vmem:[%s13507_s2 + $0x1f8] sm:$0xff] }
  0x9b   : > { %7569 = vmatprep.mubr.msk.bf16.mxu0 %vm1974_vm2, %v7928_v40  ;;  %7731 = vmatprep.mubr.msk.bf16.mxu1 %vm1974_vm2, %v7928_v40  ;;  %v674_v40 = vld [vmem:[%s13507_s2 + $0x1f0] sm:$0xff] }
  0x9c   : > { %881 = vperm.xlu1 %7917, %v633_v41   ;;  %876 = vperm.xlu0 %7916, %v632_v42   ;;  %v7949_v41 = vld [vmem:[%s13506_s1 + $0xf8] sm:$0xff]   ;;  %v7950_v42 = vld [vmem:[%s13506_s1 + $0x100] sm:$0xff]  }
  0xa0   : > { %891 = vperm.xlu1 %7917, %v635_v43   ;;  %886 = vperm.xlu0 %7916, %v634_v44   ;;  %v677_v43 = vld [vmem:[%s13507_s2 + $0x208] sm:$0xff]  ;;  %v676_v44 = vld [vmem:[%s13507_s2 + $0x200] sm:$0xff] }
  0xa2   : > { %7570 = vmatmul.mubr.msk.bf16.gmra.mrb[20].mxu0 %vm1974_vm2, %v7929_v45  ;;  %7732 = vmatmul.mubr.msk.bf16.gmra.mrb[20].mxu1 %vm1974_vm2, %v7929_v45 }
  0xa3   : > { %7573 = vmatprep.mubr.msk.bf16.mxu0 %vm1974_vm2, %v7930_v46  ;;  %7735 = vmatprep.mubr.msk.bf16.mxu1 %vm1974_vm2, %v7930_v46 }
  0xa4   : > { %901 = vperm.xlu1 %7917, %v637_v47   ;;  %896 = vperm.xlu0 %7916, %v636_v48   ;;  %v679_v47 = vld [vmem:[%s13507_s2 + $0x218] sm:$0xff]  ;;  %v678_v48 = vld [vmem:[%s13507_s2 + $0x210] sm:$0xff] }
  0xa8   : > { %911 = vperm.xlu1 %7917, %v639_v49   ;;  %906 = vperm.xlu0 %7916, %v638_v50   ;;  %v7951_v49 = vld [vmem:[%s13506_s1 + $0x108] sm:$0xff]   ;;  %v7952_v50 = vld [vmem:[%s13506_s1 + $0x110] sm:$0xff]  }
  0xaa   : > { %7574 = vmatmul.mubr.msk.bf16.gmra.mrb[24].mxu0 %vm1974_vm2, %v7931_v51  ;;  %7736 = vmatmul.mubr.msk.bf16.gmra.mrb[24].mxu1 %vm1974_vm2, %v7931_v51 }
  0xab   : > { %7577 = vmatprep.mubr.msk.bf16.mxu0 %vm1974_vm2, %v7932_v52  ;;  %7739 = vmatprep.mubr.msk.bf16.mxu1 %vm1974_vm2, %v7932_v52 }
  0xac   : > { %921 = vperm.xlu1 %7917, %v641_v53   ;;  %916 = vperm.xlu0 %7916, %v640_v54   ;;  %v681_v53 = vld [vmem:[%s13507_s2 + $0x228] sm:$0xff]  ;;  %v680_v54 = vld [vmem:[%s13507_s2 + $0x220] sm:$0xff] }
  0xb0   : > { %931 = vperm.xlu1 %7917, %v643_v55   ;;  %926 = vperm.xlu0 %7916, %v642_v56  }
  0xb2   : > { %7578 = vmatmul.mubr.msk.bf16.gmra.mrb[28].mxu0 %vm1974_vm2, %v7933_v57  ;;  %7740 = vmatmul.mubr.msk.bf16.gmra.mrb[28].mxu1 %vm1974_vm2, %v7933_v57  ;;  %v683_v57 = vld [vmem:[%s13507_s2 + $0x238] sm:$0xff] }
  0xb3   : > { %7581 = vmatprep.mubr.msk.bf16.mxu0 %vm1974_vm2, %v7934_v58  ;;  %7743 = vmatprep.mubr.msk.bf16.mxu1 %vm1974_vm2, %v7934_v58  ;;  %v682_v58 = vld [vmem:[%s13507_s2 + $0x230] sm:$0xff] }
  0xb4   : > { %941 = vperm.xlu1 %7917, %v645_v59   ;;  %936 = vperm.xlu0 %7916, %v644_v60   ;;  %v7953_v59 = vld [vmem:[%s13506_s1 + $0x118] sm:$0xff]   ;;  %v7954_v60 = vld [vmem:[%s13506_s1 + $0x120] sm:$0xff]  }
  0xb8   : > { %951 = vperm.xlu1 %7917, %v647_v61   ;;  %946 = vperm.xlu0 %7916, %v646_v62  }
  0xba   : > { %7582 = vmatmul.mubr.msk.bf16.gmra.mrb[32].mxu0 %vm1974_vm2, %v7935_v63  ;;  %7744 = vmatmul.mubr.msk.bf16.gmra.mrb[32].mxu1 %vm1974_vm2, %v7935_v63  ;;  %v685_v63 = vld [vmem:[%s13507_s2 + $0x248] sm:$0xff] }
  0xbb   : > { %7585 = vmatprep.mubr.msk.bf16.mxu0 %vm1974_vm2, %v7936_v0  ;;  %7747 = vmatprep.mubr.msk.bf16.mxu1 %vm1974_vm2, %v7936_v0  ;;  %v684_v0 = vld [vmem:[%s13507_s2 + $0x240] sm:$0xff] }
  0xbc   : > { %961 = vperm.xlu1 %7917, %v649_v1   ;;  %956 = vperm.xlu0 %7916, %v648_v2  }
  0xc0   : > { %971 = vperm.xlu1 %7917, %v651_v3   ;;  %966 = vperm.xlu0 %7916, %v650_v4   ;;  %v687_v3 = vld [vmem:[%s13507_s2 + $0x258] sm:$0xff]  ;;  %v686_v4 = vld [vmem:[%s13507_s2 + $0x250] sm:$0xff] }
  0xc2   : > { %7586 = vmatmul.mubr.msk.bf16.gmra.mrb[36].mxu0 %vm1974_vm2, %v7937_v5  ;;  %7748 = vmatmul.mubr.msk.bf16.gmra.mrb[36].mxu1 %vm1974_vm2, %v7937_v5  ;;  %v7955_v5 = vld [vmem:[%s13506_s1 + $0x128] sm:$0xff]  }
  0xc3   : > { %7589 = vmatprep.mubr.msk.bf16.mxu0 %vm1974_vm2, %v7938_v6  ;;  %7751 = vmatprep.mubr.msk.bf16.mxu1 %vm1974_vm2, %v7938_v6  ;;  %v7956_v6 = vld [vmem:[%s13506_s1 + $0x130] sm:$0xff]  }
  0xc4   : > { %981 = vperm.xlu1 %7917, %v653_v7   ;;  %976 = vperm.xlu0 %7916, %v652_v8  }
  0xc8   : > { %991 = vperm.xlu1 %7917, %v655_v9   ;;  %986 = vperm.xlu0 %7916, %v654_v10   ;;  %v689_v9 = vld [vmem:[%s13507_s2 + $0x268] sm:$0xff]  ;;  %v688_v10 = vld [vmem:[%s13507_s2 + $0x260] sm:$0xff] }
  0xca   : > { %7590 = vmatmul.mubr.msk.bf16.gmra.mrb[40].mxu0 %vm1974_vm2, %v7939_v11  ;;  %7752 = vmatmul.mubr.msk.bf16.gmra.mrb[40].mxu1 %vm1974_vm2, %v7939_v11 }
  0xcb   : > { %7593 = vmatprep.mubr.msk.bf16.mxu0 %vm1974_vm2, %v7940_v12  ;;  %7755 = vmatprep.mubr.msk.bf16.mxu1 %vm1974_vm2, %v7940_v12 }
  0xcc   : > { %1001 = vperm.xlu1 %7917, %v657_v13   ;;  %996 = vperm.xlu0 %7916, %v656_v14   ;;  %v691_v13 = vld [vmem:[%s13507_s2 + $0x278] sm:$0xff]  ;;  %v690_v14 = vld [vmem:[%s13507_s2 + $0x270] sm:$0xff] }
  0xd0   : > { %1011 = vperm.xlu1 %7917, %v659_v15   ;;  %1006 = vperm.xlu0 %7916, %v658_v16   ;;  %v7957_v15 = vld [vmem:[%s13506_s1 + $0x138] sm:$0xff]   ;;  %v7958_v16 = vld [vmem:[%s13506_s1 + $0x140] sm:$0xff]  }
  0xd2   : > { %7594 = vmatmul.mubr.msk.bf16.gmra.mrb[44].mxu0 %vm1974_vm2, %v7941_v17  ;;  %7756 = vmatmul.mubr.msk.bf16.gmra.mrb[44].mxu1 %vm1974_vm2, %v7941_v17 }
  0xd3   : > { %7597 = vmatprep.mubr.msk.bf16.mxu0 %vm1974_vm2, %v7942_v18  ;;  %7759 = vmatprep.mubr.msk.bf16.mxu1 %vm1974_vm2, %v7942_v18 }
  0xd4   : > { %1021 = vperm.xlu1 %7917, %v661_v19   ;;  %1016 = vperm.xlu0 %7916, %v660_v20   ;;  %v693_v19 = vld [vmem:[%s13507_s2 + $0x288] sm:$0xff]  ;;  %v692_v20 = vld [vmem:[%s13507_s2 + $0x280] sm:$0xff] }
  0xd8   : > { %1031 = vperm.xlu1 %7917, %v663_v21   ;;  %1026 = vperm.xlu0 %7916, %v662_v22  }
  0xda   : > { %7598 = vmatmul.mubr.msk.bf16.gmra.mrb[48].mxu0 %vm1974_vm2, %v7943_v23  ;;  %7760 = vmatmul.mubr.msk.bf16.gmra.mrb[48].mxu1 %vm1974_vm2, %v7943_v23  ;;  %v695_v23 = vld [vmem:[%s13507_s2 + $0x298] sm:$0xff] }
  0xdb   : > { %7601 = vmatprep.mubr.msk.bf16.mxu0 %vm1974_vm2, %v7944_v24  ;;  %7763 = vmatprep.mubr.msk.bf16.mxu1 %vm1974_vm2, %v7944_v24  ;;  %v694_v24 = vld [vmem:[%s13507_s2 + $0x290] sm:$0xff] }
  0xdc   : > { %1041 = vperm.xlu1 %7917, %v665_v25   ;;  %1036 = vperm.xlu0 %7916, %v664_v26   ;;  %v7959_v25 = vld [vmem:[%s13506_s1 + $0x148] sm:$0xff]   ;;  %v7960_v26 = vld [vmem:[%s13506_s1 + $0x150] sm:$0xff]  }
  0xe0   : > { %1051 = vperm.xlu1 %7917, %v667_v27   ;;  %1046 = vperm.xlu0 %7916, %v666_v28  }
  0xe2   : > { %7602 = vmatmul.mubr.msk.bf16.gmra.mrb[52].mxu0 %vm1974_vm2, %v7945_v29  ;;  %7764 = vmatmul.mubr.msk.bf16.gmra.mrb[52].mxu1 %vm1974_vm2, %v7945_v29  ;;  %v697_v29 = vld [vmem:[%s13507_s2 + $0x2a8] sm:$0xff] }
  0xe3   : > { %7605 = vmatprep.mubr.msk.bf16.mxu0 %vm1974_vm2, %v7946_v30  ;;  %7767 = vmatprep.mubr.msk.bf16.mxu1 %vm1974_vm2, %v7946_v30  ;;  %v696_v30 = vld [vmem:[%s13507_s2 + $0x2a0] sm:$0xff] }
  0xe4   : > { %1061 = vperm.xlu1 %7917, %v669_v31   ;;  %1056 = vperm.xlu0 %7916, %v668_v32  }
  0xe8   : > { %1071 = vperm.xlu1 %7917, %v671_v33   ;;  %1066 = vperm.xlu0 %7916, %v670_v34   ;;  %v699_v33 = vld [vmem:[%s13507_s2 + $0x2b8] sm:$0xff]  ;;  %v698_v34 = vld [vmem:[%s13507_s2 + $0x2b0] sm:$0xff] }
  0xea   : > { %7606 = vmatmul.mubr.msk.bf16.gmra.mrb[56].mxu0 %vm1974_vm2, %v7947_v35  ;;  %7768 = vmatmul.mubr.msk.bf16.gmra.mrb[56].mxu1 %vm1974_vm2, %v7947_v35  ;;  %v7961_v35 = vld [vmem:[%s13506_s1 + $0x158] sm:$0xff]  }
  0xeb   : > { %7609 = vmatprep.mubr.msk.bf16.mxu0 %vm1974_vm2, %v7948_v36  ;;  %7771 = vmatprep.mubr.msk.bf16.mxu1 %vm1974_vm2, %v7948_v36  ;;  %v7962_v36 = vld [vmem:[%s13506_s1 + $0x160] sm:$0xff]  }
  0xec   : > { %1081 = vperm.xlu1 %7917, %v673_v37   ;;  %1076 = vperm.xlu0 %7916, %v672_v38  }
  0xf0   : > { %1091 = vperm.xlu1 %7917, %v675_v39   ;;  %1086 = vperm.xlu0 %7916, %v674_v40   ;;  %v701_v39 = vld [vmem:[%s13507_s2 + $0x2c8] sm:$0xff]  ;;  %v700_v40 = vld [vmem:[%s13507_s2 + $0x2c0] sm:$0xff] }
  0xf2   : > { %7610 = vmatmul.mubr.msk.bf16.gmra.mrb[60].mxu0 %vm1974_vm2, %v7949_v41  ;;  %7772 = vmatmul.mubr.msk.bf16.gmra.mrb[60].mxu1 %vm1974_vm2, %v7949_v41 }
  0xf3   : > { %7613 = vmatprep.mubr.msk.bf16.mxu0 %vm1974_vm2, %v7950_v42  ;;  %v9462_v45 = vpop.permute.xlu1 %786  ;;  %v9464_v46 = vpop.permute.xlu0 %776  ;;  %7775 = vmatprep.mubr.msk.bf16.mxu1 %vm1974_vm2, %v7950_v42 }
  0xf4   : > { %13674 = vst [vmem:[#allocation4_spill] sm:$0xff] %v9462_v45  ;;  %13675 = vst [vmem:[#allocation5_spill] sm:$0xff] %v9464_v46  ;;  %1101 = vperm.xlu1 %7917, %v677_v43   ;;  %1096 = vperm.xlu0 %7916, %v676_v44   ;;  %v703_v43 = vld [vmem:[%s13507_s2 + $0x2d8] sm:$0xff]  ;;  %v702_v44 = vld [vmem:[%s13507_s2 + $0x2d0] sm:$0xff] }
  0xf7   : > { %v9479_v51 = vpop.permute.xlu1 %791  ;;  %v9481_v52 = vpop.permute.xlu0 %781 }
  0xf8   : > { %13676 = vst [vmem:[#allocation6_spill] sm:$0xff] %v9479_v51  ;;  %13677 = vst [vmem:[#allocation7_spill] sm:$0xff] %v9481_v52  ;;  %1111 = vperm.xlu1 %7917, %v679_v47   ;;  %1106 = vperm.xlu0 %7916, %v678_v48   ;;  %v7963_v47 = vld [vmem:[%s13506_s1 + $0x168] sm:$0xff]   ;;  %v7964_v48 = vld [vmem:[%s13506_s1 + $0x170] sm:$0xff]  }
  0xfa   : > { %7614 = vmatmul.mubr.msk.bf16.gmra.mrb[64].mxu0 %vm1974_vm2, %v7951_v49  ;;  %7776 = vmatmul.mubr.msk.bf16.gmra.mrb[64].mxu1 %vm1974_vm2, %v7951_v49 }
  0xfb   : > { %7617 = vmatprep.mubr.msk.bf16.mxu0 %vm1974_vm2, %v7952_v50  ;;  %v9492_v55 = vpop.permute.xlu1 %801  ;;  %v9494_v56 = vpop.permute.xlu0 %796  ;;  %7779 = vmatprep.mubr.msk.bf16.mxu1 %vm1974_vm2, %v7952_v50 }
  0xfc   : > { %13678 = vst [vmem:[#allocation8_spill] sm:$0xff] %v9492_v55  ;;  %13679 = vst [vmem:[#allocation9_spill] sm:$0xff] %v9494_v56  ;;  %1121 = vperm.xlu1 %7917, %v681_v53   ;;  %1116 = vperm.xlu0 %7916, %v680_v54   ;;  %v705_v53 = vld [vmem:[%s13507_s2 + $0x2e8] sm:$0xff]  ;;  %v704_v54 = vld [vmem:[%s13507_s2 + $0x2e0] sm:$0xff] }
  0xff   : > { %v9509_v61 = vpop.permute.xlu1 %811  ;;  %v9511_v62 = vpop.permute.xlu0 %806 }
 0x100   : > { %13680 = vst [vmem:[#allocation10_spill] sm:$0xff] %v9509_v61  ;;  %13681 = vst [vmem:[#allocation11_spill] sm:$0xff] %v9511_v62  ;;  %1131 = vperm.xlu1 %7917, %v683_v57   ;;  %1126 = vperm.xlu0 %7916, %v682_v58  }
 0x102   : > { %7618 = vmatmul.mubr.msk.bf16.gmra.mrb[68].mxu0 %vm1974_vm2, %v7953_v59  ;;  %7780 = vmatmul.mubr.msk.bf16.gmra.mrb[68].mxu1 %vm1974_vm2, %v7953_v59  ;;  %v707_v59 = vld [vmem:[%s13507_s2 + $0x2f8] sm:$0xff] }
 0x103   : > { %7621 = vmatprep.mubr.msk.bf16.mxu0 %vm1974_vm2, %v7954_v60  ;;  %v9522_v1 = vpop.permute.xlu1 %821  ;;  %v9524_v2 = vpop.permute.xlu0 %816  ;;  %7783 = vmatprep.mubr.msk.bf16.mxu1 %vm1974_vm2, %v7954_v60  ;;  %v706_v60 = vld [vmem:[%s13507_s2 + $0x2f0] sm:$0xff] }
 0x104   : > { %13682 = vst [vmem:[#allocation12_spill] sm:$0xff] %v9522_v1  ;;  %13683 = vst [vmem:[#allocation13_spill] sm:$0xff] %v9524_v2  ;;  %1141 = vperm.xlu1 %7917, %v685_v63   ;;  %1136 = vperm.xlu0 %7916, %v684_v0   ;;  %v7965_v63 = vld [vmem:[%s13506_s1 + $0x178] sm:$0xff]   ;;  %v7966_v0 = vld [vmem:[%s13506_s1 + $0x180] sm:$0xff]  }
 0x107   : > { %v9539_v7 = vpop.permute.xlu1 %831  ;;  %v9541_v8 = vpop.permute.xlu0 %826 }
 0x108   : > { %13684 = vst [vmem:[#allocation14_spill] sm:$0xff] %v9539_v7  ;;  %13685 = vst [vmem:[#allocation15_spill] sm:$0xff] %v9541_v8  ;;  %1151 = vperm.xlu1 %7917, %v687_v3   ;;  %1146 = vperm.xlu0 %7916, %v686_v4  }
 0x10a   : > { %7622 = vmatmul.mubr.msk.bf16.gmra.mrb[72].mxu0 %vm1974_vm2, %v7955_v5  ;;  %7784 = vmatmul.mubr.msk.bf16.gmra.mrb[72].mxu1 %vm1974_vm2, %v7955_v5  ;;  %v709_v5 = vld [vmem:[%s13507_s2 + $0x308] sm:$0xff] }
 0x10b   : > { %7625 = vmatprep.mubr.msk.bf16.mxu0 %vm1974_vm2, %v7956_v6  ;;  %v9552_v11 = vpop.permute.xlu1 %841  ;;  %v9554_v12 = vpop.permute.xlu0 %836  ;;  %7787 = vmatprep.mubr.msk.bf16.mxu1 %vm1974_vm2, %v7956_v6  ;;  %v708_v6 = vld [vmem:[%s13507_s2 + $0x300] sm:$0xff] }
 0x10c   : > { %13686 = vst [vmem:[#allocation16_spill] sm:$0xff] %v9552_v11  ;;  %13687 = vst [vmem:[#allocation17_spill] sm:$0xff] %v9554_v12  ;;  %1161 = vperm.xlu1 %7917, %v689_v9   ;;  %1156 = vperm.xlu0 %7916, %v688_v10  }
 0x10f   : > { %v9569_v17 = vpop.permute.xlu1 %851  ;;  %v9571_v18 = vpop.permute.xlu0 %846 }
 0x110   : > { %13688 = vst [vmem:[#allocation18_spill] sm:$0xff] %v9569_v17  ;;  %13689 = vst [vmem:[#allocation19_spill] sm:$0xff] %v9571_v18  ;;  %1171 = vperm.xlu1 %7917, %v691_v13   ;;  %1166 = vperm.xlu0 %7916, %v690_v14   ;;  %v711_v13 = vld [vmem:[%s13507_s2 + $0x318] sm:$0xff]  ;;  %v710_v14 = vld [vmem:[%s13507_s2 + $0x310] sm:$0xff] }
 0x112   : > { %7626 = vmatmul.mubr.msk.bf16.gmra.mrb[76].mxu0 %vm1974_vm2, %v7957_v15  ;;  %7788 = vmatmul.mubr.msk.bf16.gmra.mrb[76].mxu1 %vm1974_vm2, %v7957_v15  ;;  %v7967_v15 = vld [vmem:[%s13506_s1 + $0x188] sm:$0xff]  }
 0x113   : > { %7629 = vmatprep.mubr.msk.bf16.mxu0 %vm1974_vm2, %v7958_v16  ;;  %v9582_v21 = vpop.permute.xlu1 %861  ;;  %v9584_v22 = vpop.permute.xlu0 %856  ;;  %7791 = vmatprep.mubr.msk.bf16.mxu1 %vm1974_vm2, %v7958_v16  ;;  %v7968_v16 = vld [vmem:[%s13506_s1 + $0x190] sm:$0xff]  }
 0x114   : > { %13690 = vst [vmem:[#allocation20_spill] sm:$0xff] %v9582_v21  ;;  %13691 = vst [vmem:[#allocation21_spill] sm:$0xff] %v9584_v22  ;;  %1181 = vperm.xlu1 %7917, %v693_v19   ;;  %1176 = vperm.xlu0 %7916, %v692_v20  }
 0x117   : > { %v9599_v27 = vpop.permute.xlu1 %871  ;;  %v9601_v28 = vpop.permute.xlu0 %866 }
 0x118   : > { %13692 = vst [vmem:[#allocation22_spill] sm:$0xff] %v9599_v27  ;;  %13693 = vst [vmem:[#allocation23_spill] sm:$0xff] %v9601_v28  ;;  %1191 = vperm.xlu1 %7917, %v695_v23   ;;  %1186 = vperm.xlu0 %7916, %v694_v24   ;;  %v713_v23 = vld [vmem:[%s13507_s2 + $0x328] sm:$0xff]  ;;  %v712_v24 = vld [vmem:[%s13507_s2 + $0x320] sm:$0xff] }
 0x11a   : > { %7630 = vmatmul.mubr.msk.bf16.gmra.mrb[80].mxu0 %vm1974_vm2, %v7959_v25  ;;  %7792 = vmatmul.mubr.msk.bf16.gmra.mrb[80].mxu1 %vm1974_vm2, %v7959_v25 }
 0x11b   : > { %7633 = vmatprep.mubr.msk.bf16.mxu0 %vm1974_vm2, %v7960_v26  ;;  %v9612_v31 = vpop.permute.xlu1 %881  ;;  %v9614_v32 = vpop.permute.xlu0 %876  ;;  %7795 = vmatprep.mubr.msk.bf16.mxu1 %vm1974_vm2, %v7960_v26 }
 0x11c   : > { %13694 = vst [vmem:[#allocation24_spill] sm:$0xff] %v9612_v31  ;;  %13695 = vst [vmem:[#allocation25_spill] sm:$0xff] %v9614_v32  ;;  %1201 = vperm.xlu1 %7917, %v697_v29   ;;  %1196 = vperm.xlu0 %7916, %v696_v30   ;;  %v715_v29 = vld [vmem:[%s13507_s2 + $0x338] sm:$0xff]  ;;  %v714_v30 = vld [vmem:[%s13507_s2 + $0x330] sm:$0xff] }
 0x11f   : > { %v9629_v37 = vpop.permute.xlu1 %891  ;;  %v9631_v38 = vpop.permute.xlu0 %886 }
 0x120   : > { %13696 = vst [vmem:[#allocation26_spill] sm:$0xff] %v9629_v37  ;;  %13697 = vst [vmem:[#allocation27_spill] sm:$0xff] %v9631_v38  ;;  %1211 = vperm.xlu1 %7917, %v699_v33   ;;  %1206 = vperm.xlu0 %7916, %v698_v34   ;;  %v7969_v33 = vld [vmem:[%s13506_s1 + $0x198] sm:$0xff]   ;;  %v7970_v34 = vld [vmem:[%s13506_s1 + $0x1a0] sm:$0xff]  }
 0x122   : > { %7634 = vmatmul.mubr.msk.bf16.gmra.mrb[84].mxu0 %vm1974_vm2, %v7961_v35  ;;  %7796 = vmatmul.mubr.msk.bf16.gmra.mrb[84].mxu1 %vm1974_vm2, %v7961_v35 }
 0x123   : > { %7637 = vmatprep.mubr.msk.bf16.mxu0 %vm1974_vm2, %v7962_v36  ;;  %v9642_v41 = vpop.permute.xlu1 %901  ;;  %v9644_v42 = vpop.permute.xlu0 %896  ;;  %7799 = vmatprep.mubr.msk.bf16.mxu1 %vm1974_vm2, %v7962_v36 }
 0x124   : > { %13698 = vst [vmem:[#allocation28_spill] sm:$0xff] %v9642_v41  ;;  %13699 = vst [vmem:[#allocation29_spill] sm:$0xff] %v9644_v42  ;;  %1221 = vperm.xlu1 %7917, %v701_v39   ;;  %1216 = vperm.xlu0 %7916, %v700_v40   ;;  %v717_v39 = vld [vmem:[%s13507_s2 + $0x348] sm:$0xff]  ;;  %v716_v40 = vld [vmem:[%s13507_s2 + $0x340] sm:$0xff] }
 0x127   : > { %v9659_v49 = vpop.permute.xlu1 %911  ;;  %v9661_v50 = vpop.permute.xlu0 %906 }
 0x128   : > { %13700 = vst [vmem:[#allocation30_spill] sm:$0xff] %v9659_v49  ;;  %13701 = vst [vmem:[#allocation31_spill] sm:$0xff] %v9661_v50  ;;  %1231 = vperm.xlu1 %7917, %v703_v43   ;;  %1226 = vperm.xlu0 %7916, %v702_v44  }
 0x12a   : > { %7638 = vmatmul.mubr.msk.bf16.gmra.mrb[88].mxu0 %vm1974_vm2, %v7963_v47  ;;  %7800 = vmatmul.mubr.msk.bf16.gmra.mrb[88].mxu1 %vm1974_vm2, %v7963_v47  ;;  %v719_v47 = vld [vmem:[%s13507_s2 + $0x358] sm:$0xff] }
 0x12b   : > { %7641 = vmatprep.mubr.msk.bf16.mxu0 %vm1974_vm2, %v7964_v48  ;;  %v9672_v57 = vpop.permute.xlu1 %921  ;;  %v9674_v58 = vpop.permute.xlu0 %916  ;;  %7803 = vmatprep.mubr.msk.bf16.mxu1 %vm1974_vm2, %v7964_v48  ;;  %v718_v48 = vld [vmem:[%s13507_s2 + $0x350] sm:$0xff] }
 0x12c   : > { %13702 = vst [vmem:[#allocation32_spill] sm:$0xff] %v9672_v57  ;;  %13703 = vst [vmem:[#allocation33_spill] sm:$0xff] %v9674_v58  ;;  %1241 = vperm.xlu1 %7917, %v705_v53   ;;  %1236 = vperm.xlu0 %7916, %v704_v54   ;;  %v7971_v53 = vld [vmem:[%s13506_s1 + $0x1a8] sm:$0xff]   ;;  %v7972_v54 = vld [vmem:[%s13506_s1 + $0x1b0] sm:$0xff]  }
 0x12f   : > { %v9689_v3 = vpop.permute.xlu1 %931  ;;  %v9691_v4 = vpop.permute.xlu0 %926 }
 0x130   : > { %13704 = vst [vmem:[#allocation34_spill] sm:$0xff] %v9689_v3  ;;  %13705 = vst [vmem:[#allocation35_spill] sm:$0xff] %v9691_v4  ;;  %1251 = vperm.xlu1 %7917, %v707_v59   ;;  %1246 = vperm.xlu0 %7916, %v706_v60  }
 0x132   : > { %7642 = vmatmul.mubr.msk.bf16.gmra.mrb[92].mxu0 %vm1974_vm2, %v7965_v63  ;;  %7804 = vmatmul.mubr.msk.bf16.gmra.mrb[92].mxu1 %vm1974_vm2, %v7965_v63  ;;  %v721_v63 = vld [vmem:[%s13507_s2 + $0x368] sm:$0xff] }
 0x133   : > { %7645 = vmatprep.mubr.msk.bf16.mxu0 %vm1974_vm2, %v7966_v0  ;;  %v9702_v9 = vpop.permute.xlu1 %941  ;;  %v9704_v10 = vpop.permute.xlu0 %936  ;;  %7807 = vmatprep.mubr.msk.bf16.mxu1 %vm1974_vm2, %v7966_v0  ;;  %v720_v0 = vld [vmem:[%s13507_s2 + $0x360] sm:$0xff] }
 0x134   : > { %13706 = vst [vmem:[#allocation36_spill] sm:$0xff] %v9702_v9  ;;  %13707 = vst [vmem:[#allocation37_spill] sm:$0xff] %v9704_v10  ;;  %1261 = vperm.xlu1 %7917, %v709_v5   ;;  %1256 = vperm.xlu0 %7916, %v708_v6  }
 0x137   : > { %v9719_v19 = vpop.permute.xlu1 %951  ;;  %v9721_v20 = vpop.permute.xlu0 %946 }
 0x138   : > { %13708 = vst [vmem:[#allocation38_spill] sm:$0xff] %v9719_v19  ;;  %13709 = vst [vmem:[#allocation39_spill] sm:$0xff] %v9721_v20  ;;  %1271 = vperm.xlu1 %7917, %v711_v13   ;;  %1266 = vperm.xlu0 %7916, %v710_v14  }
 0x13a   : > { %7646 = vmatmul.mubr.msk.bf16.gmra.mrb[96].mxu0 %vm1974_vm2, %v7967_v15  ;;  %7808 = vmatmul.mubr.msk.bf16.gmra.mrb[96].mxu1 %vm1974_vm2, %v7967_v15 }
 0x13b   : > { %7649 = vmatprep.mubr.msk.bf16.mxu0 %vm1974_vm2, %v7968_v16  ;;  %v9732_v25 = vpop.permute.xlu1 %961  ;;  %v9734_v26 = vpop.permute.xlu0 %956  ;;  %7811 = vmatprep.mubr.msk.bf16.mxu1 %vm1974_vm2, %v7968_v16  ;;  %v723_v16 = vld [vmem:[%s13507_s2 + $0x378] sm:$0xff] }
 0x13c   : > { %13710 = vst [vmem:[#allocation40_spill] sm:$0xff] %v9732_v25  ;;  %13711 = vst [vmem:[#allocation41_spill] sm:$0xff] %v9734_v26  ;;  %1281 = vperm.xlu1 %7917, %v713_v23   ;;  %1276 = vperm.xlu0 %7916, %v712_v24   ;;  %v722_v23 = vld [vmem:[%s13507_s2 + $0x370] sm:$0xff]  ;;  %v7973_v24 = vld [vmem:[%s13506_s1 + $0x1b8] sm:$0xff]  }
 0x13f   : > { %v9749_v35 = vpop.permute.xlu1 %971  ;;  %v9751_v36 = vpop.permute.xlu0 %966 }
 0x140   : > { %13712 = vst [vmem:[#allocation42_spill] sm:$0xff] %v9749_v35  ;;  %13713 = vst [vmem:[#allocation43_spill] sm:$0xff] %v9751_v36  ;;  %1291 = vperm.xlu1 %7917, %v715_v29   ;;  %1286 = vperm.xlu0 %7916, %v714_v30  }
 0x142   : > { %7650 = vmatmul.mubr.msk.bf16.gmra.mrb[100].mxu0 %vm1974_vm2, %v7969_v33  ;;  %7812 = vmatmul.mubr.msk.bf16.gmra.mrb[100].mxu1 %vm1974_vm2, %v7969_v33  ;;  %v7974_v33 = vld [vmem:[%s13506_s1 + $0x1c0] sm:$0xff]  }
 0x143   : > { %7653 = vmatprep.mubr.msk.bf16.mxu0 %vm1974_vm2, %v7970_v34  ;;  %v9762_v43 = vpop.permute.xlu1 %981  ;;  %v9764_v44 = vpop.permute.xlu0 %976  ;;  %7815 = vmatprep.mubr.msk.bf16.mxu1 %vm1974_vm2, %v7970_v34 }
 0x144   : > { %13714 = vst [vmem:[#allocation44_spill] sm:$0xff] %v9762_v43  ;;  %13715 = vst [vmem:[#allocation45_spill] sm:$0xff] %v9764_v44  ;;  %1301 = vperm.xlu1 %7917, %v717_v39   ;;  %1296 = vperm.xlu0 %7916, %v716_v40  }
 0x147   : > { %v9779_v59 = vpop.permute.xlu1 %991  ;;  %v9781_v60 = vpop.permute.xlu0 %986 }
 0x148   : > { %13716 = vst [vmem:[#allocation46_spill] sm:$0xff] %v9779_v59  ;;  %13717 = vst [vmem:[#allocation47_spill] sm:$0xff] %v9781_v60  ;;  %1311 = vperm.xlu1 %7917, %v719_v47   ;;  %1306 = vperm.xlu0 %7916, %v718_v48  }
 0x14a   : > { %7654 = vmatmul.mubr.msk.bf16.gmra.mrb[104].mxu0 %vm1974_vm2, %v7971_v53  ;;  %7816 = vmatmul.mubr.msk.bf16.gmra.mrb[104].mxu1 %vm1974_vm2, %v7971_v53  ;;  %v725_v53 = vld [vmem:[%s13507_s2 + $0x388] sm:$0xff] }
 0x14b   : > { %7657 = vmatprep.mubr.msk.bf16.mxu0 %vm1974_vm2, %v7972_v54  ;;  %v9792_v5 = vpop.permute.xlu1 %1001  ;;  %v9794_v6 = vpop.permute.xlu0 %996  ;;  %7819 = vmatprep.mubr.msk.bf16.mxu1 %vm1974_vm2, %v7972_v54  ;;  %v724_v54 = vld [vmem:[%s13507_s2 + $0x380] sm:$0xff] }
 0x14c   : > { %13718 = vst [vmem:[#allocation48_spill] sm:$0xff] %v9792_v5  ;;  %13719 = vst [vmem:[#allocation49_spill] sm:$0xff] %v9794_v6  ;;  %1321 = vperm.xlu1 %7917, %v721_v63   ;;  %1316 = vperm.xlu0 %7916, %v720_v0  }
 0x14d   : > { %v9797_v13 = vpop.f32.mrb[0].mxu0  ;;  %v9799_v14 = vpop.f32.mrb[0].mxu1 }
 0x14e   : > { %13720 = vst [vmem:[#allocation50_spill] sm:$0xff] %v9799_v14  ;;  %v9801_v15 = vpop.f32.mrb[1].mxu0  ;;  %v9812_v29 = vpop.f32.mrb[1].mxu1 }
 0x14f   : > { %13721 = vst [vmem:[#allocation51_spill] sm:$0xff] %v9812_v29  ;;  %v9814_v30 = vpop.f32.mrb[2].mxu0  ;;  %v9819_v34 = vpop.f32.mrb[2].mxu1 }
 0x150   : > { %13722 = vst [vmem:[#allocation52_spill] sm:$0xff] %v9819_v34  ;;  %v9821_v39 = vpop.permute.xlu1 %1011  ;;  %v9823_v40 = vpop.permute.xlu0 %1006  ;;  %1331 = vperm.xlu1 %7917, %v723_v16   ;;  %1326 = vperm.xlu0 %7916, %v722_v23  }
 0x151   : > { %13723 = vst [vmem:[#allocation53_spill] sm:$0xff] %v9821_v39  ;;  %13724 = vst [vmem:[#allocation54_spill] sm:$0xff] %v9823_v40  ;;  %v9825_v47 = vpop.f32.mrb[3].mxu0  ;;  %v9827_v48 = vpop.f32.mrb[3].mxu1 }
 0x152   : > { %13725 = vst [vmem:[#allocation55_spill] sm:$0xff] %v9827_v48  ;;  %7658 = vmatmul.mubr.msk.bf16.gmra.mrb[108].mxu0 %vm1974_vm2, %v7973_v24  ;;  %7820 = vmatmul.mubr.msk.bf16.gmra.mrb[108].mxu1 %vm1974_vm2, %v7973_v24  ;;  %v727_v24 = vld [vmem:[%s13507_s2 + $0x398] sm:$0xff]  ;;  %v726_v48 = vld [vmem:[%s13507_s2 + $0x390] sm:$0xff] }
 0x153   : > { %7661 = vmatprep.mubr.msk.bf16.mxu0 %vm1974_vm2, %v7974_v33  ;;  %7823 = vmatprep.mubr.msk.bf16.mxu1 %vm1974_vm2, %v7974_v33  ;;  %v7975_v33 = vld [vmem:[%s13506_s1 + $0x1c8] sm:$0xff]  }
 0x154   : > { %v9838_v63 = vpop.permute.xlu1 %1021  ;;  %v9841_v0 = vpop.permute.xlu0 %1016  ;;  %1341 = vperm.xlu1 %7917, %v725_v53   ;;  %1336 = vperm.xlu0 %7916, %v724_v54  }
 0x155   : > { %13726 = vst [vmem:[#allocation56_spill] sm:$0xff] %v9838_v63  ;;  %13727 = vst [vmem:[#allocation57_spill] sm:$0xff] %v9841_v0  ;;  %v9843_v16 = vpop.f32.mrb[4].mxu0  ;;  %v9845_v23 = vpop.f32.mrb[4].mxu1 }
 0x156   : > { %13728 = vst [vmem:[#allocation58_spill] sm:$0xff] %v9845_v23  ;;  %v9847_v34 = vpop.f32.mrb[5].mxu0  ;;  %v9858_v53 = vpop.f32.mrb[5].mxu1  ;;  %v7976_v23 = vld [vmem:[%s13506_s1 + $0x1d0] sm:$0xff]  }
 0x157   : > { %13729 = vst [vmem:[#allocation59_spill] sm:$0xff] %v9858_v53  ;;  %v9860_v54 = vpop.f32.mrb[6].mxu0  ;;  %v9865_v14 = vpop.f32.mrb[6].mxu1  ;;  %v729_v53 = vld [vmem:[%s13507_s2 + $0x3a8] sm:$0xff] }
 0x158   : > { %13730 = vst [vmem:[#allocation60_spill] sm:$0xff] %v9865_v14  ;;  %v9867_v29 = vpop.permute.xlu1 %1031  ;;  %v9869_v63 = vpop.permute.xlu0 %1026  ;;  %1351 = vperm.xlu1 %7917, %v727_v24   ;;  %1346 = vperm.xlu0 %7916, %v726_v48   ;;  %v728_v14 = vld [vmem:[%s13507_s2 + $0x3a0] sm:$0xff] }
 0x159   : > { %13731 = vst [vmem:[#allocation61_spill] sm:$0xff] %v9867_v29  ;;  %13732 = vst [vmem:[#allocation62_spill] sm:$0xff] %v9869_v63  ;;  %v9871_v0 = vpop.f32.mrb[7].mxu0  ;;  %v9873_v39 = vpop.f32.mrb[7].mxu1 }
 0x15a   : > { %13733 = vst [vmem:[#allocation63_spill] sm:$0xff] %v9873_v39  ;;  %7662 = vmatmul.mubr.msk.bf16.gmra.mrb[112].mxu0 %vm1974_vm2, %v7975_v33  ;;  %7824 = vmatmul.mubr.msk.bf16.gmra.mrb[112].mxu1 %vm1974_vm2, %v7975_v33  ;;  %v731_v33 = vld [vmem:[%s13507_s2 + $0x3b8] sm:$0xff] }
 0x15b   : > { %7665 = vmatprep.mubr.msk.bf16.mxu0 %vm1974_vm2, %v7976_v23  ;;  %7827 = vmatprep.mubr.msk.bf16.mxu1 %vm1974_vm2, %v7976_v23  ;;  %v7977_v23 = vld [vmem:[%s13506_s1 + $0x1d8] sm:$0xff]  }
 0x15c   : > { %v9884_v29 = vpop.permute.xlu1 %1041  ;;  %v9887_v48 = vpop.permute.xlu0 %1036  ;;  %1361 = vperm.xlu1 %7917, %v729_v53   ;;  %1356 = vperm.xlu0 %7916, %v728_v14  }
 0x15d   : > { %13734 = vst [vmem:[#allocation64_spill] sm:$0xff] %v9884_v29  ;;  %13735 = vst [vmem:[#allocation65_spill] sm:$0xff] %v9887_v48  ;;  %v9889_v24 = vpop.f32.mrb[8].mxu0  ;;  %v9891_v39 = vpop.f32.mrb[8].mxu1  ;;  %v730_v29 = vld [vmem:[%s13507_s2 + $0x3b0] sm:$0xff] }
 0x15e   : > { %13736 = vst [vmem:[#allocation66_spill] sm:$0xff] %v9891_v39  ;;  %v9893_v63 = vpop.f32.mrb[9].mxu0  ;;  %v9904_v53 = vpop.f32.mrb[9].mxu1  ;;  %v7978_v39 = vld [vmem:[%s13506_s1 + $0x1e0] sm:$0xff]  }
 0x15f   : > { %13737 = vst [vmem:[#allocation67_spill] sm:$0xff] %v9904_v53  ;;  %v9906_v14 = vpop.f32.mrb[10].mxu0  ;;  %v9911_v48 = vpop.f32.mrb[10].mxu1  ;;  %v733_v53 = vld [vmem:[%s13507_s2 + $0x3c8] sm:$0xff] }
 0x160   : > { %13738 = vst [vmem:[#allocation68_spill] sm:$0xff] %v9911_v48  ;;  %v9913_v40 = vpop.permute.xlu1 %1051  ;;  %v9915_v5 = vpop.permute.xlu0 %1046  ;;  %1371 = vperm.xlu1 %7917, %v731_v33   ;;  %1366 = vperm.xlu0 %7916, %v730_v29   ;;  %v732_v48 = vld [vmem:[%s13507_s2 + $0x3c0] sm:$0xff] }
 0x161   : > { %13739 = vst [vmem:[#allocation69_spill] sm:$0xff] %v9913_v40  ;;  %13740 = vst [vmem:[#allocation70_spill] sm:$0xff] %v9915_v5  ;;  %v9917_v6 = vpop.f32.mrb[11].mxu0  ;;  %v9919_v59 = vpop.f32.mrb[11].mxu1 }
 0x162   : > { %13741 = vst [vmem:[#allocation71_spill] sm:$0xff] %v9919_v59  ;;  %7666 = vmatmul.mubr.msk.bf16.gmra.mrb[116].mxu0 %vm1974_vm2, %v7977_v23  ;;  %7828 = vmatmul.mubr.msk.bf16.gmra.mrb[116].mxu1 %vm1974_vm2, %v7977_v23  ;;  %v735_v23 = vld [vmem:[%s13507_s2 + $0x3d8] sm:$0xff] }
 0x163   : > { %7669 = vmatprep.mubr.msk.bf16.mxu0 %vm1974_vm2, %v7978_v39  ;;  %7831 = vmatprep.mubr.msk.bf16.mxu1 %vm1974_vm2, %v7978_v39  ;;  %v7979_v39 = vld [vmem:[%s13506_s1 + $0x1e8] sm:$0xff]  }
 0x164   : > { %v9930_v40 = vpop.permute.xlu1 %1061  ;;  %v9933_v29 = vpop.permute.xlu0 %1056  ;;  %1381 = vperm.xlu1 %7917, %v733_v53   ;;  %1376 = vperm.xlu0 %7916, %v732_v48  }
 0x165   : > { %13742 = vst [vmem:[#allocation72_spill] sm:$0xff] %v9930_v40  ;;  %13743 = vst [vmem:[#allocation73_spill] sm:$0xff] %v9933_v29  ;;  %v9935_v33 = vpop.f32.mrb[12].mxu0  ;;  %v9937_v59 = vpop.f32.mrb[12].mxu1  ;;  %v734_v40 = vld [vmem:[%s13507_s2 + $0x3d0] sm:$0xff] }
 0x166   : > { %13744 = vst [vmem:[#allocation74_spill] sm:$0xff] %v9937_v59  ;;  %v9939_v5 = vpop.f32.mrb[13].mxu0  ;;  %v9950_v53 = vpop.f32.mrb[13].mxu1  ;;  %v7980_v59 = vld [vmem:[%s13506_s1 + $0x1f0] sm:$0xff]  }
 0x167   : > { %13745 = vst [vmem:[#allocation75_spill] sm:$0xff] %v9950_v53  ;;  %v9952_v48 = vpop.f32.mrb[14].mxu0  ;;  %v9957_v29 = vpop.f32.mrb[14].mxu1  ;;  %v737_v53 = vld [vmem:[%s13507_s2 + $0x3e8] sm:$0xff] }
 0x168   : > { %13746 = vst [vmem:[#allocation76_spill] sm:$0xff] %v9957_v29  ;;  %v9959_v60 = vpop.permute.xlu1 %1071  ;;  %v9961_v43 = vpop.permute.xlu0 %1066  ;;  %1391 = vperm.xlu1 %7917, %v735_v23   ;;  %1386 = vperm.xlu0 %7916, %v734_v40   ;;  %v736_v29 = vld [vmem:[%s13507_s2 + $0x3e0] sm:$0xff] }
 0x169   : > { %13747 = vst [vmem:[#allocation77_spill] sm:$0xff] %v9959_v60  ;;  %13748 = vst [vmem:[#allocation78_spill] sm:$0xff] %v9961_v43  ;;  %v9963_v44 = vpop.f32.mrb[15].mxu0  ;;  %v9965_v35 = vpop.f32.mrb[15].mxu1 }
 0x16a   : > { %13749 = vst [vmem:[#allocation79_spill] sm:$0xff] %v9965_v35  ;;  %7670 = vmatmul.mubr.msk.bf16.gmra.mrb[120].mxu0 %vm1974_vm2, %v7979_v39  ;;  %7832 = vmatmul.mubr.msk.bf16.gmra.mrb[120].mxu1 %vm1974_vm2, %v7979_v39  ;;  %v739_v39 = vld [vmem:[%s13507_s2 + $0x3f8] sm:$0xff] }
 0x16b   : > { %7673 = vmatprep.mubr.msk.bf16.mxu0 %vm1974_vm2, %v7980_v59  ;;  %7835 = vmatprep.mubr.msk.bf16.mxu1 %vm1974_vm2, %v7980_v59  ;;  %v7981_v59 = vld [vmem:[%s13506_s1 + $0x1f8] sm:$0xff]  }
 0x16c   : > { %v9976_v60 = vpop.permute.xlu1 %1081  ;;  %v9979_v40 = vpop.permute.xlu0 %1076  ;;  %1401 = vperm.xlu1 %7917, %v737_v53   ;;  %1396 = vperm.xlu0 %7916, %v736_v29  }
 0x16d   : > { %13750 = vst [vmem:[#allocation80_spill] sm:$0xff] %v9976_v60  ;;  %13751 = vst [vmem:[#allocation81_spill] sm:$0xff] %v9979_v40  ;;  %v9981_v23 = vpop.f32.mrb[16].mxu0  ;;  %v9983_v35 = vpop.f32.mrb[16].mxu1  ;;  %v738_v60 = vld [vmem:[%s13507_s2 + $0x3f0] sm:$0xff] }
 0x16e   : > { %13752 = vst [vmem:[#allocation82_spill] sm:$0xff] %v9983_v35  ;;  %v9985_v43 = vpop.f32.mrb[17].mxu0  ;;  %v9996_v53 = vpop.f32.mrb[17].mxu1  ;;  %v7982_v35 = vld [vmem:[%s13506_s1 + $0x200] sm:$0xff]  }
 0x16f   : > { %13753 = vst [vmem:[#allocation83_spill] sm:$0xff] %v9996_v53  ;;  %v9998_v29 = vpop.f32.mrb[18].mxu0  ;;  %v10003_v40 = vpop.f32.mrb[18].mxu1  ;;  %v741_v53 = vld [vmem:[%s13507_s2 + $0x408] sm:$0xff] }
 0x170   : > { %13754 = vst [vmem:[#allocation84_spill] sm:$0xff] %v10003_v40  ;;  %v10005_v36 = vpop.permute.xlu1 %1091  ;;  %v10007_v25 = vpop.permute.xlu0 %1086  ;;  %1411 = vperm.xlu1 %7917, %v739_v39   ;;  %1406 = vperm.xlu0 %7916, %v738_v60   ;;  %v740_v40 = vld [vmem:[%s13507_s2 + $0x400] sm:$0xff] }
 0x171   : > { %13755 = vst [vmem:[#allocation85_spill] sm:$0xff] %v10005_v36  ;;  %13756 = vst [vmem:[#allocation86_spill] sm:$0xff] %v10007_v25  ;;  %v10009_v26 = vpop.f32.mrb[19].mxu0  ;;  %v10011_v19 = vpop.f32.mrb[19].mxu1 }
 0x172   : > { %13757 = vst [vmem:[#allocation87_spill] sm:$0xff] %v10011_v19  ;;  %7674 = vmatmul.mubr.msk.bf16.gmra.mrb[124].mxu0 %vm1974_vm2, %v7981_v59  ;;  %7836 = vmatmul.mubr.msk.bf16.gmra.mrb[124].mxu1 %vm1974_vm2, %v7981_v59  ;;  %v743_v59 = vld [vmem:[%s13507_s2 + $0x418] sm:$0xff] }
 0x173   : > { %7677 = vmatprep.mubr.msk.bf16.mxu0 %vm1974_vm2, %v7982_v35  ;;  %7839 = vmatprep.mubr.msk.bf16.mxu1 %vm1974_vm2, %v7982_v35  ;;  %v7983_v35 = vld [vmem:[%s13506_s1 + $0x208] sm:$0xff]  }
 0x174   : > { %v10022_v36 = vpop.permute.xlu1 %1101  ;;  %v10025_v60 = vpop.permute.xlu0 %1096  ;;  %1421 = vperm.xlu1 %7917, %v741_v53   ;;  %1416 = vperm.xlu0 %7916, %v740_v40  }
 0x175   : > { %13758 = vst [vmem:[#allocation88_spill] sm:$0xff] %v10022_v36  ;;  %13759 = vst [vmem:[#allocation89_spill] sm:$0xff] %v10025_v60  ;;  %v10027_v39 = vpop.f32.mrb[20].mxu0  ;;  %v10029_v19 = vpop.f32.mrb[20].mxu1  ;;  %v742_v36 = vld [vmem:[%s13507_s2 + $0x410] sm:$0xff] }
 0x176   : > { %13760 = vst [vmem:[#allocation90_spill] sm:$0xff] %v10029_v19  ;;  %v10031_v25 = vpop.f32.mrb[21].mxu0  ;;  %v10042_v53 = vpop.f32.mrb[21].mxu1  ;;  %v7984_v19 = vld [vmem:[%s13506_s1 + $0x210] sm:$0xff]  }
 0x177   : > { %13761 = vst [vmem:[#allocation91_spill] sm:$0xff] %v10042_v53  ;;  %v10044_v40 = vpop.f32.mrb[22].mxu0  ;;  %v10049_v60 = vpop.f32.mrb[22].mxu1  ;;  %v745_v53 = vld [vmem:[%s13507_s2 + $0x428] sm:$0xff] }
 0x178   : > { %13762 = vst [vmem:[#allocation92_spill] sm:$0xff] %v10049_v60  ;;  %v10051_v20 = vpop.permute.xlu1 %1111  ;;  %v10053_v9 = vpop.permute.xlu0 %1106  ;;  %1431 = vperm.xlu1 %7917, %v743_v59   ;;  %1426 = vperm.xlu0 %7916, %v742_v36   ;;  %v744_v60 = vld [vmem:[%s13507_s2 + $0x420] sm:$0xff] }
 0x179   : > { %13763 = vst [vmem:[#allocation93_spill] sm:$0xff] %v10051_v20  ;;  %13764 = vst [vmem:[#allocation94_spill] sm:$0xff] %v10053_v9  ;;  %v10055_v10 = vpop.f32.mrb[23].mxu0  ;;  %v10057_v3 = vpop.f32.mrb[23].mxu1 }
 0x17a   : > { %13765 = vst [vmem:[#allocation95_spill] sm:$0xff] %v10057_v3  ;;  %7678 = vmatmul.mubr.msk.bf16.gmra.mrb[128].mxu0 %vm1974_vm2, %v7983_v35  ;;  %7840 = vmatmul.mubr.msk.bf16.gmra.mrb[128].mxu1 %vm1974_vm2, %v7983_v35  ;;  %v747_v35 = vld [vmem:[%s13507_s2 + $0x438] sm:$0xff] }
 0x17b   : > { %7681 = vmatprep.mubr.msk.bf16.mxu0 %vm1974_vm2, %v7984_v19  ;;  %7843 = vmatprep.mubr.msk.bf16.mxu1 %vm1974_vm2, %v7984_v19  ;;  %v7985_v19 = vld [vmem:[%s13506_s1 + $0x218] sm:$0xff]  }
 0x17c   : > { %v10068_v20 = vpop.permute.xlu1 %1121  ;;  %v10071_v36 = vpop.permute.xlu0 %1116  ;;  %1441 = vperm.xlu1 %7917, %v745_v53   ;;  %1436 = vperm.xlu0 %7916, %v744_v60  }
 0x17d   : > { %13766 = vst [vmem:[#allocation96_spill] sm:$0xff] %v10068_v20  ;;  %13767 = vst [vmem:[#allocation97_spill] sm:$0xff] %v10071_v36  ;;  %v10073_v59 = vpop.f32.mrb[24].mxu0  ;;  %v10075_v3 = vpop.f32.mrb[24].mxu1  ;;  %v746_v20 = vld [vmem:[%s13507_s2 + $0x430] sm:$0xff] }
 0x17e   : > { %13768 = vst [vmem:[#allocation98_spill] sm:$0xff] %v10073_v59  ;;  %13769 = vst [vmem:[#allocation99_spill] sm:$0xff] %v10075_v3  ;;  %v10077_v9 = vpop.f32.mrb[25].mxu0  ;;  %v10088_v53 = vpop.f32.mrb[25].mxu1  ;;  %v7986_v3 = vld [vmem:[%s13506_s1 + $0x220] sm:$0xff]  }
 0x17f   : > { %13770 = vst [vmem:[#allocation100_spill] sm:$0xff] %v10088_v53  ;;  %v10090_v60 = vpop.f32.mrb[26].mxu0  ;;  %v10095_v36 = vpop.f32.mrb[26].mxu1  ;;  %v749_v53 = vld [vmem:[%s13507_s2 + $0x448] sm:$0xff] }
 0x180   : > { %13771 = vst [vmem:[#allocation101_spill] sm:$0xff] %v10090_v60  ;;  %13772 = vst [vmem:[#allocation102_spill] sm:$0xff] %v10095_v36  ;;  %v10097_v4 = vpop.permute.xlu1 %1131  ;;  %v10099_v57 = vpop.permute.xlu0 %1126  ;;  %1451 = vperm.xlu1 %7917, %v747_v35   ;;  %1446 = vperm.xlu0 %7916, %v746_v20   ;;  %v748_v36 = vld [vmem:[%s13507_s2 + $0x440] sm:$0xff] }
 0x181   : > { %13773 = vst [vmem:[#allocation103_spill] sm:$0xff] %v10097_v4  ;;  %13774 = vst [vmem:[#allocation104_spill] sm:$0xff] %v10099_v57  ;;  %v10101_v58 = vpop.f32.mrb[27].mxu0  ;;  %v10103_v49 = vpop.f32.mrb[27].mxu1 }
 0x182   : > { %13775 = vst [vmem:[#allocation105_spill] sm:$0xff] %v10103_v49  ;;  %7682 = vmatmul.mubr.msk.bf16.gmra.mrb[132].mxu0 %vm1974_vm2, %v7985_v19  ;;  %7844 = vmatmul.mubr.msk.bf16.gmra.mrb[132].mxu1 %vm1974_vm2, %v7985_v19  ;;  %v751_v19 = vld [vmem:[%s13507_s2 + $0x458] sm:$0xff] }
 0x183   : > { %7685 = vmatprep.mubr.msk.bf16.mxu0 %vm1974_vm2, %v7986_v3  ;;  %7847 = vmatprep.mubr.msk.bf16.mxu1 %vm1974_vm2, %v7986_v3  ;;  %v7987_v3 = vld [vmem:[%s13506_s1 + $0x228] sm:$0xff]  }
 0x184   : > { %v10114_v4 = vpop.permute.xlu1 %1141  ;;  %v10117_v20 = vpop.permute.xlu0 %1136  ;;  %1461 = vperm.xlu1 %7917, %v749_v53   ;;  %1456 = vperm.xlu0 %7916, %v748_v36  }
 0x185   : > { %13776 = vst [vmem:[#allocation106_spill] sm:$0xff] %v10114_v4  ;;  %13777 = vst [vmem:[#allocation107_spill] sm:$0xff] %v10117_v20  ;;  %v10119_v35 = vpop.f32.mrb[28].mxu0  ;;  %v10121_v49 = vpop.f32.mrb[28].mxu1  ;;  %v750_v4 = vld [vmem:[%s13507_s2 + $0x450] sm:$0xff] }
 0x186   : > { %13778 = vst [vmem:[#allocation108_spill] sm:$0xff] %v10119_v35  ;;  %13779 = vst [vmem:[#allocation109_spill] sm:$0xff] %v10121_v49  ;;  %v10123_v57 = vpop.f32.mrb[29].mxu0  ;;  %v10134_v53 = vpop.f32.mrb[29].mxu1  ;;  %v7988_v49 = vld [vmem:[%s13506_s1 + $0x230] sm:$0xff]  }
 0x187   : > { %13780 = vst [vmem:[#allocation110_spill] sm:$0xff] %v10123_v57  ;;  %13781 = vst [vmem:[#allocation111_spill] sm:$0xff] %v10134_v53  ;;  %v10136_v36 = vpop.f32.mrb[30].mxu0  ;;  %v10141_v20 = vpop.f32.mrb[30].mxu1  ;;  %v753_v53 = vld [vmem:[%s13507_s2 + $0x468] sm:$0xff] }
 0x188   : > { %13782 = vst [vmem:[#allocation112_spill] sm:$0xff] %v10136_v36  ;;  %13783 = vst [vmem:[#allocation113_spill] sm:$0xff] %v10141_v20  ;;  %v10143_v35 = vpop.permute.xlu1 %1151  ;;  %v10145_v57 = vpop.permute.xlu0 %1146  ;;  %1471 = vperm.xlu1 %7917, %v751_v19   ;;  %1466 = vperm.xlu0 %7916, %v750_v4   ;;  %v752_v20 = vld [vmem:[%s13507_s2 + $0x460] sm:$0xff] }
 0x189   : > { %13784 = vst [vmem:[#allocation114_spill] sm:$0xff] %v10143_v35  ;;  %13785 = vst [vmem:[#allocation115_spill] sm:$0xff] %v10145_v57  ;;  %v10147_v60 = vpop.f32.mrb[31].mxu0  ;;  %v10149_v59 = vpop.f32.mrb[31].mxu1 }
 0x18a   : > { %13786 = vst [vmem:[#allocation116_spill] sm:$0xff] %v10147_v60  ;;  %13787 = vst [vmem:[#allocation117_spill] sm:$0xff] %v10149_v59  ;;  %7686 = vmatmul.mubr.msk.bf16.gmra.mrb[136].mxu0 %vm1974_vm2, %v7987_v3  ;;  %7848 = vmatmul.mubr.msk.bf16.gmra.mrb[136].mxu1 %vm1974_vm2, %v7987_v3  ;;  %v755_v3 = vld [vmem:[%s13507_s2 + $0x478] sm:$0xff] }
 0x18b   : > { %7689 = vmatprep.mubr.msk.bf16.mxu0 %vm1974_vm2, %v7988_v49  ;;  %7851 = vmatprep.mubr.msk.bf16.mxu1 %vm1974_vm2, %v7988_v49  ;;  %v7989_v49 = vld [vmem:[%s13506_s1 + $0x238] sm:$0xff]  }
 0x18c   : > { %v10160_v35 = vpop.permute.xlu1 %1161  ;;  %v10163_v4 = vpop.permute.xlu0 %1156  ;;  %1481 = vperm.xlu1 %7917, %v753_v53   ;;  %1476 = vperm.xlu0 %7916, %v752_v20  }
 0x18d   : > { %13788 = vst [vmem:[#allocation118_spill] sm:$0xff] %v10160_v35  ;;  %13789 = vst [vmem:[#allocation119_spill] sm:$0xff] %v10163_v4  ;;  %v10165_v19 = vpop.f32.mrb[32].mxu0  ;;  %v10167_v59 = vpop.f32.mrb[32].mxu1  ;;  %v754_v35 = vld [vmem:[%s13507_s2 + $0x470] sm:$0xff] }
 0x18e   : > { %13790 = vst [vmem:[#allocation120_spill] sm:$0xff] %v10165_v19  ;;  %13791 = vst [vmem:[#allocation121_spill] sm:$0xff] %v10167_v59  ;;  %v10169_v57 = vpop.f32.mrb[33].mxu0  ;;  %v10180_v53 = vpop.f32.mrb[33].mxu1  ;;  %v7990_v59 = vld [vmem:[%s13506_s1 + $0x240] sm:$0xff]  }
 0x18f   : > { %13792 = vst [vmem:[#allocation122_spill] sm:$0xff] %v10169_v57  ;;  %13793 = vst [vmem:[#allocation123_spill] sm:$0xff] %v10180_v53  ;;  %v10182_v20 = vpop.f32.mrb[34].mxu0  ;;  %v10187_v4 = vpop.f32.mrb[34].mxu1  ;;  %v757_v53 = vld [vmem:[%s13507_s2 + $0x488] sm:$0xff] }
 0x190   : > { %13794 = vst [vmem:[#allocation124_spill] sm:$0xff] %v10182_v20  ;;  %13795 = vst [vmem:[#allocation125_spill] sm:$0xff] %v10187_v4  ;;  %v10189_v19 = vpop.permute.xlu1 %1171  ;;  %v10191_v57 = vpop.permute.xlu0 %1166  ;;  %1491 = vperm.xlu1 %7917, %v755_v3   ;;  %1486 = vperm.xlu0 %7916, %v754_v35   ;;  %v756_v4 = vld [vmem:[%s13507_s2 + $0x480] sm:$0xff] }
 0x191   : > { %13796 = vst [vmem:[#allocation126_spill] sm:$0xff] %v10189_v19  ;;  %13797 = vst [vmem:[#allocation127_spill] sm:$0xff] %v10191_v57  ;;  %v10193_v36 = vpop.f32.mrb[35].mxu0  ;;  %v10195_v60 = vpop.f32.mrb[35].mxu1 }
 0x192   : > { %13798 = vst [vmem:[#allocation128_spill] sm:$0xff] %v10193_v36  ;;  %13799 = vst [vmem:[#allocation129_spill] sm:$0xff] %v10195_v60  ;;  %7690 = vmatmul.mubr.msk.bf16.gmra.mrb[140].mxu0 %vm1974_vm2, %v7989_v49  ;;  %7852 = vmatmul.mubr.msk.bf16.gmra.mrb[140].mxu1 %vm1974_vm2, %v7989_v49  ;;  %v759_v49 = vld [vmem:[%s13507_s2 + $0x498] sm:$0xff] }
 0x193   : > { %7693 = vmatprep.mubr.msk.bf16.mxu0 %vm1974_vm2, %v7990_v59  ;;  %7855 = vmatprep.mubr.msk.bf16.mxu1 %vm1974_vm2, %v7990_v59  ;;  %v7991_v59 = vld [vmem:[%s13506_s1 + $0x248] sm:$0xff]  }
 0x194   : > { %v10206_v19 = vpop.permute.xlu1 %1181  ;;  %v10209_v35 = vpop.permute.xlu0 %1176  ;;  %1501 = vperm.xlu1 %7917, %v757_v53   ;;  %1496 = vperm.xlu0 %7916, %v756_v4  }
 0x195   : > { %13800 = vst [vmem:[#allocation130_spill] sm:$0xff] %v10206_v19  ;;  %13801 = vst [vmem:[#allocation131_spill] sm:$0xff] %v10209_v35  ;;  %v10211_v3 = vpop.f32.mrb[36].mxu0  ;;  %v10213_v60 = vpop.f32.mrb[36].mxu1  ;;  %v758_v19 = vld [vmem:[%s13507_s2 + $0x490] sm:$0xff] }
 0x196   : > { %13802 = vst [vmem:[#allocation132_spill] sm:$0xff] %v10211_v3  ;;  %13803 = vst [vmem:[#allocation133_spill] sm:$0xff] %v10213_v60  ;;  %v10215_v57 = vpop.f32.mrb[37].mxu0  ;;  %v10226_v53 = vpop.f32.mrb[37].mxu1  ;;  %v7992_v60 = vld [vmem:[%s13506_s1 + $0x250] sm:$0xff]  }
 0x197   : > { %13804 = vst [vmem:[#allocation134_spill] sm:$0xff] %v10215_v57  ;;  %13805 = vst [vmem:[#allocation135_spill] sm:$0xff] %v10226_v53  ;;  %v10228_v4 = vpop.f32.mrb[38].mxu0  ;;  %v10233_v35 = vpop.f32.mrb[38].mxu1  ;;  %v761_v53 = vld [vmem:[%s13507_s2 + $0x4a8] sm:$0xff] }
 0x198   : > { %13806 = vst [vmem:[#allocation136_spill] sm:$0xff] %v10228_v4  ;;  %13807 = vst [vmem:[#allocation137_spill] sm:$0xff] %v10233_v35  ;;  %v10235_v3 = vpop.permute.xlu1 %1191  ;;  %v10237_v57 = vpop.permute.xlu0 %1186  ;;  %1511 = vperm.xlu1 %7917, %v759_v49   ;;  %1506 = vperm.xlu0 %7916, %v758_v19   ;;  %v760_v35 = vld [vmem:[%s13507_s2 + $0x4a0] sm:$0xff] }
 0x199   : > { %13808 = vst [vmem:[#allocation138_spill] sm:$0xff] %v10235_v3  ;;  %13809 = vst [vmem:[#allocation139_spill] sm:$0xff] %v10237_v57  ;;  %v10239_v20 = vpop.f32.mrb[39].mxu0  ;;  %v10241_v36 = vpop.f32.mrb[39].mxu1 }
 0x19a   : > { %13810 = vst [vmem:[#allocation140_spill] sm:$0xff] %v10239_v20  ;;  %13811 = vst [vmem:[#allocation141_spill] sm:$0xff] %v10241_v36  ;;  %7694 = vmatmul.mubr.msk.bf16.gmra.mrb[144].mxu0 %vm1974_vm2, %v7991_v59  ;;  %7856 = vmatmul.mubr.msk.bf16.gmra.mrb[144].mxu1 %vm1974_vm2, %v7991_v59  ;;  %v763_v59 = vld [vmem:[%s13507_s2 + $0x4b8] sm:$0xff] }
 0x19b   : > { %7697 = vmatprep.mubr.msk.bf16.mxu0 %vm1974_vm2, %v7992_v60  ;;  %7859 = vmatprep.mubr.msk.bf16.mxu1 %vm1974_vm2, %v7992_v60  ;;  %v7993_v60 = vld [vmem:[%s13506_s1 + $0x258] sm:$0xff]  }
 0x19c   : > { %v10252_v3 = vpop.permute.xlu1 %1201  ;;  %v10255_v19 = vpop.permute.xlu0 %1196  ;;  %1521 = vperm.xlu1 %7917, %v761_v53   ;;  %1516 = vperm.xlu0 %7916, %v760_v35  }
 0x19d   : > { %13812 = vst [vmem:[#allocation142_spill] sm:$0xff] %v10252_v3  ;;  %13813 = vst [vmem:[#allocation143_spill] sm:$0xff] %v10255_v19  ;;  %v10257_v49 = vpop.f32.mrb[40].mxu0  ;;  %v10259_v36 = vpop.f32.mrb[40].mxu1  ;;  %v762_v3 = vld [vmem:[%s13507_s2 + $0x4b0] sm:$0xff] }
 0x19e   : > { %13814 = vst [vmem:[#allocation144_spill] sm:$0xff] %v10257_v49  ;;  %13815 = vst [vmem:[#allocation145_spill] sm:$0xff] %v10259_v36  ;;  %v10261_v57 = vpop.f32.mrb[41].mxu0  ;;  %v10272_v53 = vpop.f32.mrb[41].mxu1  ;;  %v7994_v36 = vld [vmem:[%s13506_s1 + $0x260] sm:$0xff]  }
 0x19f   : > { %13816 = vst [vmem:[#allocation146_spill] sm:$0xff] %v10261_v57  ;;  %13817 = vst [vmem:[#allocation147_spill] sm:$0xff] %v10272_v53  ;;  %v10274_v35 = vpop.f32.mrb[42].mxu0  ;;  %v10279_v19 = vpop.f32.mrb[42].mxu1  ;;  %v765_v53 = vld [vmem:[%s13507_s2 + $0x4c8] sm:$0xff] }
 0x1a0   : > { %13818 = vst [vmem:[#allocation148_spill] sm:$0xff] %v10274_v35  ;;  %13819 = vst [vmem:[#allocation149_spill] sm:$0xff] %v10279_v19  ;;  %v10281_v49 = vpop.permute.xlu1 %1211  ;;  %v10283_v57 = vpop.permute.xlu0 %1206  ;;  %1531 = vperm.xlu1 %7917, %v763_v59   ;;  %1526 = vperm.xlu0 %7916, %v762_v3   ;;  %v764_v19 = vld [vmem:[%s13507_s2 + $0x4c0] sm:$0xff] }
 0x1a1   : > { %13820 = vst [vmem:[#allocation150_spill] sm:$0xff] %v10281_v49  ;;  %13821 = vst [vmem:[#allocation151_spill] sm:$0xff] %v10283_v57  ;;  %v10285_v4 = vpop.f32.mrb[43].mxu0  ;;  %v10287_v20 = vpop.f32.mrb[43].mxu1 }
 0x1a2   : > { %13822 = vst [vmem:[#allocation152_spill] sm:$0xff] %v10285_v4  ;;  %13823 = vst [vmem:[#allocation153_spill] sm:$0xff] %v10287_v20  ;;  %7698 = vmatmul.mubr.msk.bf16.gmra.mrb[148].mxu0 %vm1974_vm2, %v7993_v60  ;;  %7860 = vmatmul.mubr.msk.bf16.gmra.mrb[148].mxu1 %vm1974_vm2, %v7993_v60  ;;  %v767_v60 = vld [vmem:[%s13507_s2 + $0x4d8] sm:$0xff] }
 0x1a3   : > { %7701 = vmatprep.mubr.msk.bf16.mxu0 %vm1974_vm2, %v7994_v36  ;;  %7863 = vmatprep.mubr.msk.bf16.mxu1 %vm1974_vm2, %v7994_v36  ;;  %v7995_v36 = vld [vmem:[%s13506_s1 + $0x268] sm:$0xff]  }
 0x1a4   : > { %v10298_v49 = vpop.permute.xlu1 %1221  ;;  %v10301_v3 = vpop.permute.xlu0 %1216  ;;  %1541 = vperm.xlu1 %7917, %v765_v53   ;;  %1536 = vperm.xlu0 %7916, %v764_v19  }
 0x1a5   : > { %13824 = vst [vmem:[#allocation154_spill] sm:$0xff] %v10298_v49  ;;  %13825 = vst [vmem:[#allocation155_spill] sm:$0xff] %v10301_v3  ;;  %v10303_v59 = vpop.f32.mrb[44].mxu0  ;;  %v10305_v20 = vpop.f32.mrb[44].mxu1  ;;  %v766_v49 = vld [vmem:[%s13507_s2 + $0x4d0] sm:$0xff] }
 0x1a6   : > { %13826 = vst [vmem:[#allocation156_spill] sm:$0xff] %v10303_v59  ;;  %13827 = vst [vmem:[#allocation157_spill] sm:$0xff] %v10305_v20  ;;  %v10307_v57 = vpop.f32.mrb[45].mxu0  ;;  %v10318_v53 = vpop.f32.mrb[45].mxu1  ;;  %v7996_v20 = vld [vmem:[%s13506_s1 + $0x270] sm:$0xff]  }
 0x1a7   : > { %13828 = vst [vmem:[#allocation158_spill] sm:$0xff] %v10307_v57  ;;  %13829 = vst [vmem:[#allocation159_spill] sm:$0xff] %v10318_v53  ;;  %v10320_v19 = vpop.f32.mrb[46].mxu0  ;;  %v10325_v3 = vpop.f32.mrb[46].mxu1  ;;  %v769_v53 = vld [vmem:[%s13507_s2 + $0x4e8] sm:$0xff] }
 0x1a8   : > { %13830 = vst [vmem:[#allocation160_spill] sm:$0xff] %v10320_v19  ;;  %13831 = vst [vmem:[#allocation161_spill] sm:$0xff] %v10325_v3  ;;  %v10327_v59 = vpop.permute.xlu1 %1231  ;;  %v10329_v57 = vpop.permute.xlu0 %1226  ;;  %1551 = vperm.xlu1 %7917, %v767_v60   ;;  %1546 = vperm.xlu0 %7916, %v766_v49   ;;  %v768_v3 = vld [vmem:[%s13507_s2 + $0x4e0] sm:$0xff] }
 0x1a9   : > { %13832 = vst [vmem:[#allocation162_spill] sm:$0xff] %v10327_v59  ;;  %13833 = vst [vmem:[#allocation163_spill] sm:$0xff] %v10329_v57  ;;  %v10331_v35 = vpop.f32.mrb[47].mxu0  ;;  %v10333_v4 = vpop.f32.mrb[47].mxu1 }
 0x1aa   : > { %13834 = vst [vmem:[#allocation164_spill] sm:$0xff] %v10331_v35  ;;  %13835 = vst [vmem:[#allocation165_spill] sm:$0xff] %v10333_v4  ;;  %7702 = vmatmul.mubr.msk.bf16.gmra.mrb[152].mxu0 %vm1974_vm2, %v7995_v36  ;;  %7864 = vmatmul.mubr.msk.bf16.gmra.mrb[152].mxu1 %vm1974_vm2, %v7995_v36  ;;  %v771_v36 = vld [vmem:[%s13507_s2 + $0x4f8] sm:$0xff] }
 0x1ab   : > { %7705 = vmatprep.mubr.msk.bf16.mxu0 %vm1974_vm2, %v7996_v20  ;;  %7867 = vmatprep.mubr.msk.bf16.mxu1 %vm1974_vm2, %v7996_v20  ;;  %v7997_v20 = vld [vmem:[%s13506_s1 + $0x278] sm:$0xff]  }
 0x1ac   : > { %v10344_v59 = vpop.permute.xlu1 %1241  ;;  %v10347_v49 = vpop.permute.xlu0 %1236  ;;  %1561 = vperm.xlu1 %7917, %v769_v53   ;;  %1556 = vperm.xlu0 %7916, %v768_v3  }
 0x1ad   : > { %13836 = vst [vmem:[#allocation166_spill] sm:$0xff] %v10344_v59  ;;  %13837 = vst [vmem:[#allocation167_spill] sm:$0xff] %v10347_v49  ;;  %v10349_v60 = vpop.f32.mrb[48].mxu0  ;;  %v10351_v4 = vpop.f32.mrb[48].mxu1  ;;  %v770_v59 = vld [vmem:[%s13507_s2 + $0x4f0] sm:$0xff] }
 0x1ae   : > { %13838 = vst [vmem:[#allocation168_spill] sm:$0xff] %v10349_v60  ;;  %13839 = vst [vmem:[#allocation169_spill] sm:$0xff] %v10351_v4  ;;  %v10353_v57 = vpop.f32.mrb[49].mxu0  ;;  %v10364_v53 = vpop.f32.mrb[49].mxu1 }
 0x1af   : > { %13840 = vst [vmem:[#allocation170_spill] sm:$0xff] %v10353_v57  ;;  %13841 = vst [vmem:[#allocation171_spill] sm:$0xff] %v10364_v53  ;;  %v10366_v3 = vpop.f32.mrb[50].mxu0  ;;  %v10368_v49 = vpop.f32.mrb[50].mxu1  ;;  %v2254_v53 = vadd.f32 %v9801_v15, %v9464_v46 }
 0x1b0   : > { %13842 = vst [vmem:[#allocation172_spill] sm:$0xff] %v10366_v3  ;;  %13843 = vst [vmem:[#allocation173_spill] sm:$0xff] %v10368_v49  ;;  %v10370_v4 = vpop.permute.xlu1 %1251  ;;  %v10372_v60 = vpop.permute.xlu0 %1246  ;;  %1571 = vperm.xlu1 %7917, %v771_v36   ;;  %1566 = vperm.xlu0 %7916, %v770_v59  }
 0x1b1   : > { %13844 = vst [vmem:[#allocation174_spill] sm:$0xff] %v10370_v4  ;;  %13845 = vst [vmem:[#allocation175_spill] sm:$0xff] %v10372_v60  ;;  %v10374_v57 = vpop.f32.mrb[51].mxu0  ;;  %v10376_v19 = vpop.f32.mrb[51].mxu1  ;;  %v10402_v15 = vmul.f32 0.5, %v2254_v53 }
 0x1b2   : > { %13846 = vst [vmem:[#allocation176_spill] sm:$0xff] %v10376_v19  ;;  %7706 = vmatmul.mubr.msk.bf16.gmra.mrb[156].mxu0 %vm1974_vm2, %v7997_v20  ;;  %7868 = vmatmul.mubr.msk.bf16.gmra.mrb[156].mxu1 %vm1974_vm2, %v7997_v20  ;;  %v2262_v20 = vadd.f32 %v9797_v13, %v9462_v45  ;;  %v2265_v13 = vadd.f32 %v9814_v30, %v9479_v51 }
 0x1b3   : > { %7998 = vtanh.f32 %v10402_v15 }
 0x1b4   : > { %v10380_v35 = vpop.permute.xlu1 %1261  ;;  %v10384_v49 = vpop.permute.xlu0 %1256  ;;  %v10436_v51 = vmul.f32 0.5, %v2265_v13 }
 0x1b5   : > { %13847 = vst [vmem:[#allocation177_spill] sm:$0xff] %v10380_v35  ;;  %13848 = vst [vmem:[#allocation178_spill] sm:$0xff] %v10384_v49  ;;  %v10386_v4 = vpop.f32.mrb[52].mxu0  ;;  %v10388_v60 = vpop.f32.mrb[52].mxu1 }
 0x1b6   : > { %13849 = vst [vmem:[#allocation179_spill] sm:$0xff] %v10386_v4  ;;  %13850 = vst [vmem:[#allocation180_spill] sm:$0xff] %v10388_v60  ;;  %v10390_v3 = vpop.f32.mrb[53].mxu0  ;;  %v10392_v59 = vpop.f32.mrb[53].mxu1  ;;  %v2257_v60 = vadd.f32 %v9825_v47, %v9481_v52  ;;  %v2270_v47 = vadd.f32 %v9847_v34, %v9494_v56 }
 0x1b7   : > { %13851 = vst [vmem:[#allocation181_spill] sm:$0xff] %v10392_v59  ;;  %v10394_v36 = vpop.f32.mrb[54].mxu0  ;;  %v10398_v19 = vpop.f32.mrb[54].mxu1  ;;  %v10412_v59 = vmul.f32 0.5, %v2262_v20 }
 0x1b8   : > { %13852 = vst [vmem:[#allocation182_spill] sm:$0xff] %v10398_v19  ;;  %v10400_v35 = vpop.permute.xlu1 %1271  ;;  %v10404_v46 = vpop.permute.xlu0 %1266  ;;  %v10451_v56 = vmul.f32 0.5, %v2270_v47 }
 0x1b9   : > { %13853 = vst [vmem:[#allocation183_spill] sm:$0xff] %v10400_v35  ;;  %13854 = vst [vmem:[#allocation184_spill] sm:$0xff] %v10404_v46  ;;  %v10406_v49 = vpop.f32.mrb[55].mxu0  ;;  %v10410_v4 = vpop.f32.mrb[55].mxu1  ;;  %v10423_v35 = vmul.f32 0.5, %v2257_v60  ;;  %8000 = vtanh.f32 %v10412_v59  ;;  %v2273_v60 = vadd.f32 %v9871_v0, %v9492_v55 }
 0x1ba   : > { %13855 = vst [vmem:[#allocation185_spill] sm:$0xff] %v10410_v4 }
 0x1bb   : > { %8002 = vtanh.f32 %v10423_v35  ;;  %v10460_v0 = vmul.f32 0.5, %v2273_v60 }
 0x1bc   : > { %v10416_v45 = vpop.permute.xlu1 %1281  ;;  %v10419_v53 = vpop.permute.xlu0 %1276  ;;  %8004 = vtanh.f32 %v10436_v51 }
 0x1bd   : > { %13856 = vst [vmem:[#allocation186_spill] sm:$0xff] %v10416_v45  ;;  %13857 = vst [vmem:[#allocation187_spill] sm:$0xff] %v10419_v53  ;;  %v10421_v19 = vpop.f32.mrb[56].mxu0  ;;  %v10427_v52 = vpop.f32.mrb[56].mxu1  ;;  %8006 = vtanh.f32 %v10451_v56 }
 0x1be   : > { %13858 = vst [vmem:[#allocation188_spill] sm:$0xff] %v10427_v52  ;;  %v10429_v20 = vpop.f32.mrb[57].mxu0  ;;  %v10431_v4 = vpop.f32.mrb[57].mxu1  ;;  %8008 = vtanh.f32 %v10460_v0 }
 0x1bf   : > { %13859 = vst [vmem:[#allocation189_spill] sm:$0xff] %v10431_v4  ;;  %v10433_v30 = vpop.f32.mrb[58].mxu0  ;;  %v10438_v45 = vpop.f32.mrb[58].mxu1  ;;  %v2278_v4 = vadd.f32 %v9843_v16, %v9511_v62  ;;  %v2286_v16 = vadd.f32 %v9893_v63, %v9524_v2  ;;  %v2289_v63 = vadd.f32 %v9917_v6, %v9522_v1  ;;  %v2297_v6 = vadd.f32 %v9906_v14, %v9539_v7 }
 0x1c0   : > { %13860 = vst [vmem:[#allocation190_spill] sm:$0xff] %v10438_v45  ;;  %v10440_v53 = vpop.permute.xlu1 %1291  ;;  %v10444_v34 = vpop.permute.xlu0 %1286  ;;  %v2281_v45 = vadd.f32 %v9860_v54, %v9509_v61 }
 0x1c1   : > { %13861 = vst [vmem:[#allocation191_spill] sm:$0xff] %v10440_v53  ;;  %13862 = vst [vmem:[#allocation192_spill] sm:$0xff] %v10444_v34  ;;  %v10446_v52 = vpop.f32.mrb[59].mxu0  ;;  %v10453_v13 = vpop.f32.mrb[59].mxu1  ;;  %v10466_v46 = vmul.f32 0.5, %v2278_v4 }
 0x1c2   : > { %13863 = vst [vmem:[#allocation193_spill] sm:$0xff] %v10453_v13  ;;  %v7999_v54 = vpop.eup %7998  ;;  %v10479_v62 = vmul.f32 0.5, %v2281_v45  ;;  %v2294_v45 = vadd.f32 %v9889_v24, %v9541_v8 }
 0x1c3   : > { %8010 = vtanh.f32 %v10466_v46 }
 0x1c4   : > { %v10458_v53 = vpop.permute.xlu1 %1301  ;;  %v10462_v55 = vpop.permute.xlu0 %1296  ;;  %8012 = vtanh.f32 %v10479_v62  ;;  %v10511_v8 = vmul.f32 0.5, %v2294_v45 }
 0x1c5   : > { %13864 = vst [vmem:[#allocation194_spill] sm:$0xff] %v10458_v53  ;;  %13865 = vst [vmem:[#allocation195_spill] sm:$0xff] %v10462_v55  ;;  %v10464_v34 = vpop.f32.mrb[60].mxu0  ;;  %v10471_v47 = vpop.f32.mrb[60].mxu1 }
 0x1c6   : > { %13866 = vst [vmem:[#allocation196_spill] sm:$0xff] %v10464_v34  ;;  %13867 = vst [vmem:[#allocation197_spill] sm:$0xff] %v10471_v47  ;;  %v10473_v13 = vpop.f32.mrb[61].mxu0  ;;  %v10475_v61 = vpop.f32.mrb[61].mxu1  ;;  %v3212_v34 = vadd.f32 1.0, %v7999_v54 }
 0x1c7   : > { %13868 = vst [vmem:[#allocation198_spill] sm:$0xff] %v10475_v61  ;;  %v10477_v60 = vpop.f32.mrb[62].mxu0  ;;  %v10481_v53 = vpop.f32.mrb[62].mxu1  ;;  %v10495_v61 = vmul.f32 0.5, %v2286_v16 }
 0x1c8   : > { %13869 = vst [vmem:[#allocation199_spill] sm:$0xff] %v10477_v60  ;;  %13870 = vst [vmem:[#allocation200_spill] sm:$0xff] %v10481_v53  ;;  %v10483_v4 = vpop.permute.xlu1 %1311  ;;  %v10488_v2 = vpop.permute.xlu0 %1306  ;;  %v10504_v60 = vmul.f32 0.5, %v2289_v63  ;;  %v3372_v16 = vmul.f32 %v3212_v34, %v10402_v15 }
 0x1c9   : > { %13871 = vst [vmem:[#allocation201_spill] sm:$0xff] %v10483_v4  ;;  %13872 = vst [vmem:[#allocation202_spill] sm:$0xff] %v10488_v2  ;;  %v10490_v47 = vpop.f32.mrb[63].mxu0  ;;  %v8001_v55 = vpop.eup %8000  ;;  %8014 = vtanh.f32 %v10495_v61 }
 0x1ca   : > { %13873 = vst [vmem:[#allocation203_spill] sm:$0xff] %v10490_v47  ;;  %v10497_v53 = vpop.f32.mrb[63].mxu1  ;;  %v8003_v4 = vpop.eup %8002  ;;  %v3214_v2 = vadd.f32 1.0, %v8001_v55  ;;  %8016 = vtanh.f32 %v10504_v60 }
 0x1cb   : > { %13874 = vst [vmem:[#allocation204_spill] sm:$0xff] %v10497_v53  ;;  %v8005_v24 = vpop.eup %8004  ;;  %v2302_v53 = vadd.f32 %v9939_v5, %v9554_v12  ;;  %v3213_v55 = vadd.f32 1.0, %v8003_v4  ;;  %v2305_v5 = vadd.f32 %v9963_v44, %v9552_v11  ;;  %8018 = vtanh.f32 %v10511_v8 }
 0x1cc   : > { %v10502_v1 = vpop.permute.xlu1 %1321  ;;  %v10506_v54 = vpop.permute.xlu0 %1316  ;;  %v3215_v45 = vadd.f32 1.0, %v8005_v24  ;;  %v2313_v11 = vadd.f32 %v9952_v48, %v9569_v17  ;;  %v2318_v48 = vadd.f32 %v9985_v43, %v9584_v22 }
 0x1cd   : > { %13875 = vst [vmem:[#allocation205_spill] sm:$0xff] %v10502_v1  ;;  %13876 = vst [vmem:[#allocation206_spill] sm:$0xff] %v10506_v54  ;;  %v10508_v47 = vpop.f32.mrb[64].mxu0  ;;  %v10516_v14 = vpop.f32.mrb[64].mxu1  ;;  %v3373_v12 = vmul.f32 %v3213_v55, %v10423_v35 }
 0x1ce   : > { %13877 = vst [vmem:[#allocation207_spill] sm:$0xff] %v10508_v47  ;;  %13878 = vst [vmem:[#allocation208_spill] sm:$0xff] %v10516_v14  ;;  %v10518_v7 = vpop.f32.mrb[65].mxu0  ;;  %v10520_v63 = vpop.f32.mrb[65].mxu1  ;;  %v10524_v47 = vmul.f32 0.5, %v2297_v6  ;;  %v2310_v6 = vadd.f32 %v9935_v33, %v9571_v18  ;;  %v10552_v33 = vmul.f32 0.5, %v2305_v5 }
 0x1cf   : > { %13879 = vst [vmem:[#allocation209_spill] sm:$0xff] %v10520_v63  ;;  %v10522_v1 = vpop.f32.mrb[66].mxu0  ;;  %v8007_v54 = vpop.eup %8006  ;;  %3692 = vadd.xlane.f32.xlu0 %v3372_v16  ;;  %v3374_v63 = vmul.f32 %v3214_v2, %v10412_v59  ;;  %v3375_v59 = vmul.f32 %v3215_v45, %v10436_v51 }
 0x1d0   : > { %v10526_v15 = vpop.f32.mrb[66].mxu1  ;;  %v10528_v34 = vpop.permute.xlu1 %1331  ;;  %8020 = vtanh.f32 %v10524_v47  ;;  %v10558_v55 = vmul.f32 0.5, %v2310_v6 }
 0x1d1   : > { %13880 = vst [vmem:[#allocation210_spill] sm:$0xff] %v10526_v15  ;;  %13881 = vst [vmem:[#allocation211_spill] sm:$0xff] %v10528_v34  ;;  %v10533_v14 = vpop.permute.xlu0 %1326  ;;  %v10535_v4 = vpop.f32.mrb[67].mxu0  ;;  %v10541_v15 = vmul.f32 0.5, %v2302_v53  ;;  %v3216_v34 = vadd.f32 1.0, %v8007_v54 }
 0x1d2   : > { %13882 = vst [vmem:[#allocation212_spill] sm:$0xff] %v10533_v14  ;;  %v10543_v16 = vpop.f32.mrb[67].mxu1  ;;  %v8009_v24 = vpop.eup %8008 }
 0x1d3   : > { %13883 = vst [vmem:[#allocation213_spill] sm:$0xff] %v10543_v16  ;;  %v8011_v44 = vpop.eup %8010  ;;  %3696 = vadd.xlane.f32.xlu0 %v3374_v63  ;;  %v3217_v54 = vadd.f32 1.0, %v8009_v24  ;;  %8022 = vtanh.f32 %v10541_v15  ;;  %v3376_v45 = vmul.f32 %v3216_v34, %v10451_v56  ;;  %v10572_v24 = vmul.f32 0.5, %v2313_v11 }
 0x1d4   : > { %v10549_v2 = vpop.permute.xlu1 %1341  ;;  %3694 = vadd.xlane.f32.xlu1 %v3373_v12  ;;  %v8013_v35 = vpop.eup %8012  ;;  %v3218_v51 = vadd.f32 1.0, %v8011_v44  ;;  %8024 = vtanh.f32 %v10552_v33  ;;  %v2321_v44 = vadd.f32 %v10009_v26, %v9582_v21  ;;  %v2326_v11 = vadd.f32 %v9981_v23, %v9601_v28 }
 0x1d5   : > { %13884 = vst [vmem:[#allocation214_spill] sm:$0xff] %v10549_v2  ;;  %v10554_v53 = vpop.permute.xlu0 %1336  ;;  %v10556_v16 = vpop.f32.mrb[68].mxu0  ;;  %v3219_v43 = vadd.f32 1.0, %v8013_v35  ;;  %v3377_v34 = vmul.f32 %v3217_v54, %v10460_v0  ;;  %8026 = vtanh.f32 %v10558_v55 }
 0x1d6   : > { %13885 = vst [vmem:[#allocation215_spill] sm:$0xff] %v10554_v53  ;;  %v10563_v17 = vpop.f32.mrb[68].mxu1  ;;  %v10565_v63 = vpop.f32.mrb[69].mxu0  ;;  %8028 = vtanh.f32 %v10572_v24  ;;  %v10600_v23 = vmul.f32 0.5, %v2321_v44 }
 0x1d7   : > { %13886 = vst [vmem:[#allocation216_spill] sm:$0xff] %v10563_v17  ;;  %v10568_v5 = vpop.f32.mrb[69].mxu1  ;;  %v10570_v18 = vpop.f32.mrb[70].mxu0  ;;  %3698 = vadd.xlane.f32.xlu0 %v3375_v59  ;;  %v3379_v54 = vmul.f32 %v3219_v43, %v10479_v62 }
 0x1d8   : > { %13887 = vst [vmem:[#allocation217_spill] sm:$0xff] %v10568_v5  ;;  %v8015_v12 = vpop.eup %8014  ;;  %v10574_v6 = vpop.f32.mrb[70].mxu1  ;;  %3700 = vadd.xlane.f32.xlu1 %v3376_v45  ;;  %v3378_v5 = vmul.f32 %v3218_v51, %v10466_v46  ;;  %v2329_v45 = vadd.f32 %v9998_v29, %v9599_v27  ;;  %v2334_v29 = vadd.f32 %v10031_v25, %v9614_v32 }
 0x1d9   : > { %13888 = vst [vmem:[#allocation218_spill] sm:$0xff] %v10574_v6  ;;  %v10576_v2 = vpop.permute.xlu1 %1351  ;;  %v10581_v17 = vpop.permute.xlu0 %1346  ;;  %v10589_v6 = vmul.f32 0.5, %v2318_v48  ;;  %v3220_v26 = vadd.f32 1.0, %v8015_v12  ;;  %v10606_v12 = vmul.f32 0.5, %v2326_v11 }
 0x1da   : > { %13889 = vst [vmem:[#allocation219_spill] sm:$0xff] %v10576_v2  ;;  %13890 = vst [vmem:[#allocation220_spill] sm:$0xff] %v10581_v17  ;;  %v10583_v56 = vpop.f32.mrb[71].mxu0  ;;  %v10591_v59 = vpop.f32.mrb[71].mxu1 }
 0x1db   : > { %13891 = vst [vmem:[#allocation221_spill] sm:$0xff] %v10591_v59  ;;  %v8017_v35 = vpop.eup %8016  ;;  %3702 = vadd.xlane.f32.xlu0 %v3377_v34  ;;  %8030 = vtanh.f32 %v10589_v6  ;;  %v3380_v43 = vmul.f32 %v3220_v26, %v10495_v61 }
 0x1dc   : > { %v8019_v21 = vpop.eup %8018  ;;  %3704 = vadd.xlane.f32.xlu1 %v3378_v5  ;;  %v3221_v51 = vadd.f32 1.0, %v8017_v35  ;;  %v10620_v35 = vmul.f32 0.5, %v2329_v45  ;;  %8032 = vtanh.f32 %v10600_v23  ;;  %v2342_v45 = vadd.f32 %v10027_v39, %v9631_v38 }
 0x1dd   : > { %v10597_v0 = vpop.permute.xlu1 %1361  ;;  %v10602_v48 = vpop.permute.xlu0 %1356  ;;  %v3222_v62 = vadd.f32 1.0, %v8019_v21  ;;  %v2337_v21 = vadd.f32 %v10055_v10, %v9612_v31  ;;  %8034 = vtanh.f32 %v10606_v12 }
 0x1de   : > { %13892 = vst [vmem:[#allocation222_spill] sm:$0xff] %v10597_v0  ;;  %13893 = vst [vmem:[#allocation223_spill] sm:$0xff] %v10602_v48  ;;  %v10604_v59 = vpop.f32.mrb[72].mxu0  ;;  %v8021_v46 = vpop.eup %8020  ;;  %v3381_v26 = vmul.f32 %v3221_v51, %v10504_v60  ;;  %8036 = vtanh.f32 %v10620_v35 }
 0x1df   : > { %v10611_v27 = vpop.f32.mrb[72].mxu1  ;;  %v10613_v34 = vpop.f32.mrb[73].mxu0  ;;  %3706 = vadd.xlane.f32.xlu0 %v3379_v54  ;;  %v3223_v25 = vadd.f32 1.0, %v8021_v46  ;;  %v10648_v39 = vmul.f32 0.5, %v2337_v21 }
 0x1e0   : > { %13894 = vst [vmem:[#allocation224_spill] sm:$0xff] %v10611_v27  ;;  %v10616_v44 = vpop.f32.mrb[73].mxu1  ;;  %v10618_v28 = vpop.f32.mrb[74].mxu0  ;;  %3708 = vadd.xlane.f32.xlu1 %v3380_v43  ;;  %v2345_v43 = vadd.f32 %v10044_v40, %v9629_v37  ;;  %v2350_v40 = vadd.f32 %v10077_v9, %v9644_v42 }
 0x1e1   : > { %13895 = vst [vmem:[#allocation225_spill] sm:$0xff] %v10616_v44  ;;  %v8023_v5 = vpop.eup %8022  ;;  %v10622_v11 = vpop.f32.mrb[74].mxu1  ;;  %v3382_v44 = vmul.f32 %v3222_v62, %v10511_v8  ;;  %v3383_v51 = vmul.f32 %v3223_v25, %v10524_v47 }
 0x1e2   : > { %13896 = vst [vmem:[#allocation226_spill] sm:$0xff] %v10622_v11  ;;  %v10624_v22 = vpop.permute.xlu1 %1371  ;;  %v10629_v27 = vpop.permute.xlu0 %1366  ;;  %v10637_v11 = vmul.f32 0.5, %v2334_v29  ;;  %v3224_v10 = vadd.f32 1.0, %v8023_v5  ;;  %v10654_v5 = vmul.f32 0.5, %v2342_v45 }
 0x1e3   : > { %13897 = vst [vmem:[#allocation227_spill] sm:$0xff] %v10624_v22  ;;  %13898 = vst [vmem:[#allocation228_spill] sm:$0xff] %v10629_v27  ;;  %v10631_v61 = vpop.f32.mrb[75].mxu0  ;;  %v10639_v54 = vpop.f32.mrb[75].mxu1  ;;  %3710 = vadd.xlane.f32.xlu0 %v3381_v26 }
 0x1e4   : > { %13899 = vst [vmem:[#allocation229_spill] sm:$0xff] %v10639_v54  ;;  %v8025_v46 = vpop.eup %8024  ;;  %3712 = vadd.xlane.f32.xlu1 %v3382_v44  ;;  %8038 = vtanh.f32 %v10637_v11  ;;  %v3384_v25 = vmul.f32 %v3224_v10, %v10541_v15 }
 0x1e5   : > { %v8027_v31 = vpop.eup %8026  ;;  %v10652_v54 = vpop.f32.mrb[76].mxu0  ;;  %v3225_v62 = vadd.f32 1.0, %v8025_v46  ;;  %v10668_v46 = vmul.f32 0.5, %v2345_v43  ;;  %8040 = vtanh.f32 %v10648_v39  ;;  %v13907_v43 = vld [vmem:[#allocation98_spill] sm:$0xff] }
 0x1e6   : > { %v10645_v60 = vpop.permute.xlu1 %1381  ;;  %v10650_v29 = vpop.permute.xlu0 %1376  ;;  %v3226_v47 = vadd.f32 1.0, %v8027_v31  ;;  %v2353_v31 = vadd.f32 %v10101_v58, %v9642_v41  ;;  %8042 = vtanh.f32 %v10654_v5 }
 0x1e7   : > { %13900 = vst [vmem:[#allocation230_spill] sm:$0xff] %v10645_v60  ;;  %13901 = vst [vmem:[#allocation231_spill] sm:$0xff] %v10650_v29  ;;  %v8029_v8 = vpop.eup %8028  ;;  %v10659_v37 = vpop.f32.mrb[76].mxu1  ;;  %3714 = vadd.xlane.f32.xlu0 %v3383_v51  ;;  %v3385_v10 = vmul.f32 %v3225_v62, %v10552_v33  ;;  %8044 = vtanh.f32 %v10668_v46  ;;  %v13909_v60 = vld [vmem:[#allocation30_spill] sm:$0xff] }
 0x1e8   : > { %13902 = vst [vmem:[#allocation232_spill] sm:$0xff] %v10659_v37  ;;  %v10661_v26 = vpop.f32.mrb[77].mxu0  ;;  %v10664_v21 = vpop.f32.mrb[77].mxu1  ;;  %v3227_v9 = vadd.f32 1.0, %v8029_v8  ;;  %3716 = vadd.xlane.f32.xlu1 %v3384_v25  ;;  %v3386_v42 = vmul.f32 %v3226_v47, %v10558_v55  ;;  %v13910_v25 = vld [vmem:[#allocation101_spill] sm:$0xff] }
 0x1e9   : > { %13903 = vst [vmem:[#allocation233_spill] sm:$0xff] %v10664_v21  ;;  %v10666_v38 = vpop.f32.mrb[78].mxu0  ;;  %v8031_v44 = vpop.eup %8030  ;;  %v10685_v21 = vmul.f32 0.5, %v2350_v40 }
 0x1ea   : > { %v10670_v45 = vpop.f32.mrb[78].mxu1  ;;  %v10672_v32 = vpop.permute.xlu1 %1391  ;;  %v3228_v58 = vadd.f32 1.0, %v8031_v44  ;;  %v3387_v62 = vmul.f32 %v3227_v9, %v10572_v24 }
 0x1eb   : > { %13904 = vst [vmem:[#allocation234_spill] sm:$0xff] %v10670_v45  ;;  %13905 = vst [vmem:[#allocation235_spill] sm:$0xff] %v10672_v32  ;;  %v10677_v37 = vpop.permute.xlu0 %1386  ;;  %v10679_v15 = vpop.f32.mrb[79].mxu0  ;;  %v2358_v45 = vadd.f32 %v13907_v43, %v9661_v50  ;;  %v2361_v32 = vadd.f32 %v13910_v25, %v13909_v60  ;;  %3718 = vadd.xlane.f32.xlu0 %v3385_v10  ;;  %v10696_v43 = vmul.f32 0.5, %v2353_v31  ;;  %8046 = vtanh.f32 %v10685_v21  ;;  %v13913_v50 = vld [vmem:[#allocation33_spill] sm:$0xff]  ;;  %v13914_v25 = vld [vmem:[#allocation110_spill] sm:$0xff] }
 0x1ec   : > { %13906 = vst [vmem:[#allocation236_spill] sm:$0xff] %v10677_v37  ;;  %v10687_v51 = vpop.f32.mrb[79].mxu1  ;;  %v8033_v8 = vpop.eup %8032  ;;  %3720 = vadd.xlane.f32.xlu1 %v3386_v42  ;;  %v2366_v60 = vadd.f32 %v13914_v25, %v13913_v50  ;;  %v3388_v9 = vmul.f32 %v3228_v58, %v10589_v6  ;;  %v13920_v50 = vld [vmem:[#allocation116_spill] sm:$0xff] }
 0x1ed   : > { %13908 = vst [vmem:[#allocation98_spill] sm:$0xff] %v10687_v51  ;;  %v8035_v41 = vpop.eup %8034  ;;  %v10700_v51 = vpop.f32.mrb[80].mxu0  ;;  %v3229_v47 = vadd.f32 1.0, %v8033_v8  ;;  %v10702_v44 = vmul.f32 0.5, %v2358_v45  ;;  %v10716_v8 = vmul.f32 0.5, %v2361_v32  ;;  %8048 = vtanh.f32 %v10696_v43  ;;  %v13922_v32 = vld [vmem:[#allocation35_spill] sm:$0xff] }
 0x1ee   : > { %v10693_v33 = vpop.permute.xlu1 %1401  ;;  %v8037_v55 = vpop.eup %8036  ;;  %v3230_v24 = vadd.f32 1.0, %v8035_v41 }
 0x1ef   : > { %13911 = vst [vmem:[#allocation101_spill] sm:$0xff] %v10693_v33  ;;  %v10698_v40 = vpop.permute.xlu0 %1396  ;;  %v10707_v33 = vpop.f32.mrb[80].mxu1  ;;  %3722 = vadd.xlane.f32.xlu0 %v3387_v62  ;;  %v3231_v25 = vadd.f32 1.0, %v8037_v55  ;;  %v3389_v58 = vmul.f32 %v3229_v47, %v10600_v23  ;;  %8050 = vtanh.f32 %v10702_v44 }
 0x1f0   : > { %13912 = vst [vmem:[#allocation237_spill] sm:$0xff] %v10698_v40  ;;  %13915 = vst [vmem:[#allocation110_spill] sm:$0xff] %v10707_v33  ;;  %v10709_v10 = vpop.f32.mrb[81].mxu0  ;;  %v10712_v31 = vpop.f32.mrb[81].mxu1  ;;  %v13919_v33 = vld [vmem:[#allocation32_spill] sm:$0xff]  ;;  %3724 = vadd.xlane.f32.xlu1 %v3388_v9  ;;  %v3390_v22 = vmul.f32 %v3230_v24, %v10606_v12  ;;  %8052 = vtanh.f32 %v10716_v8 }
 0x1f1   : > { %13916 = vst [vmem:[#allocation238_spill] sm:$0xff] %v10712_v31  ;;  %v10714_v40 = vpop.f32.mrb[82].mxu0  ;;  %v8039_v42 = vpop.eup %8038  ;;  %v2369_v41 = vadd.f32 %v13920_v50, %v13919_v33  ;;  %v13926_v9 = vld [vmem:[#allocation112_spill] sm:$0xff]  ;;  %v3391_v47 = vmul.f32 %v3231_v25, %v10620_v35 }
 0x1f2   : > { %v10718_v45 = vpop.f32.mrb[82].mxu1  ;;  %v10720_v29 = vpop.permute.xlu1 %1411  ;;  %v3232_v50 = vadd.f32 1.0, %v8039_v42 }
 0x1f3   : > { %13917 = vst [vmem:[#allocation239_spill] sm:$0xff] %v10718_v45  ;;  %13918 = vst [vmem:[#allocation240_spill] sm:$0xff] %v10720_v29  ;;  %v10725_v37 = vpop.permute.xlu0 %1406  ;;  %v10727_v6 = vpop.f32.mrb[83].mxu0  ;;  %v13923_v45 = vld [vmem:[#allocation108_spill] sm:$0xff]  ;;  %v10733_v29 = vmul.f32 0.5, %v2366_v60  ;;  %3726 = vadd.xlane.f32.xlu0 %v3389_v58 }
 0x1f4   : > { %13921 = vst [vmem:[#allocation116_spill] sm:$0xff] %v10725_v37  ;;  %v2374_v31 = vadd.f32 %v13923_v45, %v13922_v32  ;;  %v10735_v62 = vpop.f32.mrb[83].mxu1  ;;  %v8041_v55 = vpop.eup %8040  ;;  %v13925_v37 = vld [vmem:[#allocation34_spill] sm:$0xff]  ;;  %v10744_v45 = vmul.f32 0.5, %v2369_v41  ;;  %3728 = vadd.xlane.f32.xlu1 %v3390_v22  ;;  %v13929_v32 = vld [vmem:[#allocation37_spill] sm:$0xff]  ;;  %v3392_v25 = vmul.f32 %v3232_v50, %v10637_v11 }
 0x1f5   : > { %13924 = vst [vmem:[#allocation108_spill] sm:$0xff] %v10735_v62  ;;  %v8043_v33 = vpop.eup %8042  ;;  %v2377_v27 = vadd.f32 %v13926_v9, %v13925_v37  ;;  %v10748_v62 = vpop.f32.mrb[84].mxu0  ;;  %v3233_v24 = vadd.f32 1.0, %v8041_v55  ;;  %8054 = vtanh.f32 %v10733_v29  ;;  %v13930_v9 = vld [vmem:[#allocation122_spill] sm:$0xff] }
 0x1f6   : > { %v10741_v23 = vpop.permute.xlu1 %1421  ;;  %v8045_v12 = vpop.eup %8044  ;;  %v10750_v42 = vmul.f32 0.5, %v2374_v31  ;;  %v2382_v37 = vadd.f32 %v13930_v9, %v13929_v32  ;;  %v3234_v35 = vadd.f32 1.0, %v8043_v33  ;;  %8056 = vtanh.f32 %v10744_v45  ;;  %v13936_v32 = vld [vmem:[#allocation128_spill] sm:$0xff] }
 0x1f7   : > { %13927 = vst [vmem:[#allocation112_spill] sm:$0xff] %v10741_v23  ;;  %v10746_v60 = vpop.permute.xlu0 %1416  ;;  %v10755_v23 = vpop.f32.mrb[84].mxu1  ;;  %v10764_v55 = vmul.f32 0.5, %v2377_v27  ;;  %3730 = vadd.xlane.f32.xlu0 %v3391_v47  ;;  %v3235_v9 = vadd.f32 1.0, %v8045_v12  ;;  %v3393_v50 = vmul.f32 %v3233_v24, %v10648_v39  ;;  %v13938_v27 = vld [vmem:[#allocation39_spill] sm:$0xff] }
 0x1f8   : > { %13928 = vst [vmem:[#allocation241_spill] sm:$0xff] %v10746_v60  ;;  %13931 = vst [vmem:[#allocation122_spill] sm:$0xff] %v10755_v23  ;;  %v10757_v58 = vpop.f32.mrb[85].mxu0  ;;  %v10760_v41 = vpop.f32.mrb[85].mxu1  ;;  %v13935_v23 = vld [vmem:[#allocation36_spill] sm:$0xff]  ;;  %3732 = vadd.xlane.f32.xlu1 %v3392_v25  ;;  %8058 = vtanh.f32 %v10750_v42  ;;  %v3394_v2 = vmul.f32 %v3234_v35, %v10654_v5 }
 0x1f9   : > { %13932 = vst [vmem:[#allocation242_spill] sm:$0xff] %v10760_v41  ;;  %v10762_v60 = vpop.f32.mrb[86].mxu0  ;;  %v8047_v22 = vpop.eup %8046  ;;  %v2385_v33 = vadd.f32 %v13936_v32, %v13935_v23  ;;  %8060 = vtanh.f32 %v10764_v55  ;;  %v13942_v25 = vld [vmem:[#allocation124_spill] sm:$0xff]  ;;  %v3395_v24 = vmul.f32 %v3235_v9, %v10668_v46 }
 0x1fa   : > { %v10766_v31 = vpop.f32.mrb[86].mxu1  ;;  %v10768_v0 = vpop.permute.xlu1 %1431  ;;  %v3236_v32 = vadd.f32 1.0, %v8047_v22 }
 0x1fb   : > { %13933 = vst [vmem:[#allocation243_spill] sm:$0xff] %v10766_v31  ;;  %13934 = vst [vmem:[#allocation244_spill] sm:$0xff] %v10768_v0  ;;  %v10773_v48 = vpop.permute.xlu0 %1426  ;;  %v10775_v11 = vpop.f32.mrb[87].mxu0  ;;  %v13939_v31 = vld [vmem:[#allocation120_spill] sm:$0xff]  ;;  %v10781_v0 = vmul.f32 0.5, %v2382_v37  ;;  %3734 = vadd.xlane.f32.xlu0 %v3393_v50 }
 0x1fc   : > { %13937 = vst [vmem:[#allocation128_spill] sm:$0xff] %v10773_v48  ;;  %v2390_v41 = vadd.f32 %v13939_v31, %v13938_v27  ;;  %v10783_v47 = vpop.f32.mrb[87].mxu1  ;;  %v8049_v12 = vpop.eup %8048  ;;  %v13941_v48 = vld [vmem:[#allocation38_spill] sm:$0xff]  ;;  %v10792_v31 = vmul.f32 0.5, %v2385_v33  ;;  %3736 = vadd.xlane.f32.xlu1 %v3394_v2  ;;  %v13946_v27 = vld [vmem:[#allocation41_spill] sm:$0xff]  ;;  %v3396_v9 = vmul.f32 %v3236_v32, %v10685_v21 }
 0x1fd   : > { %13940 = vst [vmem:[#allocation120_spill] sm:$0xff] %v10783_v47  ;;  %v8051_v23 = vpop.eup %8050  ;;  %v2393_v17 = vadd.f32 %v13942_v25, %v13941_v48  ;;  %v10796_v47 = vpop.f32.mrb[88].mxu0  ;;  %v3237_v35 = vadd.f32 1.0, %v8049_v12  ;;  %8062 = vtanh.f32 %v10781_v0  ;;  %v13947_v25 = vld [vmem:[#allocation134_spill] sm:$0xff] }
 0x1fe   : > { %v10789_v39 = vpop.permute.xlu1 %1441  ;;  %13945 = vst [vmem:[#allocation246_spill] sm:$0xff] %v10796_v47  ;;  %v8053_v5 = vpop.eup %8052  ;;  %v10798_v22 = vmul.f32 0.5, %v2390_v41  ;;  %v2398_v48 = vadd.f32 %v13947_v25, %v13946_v27  ;;  %v3238_v46 = vadd.f32 1.0, %v8051_v23  ;;  %8064 = vtanh.f32 %v10792_v31  ;;  %v13954_v27 = vld [vmem:[#allocation140_spill] sm:$0xff] }
 0x1ff   : > { %13943 = vst [vmem:[#allocation124_spill] sm:$0xff] %v10789_v39  ;;  %v10794_v37 = vpop.permute.xlu0 %1436  ;;  %v10803_v39 = vpop.f32.mrb[88].mxu1  ;;  %v10812_v12 = vmul.f32 0.5, %v2393_v17  ;;  %3738 = vadd.xlane.f32.xlu0 %v3395_v24  ;;  %v3239_v25 = vadd.f32 1.0, %v8053_v5  ;;  %v3397_v32 = vmul.f32 %v3237_v35, %v10696_v43  ;;  %v13957_v17 = vld [vmem:[#allocation43_spill] sm:$0xff] }
 0x200   : > { %13944 = vst [vmem:[#allocation245_spill] sm:$0xff] %v10794_v37  ;;  %13948 = vst [vmem:[#allocation134_spill] sm:$0xff] %v10803_v39  ;;  %v10805_v50 = vpop.f32.mrb[89].mxu0  ;;  %v10808_v33 = vpop.f32.mrb[89].mxu1  ;;  %v13953_v39 = vld [vmem:[#allocation40_spill] sm:$0xff]  ;;  %3740 = vadd.xlane.f32.xlu1 %v3396_v9  ;;  %8066 = vtanh.f32 %v10798_v22 }
 0x201   : > { %13949 = vst [vmem:[#allocation247_spill] sm:$0xff] %v10808_v33  ;;  %v10810_v37 = vpop.f32.mrb[90].mxu0  ;;  %v8055_v2 = vpop.eup %8054  ;;  %v2401_v23 = vadd.f32 %v13954_v27, %v13953_v39  ;;  %8068 = vtanh.f32 %v10812_v12  ;;  %v13961_v9 = vld [vmem:[#allocation136_spill] sm:$0xff]  ;;  %v3399_v35 = vmul.f32 %v3239_v25, %v10716_v8 }
 0x202   : > { %13950 = vst [vmem:[#allocation248_spill] sm:$0xff] %v10810_v37  ;;  %v10814_v41 = vpop.f32.mrb[90].mxu1  ;;  %v10816_v53 = vpop.permute.xlu1 %1451  ;;  %v3398_v37 = vmul.f32 %v3238_v46, %v10702_v44  ;;  %v3240_v27 = vadd.f32 1.0, %v8055_v2 }
 0x203   : > { %13951 = vst [vmem:[#allocation249_spill] sm:$0xff] %v10814_v41  ;;  %13952 = vst [vmem:[#allocation250_spill] sm:$0xff] %v10816_v53  ;;  %v10821_v14 = vpop.permute.xlu0 %1446  ;;  %v10823_v21 = vpop.f32.mrb[91].mxu0  ;;  %v13958_v41 = vld [vmem:[#allocation132_spill] sm:$0xff]  ;;  %v10829_v53 = vmul.f32 0.5, %v2398_v48  ;;  %3742 = vadd.xlane.f32.xlu0 %v3397_v32 }
 0x204   : > { %13955 = vst [vmem:[#allocation140_spill] sm:$0xff] %v10821_v14  ;;  %13956 = vst [vmem:[#allocation251_spill] sm:$0xff] %v10823_v21  ;;  %v2406_v33 = vadd.f32 %v13958_v41, %v13957_v17  ;;  %v10831_v24 = vpop.f32.mrb[91].mxu1  ;;  %v8057_v5 = vpop.eup %8056  ;;  %v13960_v14 = vld [vmem:[#allocation42_spill] sm:$0xff]  ;;  %v10840_v41 = vmul.f32 0.5, %v2401_v23  ;;  %3744 = vadd.xlane.f32.xlu1 %v3398_v37  ;;  %v13965_v17 = vld [vmem:[#allocation45_spill] sm:$0xff]  ;;  %v3400_v25 = vmul.f32 %v3240_v27, %v10733_v29 }
 0x205   : > { %13959 = vst [vmem:[#allocation132_spill] sm:$0xff] %v10831_v24  ;;  %v8059_v39 = vpop.eup %8058  ;;  %v2409_v47 = vadd.f32 %v13961_v9, %v13960_v14  ;;  %v10844_v24 = vpop.f32.mrb[92].mxu0  ;;  %v3241_v46 = vadd.f32 1.0, %v8057_v5  ;;  %8070 = vtanh.f32 %v10829_v53  ;;  %v13966_v9 = vld [vmem:[#allocation146_spill] sm:$0xff]  ;;  %v13976_v27 = vld [vmem:[#allocation144_spill] sm:$0xff] }
 0x206   : > { %v10837_v43 = vpop.permute.xlu1 %1461  ;;  %13964 = vst [vmem:[#allocation253_spill] sm:$0xff] %v10844_v24  ;;  %v8061_v44 = vpop.eup %8060  ;;  %v10846_v2 = vmul.f32 0.5, %v2406_v33  ;;  %v2414_v14 = vadd.f32 %v13966_v9, %v13965_v17  ;;  %v3242_v8 = vadd.f32 1.0, %v8059_v39  ;;  %8072 = vtanh.f32 %v10840_v41  ;;  %v13972_v9 = vld [vmem:[#allocation44_spill] sm:$0xff]  ;;  %v13975_v39 = vld [vmem:[#allocation47_spill] sm:$0xff] }
 0x207   : > { %13962 = vst [vmem:[#allocation136_spill] sm:$0xff] %v10837_v43  ;;  %v10842_v48 = vpop.permute.xlu0 %1456  ;;  %v10851_v43 = vpop.f32.mrb[92].mxu1  ;;  %v10860_v5 = vmul.f32 0.5, %v2409_v47  ;;  %3746 = vadd.xlane.f32.xlu0 %v3399_v35  ;;  %v3243_v24 = vadd.f32 1.0, %v8061_v44  ;;  %v3401_v29 = vmul.f32 %v3241_v46, %v10744_v45  ;;  %v2422_v47 = vadd.f32 %v13976_v27, %v13975_v39  ;;  %v13983_v39 = vld [vmem:[#allocation49_spill] sm:$0xff] }
 0x208   : > { %13963 = vst [vmem:[#allocation252_spill] sm:$0xff] %v10842_v48  ;;  %13967 = vst [vmem:[#allocation146_spill] sm:$0xff] %v10851_v43  ;;  %v10853_v32 = vpop.f32.mrb[93].mxu0  ;;  %v10856_v23 = vpop.f32.mrb[93].mxu1  ;;  %v13973_v43 = vld [vmem:[#allocation152_spill] sm:$0xff]  ;;  %3748 = vadd.xlane.f32.xlu1 %v3400_v25  ;;  %8074 = vtanh.f32 %v10846_v2  ;;  %v3402_v44 = vmul.f32 %v3242_v8, %v10750_v42 }
 0x209   : > { %13968 = vst [vmem:[#allocation254_spill] sm:$0xff] %v10853_v32  ;;  %13969 = vst [vmem:[#allocation255_spill] sm:$0xff] %v10856_v23  ;;  %v10858_v48 = vpop.f32.mrb[94].mxu0  ;;  %v8063_v37 = vpop.eup %8062  ;;  %v2417_v17 = vadd.f32 %v13973_v43, %v13972_v9  ;;  %v10873_v23 = vmul.f32 0.5, %v2414_v14  ;;  %8076 = vtanh.f32 %v10860_v5  ;;  %v13978_v43 = vld [vmem:[#allocation46_spill] sm:$0xff]  ;;  %v13979_v25 = vld [vmem:[#allocation148_spill] sm:$0xff]  ;;  %v3403_v46 = vmul.f32 %v3243_v24, %v10764_v55 }
 0x20a   : > { %13970 = vst [vmem:[#allocation256_spill] sm:$0xff] %v10858_v48  ;;  %v10862_v33 = vpop.f32.mrb[94].mxu1  ;;  %v10867_v32 = vpop.f32.mrb[95].mxu0  ;;  %v3244_v48 = vadd.f32 1.0, %v8063_v37  ;;  %v2425_v9 = vadd.f32 %v13979_v25, %v13978_v43  ;;  %v10890_v37 = vmul.f32 0.5, %v2422_v47  ;;  %v13984_v25 = vld [vmem:[#allocation158_spill] sm:$0xff] }
 0x20b   : > { %13971 = vst [vmem:[#allocation257_spill] sm:$0xff] %v10862_v33  ;;  %13974 = vst [vmem:[#allocation152_spill] sm:$0xff] %v10867_v32  ;;  %v10875_v33 = vpop.f32.mrb[95].mxu1  ;;  %v8065_v35 = vpop.eup %8064  ;;  %3750 = vadd.xlane.f32.xlu0 %v3401_v29  ;;  %v10884_v27 = vmul.f32 0.5, %v2417_v17  ;;  %8078 = vtanh.f32 %v10873_v23  ;;  %v2430_v43 = vadd.f32 %v13984_v25, %v13983_v39  ;;  %v13990_v25 = vld [vmem:[#allocation48_spill] sm:$0xff] }
 0x20c   : > { %13977 = vst [vmem:[#allocation144_spill] sm:$0xff] %v10875_v33  ;;  %v8067_v21 = vpop.eup %8066  ;;  %v10881_v45 = vpop.permute.xlu1 %1471  ;;  %3752 = vadd.xlane.f32.xlu1 %v3402_v44  ;;  %v3245_v8 = vadd.f32 1.0, %v8065_v35  ;;  %v3404_v17 = vmul.f32 %v3244_v48, %v10781_v0  ;;  %v10904_v35 = vmul.f32 0.5, %v2425_v9  ;;  %v13993_v48 = vld [vmem:[#allocation156_spill] sm:$0xff] }
 0x20d   : > { %13980 = vst [vmem:[#allocation148_spill] sm:$0xff] %v10881_v45  ;;  %v10886_v14 = vpop.permute.xlu0 %1466  ;;  %v10888_v33 = vpop.f32.mrb[96].mxu0  ;;  %v3246_v55 = vadd.f32 1.0, %v8067_v21  ;;  %8080 = vtanh.f32 %v10884_v27  ;;  %v13992_v21 = vld [vmem:[#allocation54_spill] sm:$0xff] }
 0x20e   : > { %13981 = vst [vmem:[#allocation258_spill] sm:$0xff] %v10886_v14  ;;  %13982 = vst [vmem:[#allocation259_spill] sm:$0xff] %v10888_v33  ;;  %v8069_v42 = vpop.eup %8068  ;;  %v10895_v45 = vpop.f32.mrb[96].mxu1  ;;  %v3405_v0 = vmul.f32 %v3245_v8, %v10792_v31  ;;  %8082 = vtanh.f32 %v10890_v37  ;;  %v2438_v9 = vadd.f32 %v13993_v48, %v13992_v21  ;;  %v14000_v21 = vld [vmem:[#allocation57_spill] sm:$0xff] }
 0x20f   : > { %13985 = vst [vmem:[#allocation158_spill] sm:$0xff] %v10895_v45  ;;  %v10897_v29 = vpop.f32.mrb[97].mxu0  ;;  %v10900_v24 = vpop.f32.mrb[97].mxu1  ;;  %3754 = vadd.xlane.f32.xlu0 %v3403_v46  ;;  %v3247_v33 = vadd.f32 1.0, %v8069_v42  ;;  %v13991_v45 = vld [vmem:[#allocation164_spill] sm:$0xff]  ;;  %v3406_v42 = vmul.f32 %v3246_v55, %v10798_v22  ;;  %8084 = vtanh.f32 %v10904_v35 }
 0x210   : > { %13986 = vst [vmem:[#allocation260_spill] sm:$0xff] %v10897_v29  ;;  %13987 = vst [vmem:[#allocation261_spill] sm:$0xff] %v10900_v24  ;;  %v10902_v14 = vpop.f32.mrb[98].mxu0  ;;  %v8071_v44 = vpop.eup %8070  ;;  %v2433_v39 = vadd.f32 %v13991_v45, %v13990_v25  ;;  %3756 = vadd.xlane.f32.xlu1 %v3404_v17  ;;  %v10917_v24 = vmul.f32 0.5, %v2430_v43  ;;  %v13995_v45 = vld [vmem:[#allocation53_spill] sm:$0xff]  ;;  %v13996_v17 = vld [vmem:[#allocation160_spill] sm:$0xff] }
 0x211   : > { %13988 = vst [vmem:[#allocation262_spill] sm:$0xff] %v10902_v14  ;;  %v10906_v47 = vpop.f32.mrb[98].mxu1  ;;  %v10911_v29 = vpop.f32.mrb[99].mxu0  ;;  %v3248_v14 = vadd.f32 1.0, %v8071_v44  ;;  %v2441_v25 = vadd.f32 %v13996_v17, %v13995_v45  ;;  %v3407_v8 = vmul.f32 %v3247_v33, %v10812_v12  ;;  %v10934_v44 = vmul.f32 0.5, %v2438_v9  ;;  %v14001_v17 = vld [vmem:[#allocation170_spill] sm:$0xff] }
 0x212   : > { %13989 = vst [vmem:[#allocation263_spill] sm:$0xff] %v10906_v47  ;;  %v10919_v47 = vpop.f32.mrb[99].mxu1  ;;  %v8073_v46 = vpop.eup %8072  ;;  %v10928_v48 = vmul.f32 0.5, %v2433_v39  ;;  %8086 = vtanh.f32 %v10917_v24  ;;  %v2446_v45 = vadd.f32 %v14001_v17, %v14000_v21  ;;  %v14007_v17 = vld [vmem:[#allocation56_spill] sm:$0xff] }
 0x213   : > { %13994 = vst [vmem:[#allocation164_spill] sm:$0xff] %v10919_v47  ;;  %v8075_v32 = vpop.eup %8074  ;;  %v10925_v31 = vpop.permute.xlu1 %1481  ;;  %3758 = vadd.xlane.f32.xlu0 %v3405_v0  ;;  %v3249_v55 = vadd.f32 1.0, %v8073_v46  ;;  %v3408_v33 = vmul.f32 %v3248_v14, %v10829_v53  ;;  %v10948_v46 = vmul.f32 0.5, %v2441_v25  ;;  %v14009_v14 = vld [vmem:[#allocation168_spill] sm:$0xff] }
 0x214   : > { %13997 = vst [vmem:[#allocation156_spill] sm:$0xff] %v10925_v31  ;;  %v10930_v43 = vpop.permute.xlu0 %1476  ;;  %3760 = vadd.xlane.f32.xlu1 %v3406_v42  ;;  %v8077_v22 = vpop.eup %8076  ;;  %v3250_v12 = vadd.f32 1.0, %v8075_v32  ;;  %8088 = vtanh.f32 %v10928_v48  ;;  %v14008_v32 = vld [vmem:[#allocation62_spill] sm:$0xff] }
 0x215   : > { %13998 = vst [vmem:[#allocation160_spill] sm:$0xff] %v10930_v43  ;;  %v10932_v47 = vpop.f32.mrb[100].mxu0  ;;  %v10939_v31 = vpop.f32.mrb[100].mxu1  ;;  %v3409_v53 = vmul.f32 %v3249_v55, %v10840_v41  ;;  %8090 = vtanh.f32 %v10934_v44  ;;  %v2454_v25 = vadd.f32 %v14009_v14, %v14008_v32  ;;  %v14016_v32 = vld [vmem:[#allocation65_spill] sm:$0xff] }
 0x216   : > { %13999 = vst [vmem:[#allocation264_spill] sm:$0xff] %v10932_v47  ;;  %14002 = vst [vmem:[#allocation170_spill] sm:$0xff] %v10939_v31  ;;  %v10941_v0 = vpop.f32.mrb[101].mxu0  ;;  %v10944_v39 = vpop.f32.mrb[101].mxu1  ;;  %v3251_v47 = vadd.f32 1.0, %v8077_v22  ;;  %v2449_v31 = vadd.f32 %v10374_v57, %v14007_v17  ;;  %v3410_v22 = vmul.f32 %v3250_v12, %v10846_v2  ;;  %8092 = vtanh.f32 %v10948_v46  ;;  %v14011_v57 = vld [vmem:[#allocation61_spill] sm:$0xff] }
 0x217   : > { %14003 = vst [vmem:[#allocation265_spill] sm:$0xff] %v10941_v0  ;;  %14004 = vst [vmem:[#allocation266_spill] sm:$0xff] %v10944_v39  ;;  %v10946_v43 = vpop.f32.mrb[102].mxu0  ;;  %v8079_v42 = vpop.eup %8078  ;;  %3762 = vadd.xlane.f32.xlu0 %v3407_v8  ;;  %v10961_v39 = vmul.f32 0.5, %v2446_v45 }
 0x218   : > { %14005 = vst [vmem:[#allocation267_spill] sm:$0xff] %v10946_v43  ;;  %v10950_v9 = vpop.f32.mrb[102].mxu1  ;;  %v10955_v21 = vpop.f32.mrb[103].mxu0  ;;  %3764 = vadd.xlane.f32.xlu1 %v3408_v33  ;;  %v3252_v43 = vadd.f32 1.0, %v8079_v42  ;;  %v14012_v33 = vld [vmem:[#allocation172_spill] sm:$0xff]  ;;  %v3411_v55 = vmul.f32 %v3251_v47, %v10860_v5  ;;  %v10972_v14 = vmul.f32 0.5, %v2449_v31 }
 0x219   : > { %14006 = vst [vmem:[#allocation268_spill] sm:$0xff] %v10950_v9  ;;  %v10963_v9 = vpop.f32.mrb[103].mxu1  ;;  %v8081_v8 = vpop.eup %8080  ;;  %v2457_v17 = vadd.f32 %v14012_v33, %v14011_v57  ;;  %v10978_v42 = vmul.f32 0.5, %v2454_v25  ;;  %8094 = vtanh.f32 %v10961_v39  ;;  %v2462_v33 = vadd.f32 %v10390_v3, %v14016_v32  ;;  %v14021_v3 = vld [vmem:[#allocation64_spill] sm:$0xff] }
 0x21a   : > { %14010 = vst [vmem:[#allocation168_spill] sm:$0xff] %v10963_v9  ;;  %v8083_v0 = vpop.eup %8082  ;;  %v10969_v41 = vpop.permute.xlu1 %1491  ;;  %v3253_v12 = vadd.f32 1.0, %v8081_v8  ;;  %v3412_v47 = vmul.f32 %v3252_v43, %v10873_v23  ;;  %8096 = vtanh.f32 %v10972_v14  ;;  %v14022_v43 = vld [vmem:[#allocation70_spill] sm:$0xff] }
 0x21b   : > { %14013 = vst [vmem:[#allocation172_spill] sm:$0xff] %v10969_v41  ;;  %3766 = vadd.xlane.f32.xlu0 %v3409_v53  ;;  %v10974_v45 = vpop.permute.xlu0 %1486  ;;  %v8085_v2 = vpop.eup %8084  ;;  %v3254_v5 = vadd.f32 1.0, %v8083_v0  ;;  %v10992_v8 = vmul.f32 0.5, %v2457_v17  ;;  %8098 = vtanh.f32 %v10978_v42  ;;  %v14023_v0 = vld [vmem:[#allocation179_spill] sm:$0xff] }
 0x21c   : > { %14014 = vst [vmem:[#allocation269_spill] sm:$0xff] %v10974_v45  ;;  %3768 = vadd.xlane.f32.xlu1 %v3410_v22  ;;  %v8087_v22 = vpop.eup %8086  ;;  %v3255_v45 = vadd.f32 1.0, %v8085_v2  ;;  %v3413_v23 = vmul.f32 %v3253_v12, %v10884_v27  ;;  %v2470_v17 = vadd.f32 %v14023_v0, %v14022_v43  ;;  %v14028_v43 = vld [vmem:[#allocation73_spill] sm:$0xff] }
 0x21d   : > { %v10976_v9 = vpop.f32.mrb[104].mxu0  ;;  %v10983_v57 = vpop.f32.mrb[104].mxu1  ;;  %v3414_v2 = vmul.f32 %v3254_v5, %v10890_v37  ;;  %8100 = vtanh.f32 %v10992_v8 }
 0x21e   : > { %14015 = vst [vmem:[#allocation270_spill] sm:$0xff] %v10976_v9  ;;  %14017 = vst [vmem:[#allocation271_spill] sm:$0xff] %v10983_v57  ;;  %v10985_v53 = vpop.f32.mrb[105].mxu0  ;;  %v10988_v31 = vpop.f32.mrb[105].mxu1  ;;  %v2465_v57 = vadd.f32 %v10406_v49, %v14021_v3  ;;  %v14025_v49 = vld [vmem:[#allocation69_spill] sm:$0xff]  ;;  %v3415_v12 = vmul.f32 %v3255_v45, %v10904_v35 }
 0x21f   : > { %14018 = vst [vmem:[#allocation272_spill] sm:$0xff] %v10988_v31  ;;  %v10990_v41 = vpop.f32.mrb[106].mxu0  ;;  %v10994_v25 = vpop.f32.mrb[106].mxu1  ;;  %3770 = vadd.xlane.f32.xlu0 %v3411_v55  ;;  %v11005_v31 = vmul.f32 0.5, %v2462_v33 }
 0x220   : > { %14019 = vst [vmem:[#allocation273_spill] sm:$0xff] %v10990_v41  ;;  %14020 = vst [vmem:[#allocation274_spill] sm:$0xff] %v10994_v25  ;;  %v10999_v32 = vpop.f32.mrb[107].mxu0  ;;  %3772 = vadd.xlane.f32.xlu1 %v3412_v47  ;;  %v11007_v25 = vpop.f32.mrb[107].mxu1  ;;  %v3256_v41 = vadd.f32 1.0, %v8087_v22  ;;  %v2473_v47 = vadd.f32 %v10394_v36, %v14025_v49  ;;  %v11016_v0 = vmul.f32 0.5, %v2465_v57  ;;  %v2478_v36 = vadd.f32 %v10429_v20, %v14028_v43 }
 0x221   : > { %14024 = vst [vmem:[#allocation179_spill] sm:$0xff] %v11007_v25  ;;  %v8089_v55 = vpop.eup %8088  ;;  %v11013_v27 = vpop.permute.xlu1 %1501  ;;  %v11022_v22 = vmul.f32 0.5, %v2470_v17  ;;  %8102 = vtanh.f32 %v11005_v31  ;;  %v14032_v20 = vld [vmem:[#allocation72_spill] sm:$0xff] }
 0x222   : > { %v8091_v9 = vpop.eup %8090  ;;  %14026 = vst [vmem:[#allocation275_spill] sm:$0xff] %v11013_v27  ;;  %v11018_v33 = vpop.permute.xlu0 %1496  ;;  %v3257_v5 = vadd.f32 1.0, %v8089_v55  ;;  %v3416_v57 = vmul.f32 %v3256_v41, %v10917_v24  ;;  %v11036_v55 = vmul.f32 0.5, %v2473_v47  ;;  %8104 = vtanh.f32 %v11016_v0 }
 0x223   : > { %3774 = vadd.xlane.f32.xlu0 %v3413_v23  ;;  %14027 = vst [vmem:[#allocation276_spill] sm:$0xff] %v11018_v33  ;;  %v8093_v37 = vpop.eup %8092  ;;  %v3258_v35 = vadd.f32 1.0, %v8091_v9  ;;  %8106 = vtanh.f32 %v11022_v22  ;;  %v14033_v9 = vld [vmem:[#allocation78_spill] sm:$0xff]  ;;  %v11049_v47 = vmul.f32 0.5, %v2478_v36 }
 0x224   : > { %3776 = vadd.xlane.f32.xlu1 %v3414_v2  ;;  %v8095_v2 = vpop.eup %8094  ;;  %v3259_v27 = vadd.f32 1.0, %v8093_v37  ;;  %v3417_v24 = vmul.f32 %v3257_v5, %v10928_v48  ;;  %v2486_v41 = vadd.f32 %v10421_v19, %v14033_v9  ;;  %8108 = vtanh.f32 %v11036_v55  ;;  %v14039_v9 = vld [vmem:[#allocation81_spill] sm:$0xff] }
 0x225   : > { %v11020_v25 = vpop.f32.mrb[108].mxu0  ;;  %v11027_v49 = vpop.f32.mrb[108].mxu1  ;;  %v3418_v37 = vmul.f32 %v3258_v35, %v10934_v44  ;;  %8110 = vtanh.f32 %v11049_v47 }
 0x226   : > { %14029 = vst [vmem:[#allocation277_spill] sm:$0xff] %v11027_v49  ;;  %v11029_v23 = vpop.f32.mrb[109].mxu0  ;;  %v11032_v45 = vpop.f32.mrb[109].mxu1  ;;  %v2481_v49 = vadd.f32 %v10446_v52, %v14032_v20  ;;  %v14035_v52 = vld [vmem:[#allocation77_spill] sm:$0xff]  ;;  %v3419_v5 = vmul.f32 %v3259_v27, %v10948_v46 }
 0x227   : > { %14030 = vst [vmem:[#allocation278_spill] sm:$0xff] %v11032_v45  ;;  %v11034_v3 = vpop.f32.mrb[110].mxu0  ;;  %v11038_v17 = vpop.f32.mrb[110].mxu1  ;;  %3778 = vadd.xlane.f32.xlu0 %v3415_v12  ;;  %v3260_v45 = vadd.f32 1.0, %v8095_v2  ;;  %v11066_v2 = vmul.f32 0.5, %v2486_v41 }
 0x228   : > { %14031 = vst [vmem:[#allocation279_spill] sm:$0xff] %v11038_v17  ;;  %v11043_v43 = vpop.f32.mrb[111].mxu0  ;;  %3780 = vadd.xlane.f32.xlu1 %v3416_v57  ;;  %v11051_v17 = vpop.f32.mrb[111].mxu1  ;;  %v2489_v57 = vadd.f32 %v10433_v30, %v14035_v52  ;;  %v11060_v19 = vmul.f32 0.5, %v2481_v49  ;;  %v2494_v30 = vadd.f32 %v10473_v13, %v14039_v9  ;;  %v14044_v13 = vld [vmem:[#allocation80_spill] sm:$0xff] }
 0x229   : > { %14034 = vst [vmem:[#allocation280_spill] sm:$0xff] %v11051_v17  ;;  %v8097_v12 = vpop.eup %8096  ;;  %v11057_v48 = vpop.permute.xlu1 %1511  ;;  %v3420_v49 = vmul.f32 %v3260_v45, %v10961_v39  ;;  %v14047_v45 = vld [vmem:[#allocation196_spill] sm:$0xff] }
 0x22a   : > { %v8099_v33 = vpop.eup %8098  ;;  %14036 = vst [vmem:[#allocation281_spill] sm:$0xff] %v11057_v48  ;;  %v11062_v36 = vpop.permute.xlu0 %1506  ;;  %v3261_v35 = vadd.f32 1.0, %v8097_v12  ;;  %v11080_v12 = vmul.f32 0.5, %v2489_v57  ;;  %8112 = vtanh.f32 %v11060_v19 }
 0x22b   : > { %3782 = vadd.xlane.f32.xlu0 %v3417_v24  ;;  %14037 = vst [vmem:[#allocation282_spill] sm:$0xff] %v11062_v36  ;;  %v8101_v44 = vpop.eup %8100  ;;  %v3262_v46 = vadd.f32 1.0, %v8099_v33  ;;  %8114 = vtanh.f32 %v11066_v2  ;;  %v14046_v33 = vld [vmem:[#allocation86_spill] sm:$0xff] }
 0x22c   : > { %3784 = vadd.xlane.f32.xlu1 %v3418_v37  ;;  %v8103_v37 = vpop.eup %8102  ;;  %v3263_v48 = vadd.f32 1.0, %v8101_v44  ;;  %v3421_v39 = vmul.f32 %v3261_v35, %v10972_v14  ;;  %v2502_v57 = vadd.f32 %v14047_v45, %v14046_v33  ;;  %8116 = vtanh.f32 %v11080_v12  ;;  %v14054_v33 = vld [vmem:[#allocation89_spill] sm:$0xff] }
 0x22d   : > { %v11064_v17 = vpop.f32.mrb[112].mxu0  ;;  %v11071_v52 = vpop.f32.mrb[112].mxu1  ;;  %v3422_v44 = vmul.f32 %v3262_v46, %v10978_v42 }
 0x22e   : > { %14038 = vst [vmem:[#allocation283_spill] sm:$0xff] %v11064_v17  ;;  %14040 = vst [vmem:[#allocation284_spill] sm:$0xff] %v11071_v52  ;;  %v11073_v24 = vpop.f32.mrb[113].mxu0  ;;  %v11076_v27 = vpop.f32.mrb[113].mxu1  ;;  %v14045_v52 = vld [vmem:[#allocation203_spill] sm:$0xff]  ;;  %v3423_v35 = vmul.f32 %v3263_v48, %v10992_v8 }
 0x22f   : > { %14041 = vst [vmem:[#allocation285_spill] sm:$0xff] %v11076_v27  ;;  %v11078_v20 = vpop.f32.mrb[114].mxu0  ;;  %v11082_v41 = vpop.f32.mrb[114].mxu1  ;;  %3786 = vadd.xlane.f32.xlu0 %v3419_v5  ;;  %v2497_v9 = vadd.f32 %v14045_v52, %v14044_v13  ;;  %v11093_v27 = vmul.f32 0.5, %v2494_v30  ;;  %v14049_v52 = vld [vmem:[#allocation85_spill] sm:$0xff] }
 0x230   : > { %14042 = vst [vmem:[#allocation286_spill] sm:$0xff] %v11078_v20  ;;  %14043 = vst [vmem:[#allocation287_spill] sm:$0xff] %v11082_v41  ;;  %v11087_v36 = vpop.f32.mrb[115].mxu0  ;;  %3788 = vadd.xlane.f32.xlu1 %v3420_v49  ;;  %v11095_v41 = vpop.f32.mrb[115].mxu1  ;;  %v3264_v20 = vadd.f32 1.0, %v8103_v37  ;;  %v14050_v49 = vld [vmem:[#allocation199_spill] sm:$0xff] }
 0x231   : > { %14048 = vst [vmem:[#allocation203_spill] sm:$0xff] %v11095_v41  ;;  %v8105_v5 = vpop.eup %8104  ;;  %v2505_v13 = vadd.f32 %v14050_v49, %v14049_v52  ;;  %v11101_v14 = vpop.permute.xlu1 %1521  ;;  %v11104_v45 = vmul.f32 0.5, %v2497_v9  ;;  %v11110_v37 = vmul.f32 0.5, %v2502_v57  ;;  %8118 = vtanh.f32 %v11093_v27 }
 0x232   : > { %v8107_v17 = vpop.eup %8106  ;;  %14051 = vst [vmem:[#allocation196_spill] sm:$0xff] %v11101_v14  ;;  %v11106_v30 = vpop.permute.xlu0 %1516  ;;  %v3265_v46 = vadd.f32 1.0, %v8105_v5  ;;  %v2510_v49 = vadd.f32 %v10518_v7, %v14054_v33  ;;  %v3424_v9 = vmul.f32 %v3264_v20, %v11005_v31  ;;  %v14061_v20 = vld [vmem:[#allocation94_spill] sm:$0xff] }
 0x233   : > { %3790 = vadd.xlane.f32.xlu0 %v3421_v39  ;;  %14052 = vst [vmem:[#allocation199_spill] sm:$0xff] %v11106_v30  ;;  %v8109_v42 = vpop.eup %8108  ;;  %v3266_v8 = vadd.f32 1.0, %v8107_v17  ;;  %v11124_v5 = vmul.f32 0.5, %v2505_v13  ;;  %8120 = vtanh.f32 %v11104_v45  ;;  %v14062_v13 = vld [vmem:[#allocation207_spill] sm:$0xff] }
 0x234   : > { %3792 = vadd.xlane.f32.xlu1 %v3422_v44  ;;  %v8111_v44 = vpop.eup %8110  ;;  %v3267_v7 = vadd.f32 1.0, %v8109_v42  ;;  %v3425_v31 = vmul.f32 %v3265_v46, %v11016_v0  ;;  %8122 = vtanh.f32 %v11110_v37 }
 0x235   : > { %v11108_v41 = vpop.f32.mrb[116].mxu0  ;;  %v11115_v52 = vpop.f32.mrb[116].mxu1  ;;  %v3268_v42 = vadd.f32 1.0, %v8111_v44  ;;  %8124 = vtanh.f32 %v11124_v5 }
 0x236   : > { %14053 = vst [vmem:[#allocation288_spill] sm:$0xff] %v11108_v41  ;;  %14055 = vst [vmem:[#allocation289_spill] sm:$0xff] %v11115_v52  ;;  %v11117_v39 = vpop.f32.mrb[117].mxu0  ;;  %v11120_v48 = vpop.f32.mrb[117].mxu1  ;;  %v14059_v52 = vld [vmem:[#allocation88_spill] sm:$0xff]  ;;  %v3427_v0 = vmul.f32 %v3267_v7, %v11036_v55 }
 0x237   : > { %14056 = vst [vmem:[#allocation290_spill] sm:$0xff] %v11120_v48  ;;  %v11122_v14 = vpop.f32.mrb[118].mxu0  ;;  %v11126_v57 = vpop.f32.mrb[118].mxu1  ;;  %3794 = vadd.xlane.f32.xlu0 %v3423_v35  ;;  %v2513_v17 = vadd.f32 %v10535_v4, %v14059_v52  ;;  %v2518_v48 = vadd.f32 %v14062_v13, %v14061_v20  ;;  %v3426_v35 = vmul.f32 %v3266_v8, %v11022_v22  ;;  %v14063_v4 = vld [vmem:[#allocation93_spill] sm:$0xff] }
 0x238   : > { %14057 = vst [vmem:[#allocation291_spill] sm:$0xff] %v11122_v14  ;;  %14058 = vst [vmem:[#allocation292_spill] sm:$0xff] %v11126_v57  ;;  %v11128_v30 = vpop.f32.mrb[119].mxu0  ;;  %v11133_v33 = vpop.f32.mrb[119].mxu1  ;;  %3796 = vadd.xlane.f32.xlu1 %v3424_v9  ;;  %v11139_v57 = vmul.f32 0.5, %v2510_v49  ;;  %v14066_v20 = vld [vmem:[#allocation97_spill] sm:$0xff]  ;;  %v3428_v7 = vmul.f32 %v3268_v42, %v11049_v47 }
 0x239   : > { %14060 = vst [vmem:[#allocation293_spill] sm:$0xff] %v11133_v33  ;;  %v8113_v14 = vpop.eup %8112  ;;  %v2521_v33 = vadd.f32 %v10522_v1, %v14063_v4  ;;  %v11145_v9 = vpop.permute.xlu1 %1531  ;;  %v11148_v46 = vmul.f32 0.5, %v2513_v17  ;;  %v11154_v44 = vmul.f32 0.5, %v2518_v48  ;;  %v2526_v1 = vadd.f32 %v10565_v63, %v14066_v20 }
 0x23a   : > { %v8115_v41 = vpop.eup %8114  ;;  %14064 = vst [vmem:[#allocation207_spill] sm:$0xff] %v11145_v9  ;;  %v11150_v13 = vpop.permute.xlu0 %1526  ;;  %v3269_v8 = vadd.f32 1.0, %v8113_v14  ;;  %8126 = vtanh.f32 %v11139_v57 }
 0x23b   : > { %3798 = vadd.xlane.f32.xlu0 %v3425_v31  ;;  %14065 = vst [vmem:[#allocation294_spill] sm:$0xff] %v11150_v13  ;;  %v8117_v22 = vpop.eup %8116  ;;  %v3270_v55 = vadd.f32 1.0, %v8115_v41  ;;  %v11168_v14 = vmul.f32 0.5, %v2521_v33  ;;  %8128 = vtanh.f32 %v11148_v46  ;;  %v14072_v33 = vld [vmem:[#allocation104_spill] sm:$0xff] }
 0x23c   : > { %3800 = vadd.xlane.f32.xlu1 %v3426_v35  ;;  %v8119_v35 = vpop.eup %8118  ;;  %v3271_v63 = vadd.f32 1.0, %v8117_v22  ;;  %v3429_v47 = vmul.f32 %v3269_v8, %v11060_v19  ;;  %8130 = vtanh.f32 %v11154_v44  ;;  %v2534_v42 = vadd.f32 %v10556_v16, %v14072_v33  ;;  %v14076_v33 = vld [vmem:[#allocation107_spill] sm:$0xff] }
 0x23d   : > { %v11152_v49 = vpop.f32.mrb[120].mxu0  ;;  %v11159_v4 = vpop.f32.mrb[120].mxu1  ;;  %v3272_v22 = vadd.f32 1.0, %v8119_v35  ;;  %8132 = vtanh.f32 %v11168_v14 }
 0x23e   : > { %14067 = vst [vmem:[#allocation295_spill] sm:$0xff] %v11159_v4  ;;  %v11161_v31 = vpop.f32.mrb[121].mxu0  ;;  %v11164_v17 = vpop.f32.mrb[121].mxu1  ;;  %v14070_v4 = vld [vmem:[#allocation96_spill] sm:$0xff]  ;;  %v3431_v19 = vmul.f32 %v3271_v63, %v11080_v12  ;;  %v11198_v35 = vmul.f32 0.5, %v2534_v42 }
 0x23f   : > { %14068 = vst [vmem:[#allocation296_spill] sm:$0xff] %v11164_v17  ;;  %v11166_v52 = vpop.f32.mrb[122].mxu0  ;;  %v11170_v48 = vpop.f32.mrb[122].mxu1  ;;  %3802 = vadd.xlane.f32.xlu0 %v3427_v0  ;;  %v2529_v41 = vadd.f32 %v10583_v56, %v14070_v4  ;;  %v3430_v0 = vmul.f32 %v3270_v55, %v11066_v2  ;;  %v14073_v56 = vld [vmem:[#allocation103_spill] sm:$0xff]  ;;  %v3432_v63 = vmul.f32 %v3272_v22, %v11093_v27 }
 0x240   : > { %14069 = vst [vmem:[#allocation297_spill] sm:$0xff] %v11170_v48  ;;  %v11172_v9 = vpop.f32.mrb[123].mxu0  ;;  %v11177_v20 = vpop.f32.mrb[123].mxu1  ;;  %3804 = vadd.xlane.f32.xlu1 %v3428_v7  ;;  %v11183_v48 = vmul.f32 0.5, %v2526_v1 }
 0x241   : > { %14071 = vst [vmem:[#allocation298_spill] sm:$0xff] %v11177_v20  ;;  %v8121_v17 = vpop.eup %8120  ;;  %v2537_v20 = vadd.f32 %v10570_v18, %v14073_v56  ;;  %v11189_v7 = vpop.permute.xlu1 %1541  ;;  %v11192_v8 = vmul.f32 0.5, %v2529_v41  ;;  %v2542_v18 = vadd.f32 %v10613_v34, %v14076_v33 }
 0x242   : > { %v8123_v13 = vpop.eup %8122  ;;  %14074 = vst [vmem:[#allocation299_spill] sm:$0xff] %v11189_v7  ;;  %v11194_v16 = vpop.permute.xlu0 %1536  ;;  %v3273_v55 = vadd.f32 1.0, %v8121_v17  ;;  %8134 = vtanh.f32 %v11183_v48 }
 0x243   : > { %3806 = vadd.xlane.f32.xlu0 %v3429_v47  ;;  %14075 = vst [vmem:[#allocation300_spill] sm:$0xff] %v11194_v16  ;;  %v8125_v2 = vpop.eup %8124  ;;  %v3274_v12 = vadd.f32 1.0, %v8123_v13  ;;  %v11212_v17 = vmul.f32 0.5, %v2537_v20  ;;  %8136 = vtanh.f32 %v11192_v8  ;;  %v14082_v20 = vld [vmem:[#allocation115_spill] sm:$0xff] }
 0x244   : > { %3808 = vadd.xlane.f32.xlu1 %v3430_v0  ;;  %v8127_v0 = vpop.eup %8126  ;;  %v3275_v34 = vadd.f32 1.0, %v8125_v2  ;;  %v3433_v27 = vmul.f32 %v3273_v55, %v11104_v45  ;;  %8138 = vtanh.f32 %v11198_v35  ;;  %v2550_v22 = vadd.f32 %v10604_v59, %v14082_v20  ;;  %v14086_v20 = vld [vmem:[#allocation119_spill] sm:$0xff] }
 0x245   : > { %v11196_v1 = vpop.f32.mrb[124].mxu0  ;;  %v11203_v56 = vpop.f32.mrb[124].mxu1  ;;  %v3276_v2 = vadd.f32 1.0, %v8127_v0  ;;  %8140 = vtanh.f32 %v11212_v17 }
 0x246   : > { %14077 = vst [vmem:[#allocation301_spill] sm:$0xff] %v11203_v56  ;;  %v11205_v47 = vpop.f32.mrb[125].mxu0  ;;  %v11208_v41 = vpop.f32.mrb[125].mxu1  ;;  %v14080_v56 = vld [vmem:[#allocation106_spill] sm:$0xff]  ;;  %v3435_v45 = vmul.f32 %v3275_v34, %v11124_v5  ;;  %v11242_v0 = vmul.f32 0.5, %v2550_v22 }
 0x247   : > { %14078 = vst [vmem:[#allocation302_spill] sm:$0xff] %v11208_v41  ;;  %v11210_v4 = vpop.f32.mrb[126].mxu0  ;;  %v11214_v42 = vpop.f32.mrb[126].mxu1  ;;  %3810 = vadd.xlane.f32.xlu0 %v3431_v19  ;;  %v2545_v13 = vadd.f32 %v10631_v61, %v14080_v56  ;;  %v3434_v19 = vmul.f32 %v3274_v12, %v11110_v37  ;;  %v14083_v61 = vld [vmem:[#allocation114_spill] sm:$0xff]  ;;  %v3436_v34 = vmul.f32 %v3276_v2, %v11139_v57 }
 0x248   : > { %14079 = vst [vmem:[#allocation303_spill] sm:$0xff] %v11214_v42  ;;  %v11216_v7 = vpop.f32.mrb[127].mxu0  ;;  %v11221_v33 = vpop.f32.mrb[127].mxu1  ;;  %3812 = vadd.xlane.f32.xlu1 %v3432_v63  ;;  %v11227_v42 = vmul.f32 0.5, %v2542_v18 }
 0x249   : > { %14081 = vst [vmem:[#allocation304_spill] sm:$0xff] %v11221_v33  ;;  %v8129_v41 = vpop.eup %8128  ;;  %v2553_v33 = vadd.f32 %v10618_v28, %v14083_v61  ;;  %v11233_v63 = vpop.permute.xlu1 %1551  ;;  %v11236_v55 = vmul.f32 0.5, %v2545_v13  ;;  %v2558_v28 = vadd.f32 %v10661_v26, %v14086_v20 }
 0x24a   : > { %v8131_v16 = vpop.eup %8130  ;;  %14084 = vst [vmem:[#allocation305_spill] sm:$0xff] %v11233_v63  ;;  %v11238_v59 = vpop.permute.xlu0 %1546  ;;  %v3277_v12 = vadd.f32 1.0, %v8129_v41  ;;  %8142 = vtanh.f32 %v11227_v42 }
 0x24b   : > { %3814 = vadd.xlane.f32.xlu0 %v3433_v27  ;;  %14085 = vst [vmem:[#allocation306_spill] sm:$0xff] %v11238_v59  ;;  %v8133_v37 = vpop.eup %8132  ;;  %v3278_v5 = vadd.f32 1.0, %v8131_v16  ;;  %v11256_v41 = vmul.f32 0.5, %v2553_v33  ;;  %8144 = vtanh.f32 %v11236_v55  ;;  %v14093_v33 = vld [vmem:[#allocation127_spill] sm:$0xff] }
 0x24c   : > { %3816 = vadd.xlane.f32.xlu1 %v3434_v19  ;;  %v8135_v19 = vpop.eup %8134  ;;  %v3279_v26 = vadd.f32 1.0, %v8133_v37  ;;  %v3437_v57 = vmul.f32 %v3277_v12, %v11148_v46  ;;  %8146 = vtanh.f32 %v11242_v0  ;;  %v2566_v2 = vadd.f32 %v10652_v54, %v14093_v33 }
 0x24d   : > { %v11240_v18 = vpop.f32.mrb[128].mxu0  ;;  %v11247_v61 = vpop.f32.mrb[128].mxu1  ;;  %v3280_v37 = vadd.f32 1.0, %v8135_v19  ;;  %8148 = vtanh.f32 %v11256_v41 }
 0x24e   : > { %14087 = vst [vmem:[#allocation307_spill] sm:$0xff] %v11247_v61  ;;  %v11249_v27 = vpop.f32.mrb[129].mxu0  ;;  %v11252_v13 = vpop.f32.mrb[129].mxu1  ;;  %v14091_v61 = vld [vmem:[#allocation118_spill] sm:$0xff]  ;;  %v3439_v46 = vmul.f32 %v3279_v26, %v11168_v14  ;;  %v11286_v19 = vmul.f32 0.5, %v2566_v2 }
 0x24f   : > { %14088 = vst [vmem:[#allocation308_spill] sm:$0xff] %v11252_v13  ;;  %v11254_v56 = vpop.f32.mrb[130].mxu0  ;;  %v11258_v22 = vpop.f32.mrb[130].mxu1  ;;  %3818 = vadd.xlane.f32.xlu0 %v3435_v45  ;;  %v2561_v16 = vadd.f32 %v10679_v15, %v14091_v61  ;;  %v3438_v45 = vmul.f32 %v3278_v5, %v11154_v44  ;;  %v14095_v15 = vld [vmem:[#allocation126_spill] sm:$0xff]  ;;  %v3440_v26 = vmul.f32 %v3280_v37, %v11183_v48 }
 0x250   : > { %14089 = vst [vmem:[#allocation309_spill] sm:$0xff] %v11254_v56  ;;  %14090 = vst [vmem:[#allocation310_spill] sm:$0xff] %v11258_v22  ;;  %v11260_v63 = vpop.f32.mrb[131].mxu0  ;;  %v11265_v20 = vpop.f32.mrb[131].mxu1  ;;  %3820 = vadd.xlane.f32.xlu1 %v3436_v34  ;;  %v11271_v22 = vmul.f32 0.5, %v2558_v28  ;;  %v2569_v34 = vadd.f32 %v10666_v38, %v14095_v15 }
 0x251   : > { %14092 = vst [vmem:[#allocation311_spill] sm:$0xff] %v11265_v20  ;;  %v8137_v13 = vpop.eup %8136  ;;  %v11274_v59 = vpop.permute.xlu0 %1556  ;;  %v11280_v12 = vmul.f32 0.5, %v2561_v16  ;;  %v14097_v20 = vld [vmem:[#allocation131_spill] sm:$0xff] }
 0x252   : > { %14094 = vst [vmem:[#allocation312_spill] sm:$0xff] %v11274_v59  ;;  %v8139_v56 = vpop.eup %8138  ;;  %v11282_v54 = vpop.permute.xlu1 %1561  ;;  %v3281_v5 = vadd.f32 1.0, %v8137_v13  ;;  %8150 = vtanh.f32 %v11271_v22  ;;  %v2574_v33 = vadd.f32 %v10709_v10, %v14097_v20  ;;  %v11300_v13 = vmul.f32 0.5, %v2569_v34  ;;  %v14107_v34 = vld [vmem:[#allocation139_spill] sm:$0xff] }
 0x253   : > { %3822 = vadd.xlane.f32.xlu0 %v3437_v57  ;;  %14096 = vst [vmem:[#allocation313_spill] sm:$0xff] %v11282_v54  ;;  %v8141_v44 = vpop.eup %8140  ;;  %v3282_v14 = vadd.f32 1.0, %v8139_v56  ;;  %8152 = vtanh.f32 %v11280_v12 }
 0x254   : > { %3824 = vadd.xlane.f32.xlu1 %v3438_v45  ;;  %v8143_v45 = vpop.eup %8142  ;;  %v3283_v10 = vadd.f32 1.0, %v8141_v44  ;;  %v3441_v37 = vmul.f32 %v3281_v5, %v11192_v8  ;;  %8154 = vtanh.f32 %v11286_v19 }
 0x255   : > { %v11284_v28 = vpop.f32.mrb[132].mxu0  ;;  %v11291_v38 = vpop.f32.mrb[132].mxu1  ;;  %v3442_v44 = vmul.f32 %v3282_v14, %v11198_v35  ;;  %v3284_v54 = vadd.f32 1.0, %v8143_v45  ;;  %8156 = vtanh.f32 %v11300_v13 }
 0x256   : > { %14098 = vst [vmem:[#allocation314_spill] sm:$0xff] %v11291_v38  ;;  %v11293_v57 = vpop.f32.mrb[133].mxu0  ;;  %v11296_v16 = vpop.f32.mrb[133].mxu1  ;;  %v14104_v38 = vld [vmem:[#allocation130_spill] sm:$0xff]  ;;  %v3443_v8 = vmul.f32 %v3283_v10, %v11212_v17 }
 0x257   : > { %14099 = vst [vmem:[#allocation315_spill] sm:$0xff] %v11293_v57  ;;  %14100 = vst [vmem:[#allocation316_spill] sm:$0xff] %v11296_v16  ;;  %v11298_v15 = vpop.f32.mrb[134].mxu0  ;;  %v11302_v2 = vpop.f32.mrb[134].mxu1  ;;  %3826 = vadd.xlane.f32.xlu0 %v3439_v46  ;;  %v2577_v56 = vadd.f32 %v10727_v6, %v14104_v38  ;;  %v11317_v16 = vmul.f32 0.5, %v2574_v33  ;;  %v14108_v6 = vld [vmem:[#allocation138_spill] sm:$0xff]  ;;  %v3444_v10 = vmul.f32 %v3284_v54, %v11227_v42 }
 0x258   : > { %14101 = vst [vmem:[#allocation317_spill] sm:$0xff] %v11298_v15  ;;  %14102 = vst [vmem:[#allocation318_spill] sm:$0xff] %v11302_v2  ;;  %v11304_v61 = vpop.f32.mrb[135].mxu0  ;;  %v11309_v20 = vpop.permute.xlu0 %1566  ;;  %3828 = vadd.xlane.f32.xlu1 %v3440_v26  ;;  %v2582_v2 = vadd.f32 %v10700_v51, %v14107_v34  ;;  %v14111_v34 = vld [vmem:[#allocation143_spill] sm:$0xff] }
 0x259   : > { %14103 = vst [vmem:[#allocation319_spill] sm:$0xff] %v11304_v61  ;;  %14105 = vst [vmem:[#allocation320_spill] sm:$0xff] %v11309_v20  ;;  %v11311_v48 = vpop.f32.mrb[135].mxu1  ;;  %v8145_v46 = vpop.eup %8144  ;;  %v11326_v5 = vmul.f32 0.5, %v2577_v56  ;;  %8158 = vtanh.f32 %v11317_v16 }
 0x25a   : > { %14106 = vst [vmem:[#allocation321_spill] sm:$0xff] %v11311_v48  ;;  %v8147_v59 = vpop.eup %8146  ;;  %v2585_v48 = vadd.f32 %v10714_v40, %v14108_v6  ;;  %v11323_v26 = vpop.permute.xlu1 %1571  ;;  %v3285_v14 = vadd.f32 1.0, %v8145_v46  ;;  %v11332_v45 = vmul.f32 0.5, %v2582_v2  ;;  %v2590_v40 = vadd.f32 %v10757_v58, %v14111_v34 }
 0x25b   : > { %14109 = vst [vmem:[#allocation322_spill] sm:$0xff] %v11323_v26  ;;  %3830 = vadd.xlane.f32.xlu0 %v3441_v37  ;;  %v8149_v35 = vpop.eup %8148  ;;  %v3286_v17 = vadd.f32 1.0, %v8147_v59  ;;  %8160 = vtanh.f32 %v11326_v5 }
 0x25c   : > { %3832 = vadd.xlane.f32.xlu1 %v3442_v44  ;;  %v11330_v33 = vpop.xlane.xlu0 %3692  ;;  %v8151_v38 = vpop.eup %8150  ;;  %v11346_v46 = vmul.f32 0.5, %v2585_v48  ;;  %v3287_v58 = vadd.f32 1.0, %v8149_v35  ;;  %v3445_v54 = vmul.f32 %v3285_v14, %v11236_v55  ;;  %8162 = vtanh.f32 %v11332_v45  ;;  %v14120_v48 = vld [vmem:[#allocation151_spill] sm:$0xff] }
 0x25d   : > { %v11328_v51 = vpop.f32.mrb[136].mxu0  ;;  %v11337_v6 = vpop.f32.mrb[136].mxu1  ;;  %v3446_v20 = vmul.f32 %v3286_v17, %v11242_v0 }
 0x25e   : > { %14110 = vst [vmem:[#allocation323_spill] sm:$0xff] %v11328_v51  ;;  %14112 = vst [vmem:[#allocation324_spill] sm:$0xff] %v11337_v6  ;;  %v11339_v37 = vpop.f32.mrb[137].mxu0  ;;  %v11342_v56 = vpop.f32.mrb[137].mxu1  ;;  %v14118_v6 = vld [vmem:[#allocation142_spill] sm:$0xff]  ;;  %8164 = vtanh.f32 %v11346_v46  ;;  %v3447_v55 = vmul.f32 %v3287_v58, %v11256_v41 }
 0x25f   : > { %14113 = vst [vmem:[#allocation325_spill] sm:$0xff] %v11339_v37  ;;  %14114 = vst [vmem:[#allocation326_spill] sm:$0xff] %v11342_v56  ;;  %v11344_v44 = vpop.f32.mrb[138].mxu0  ;;  %v11348_v2 = vpop.f32.mrb[138].mxu1  ;;  %3834 = vadd.xlane.f32.xlu0 %v3443_v8  ;;  %v2593_v59 = vadd.f32 %v10775_v11, %v14118_v6  ;;  %v11363_v56 = vmul.f32 0.5, %v2590_v40  ;;  %v3288_v11 = vadd.f32 1.0, %v8151_v38 }
 0x260   : > { %14115 = vst [vmem:[#allocation327_spill] sm:$0xff] %v11344_v44  ;;  %14116 = vst [vmem:[#allocation328_spill] sm:$0xff] %v11348_v2  ;;  %v11350_v26 = vpop.f32.mrb[139].mxu0  ;;  %v11355_v34 = vpop.f32.mrb[139].mxu1  ;;  %3836 = vadd.xlane.f32.xlu1 %v3444_v10  ;;  %v2598_v2 = vadd.f32 %v10748_v62, %v14120_v48  ;;  %v14121_v10 = vld [vmem:[#allocation150_spill] sm:$0xff]  ;;  %v14123_v38 = vld [vmem:[#allocation155_spill] sm:$0xff] }
 0x261   : > { %14117 = vst [vmem:[#allocation329_spill] sm:$0xff] %v11350_v26  ;;  %14119 = vst [vmem:[#allocation330_spill] sm:$0xff] %v11355_v34  ;;  %v11357_v42 = vpop.xlane.xlu0 %3696  ;;  %v11365_v8 = vpop.xlane.xlu1 %3694  ;;  %v2601_v34 = vadd.f32 %v10762_v60, %v14121_v10  ;;  %v11372_v14 = vmul.f32 0.5, %v2593_v59  ;;  %8166 = vtanh.f32 %v11363_v56  ;;  %v2606_v17 = vadd.f32 %v10805_v50, %v14123_v38  ;;  %v14130_v38 = vld [vmem:[#allocation251_spill] sm:$0xff] }
 0x262   : > { %v8153_v35 = vpop.eup %8152  ;;  %v11378_v0 = vmul.f32 0.5, %v2598_v2  ;;  %v3448_v58 = vmul.f32 %v3288_v11, %v11271_v22 }
 0x263   : > { %v8155_v6 = vpop.eup %8154  ;;  %3838 = vadd.xlane.f32.xlu0 %v3445_v54  ;;  %v3289_v26 = vadd.f32 1.0, %v8153_v35  ;;  %v11392_v35 = vmul.f32 0.5, %v2601_v34  ;;  %8168 = vtanh.f32 %v11372_v14  ;;  %v14133_v34 = vld [vmem:[#allocation163_spill] sm:$0xff] }
 0x264   : > { %3840 = vadd.xlane.f32.xlu1 %v3446_v20  ;;  %v8157_v48 = vpop.eup %8156  ;;  %v3290_v41 = vadd.f32 1.0, %v8155_v6  ;;  %8170 = vtanh.f32 %v11378_v0 }
 0x265   : > { %v11374_v62 = vpop.f32.mrb[140].mxu0  ;;  %v11376_v40 = vpop.xlane.xlu0 %3698  ;;  %v3291_v50 = vadd.f32 1.0, %v8157_v48  ;;  %v3449_v11 = vmul.f32 %v3289_v26, %v11280_v12  ;;  %8172 = vtanh.f32 %v11392_v35  ;;  %v14136_v12 = vld [vmem:[#allocation248_spill] sm:$0xff] }
 0x266   : > { %14122 = vst [vmem:[#allocation331_spill] sm:$0xff] %v11374_v62  ;;  %v11383_v60 = vpop.f32.mrb[140].mxu1  ;;  %v11385_v54 = vpop.f32.mrb[141].mxu0  ;;  %v3450_v44 = vmul.f32 %v3290_v41, %v11286_v19  ;;  %v14139_v41 = vld [vmem:[#allocation254_spill] sm:$0xff] }
 0x267   : > { %14124 = vst [vmem:[#allocation332_spill] sm:$0xff] %v11383_v60  ;;  %14125 = vst [vmem:[#allocation333_spill] sm:$0xff] %v11385_v54  ;;  %v11388_v59 = vpop.f32.mrb[141].mxu1  ;;  %v11390_v20 = vpop.xlane.xlu1 %3700  ;;  %3842 = vadd.xlane.f32.xlu0 %v3447_v55  ;;  %v14129_v60 = vld [vmem:[#allocation154_spill] sm:$0xff] }
 0x268   : > { %14126 = vst [vmem:[#allocation334_spill] sm:$0xff] %v11388_v59  ;;  %v8159_v10 = vpop.eup %8158  ;;  %v11394_v2 = vpop.f32.mrb[142].mxu0  ;;  %v2609_v6 = vadd.f32 %v14130_v38, %v14129_v60  ;;  %3844 = vadd.xlane.f32.xlu1 %v3448_v58  ;;  %v14134_v59 = vld [vmem:[#allocation246_spill] sm:$0xff] }
 0x269   : > { %14127 = vst [vmem:[#allocation335_spill] sm:$0xff] %v11394_v2  ;;  %v11396_v62 = vpop.f32.mrb[142].mxu1  ;;  %v11401_v54 = vpop.f32.mrb[143].mxu0  ;;  %v2614_v2 = vadd.f32 %v14134_v59, %v14133_v34  ;;  %v3292_v38 = vadd.f32 1.0, %v8159_v10  ;;  %v14135_v58 = vld [vmem:[#allocation162_spill] sm:$0xff]  ;;  %v14138_v10 = vld [vmem:[#allocation167_spill] sm:$0xff] }
 0x26a   : > { %14128 = vst [vmem:[#allocation336_spill] sm:$0xff] %v11396_v62  ;;  %14131 = vst [vmem:[#allocation251_spill] sm:$0xff] %v11401_v54  ;;  %v11403_v22 = vpop.f32.mrb[143].mxu1  ;;  %v11409_v62 = vmul.f32 0.5, %v2606_v17  ;;  %v11411_v48 = vpop.xlane.xlu0 %3702  ;;  %v2617_v26 = vadd.f32 %v14136_v12, %v14135_v58  ;;  %v11420_v59 = vmul.f32 0.5, %v2609_v6  ;;  %v2622_v51 = vadd.f32 %v14139_v41, %v14138_v10  ;;  %v14145_v10 = vld [vmem:[#allocation152_spill] sm:$0xff] }
 0x26b   : > { %14132 = vst [vmem:[#allocation337_spill] sm:$0xff] %v11403_v22  ;;  %v8161_v55 = vpop.eup %8160  ;;  %v11414_v60 = vpop.xlane.xlu1 %3704  ;;  %3846 = vadd.xlane.f32.xlu0 %v3449_v11  ;;  %v3451_v22 = vmul.f32 %v3291_v50, %v11300_v13  ;;  %v11424_v19 = vmul.f32 0.5, %v2614_v2  ;;  %v3452_v13 = vmul.f32 %v3292_v38, %v11317_v16 }
 0x26c   : > { %v8163_v54 = vpop.eup %8162  ;;  %3848 = vadd.xlane.f32.xlu1 %v3450_v44  ;;  %v3293_v37 = vadd.f32 1.0, %v8161_v55  ;;  %8174 = vtanh.f32 %v11409_v62  ;;  %v11438_v55 = vmul.f32 0.5, %v2617_v26  ;;  %v14148_v26 = vld [vmem:[#allocation175_spill] sm:$0xff] }
 0x26d   : > { %v11422_v17 = vpop.f32.mrb[144].mxu0  ;;  %v8165_v34 = vpop.eup %8164  ;;  %v3294_v11 = vadd.f32 1.0, %v8163_v54  ;;  %8176 = vtanh.f32 %v11420_v59 }
 0x26e   : > { %14137 = vst [vmem:[#allocation246_spill] sm:$0xff] %v11422_v17  ;;  %v11429_v61 = vpop.f32.mrb[144].mxu1  ;;  %v11431_v12 = vpop.xlane.xlu0 %3706  ;;  %v3295_v41 = vadd.f32 1.0, %v8165_v34  ;;  %v3453_v38 = vmul.f32 %v3293_v37, %v11326_v5  ;;  %8178 = vtanh.f32 %v11424_v19  ;;  %v14153_v5 = vld [vmem:[#allocation256_spill] sm:$0xff] }
 0x26f   : > { %14140 = vst [vmem:[#allocation248_spill] sm:$0xff] %v11429_v61  ;;  %v11434_v50 = vpop.f32.mrb[145].mxu0  ;;  %v11436_v6 = vpop.f32.mrb[145].mxu1  ;;  %3850 = vadd.xlane.f32.xlu0 %v3451_v22  ;;  %v14144_v61 = vld [vmem:[#allocation166_spill] sm:$0xff]  ;;  %8180 = vtanh.f32 %v11438_v55 }
 0x270   : > { %14141 = vst [vmem:[#allocation254_spill] sm:$0xff] %v11434_v50  ;;  %14142 = vst [vmem:[#allocation338_spill] sm:$0xff] %v11436_v6  ;;  %v8167_v44 = vpop.eup %8166  ;;  %v11440_v2 = vpop.xlane.xlu1 %3708  ;;  %v2625_v54 = vadd.f32 %v14145_v10, %v14144_v61  ;;  %3852 = vadd.xlane.f32.xlu1 %v3452_v13  ;;  %v14149_v6 = vld [vmem:[#allocation253_spill] sm:$0xff]  ;;  %v3454_v10 = vmul.f32 %v3294_v11, %v11332_v45  ;;  %v14152_v13 = vld [vmem:[#allocation174_spill] sm:$0xff] }
 0x271   : > { %v11442_v58 = vpop.f32.mrb[146].mxu0  ;;  %v11447_v17 = vpop.f32.mrb[146].mxu1  ;;  %v2630_v50 = vadd.f32 %v14149_v6, %v14148_v26  ;;  %v2633_v37 = vadd.f32 %v14153_v5, %v14152_v13  ;;  %v14155_v11 = vld [vmem:[#allocation178_spill] sm:$0xff] }
 0x272   : > { %14143 = vst [vmem:[#allocation339_spill] sm:$0xff] %v11442_v58  ;;  %14146 = vst [vmem:[#allocation152_spill] sm:$0xff] %v11447_v17  ;;  %v11449_v16 = vpop.f32.mrb[147].mxu0  ;;  %v11455_v58 = vmul.f32 0.5, %v2622_v51  ;;  %v11457_v22 = vpop.f32.mrb[147].mxu1  ;;  %v3296_v17 = vadd.f32 1.0, %v8167_v44  ;;  %v3455_v51 = vmul.f32 %v3295_v41, %v11346_v46 }
 0x273   : > { %14147 = vst [vmem:[#allocation340_spill] sm:$0xff] %v11449_v16  ;;  %14150 = vst [vmem:[#allocation253_spill] sm:$0xff] %v11457_v22  ;;  %v11459_v34 = vpop.xlane.xlu0 %3710  ;;  %v8169_v15 = vpop.eup %8168  ;;  %3854 = vadd.xlane.f32.xlu0 %v3453_v38  ;;  %v11468_v6 = vmul.f32 0.5, %v2625_v54  ;;  %v11472_v45 = vmul.f32 0.5, %v2630_v50  ;;  %v14156_v44 = vld [vmem:[#allocation260_spill] sm:$0xff] }
 0x274   : > { %14151 = vst [vmem:[#allocation341_spill] sm:$0xff] %v11459_v34  ;;  %v8171_v61 = vpop.eup %8170  ;;  %v11465_v16 = vpop.xlane.xlu1 %3712  ;;  %3856 = vadd.xlane.f32.xlu1 %v3454_v10  ;;  %v3297_v34 = vadd.f32 1.0, %v8169_v15  ;;  %8182 = vtanh.f32 %v11455_v58  ;;  %v2638_v57 = vadd.f32 %v14156_v44, %v14155_v11  ;;  %v3456_v46 = vmul.f32 %v3296_v17, %v11363_v56 }
 0x275   : > { %v11470_v22 = vpop.f32.mrb[148].mxu0  ;;  %v8173_v26 = vpop.eup %8172  ;;  %v3298_v38 = vadd.f32 1.0, %v8171_v61  ;;  %v11486_v15 = vmul.f32 0.5, %v2633_v37  ;;  %8184 = vtanh.f32 %v11468_v6  ;;  %v14166_v37 = vld [vmem:[#allocation184_spill] sm:$0xff] }
 0x276   : > { %14154 = vst [vmem:[#allocation256_spill] sm:$0xff] %v11470_v22  ;;  %v11477_v5 = vpop.f32.mrb[148].mxu1  ;;  %v11482_v41 = vpop.f32.mrb[149].mxu0  ;;  %v3299_v44 = vadd.f32 1.0, %v8173_v26  ;;  %v3457_v17 = vmul.f32 %v3297_v34, %v11372_v14  ;;  %8186 = vtanh.f32 %v11472_v45  ;;  %v14171_v34 = vld [vmem:[#allocation183_spill] sm:$0xff] }
 0x277   : > { %14157 = vst [vmem:[#allocation260_spill] sm:$0xff] %v11477_v5  ;;  %v11479_v13 = vpop.xlane.xlu0 %3714  ;;  %14159 = vst [vmem:[#allocation343_spill] sm:$0xff] %v11482_v41  ;;  %v11484_v54 = vpop.f32.mrb[149].mxu1  ;;  %3858 = vadd.xlane.f32.xlu0 %v3455_v51  ;;  %v14163_v5 = vld [vmem:[#allocation177_spill] sm:$0xff]  ;;  %8188 = vtanh.f32 %v11486_v15 }
 0x278   : > { %14158 = vst [vmem:[#allocation342_spill] sm:$0xff] %v11479_v13  ;;  %14160 = vst [vmem:[#allocation344_spill] sm:$0xff] %v11484_v54  ;;  %v8175_v10 = vpop.eup %8174  ;;  %v11488_v50 = vpop.xlane.xlu1 %3716  ;;  %v2641_v61 = vadd.f32 %v10911_v29, %v14163_v5  ;;  %3860 = vadd.xlane.f32.xlu1 %v3456_v46  ;;  %v14167_v54 = vld [vmem:[#allocation259_spill] sm:$0xff]  ;;  %v3458_v29 = vmul.f32 %v3298_v38, %v11378_v0  ;;  %v3459_v14 = vmul.f32 %v3299_v44, %v11392_v35 }
 0x279   : > { %14161 = vst [vmem:[#allocation345_spill] sm:$0xff] %v11488_v50  ;;  %v11490_v22 = vpop.f32.mrb[150].mxu0  ;;  %v11495_v11 = vpop.f32.mrb[150].mxu1  ;;  %v2646_v41 = vadd.f32 %v14167_v54, %v14166_v37  ;;  %v14172_v54 = vld [vmem:[#allocation262_spill] sm:$0xff]  ;;  %v14174_v38 = vld [vmem:[#allocation187_spill] sm:$0xff] }
 0x27a   : > { %14162 = vst [vmem:[#allocation346_spill] sm:$0xff] %v11490_v22  ;;  %14164 = vst [vmem:[#allocation347_spill] sm:$0xff] %v11495_v11  ;;  %v11497_v56 = vpop.f32.mrb[151].mxu0  ;;  %v11503_v22 = vmul.f32 0.5, %v2638_v57  ;;  %v11505_v26 = vpop.f32.mrb[151].mxu1  ;;  %v3300_v11 = vadd.f32 1.0, %v8175_v10  ;;  %v2649_v57 = vadd.f32 %v14172_v54, %v14171_v34 }
 0x27b   : > { %14165 = vst [vmem:[#allocation348_spill] sm:$0xff] %v11497_v56  ;;  %14168 = vst [vmem:[#allocation259_spill] sm:$0xff] %v11505_v26  ;;  %v11507_v51 = vpop.xlane.xlu0 %3718  ;;  %v8177_v50 = vpop.eup %8176  ;;  %3862 = vadd.xlane.f32.xlu0 %v3457_v17  ;;  %v11516_v37 = vmul.f32 0.5, %v2641_v61  ;;  %v11520_v0 = vmul.f32 0.5, %v2646_v41  ;;  %v14175_v10 = vld [vmem:[#allocation265_spill] sm:$0xff] }
 0x27c   : > { %14169 = vst [vmem:[#allocation349_spill] sm:$0xff] %v11507_v51  ;;  %v8179_v5 = vpop.eup %8178  ;;  %v11511_v46 = vpop.xlane.xlu1 %3720  ;;  %3864 = vadd.xlane.f32.xlu1 %v3458_v29  ;;  %v3301_v51 = vadd.f32 1.0, %v8177_v50  ;;  %8190 = vtanh.f32 %v11503_v22  ;;  %v3460_v61 = vmul.f32 %v3300_v11, %v11409_v62  ;;  %v11538_v13 = vmul.f32 0.5, %v2649_v57 }
 0x27d   : > { %14170 = vst [vmem:[#allocation350_spill] sm:$0xff] %v11511_v46  ;;  %v11518_v26 = vpop.f32.mrb[152].mxu0  ;;  %v8181_v56 = vpop.eup %8180  ;;  %v2654_v46 = vadd.f32 %v14175_v10, %v14174_v38  ;;  %v3302_v44 = vadd.f32 1.0, %v8179_v5  ;;  %8192 = vtanh.f32 %v11516_v37  ;;  %v14180_v10 = vld [vmem:[#allocation186_spill] sm:$0xff]  ;;  %v14184_v38 = vld [vmem:[#allocation264_spill] sm:$0xff] }
 0x27e   : > { %14173 = vst [vmem:[#allocation262_spill] sm:$0xff] %v11518_v26  ;;  %v11525_v17 = vpop.f32.mrb[152].mxu1  ;;  %v11530_v54 = vpop.f32.mrb[153].mxu0  ;;  %v3303_v26 = vadd.f32 1.0, %v8181_v56  ;;  %v2657_v5 = vadd.f32 %v10955_v21, %v14180_v10  ;;  %v3461_v11 = vmul.f32 %v3301_v51, %v11420_v59  ;;  %8194 = vtanh.f32 %v11520_v0  ;;  %v14188_v51 = vld [vmem:[#allocation191_spill] sm:$0xff] }
 0x27f   : > { %14176 = vst [vmem:[#allocation265_spill] sm:$0xff] %v11525_v17  ;;  %v11527_v35 = vpop.xlane.xlu0 %3722  ;;  %14177 = vst [vmem:[#allocation351_spill] sm:$0xff] %v11530_v54  ;;  %v11532_v34 = vpop.f32.mrb[153].mxu1  ;;  %3866 = vadd.xlane.f32.xlu0 %v3459_v14  ;;  %v11551_v56 = vmul.f32 0.5, %v2654_v46  ;;  %v3462_v21 = vmul.f32 %v3302_v44, %v11424_v19  ;;  %8196 = vtanh.f32 %v11538_v13  ;;  %v14191_v44 = vld [vmem:[#allocation195_spill] sm:$0xff] }
 0x280   : > { %14178 = vst [vmem:[#allocation352_spill] sm:$0xff] %v11532_v34  ;;  %v8183_v29 = vpop.eup %8182  ;;  %v11534_v50 = vpop.xlane.xlu1 %3724  ;;  %3868 = vadd.xlane.f32.xlu1 %v3460_v61  ;;  %v14183_v34 = vld [vmem:[#allocation192_spill] sm:$0xff]  ;;  %v3463_v59 = vmul.f32 %v3303_v26, %v11438_v55  ;;  %v11564_v61 = vmul.f32 0.5, %v2657_v5 }
 0x281   : > { %v11536_v41 = vpop.f32.mrb[154].mxu0  ;;  %v11543_v17 = vpop.f32.mrb[154].mxu1  ;;  %v2662_v14 = vadd.f32 %v14184_v38, %v14183_v34  ;;  %v14189_v38 = vld [vmem:[#allocation267_spill] sm:$0xff]  ;;  %8198 = vtanh.f32 %v11551_v56 }
 0x282   : > { %14179 = vst [vmem:[#allocation353_spill] sm:$0xff] %v11536_v41  ;;  %14181 = vst [vmem:[#allocation354_spill] sm:$0xff] %v11543_v17  ;;  %v11545_v62 = vpop.f32.mrb[155].mxu0  ;;  %v11553_v57 = vpop.f32.mrb[155].mxu1  ;;  %v3304_v17 = vadd.f32 1.0, %v8183_v29  ;;  %v2665_v46 = vadd.f32 %v14189_v38, %v14188_v51  ;;  %v2670_v29 = vadd.f32 %v10985_v53, %v14191_v44  ;;  %8200 = vtanh.f32 %v11564_v61 }
 0x283   : > { %14182 = vst [vmem:[#allocation355_spill] sm:$0xff] %v11545_v62  ;;  %14185 = vst [vmem:[#allocation264_spill] sm:$0xff] %v11553_v57  ;;  %v11555_v41 = vpop.xlane.xlu0 %3726  ;;  %v8185_v54 = vpop.eup %8184  ;;  %3870 = vadd.xlane.f32.xlu0 %v3461_v11  ;;  %v11568_v19 = vmul.f32 0.5, %v2662_v14 }
 0x284   : > { %14186 = vst [vmem:[#allocation356_spill] sm:$0xff] %v11555_v41  ;;  %v8187_v10 = vpop.eup %8186  ;;  %v11558_v62 = vpop.xlane.xlu1 %3728  ;;  %3872 = vadd.xlane.f32.xlu1 %v3462_v21  ;;  %v3305_v41 = vadd.f32 1.0, %v8185_v54  ;;  %v3464_v5 = vmul.f32 %v3304_v17, %v11455_v58  ;;  %v14195_v54 = vld [vmem:[#allocation194_spill] sm:$0xff]  ;;  %v11599_v44 = vmul.f32 0.5, %v2670_v29 }
 0x285   : > { %14187 = vst [vmem:[#allocation357_spill] sm:$0xff] %v11558_v62  ;;  %v11566_v57 = vpop.f32.mrb[156].mxu0  ;;  %v8189_v34 = vpop.eup %8188  ;;  %v3306_v11 = vadd.f32 1.0, %v8187_v10  ;;  %v2673_v14 = vadd.f32 %v10999_v32, %v14195_v54  ;;  %8202 = vtanh.f32 %v11568_v19  ;;  %v14200_v32 = vld [vmem:[#allocation202_spill] sm:$0xff] }
 0x286   : > { %14190 = vst [vmem:[#allocation267_spill] sm:$0xff] %v11566_v57  ;;  %v11573_v55 = vpop.f32.mrb[156].mxu1  ;;  %v11578_v38 = vpop.f32.mrb[157].mxu0  ;;  %v3307_v53 = vadd.f32 1.0, %v8189_v34  ;;  %v3465_v17 = vmul.f32 %v3305_v41, %v11468_v6 }
 0x287   : > { %14192 = vst [vmem:[#allocation358_spill] sm:$0xff] %v11573_v55  ;;  %v11575_v26 = vpop.xlane.xlu0 %3730  ;;  %14193 = vst [vmem:[#allocation359_spill] sm:$0xff] %v11578_v38  ;;  %v11580_v51 = vpop.f32.mrb[157].mxu1  ;;  %3874 = vadd.xlane.f32.xlu0 %v3463_v59  ;;  %v11588_v55 = vmul.f32 0.5, %v2665_v46  ;;  %v11608_v6 = vmul.f32 0.5, %v2673_v14 }
 0x288   : > { %14194 = vst [vmem:[#allocation360_spill] sm:$0xff] %v11580_v51  ;;  %v8191_v21 = vpop.eup %8190  ;;  %v11584_v57 = vpop.xlane.xlu1 %3732  ;;  %3876 = vadd.xlane.f32.xlu1 %v3464_v5  ;;  %v14201_v51 = vld [vmem:[#allocation270_spill] sm:$0xff]  ;;  %v14204_v5 = vld [vmem:[#allocation273_spill] sm:$0xff] }
 0x289   : > { %14196 = vst [vmem:[#allocation361_spill] sm:$0xff] %v11584_v57  ;;  %v11586_v62 = vpop.f32.mrb[158].mxu0  ;;  %v11591_v10 = vpop.f32.mrb[158].mxu1  ;;  %v2678_v54 = vadd.f32 %v14201_v51, %v14200_v32  ;;  %v3467_v51 = vmul.f32 %v3307_v53, %v11486_v15  ;;  %8204 = vtanh.f32 %v11588_v55  ;;  %v14206_v15 = vld [vmem:[#allocation212_spill] sm:$0xff]  ;;  %v14207_v53 = vld [vmem:[#allocation205_spill] sm:$0xff] }
 0x28a   : > { %14197 = vst [vmem:[#allocation362_spill] sm:$0xff] %v11586_v62  ;;  %14198 = vst [vmem:[#allocation363_spill] sm:$0xff] %v11591_v10  ;;  %v11593_v58 = vpop.f32.mrb[159].mxu0  ;;  %v11601_v59 = vpop.f32.mrb[159].mxu1  ;;  %v3466_v62 = vmul.f32 %v3306_v11, %v11472_v45  ;;  %v3308_v10 = vadd.f32 1.0, %v8191_v21  ;;  %8206 = vtanh.f32 %v11599_v44  ;;  %v14205_v45 = vld [vmem:[#allocation206_spill] sm:$0xff] }
 0x28b   : > { %14199 = vst [vmem:[#allocation364_spill] sm:$0xff] %v11593_v58  ;;  %14202 = vst [vmem:[#allocation270_spill] sm:$0xff] %v11601_v59  ;;  %v11603_v34 = vpop.xlane.xlu0 %3734  ;;  %v8193_v46 = vpop.eup %8192  ;;  %v14203_v58 = vld [vmem:[#allocation201_spill] sm:$0xff]  ;;  %3878 = vadd.xlane.f32.xlu0 %v3465_v17  ;;  %v11614_v59 = vmul.f32 0.5, %v2678_v54  ;;  %v2686_v11 = vadd.f32 %v11029_v23, %v14205_v45  ;;  %8208 = vtanh.f32 %v11608_v6  ;;  %v2689_v23 = vadd.f32 %v11043_v43, %v14207_v53  ;;  %v14208_v43 = vld [vmem:[#allocation211_spill] sm:$0xff] }
 0x28c   : > { %v8195_v38 = vpop.eup %8194  ;;  %v2681_v57 = vadd.f32 %v14204_v5, %v14203_v58  ;;  %v11610_v41 = vpop.xlane.xlu1 %3736  ;;  %3880 = vadd.xlane.f32.xlu1 %v3466_v62  ;;  %v3309_v29 = vadd.f32 1.0, %v8193_v46  ;;  %v3468_v58 = vmul.f32 %v3308_v10, %v11503_v22  ;;  %v2694_v62 = vadd.f32 %v11020_v25, %v14206_v15 }
 0x28d   : > { %v8197_v14 = vpop.eup %8196  ;;  %v3310_v5 = vadd.f32 1.0, %v8195_v38  ;;  %8210 = vtanh.f32 %v11614_v59  ;;  %v11633_v22 = vmul.f32 0.5, %v2686_v11 }
 0x28e   : > { %v8199_v17 = vpop.eup %8198  ;;  %v11622_v32 = vmul.f32 0.5, %v2681_v57  ;;  %v3311_v46 = vadd.f32 1.0, %v8197_v14  ;;  %v3469_v38 = vmul.f32 %v3309_v29, %v11516_v37  ;;  %v11645_v37 = vmul.f32 0.5, %v2689_v23 }
 0x28f   : > { %v11619_v21 = vpop.xlane.xlu0 %3738  ;;  %3882 = vadd.xlane.f32.xlu0 %v3467_v51  ;;  %v8201_v10 = vpop.eup %8200  ;;  %v3470_v45 = vmul.f32 %v3310_v5, %v11520_v0  ;;  %v3312_v25 = vadd.f32 1.0, %v8199_v17  ;;  %v11639_v51 = vmul.f32 0.5, %v2694_v62  ;;  %v14210_v0 = vld [vmem:[#allocation215_spill] sm:$0xff] }
 0x290   : > { %v11627_v54 = vpop.xlane.xlu1 %3740  ;;  %3884 = vadd.xlane.f32.xlu1 %v3468_v58  ;;  %v8203_v15 = vpop.eup %8202  ;;  %8212 = vtanh.f32 %v11622_v32  ;;  %v2697_v58 = vadd.f32 %v11034_v3, %v14208_v43  ;;  %v3471_v29 = vmul.f32 %v3311_v46, %v11538_v13  ;;  %v3313_v11 = vadd.f32 1.0, %v8201_v10  ;;  %v14213_v13 = vld [vmem:[#allocation214_spill] sm:$0xff]  ;;  %v14214_v10 = vld [vmem:[#allocation220_spill] sm:$0xff] }
 0x291   : > { %8214 = vtanh.f32 %v11633_v22  ;;  %v2702_v5 = vadd.f32 %v11073_v24, %v14210_v0  ;;  %v3314_v53 = vadd.f32 1.0, %v8203_v15  ;;  %v3472_v3 = vmul.f32 %v3312_v25, %v11551_v56  ;;  %v14215_v56 = vld [vmem:[#allocation283_spill] sm:$0xff] }
 0x292   : > { %8216 = vtanh.f32 %v11639_v51  ;;  %v11655_v23 = vmul.f32 0.5, %v2697_v58  ;;  %v2705_v46 = vadd.f32 %v11087_v36, %v14213_v13  ;;  %v3473_v15 = vmul.f32 %v3313_v11, %v11564_v61 }
 0x293   : > { %v11635_v57 = vpop.xlane.xlu0 %3742  ;;  %3886 = vadd.xlane.f32.xlu0 %v3469_v38  ;;  %v8205_v62 = vpop.eup %8204  ;;  %8218 = vtanh.f32 %v11645_v37  ;;  %v2710_v25 = vadd.f32 %v14215_v56, %v14214_v10  ;;  %v11665_v0 = vmul.f32 0.5, %v2702_v5 }
 0x294   : > { %v11643_v14 = vpop.xlane.xlu1 %3744  ;;  %3888 = vadd.xlane.f32.xlu1 %v3470_v45  ;;  %v8207_v43 = vpop.eup %8206  ;;  %v3315_v38 = vadd.f32 1.0, %v8205_v62  ;;  %8220 = vtanh.f32 %v11655_v23  ;;  %v14217_v62 = vld [vmem:[#allocation219_spill] sm:$0xff]  ;;  %v11675_v11 = vmul.f32 0.5, %v2705_v46 }
 0x295   : > { %14209 = vst [vmem:[#allocation273_spill] sm:$0xff] %v11643_v14  ;;  %v8209_v24 = vpop.eup %8208  ;;  %v11678_v10 = vmul.f32 0.5, %v2710_v25  ;;  %8222 = vtanh.f32 %v11665_v0 }
 0x296   : > { %v3317_v36 = vadd.f32 1.0, %v8209_v24  ;;  %v3475_v56 = vmul.f32 %v3315_v38, %v11588_v55  ;;  %8224 = vtanh.f32 %v11675_v11 }
 0x297   : > { %v11651_v17 = vpop.xlane.xlu0 %3746  ;;  %3890 = vadd.xlane.f32.xlu0 %v3471_v29  ;;  %v3316_v29 = vadd.f32 1.0, %v8207_v43  ;;  %8226 = vtanh.f32 %v11678_v10 }
 0x298   : > { %14211 = vst [vmem:[#allocation365_spill] sm:$0xff] %v11651_v17  ;;  %v11657_v45 = vpop.xlane.xlu1 %3748  ;;  %3892 = vadd.xlane.f32.xlu1 %v3472_v3  ;;  %v8211_v17 = vpop.eup %8210  ;;  %v14218_v3 = vld [vmem:[#allocation286_spill] sm:$0xff]  ;;  %v3477_v38 = vmul.f32 %v3317_v36, %v11608_v6  ;;  %v14225_v36 = vld [vmem:[#allocation227_spill] sm:$0xff] }
 0x299   : > { %14212 = vst [vmem:[#allocation366_spill] sm:$0xff] %v11657_v45  ;;  %v3474_v45 = vmul.f32 %v3314_v53, %v11568_v19  ;;  %v2713_v61 = vadd.f32 %v14218_v3, %v14217_v62  ;;  %v14219_v19 = vld [vmem:[#allocation223_spill] sm:$0xff]  ;;  %v3476_v24 = vmul.f32 %v3316_v29, %v11599_v44  ;;  %v14221_v3 = vld [vmem:[#allocation222_spill] sm:$0xff]  ;;  %v14223_v44 = vld [vmem:[#allocation228_spill] sm:$0xff] }
 0x29a   : > { %v8213_v5 = vpop.eup %8212  ;;  %v2718_v53 = vadd.f32 %v11117_v39, %v14219_v19  ;;  %v2721_v46 = vadd.f32 %v11128_v30, %v14221_v3 }
 0x29b   : > { %v11667_v58 = vpop.xlane.xlu0 %3750  ;;  %3894 = vadd.xlane.f32.xlu0 %v3473_v15  ;;  %v3318_v15 = vadd.f32 1.0, %v8211_v17  ;;  %v8215_v13 = vpop.eup %8214  ;;  %v3319_v55 = vadd.f32 1.0, %v8213_v5  ;;  %v11691_v25 = vmul.f32 0.5, %v2713_v61  ;;  %v14224_v17 = vld [vmem:[#allocation288_spill] sm:$0xff]  ;;  %v14226_v61 = vld [vmem:[#allocation291_spill] sm:$0xff] }
 0x29c   : > { %v11671_v14 = vpop.xlane.xlu1 %3752  ;;  %3896 = vadd.xlane.f32.xlu1 %v3474_v45  ;;  %v3532_v45 = vld [vmem:[#allocation2] sm:$0xff]  ;;  %v8217_v39 = vpop.eup %8216  ;;  %v2726_v29 = vadd.f32 %v14224_v17, %v14223_v44  ;;  %v11697_v19 = vmul.f32 0.5, %v2718_v53  ;;  %v3320_v6 = vadd.f32 1.0, %v8215_v13  ;;  %v2729_v3 = vadd.f32 %v14226_v61, %v14225_v36  ;;  %v3534_v61 = vld [vmem:[#allocation2 + $0x10] sm:$0xff] }
 0x29d   : > { %14216 = vst [vmem:[#allocation283_spill] sm:$0xff] %v11671_v14  ;;  %v3478_v5 = vmul.f32 %v3318_v15, %v11614_v59  ;;  %v3479_v53 = vmul.f32 %v3319_v55, %v11622_v32  ;;  %v3322_v44 = vadd.f32 1.0, %v8217_v39  ;;  %8228 = vtanh.f32 %v11691_v25  ;;  %v14228_v59 = vld [vmem:[#allocation231_spill] sm:$0xff]  ;;  %v14230_v39 = vld [vmem:[#allocation230_spill] sm:$0xff] }
 0x29e   : > { %v2734_v13 = vadd.f32 %v11161_v31, %v14228_v59  ;;  %8230 = vtanh.f32 %v11697_v19  ;;  %v3480_v32 = vmul.f32 %v3320_v6, %v11633_v22  ;;  %v11724_v55 = vmul.f32 0.5, %v2729_v3 }
 0x29f   : > { %v11683_v43 = vpop.xlane.xlu0 %3754  ;;  %3898 = vadd.xlane.f32.xlu0 %v3475_v56  ;;  %v8219_v56 = vpop.eup %8218  ;;  %v2737_v31 = vadd.f32 %v11172_v9, %v14230_v39  ;;  %v4014_v3 = vadd.f32 %v11357_v42, %v3534_v61  ;;  %v14231_v42 = vld [vmem:[#allocation116_spill] sm:$0xff] }
 0x2a0   : > { %14220 = vst [vmem:[#allocation286_spill] sm:$0xff] %v11683_v43  ;;  %v11688_v62 = vpop.xlane.xlu1 %3756  ;;  %3900 = vadd.xlane.f32.xlu1 %v3476_v24  ;;  %v4012_v24 = vadd.f32 %v11330_v33, %v3532_v45  ;;  %v14227_v43 = vld [vmem:[#allocation236_spill] sm:$0xff]  ;;  %v8221_v33 = vpop.eup %8220  ;;  %v3321_v15 = vadd.f32 1.0, %v8219_v56  ;;  %v3533_v56 = vld [vmem:[#allocation2 + $0x8] sm:$0xff] }
 0x2a1   : > { %14222 = vst [vmem:[#allocation367_spill] sm:$0xff] %v11688_v62  ;;  %v11705_v62 = vmul.f32 0.5, %v2721_v46  ;;  %v2742_v14 = vadd.f32 %v11152_v49, %v14227_v43  ;;  %v11716_v46 = vmul.f32 0.5, %v2726_v29  ;;  %v14229_v49 = vld [vmem:[#allocation235_spill] sm:$0xff]  ;;  %v11734_v43 = vmul.f32 0.5, %v2734_v13  ;;  %4175 = vst.msk [vmem:[#allocation2 + $0x10] sm:$0xff] %vm4172_vm3, %v4014_v3 }
 0x2a2   : > { %4173 = vst.msk [vmem:[#allocation2] sm:$0xff] %vm4172_vm3, %v4012_v24  ;;  %v2745_v45 = vadd.f32 %v11166_v52, %v14229_v49  ;;  %v3482_v52 = vmul.f32 %v3322_v44, %v11639_v51  ;;  %v3323_v49 = vadd.f32 1.0, %v8221_v33  ;;  %v3481_v22 = vmul.f32 %v3321_v15, %v11645_v37  ;;  %v3536_v15 = vld [vmem:[#allocation2 + $0x20] sm:$0xff] }
 0x2a3   : > { %v11699_v30 = vpop.xlane.xlu0 %3758  ;;  %3902 = vadd.xlane.f32.xlu0 %v3477_v38  ;;  %8232 = vtanh.f32 %v11705_v62  ;;  %v11729_v29 = vmul.f32 0.5, %v2742_v14  ;;  %v3535_v14 = vld [vmem:[#allocation2 + $0x18] sm:$0xff]  ;;  %v11744_v51 = vmul.f32 0.5, %v2737_v31  ;;  %v4013_v44 = vadd.f32 %v11365_v8, %v3533_v56 }
 0x2a4   : > { %v11709_v17 = vpop.xlane.xlu1 %3760  ;;  %3904 = vadd.xlane.f32.xlu1 %v3478_v5  ;;  %v8223_v5 = vpop.eup %8222  ;;  %8234 = vtanh.f32 %v11716_v46  ;;  %v11738_v9 = vmul.f32 0.5, %v2745_v45  ;;  %v2758_v13 = vadd.f32 %v11196_v1, %v14231_v42  ;;  %v4015_v33 = vadd.f32 %v11376_v40, %v3535_v14  ;;  %v3540_v42 = vld [vmem:[#allocation2 + $0x40] sm:$0xff] }
 0x2a5   : > { %v8225_v39 = vpop.eup %8224  ;;  %v3324_v59 = vadd.f32 1.0, %v8223_v5  ;;  %8236 = vtanh.f32 %v11724_v55  ;;  %4174 = vst.msk [vmem:[#allocation2 + $0x8] sm:$0xff] %vm4172_vm3, %v4013_v44  ;;  %v3483_v8 = vmul.f32 %v3323_v49, %v11655_v23 }
 0x2a6   : > { %8238 = vtanh.f32 %v11729_v29  ;;  %v3325_v45 = vadd.f32 1.0, %v8225_v39  ;;  %4176 = vst.msk [vmem:[#allocation2 + $0x18] sm:$0xff] %vm4172_vm3, %v4015_v33  ;;  %v11768_v49 = vmul.f32 0.5, %v2758_v13  ;;  %v14233_v39 = vld [vmem:[#allocation101_spill] sm:$0xff]  ;;  %v14234_v33 = vld [vmem:[#allocation240_spill] sm:$0xff] }
 0x2a7   : > { %v11721_v38 = vpop.xlane.xlu0 %3762  ;;  %3906 = vadd.xlane.f32.xlu0 %v3479_v53  ;;  %v8227_v53 = vpop.eup %8226  ;;  %8240 = vtanh.f32 %v11734_v43  ;;  %v3484_v1 = vmul.f32 %v3324_v59, %v11665_v0 }
 0x2a8   : > { %v11731_v24 = vpop.xlane.xlu1 %3764  ;;  %3908 = vadd.xlane.f32.xlu1 %v3480_v32  ;;  %8242 = vtanh.f32 %v11738_v9  ;;  %v14232_v32 = vld [vmem:[#allocation237_spill] sm:$0xff]  ;;  %v8229_v5 = vpop.eup %8228  ;;  %v3326_v56 = vadd.f32 1.0, %v8227_v53  ;;  %v3485_v0 = vmul.f32 %v3325_v45, %v11675_v11  ;;  %v3537_v53 = vld [vmem:[#allocation2 + $0x28] sm:$0xff] }
 0x2a9   : > { %v2750_v31 = vadd.f32 %v11205_v47, %v14232_v32  ;;  %8244 = vtanh.f32 %v11744_v51  ;;  %v8231_v40 = vpop.eup %8230  ;;  %v2753_v47 = vadd.f32 %v11216_v7, %v14233_v39  ;;  %v3327_v3 = vadd.f32 1.0, %v8229_v5  ;;  %v3538_v7 = vld [vmem:[#allocation2 + $0x30] sm:$0xff] }
 0x2aa   : > { %v3328_v44 = vadd.f32 1.0, %v8231_v40  ;;  %8246 = vtanh.f32 %v11768_v49  ;;  %v4017_v40 = vadd.f32 %v11411_v48, %v3537_v53 }
 0x2ab   : > { %v11741_v6 = vpop.xlane.xlu0 %3766  ;;  %3910 = vadd.xlane.f32.xlu0 %v3481_v22  ;;  %v11773_v59 = vmul.f32 0.5, %v2750_v31  ;;  %v11784_v45 = vmul.f32 0.5, %v2753_v47  ;;  %v3539_v31 = vld [vmem:[#allocation2 + $0x38] sm:$0xff]  ;;  %v4018_v47 = vadd.f32 %v11414_v60, %v3538_v7  ;;  %v4020_v7 = vadd.f32 %v11440_v2, %v3540_v42 }
 0x2ac   : > { %v11749_v37 = vpop.xlane.xlu1 %3768  ;;  %3912 = vadd.xlane.f32.xlu1 %v3482_v52  ;;  %v4016_v52 = vadd.f32 %v11390_v20, %v3536_v15  ;;  %v3486_v20 = vmul.f32 %v3326_v56, %v11678_v10  ;;  %v2761_v15 = vadd.f32 %v11210_v4, %v14234_v33  ;;  %v3487_v10 = vmul.f32 %v3327_v3, %v11691_v25  ;;  %v14235_v56 = vld [vmem:[#allocation241_spill] sm:$0xff] }
 0x2ad   : > { %v8233_v22 = vpop.eup %8232  ;;  %8248 = vtanh.f32 %v11773_v59  ;;  %v2766_v4 = vadd.f32 %v11249_v27, %v14235_v56  ;;  %v3488_v33 = vmul.f32 %v3328_v44, %v11697_v19  ;;  %4178 = vst.msk [vmem:[#allocation2 + $0x28] sm:$0xff] %vm4172_vm3, %v4017_v40  ;;  %v4019_v25 = vadd.f32 %v11431_v12, %v3539_v31  ;;  %v14236_v19 = vld [vmem:[#allocation112_spill] sm:$0xff]  ;;  %4179 = vst.msk [vmem:[#allocation2 + $0x30] sm:$0xff] %vm4172_vm3, %v4018_v47  ;;  %v3541_v47 = vld [vmem:[#allocation2 + $0x48] sm:$0xff] }
 0x2ae   : > { %4177 = vst.msk [vmem:[#allocation2 + $0x20] sm:$0xff] %vm4172_vm3, %v4016_v52  ;;  %v8235_v13 = vpop.eup %8234  ;;  %v3329_v11 = vadd.f32 1.0, %v8233_v22  ;;  %v11795_v39 = vmul.f32 0.5, %v2761_v15  ;;  %8250 = vtanh.f32 %v11784_v45  ;;  %v2769_v60 = vadd.f32 %v11260_v63, %v14236_v19  ;;  %v14238_v63 = vld [vmem:[#allocation244_spill] sm:$0xff]  ;;  %4181 = vst.msk [vmem:[#allocation2 + $0x40] sm:$0xff] %vm4172_vm3, %v4020_v7 }
 0x2af   : > { %v11760_v61 = vpop.xlane.xlu0 %3770  ;;  %3914 = vadd.xlane.f32.xlu0 %v3483_v8  ;;  %v8237_v5 = vpop.eup %8236  ;;  %v3330_v22 = vadd.f32 1.0, %v8235_v13  ;;  %v14237_v13 = vld [vmem:[#allocation128_spill] sm:$0xff]  ;;  %v11808_v12 = vmul.f32 0.5, %v2766_v4  ;;  %4180 = vst.msk [vmem:[#allocation2 + $0x38] sm:$0xff] %vm4172_vm3, %v4019_v25 }
 0x2b0   : > { %v11766_v23 = vpop.xlane.xlu1 %3772  ;;  %3916 = vadd.xlane.f32.xlu1 %v3484_v1  ;;  %v8239_v1 = vpop.eup %8238  ;;  %v3331_v48 = vadd.f32 1.0, %v8237_v5  ;;  %v3489_v53 = vmul.f32 %v3329_v11, %v11705_v62  ;;  %v2774_v15 = vadd.f32 %v11240_v18, %v14237_v13  ;;  %8252 = vtanh.f32 %v11795_v39  ;;  %v14250_v13 = vld [vmem:[#allocation341_spill] sm:$0xff] }
 0x2b1   : > { %v3334_v44 = vadd.f32 1.0, %v8239_v1  ;;  %v3490_v62 = vmul.f32 %v3330_v22, %v11716_v46  ;;  %v14240_v1 = vld [vmem:[#allocation140_spill] sm:$0xff]  ;;  %v11824_v42 = vmul.f32 0.5, %v2769_v60  ;;  %v14241_v46 = vld [vmem:[#allocation245_spill] sm:$0xff]  ;;  %8254 = vtanh.f32 %v11808_v12 }
 0x2b2   : > { %v2790_v18 = vadd.f32 %v11284_v28, %v14240_v1  ;;  %v3491_v2 = vmul.f32 %v3331_v48, %v11724_v55  ;;  %v11829_v25 = vmul.f32 0.5, %v2774_v15  ;;  %v14243_v28 = vld [vmem:[#allocation250_spill] sm:$0xff]  ;;  %v14247_v1 = vld [vmem:[#allocation319_spill] sm:$0xff]  ;;  %v4021_v19 = vadd.f32 %v14250_v13, %v3541_v47  ;;  %v14254_v13 = vld [vmem:[#allocation148_spill] sm:$0xff] }
 0x2b3   : > { %v11776_v14 = vpop.xlane.xlu0 %3774  ;;  %3918 = vadd.xlane.f32.xlu0 %v3485_v0  ;;  %v8241_v0 = vpop.eup %8240  ;;  %8256 = vtanh.f32 %v11824_v42 }
 0x2b4   : > { %v11781_v8 = vpop.xlane.xlu1 %3776  ;;  %3920 = vadd.xlane.f32.xlu1 %v3486_v20  ;;  %v8243_v20 = vpop.eup %8242  ;;  %v3332_v11 = vadd.f32 1.0, %v8241_v0  ;;  %v14242_v0 = vld [vmem:[#allocation315_spill] sm:$0xff]  ;;  %8258 = vtanh.f32 %v11829_v25  ;;  %4182 = vst.msk [vmem:[#allocation2 + $0x48] sm:$0xff] %vm4172_vm3, %v4021_v19 }
 0x2b5   : > { %v8245_v27 = vpop.eup %8244  ;;  %v3335_v31 = vadd.f32 1.0, %v8243_v20  ;;  %v2782_v22 = vadd.f32 %v14242_v0, %v14241_v46  ;;  %v3494_v20 = vmul.f32 %v3334_v44, %v11729_v29  ;;  %v11843_v46 = vmul.f32 0.5, %v2790_v18  ;;  %v14255_v18 = vld [vmem:[#allocation327_spill] sm:$0xff] }
 0x2b6   : > { %v8247_v55 = vpop.eup %8246  ;;  %v3492_v48 = vmul.f32 %v3332_v11, %v11734_v43  ;;  %v14253_v11 = vld [vmem:[#allocation325_spill] sm:$0xff]  ;;  %v2809_v47 = vadd.f32 %v14255_v18, %v14254_v13  ;;  %v14260_v19 = vld [vmem:[#allocation331_spill] sm:$0xff]  ;;  %v14261_v13 = vld [vmem:[#allocation342_spill] sm:$0xff] }
 0x2b7   : > { %v11791_v52 = vpop.xlane.xlu0 %3778  ;;  %3922 = vadd.xlane.f32.xlu0 %v3487_v10  ;;  %v14239_v10 = vld [vmem:[#allocation309_spill] sm:$0xff]  ;;  %v3495_v60 = vmul.f32 %v3335_v31, %v11738_v9  ;;  %v8249_v44 = vpop.eup %8248  ;;  %v11851_v43 = vmul.f32 0.5, %v2782_v22  ;;  %v14252_v9 = vld [vmem:[#allocation252_spill] sm:$0xff] }
 0x2b8   : > { %v11799_v3 = vpop.xlane.xlu1 %3780  ;;  %3924 = vadd.xlane.f32.xlu1 %v3488_v33  ;;  %v2777_v40 = vadd.f32 %v14239_v10, %v14238_v63  ;;  %v3333_v33 = vadd.f32 1.0, %v8245_v27  ;;  %v14244_v27 = vld [vmem:[#allocation317_spill] sm:$0xff]  ;;  %v3542_v10 = vld [vmem:[#allocation2 + $0x50] sm:$0xff]  ;;  %v14248_v63 = vld [vmem:[#allocation258_spill] sm:$0xff]  ;;  %v2798_v31 = vadd.f32 %v14253_v11, %v14252_v9 }
 0x2b9   : > { %v2793_v7 = vadd.f32 %v14244_v27, %v14243_v28  ;;  %v14249_v27 = vld [vmem:[#allocation323_spill] sm:$0xff]  ;;  %v14259_v11 = vld [vmem:[#allocation269_spill] sm:$0xff] }
 0x2ba   : > { %v11838_v0 = vmul.f32 0.5, %v2777_v40  ;;  %v3493_v15 = vmul.f32 %v3333_v33, %v11744_v51  ;;  %v2806_v28 = vadd.f32 %v14249_v27, %v14248_v63  ;;  %v4022_v40 = vadd.f32 %v11465_v16, %v3542_v10  ;;  %v3543_v51 = vld [vmem:[#allocation2 + $0x58] sm:$0xff]  ;;  %v8251_v27 = vpop.eup %8250  ;;  %v14257_v10 = vld [vmem:[#allocation136_spill] sm:$0xff] }
 0x2bb   : > { %v11812_v5 = vpop.xlane.xlu0 %3782  ;;  %3926 = vadd.xlane.f32.xlu0 %v3489_v53  ;;  %v3338_v33 = vadd.f32 1.0, %v8247_v55  ;;  %v3336_v63 = vadd.f32 1.0, %v8249_v44  ;;  %v14258_v55 = vld [vmem:[#allocation329_spill] sm:$0xff]  ;;  %v2822_v18 = vadd.f32 %v14260_v19, %v14259_v11  ;;  %v4023_v9 = vadd.f32 %v14261_v13, %v3543_v51  ;;  %v14263_v44 = vld [vmem:[#allocation160_spill] sm:$0xff]  ;;  %v14267_v13 = vld [vmem:[#allocation335_spill] sm:$0xff] }
 0x2bc   : > { %v11821_v4 = vpop.xlane.xlu1 %3784  ;;  %3928 = vadd.xlane.f32.xlu1 %v3490_v62  ;;  %v14246_v62 = vld [vmem:[#allocation124_spill] sm:$0xff]  ;;  %8260 = vtanh.f32 %v11838_v0  ;;  %4183 = vst.msk [vmem:[#allocation2 + $0x50] sm:$0xff] %vm4172_vm3, %v4022_v40  ;;  %v14265_v40 = vld [vmem:[#allocation345_spill] sm:$0xff]  ;;  %v3337_v36 = vadd.f32 1.0, %v8251_v27  ;;  %v11885_v19 = vmul.f32 0.5, %v2809_v47 }
 0x2bd   : > { %v2785_v29 = vadd.f32 %v14247_v1, %v14246_v62  ;;  %v11857_v1 = vmul.f32 0.5, %v2793_v7  ;;  %8262 = vtanh.f32 %v11843_v46  ;;  %v11871_v7 = vmul.f32 0.5, %v2806_v28  ;;  %v8253_v28 = vpop.eup %8252  ;;  %v14266_v51 = vld [vmem:[#allocation172_spill] sm:$0xff]  ;;  %4184 = vst.msk [vmem:[#allocation2 + $0x58] sm:$0xff] %vm4172_vm3, %v4023_v9  ;;  %v14272_v9 = vld [vmem:[#allocation246_spill] sm:$0xff] }
 0x2be   : > { %8264 = vtanh.f32 %v11851_v43  ;;  %v2825_v11 = vadd.f32 %v14267_v13, %v14266_v51  ;;  %v8255_v47 = vpop.eup %8254  ;;  %v14271_v13 = vld [vmem:[#allocation282_spill] sm:$0xff] }
 0x2bf   : > { %v11834_v53 = vpop.xlane.xlu0 %3786  ;;  %3930 = vadd.xlane.f32.xlu0 %v3491_v2  ;;  %v3544_v2 = vld [vmem:[#allocation2 + $0x60] sm:$0xff]  ;;  %v11865_v16 = vmul.f32 0.5, %v2785_v29  ;;  %v11879_v29 = vmul.f32 0.5, %v2798_v31  ;;  %8266 = vtanh.f32 %v11857_v1  ;;  %v3496_v31 = vmul.f32 %v3336_v63, %v11773_v59 }
 0x2c0   : > { %14245 = vst [vmem:[#allocation288_spill] sm:$0xff] %v11834_v53  ;;  %v11848_v56 = vpop.xlane.xlu1 %3788  ;;  %3932 = vadd.xlane.f32.xlu1 %v3492_v48  ;;  %v2801_v48 = vadd.f32 %v14258_v55, %v14257_v10  ;;  %v14264_v55 = vld [vmem:[#allocation333_spill] sm:$0xff]  ;;  %v4024_v32 = vadd.f32 %v14265_v40, %v3544_v2  ;;  %v14270_v2 = vld [vmem:[#allocation251_spill] sm:$0xff]  ;;  %v11900_v40 = vmul.f32 0.5, %v2822_v18  ;;  %v2838_v51 = vadd.f32 %v14272_v9, %v14271_v13 }
 0x2c1   : > { %14251 = vst [vmem:[#allocation291_spill] sm:$0xff] %v11848_v56  ;;  %v2814_v10 = vadd.f32 %v14264_v55, %v14263_v44  ;;  %8268 = vtanh.f32 %v11865_v16  ;;  %v3545_v44 = vld [vmem:[#allocation2 + $0x68] sm:$0xff]  ;;  %v3339_v59 = vadd.f32 1.0, %v8253_v28  ;;  %v3498_v18 = vmul.f32 %v3338_v33, %v11768_v49  ;;  %v14293_v56 = vld [vmem:[#allocation357_spill] sm:$0xff] }
 0x2c2   : > { %v11894_v55 = vmul.f32 0.5, %v2801_v48  ;;  %4185 = vst.msk [vmem:[#allocation2 + $0x60] sm:$0xff] %vm4172_vm3, %v4024_v32  ;;  %8270 = vtanh.f32 %v11871_v7  ;;  %v14274_v48 = vld [vmem:[#allocation276_spill] sm:$0xff]  ;;  %v11914_v9 = vmul.f32 0.5, %v2825_v11  ;;  %v3340_v28 = vadd.f32 1.0, %v8255_v47 }
 0x2c3   : > { %v11862_v22 = vpop.xlane.xlu0 %3790  ;;  %3934 = vadd.xlane.f32.xlu0 %v3493_v15  ;;  %8272 = vtanh.f32 %v11879_v29  ;;  %v11907_v63 = vmul.f32 0.5, %v2814_v10  ;;  %v11923_v49 = vmul.f32 0.5, %v2838_v51  ;;  %v3499_v47 = vmul.f32 %v3339_v59, %v11795_v39  ;;  %v14280_v51 = vld [vmem:[#allocation281_spill] sm:$0xff] }
 0x2c4   : > { %14256 = vst [vmem:[#allocation309_spill] sm:$0xff] %v11862_v22  ;;  %v11876_v62 = vpop.xlane.xlu1 %3792  ;;  %3936 = vadd.xlane.f32.xlu1 %v3494_v20  ;;  %v14269_v20 = vld [vmem:[#allocation156_spill] sm:$0xff]  ;;  %8274 = vtanh.f32 %v11885_v19 }
 0x2c5   : > { %14262 = vst [vmem:[#allocation315_spill] sm:$0xff] %v11876_v62  ;;  %v2817_v27 = vadd.f32 %v14270_v2, %v14269_v20  ;;  %v14275_v2 = vld [vmem:[#allocation254_spill] sm:$0xff]  ;;  %v3546_v20 = vld [vmem:[#allocation2 + $0x70] sm:$0xff]  ;;  %v3497_v62 = vmul.f32 %v3337_v36, %v11784_v45  ;;  %8276 = vtanh.f32 %v11894_v55 }
 0x2c6   : > { %v2830_v32 = vadd.f32 %v14275_v2, %v14274_v48  ;;  %v3547_v48 = vld [vmem:[#allocation2 + $0x78] sm:$0xff]  ;;  %8278 = vtanh.f32 %v11900_v40  ;;  %v14278_v36 = vld [vmem:[#allocation350_spill] sm:$0xff] }
 0x2c7   : > { %v11890_v15 = vpop.xlane.xlu0 %3794  ;;  %3938 = vadd.xlane.f32.xlu0 %v3495_v60  ;;  %v8257_v60 = vpop.eup %8256  ;;  %v11919_v10 = vmul.f32 0.5, %v2817_v27  ;;  %v4026_v45 = vadd.f32 %v14278_v36, %v3546_v20  ;;  %8280 = vtanh.f32 %v11907_v63  ;;  %v14281_v20 = vld [vmem:[#allocation339_spill] sm:$0xff] }
 0x2c8   : > { %14268 = vst [vmem:[#allocation317_spill] sm:$0xff] %v11890_v15  ;;  %v11904_v15 = vpop.xlane.xlu1 %3796  ;;  %3940 = vadd.xlane.f32.xlu1 %v3496_v31  ;;  %v8259_v31 = vpop.eup %8258  ;;  %v11930_v27 = vmul.f32 0.5, %v2830_v32  ;;  %8282 = vtanh.f32 %v11914_v9  ;;  %v2841_v36 = vadd.f32 %v14281_v20, %v14280_v51 }
 0x2c9   : > { %14273 = vst [vmem:[#allocation319_spill] sm:$0xff] %v11904_v15  ;;  %v14277_v15 = vld [vmem:[#allocation349_spill] sm:$0xff]  ;;  %v8261_v11 = vpop.eup %8260  ;;  %4187 = vst.msk [vmem:[#allocation2 + $0x70] sm:$0xff] %vm4172_vm3, %v4026_v45  ;;  %v3342_v32 = vadd.f32 1.0, %v8259_v31  ;;  %8284 = vtanh.f32 %v11919_v10 }
 0x2ca   : > { %v4025_v2 = vadd.f32 %v14277_v15, %v3545_v44  ;;  %v3548_v44 = vld [vmem:[#allocation2 + $0x80] sm:$0xff]  ;;  %v8263_v15 = vpop.eup %8262  ;;  %8286 = vtanh.f32 %v11923_v49  ;;  %v11951_v31 = vmul.f32 0.5, %v2841_v36 }
 0x2cb   : > { %v11916_v13 = vpop.xlane.xlu0 %3798  ;;  %3942 = vadd.xlane.f32.xlu0 %v3497_v62  ;;  %v4027_v62 = vadd.f32 %v11527_v35, %v3547_v48  ;;  %v8265_v59 = vpop.eup %8264  ;;  %v4028_v45 = vadd.f32 %v11534_v50, %v3548_v44  ;;  %8288 = vtanh.f32 %v11930_v27  ;;  %v3343_v48 = vadd.f32 1.0, %v8261_v11 }
 0x2cc   : > { %14276 = vst [vmem:[#allocation323_spill] sm:$0xff] %v11916_v13  ;;  %v11926_v33 = vpop.xlane.xlu1 %3800  ;;  %4186 = vst.msk [vmem:[#allocation2 + $0x68] sm:$0xff] %vm4172_vm3, %v4025_v2  ;;  %3944 = vadd.xlane.f32.xlu1 %v3498_v18  ;;  %v3341_v13 = vadd.f32 1.0, %v8257_v60  ;;  %v14283_v18 = vld [vmem:[#allocation275_spill] sm:$0xff]  ;;  %v14284_v2 = vld [vmem:[#allocation340_spill] sm:$0xff]  ;;  %v8267_v22 = vpop.eup %8266  ;;  %v3502_v50 = vmul.f32 %v3342_v32, %v11829_v25  ;;  %v3344_v44 = vadd.f32 1.0, %v8265_v59  ;;  %8290 = vtanh.f32 %v11951_v31 }
 0x2cd   : > { %14279 = vst [vmem:[#allocation341_spill] sm:$0xff] %v11926_v33  ;;  %v3500_v33 = vmul.f32 %v3340_v28, %v11808_v12  ;;  %v2833_v60 = vadd.f32 %v14284_v2, %v14283_v18  ;;  %4188 = vst.msk [vmem:[#allocation2 + $0x78] sm:$0xff] %vm4172_vm3, %v4027_v62  ;;  %v8269_v35 = vpop.eup %8268  ;;  %v3549_v18 = vld [vmem:[#allocation2 + $0x88] sm:$0xff]  ;;  %v3346_v11 = vadd.f32 1.0, %v8263_v15  ;;  %v3503_v36 = vmul.f32 %v3343_v48, %v11838_v0  ;;  %v3551_v32 = vld [vmem:[#allocation2 + $0x98] sm:$0xff] }
 0x2ce   : > { %v8271_v12 = vpop.eup %8270  ;;  %v3501_v28 = vmul.f32 %v3341_v13, %v11824_v42  ;;  %14286 = vst [vmem:[#allocation329_spill] sm:$0xff] %v11951_v31  ;;  %4189 = vst.msk [vmem:[#allocation2 + $0x80] sm:$0xff] %vm4172_vm3, %v4028_v45  ;;  %v3550_v42 = vld [vmem:[#allocation2 + $0x90] sm:$0xff]  ;;  %v3345_v45 = vadd.f32 1.0, %v8269_v35  ;;  %v14290_v25 = vld [vmem:[#allocation343_spill] sm:$0xff]  ;;  %v4031_v31 = vadd.f32 %v11575_v26, %v3551_v32 }
 0x2cf   : > { %v11938_v39 = vpop.xlane.xlu0 %3802  ;;  %3946 = vadd.xlane.f32.xlu0 %v3499_v47  ;;  %v8273_v62 = vpop.eup %8272  ;;  %v11957_v51 = vmul.f32 0.5, %v2833_v60  ;;  %v14292_v15 = vld [vmem:[#allocation356_spill] sm:$0xff]  ;;  %v4030_v53 = vadd.f32 %v14293_v56, %v3550_v42  ;;  %v3552_v0 = vld [vmem:[#allocation2 + $0xa0] sm:$0xff] }
 0x2d0   : > { %14282 = vst [vmem:[#allocation325_spill] sm:$0xff] %v11938_v39  ;;  %v11947_v20 = vpop.xlane.xlu1 %3804  ;;  %3948 = vadd.xlane.f32.xlu1 %v3500_v33  ;;  %v8275_v47 = vpop.eup %8274  ;;  %4192 = vst.msk [vmem:[#allocation2 + $0x98] sm:$0xff] %vm4172_vm3, %v4031_v31 }
 0x2d1   : > { %14285 = vst [vmem:[#allocation327_spill] sm:$0xff] %v11947_v20  ;;  %v8277_v33 = vpop.eup %8276  ;;  %8292 = vtanh.f32 %v11957_v51  ;;  %4191 = vst.msk [vmem:[#allocation2 + $0x90] sm:$0xff] %vm4172_vm3, %v4030_v53 }
 0x2d2   : > { %v8279_v13 = vpop.eup %8278 }
 0x2d3   : > { %v11954_v2 = vpop.xlane.xlu0 %3806  ;;  %3950 = vadd.xlane.f32.xlu0 %v3501_v28  ;;  %v8281_v39 = vpop.eup %8280  ;;  %v4029_v28 = vadd.f32 %v14292_v15, %v3549_v18  ;;  %v3350_v18 = vadd.f32 1.0, %v8271_v12  ;;  %v14295_v15 = vld [vmem:[#allocation294_spill] sm:$0xff]  ;;  %v14301_v12 = vld [vmem:[#allocation5_spill] sm:$0xff] }
 0x2d4   : > { %14287 = vst [vmem:[#allocation331_spill] sm:$0xff] %v11954_v2  ;;  %v11959_v20 = vpop.xlane.xlu1 %3808  ;;  %3952 = vadd.xlane.f32.xlu1 %v3502_v50  ;;  %v14289_v2 = vld [vmem:[#allocation199_spill] sm:$0xff]  ;;  %v8283_v50 = vpop.eup %8282 }
 0x2d5   : > { %14288 = vst [vmem:[#allocation342_spill] sm:$0xff] %v11959_v20  ;;  %v2846_v59 = vadd.f32 %v14290_v25, %v14289_v2  ;;  %v3504_v20 = vmul.f32 %v3344_v44, %v11851_v43  ;;  %v8285_v48 = vpop.eup %8284  ;;  %v3506_v25 = vmul.f32 %v3346_v11, %v11843_v46  ;;  %v3347_v2 = vadd.f32 1.0, %v8267_v22  ;;  %4190 = vst.msk [vmem:[#allocation2 + $0x88] sm:$0xff] %vm4172_vm3, %v4029_v28  ;;  %v14298_v28 = vld [vmem:[#allocation207_spill] sm:$0xff] }
 0x2d6   : > { %v8287_v43 = vpop.eup %8286  ;;  %v3505_v44 = vmul.f32 %v3345_v45, %v11865_v16  ;;  %v3348_v22 = vadd.f32 1.0, %v8273_v62  ;;  %v3351_v11 = vadd.f32 1.0, %v8275_v47  ;;  %v14302_v45 = vld [vmem:[#allocation51_spill] sm:$0xff]  ;;  %v3352_v62 = vadd.f32 1.0, %v8281_v39 }
 0x2d7   : > { %v11965_v60 = vpop.xlane.xlu0 %3810  ;;  %3954 = vadd.xlane.f32.xlu0 %v3503_v36  ;;  %v11979_v42 = vmul.f32 0.5, %v2846_v59  ;;  %v8289_v46 = vpop.eup %8288  ;;  %v11990_v32 = vadd.f32 %v14302_v45, %v14301_v12  ;;  %v3349_v59 = vadd.f32 1.0, %v8277_v33  ;;  %v3507_v53 = vmul.f32 %v3347_v2, %v11857_v1  ;;  %v3554_v2 = vld [vmem:[#allocation2 + $0xb0] sm:$0xff]  ;;  %v14308_v12 = vld [vmem:[#allocation262_spill] sm:$0xff] }
 0x2d8   : > { %14291 = vst [vmem:[#allocation333_spill] sm:$0xff] %v11965_v60  ;;  %v11971_v35 = vpop.xlane.xlu1 %3812  ;;  %3956 = vadd.xlane.f32.xlu1 %v3504_v20  ;;  %v14296_v60 = vld [vmem:[#allocation256_spill] sm:$0xff]  ;;  %v14300_v20 = vld [vmem:[#allocation361_spill] sm:$0xff]  ;;  %v3355_v47 = vadd.f32 1.0, %v8283_v50  ;;  %v3358_v31 = vadd.f32 1.0, %v8287_v43  ;;  %v12004_v1 = vmul.f32 %v3351_v11, %v11885_v19  ;;  %v8291_v50 = vpop.eup %8290 }
 0x2d9   : > { %14294 = vst [vmem:[#allocation345_spill] sm:$0xff] %v11971_v35  ;;  %v2854_v56 = vadd.f32 %v14296_v60, %v14295_v15  ;;  %v14299_v35 = vld [vmem:[#allocation346_spill] sm:$0xff]  ;;  %v4032_v16 = vadd.f32 %v14300_v20, %v3552_v0  ;;  %v3354_v60 = vadd.f32 1.0, %v8279_v13  ;;  %8294 = vtanh.f32 %v11979_v42  ;;  %v3553_v20 = vld [vmem:[#allocation2 + $0xa8] sm:$0xff]  ;;  %v14305_v43 = vld [vmem:[#allocation196_spill] sm:$0xff] }
 0x2da   : > { %v2857_v26 = vadd.f32 %v14299_v35, %v14298_v28  ;;  %v3356_v35 = vadd.f32 1.0, %v8289_v46  ;;  %v3510_v13 = vmul.f32 %v3350_v18, %v11871_v7  ;;  %v3555_v18 = vld [vmem:[#allocation2 + $0xb8] sm:$0xff]  ;;  %v12022_v11 = vmul.f32 %v3355_v47, %v11914_v9  ;;  %v3558_v9 = vld [vmem:[#allocation2 + $0xd0] sm:$0xff]  ;;  %v3560_v47 = vld [vmem:[#allocation2 + $0xe0] sm:$0xff] }
 0x2db   : > { %v11982_v36 = vpop.xlane.xlu0 %3814  ;;  %3958 = vadd.xlane.f32.xlu0 %v3505_v44  ;;  %4193 = vst.msk [vmem:[#allocation2 + $0xa0] sm:$0xff] %vm4172_vm3, %v4032_v16  ;;  %v11996_v0 = vmul.f32 0.5, %v2854_v56  ;;  %v3508_v44 = vmul.f32 %v3348_v22, %v11879_v29  ;;  %v14306_v56 = vld [vmem:[#allocation348_spill] sm:$0xff]  ;;  %v14307_v16 = vld [vmem:[#allocation306_spill] sm:$0xff]  ;;  %v8293_v19 = vpop.eup %8292  ;;  %v12019_v22 = vmul.f32 %v3352_v62, %v11907_v63  ;;  %v12029_v45 = vmul.f32 %v3358_v31, %v11923_v49  ;;  %v3561_v31 = vld [vmem:[#allocation2 + $0xe8] sm:$0xff] }
 0x2dc   : > { %14297 = vst [vmem:[#allocation335_spill] sm:$0xff] %v11982_v36  ;;  %v11992_v15 = vpop.xlane.xlu1 %3816  ;;  %v3353_v36 = vadd.f32 1.0, %v8285_v48  ;;  %3960 = vadd.xlane.f32.xlu1 %v3506_v25  ;;  %v12006_v39 = vmul.f32 0.5, %v2857_v26  ;;  %v3509_v48 = vmul.f32 %v3349_v59, %v11894_v55  ;;  %v12010_v25 = vmul.f32 %v3354_v60, %v11900_v40  ;;  %v3556_v26 = vld [vmem:[#allocation2 + $0xc0] sm:$0xff]  ;;  %v3557_v60 = vld [vmem:[#allocation2 + $0xc8] sm:$0xff]  ;;  %v3567_v28 = vld [vmem:[#allocation2 + $0x118] sm:$0xff] }
 0x2dd   : > { %14303 = vst [vmem:[#allocation251_spill] sm:$0xff] %v11996_v0  ;;  %v2849_v46 = vadd.f32 %v14306_v56, %v14305_v43  ;;  %v2870_v7 = vadd.f32 %v14308_v12, %v14307_v16  ;;  %v4033_v40 = vadd.f32 %v11603_v34, %v3553_v20  ;;  %v12032_v59 = vmul.f32 %v3356_v35, %v11930_v27  ;;  %v14309_v34 = vld [vmem:[#allocation300_spill] sm:$0xff]  ;;  %v3564_v56 = vld [vmem:[#allocation2 + $0x100] sm:$0xff]  ;;  %v3565_v12 = vld [vmem:[#allocation2 + $0x108] sm:$0xff] }
 0x2de   : > { %14304 = vst [vmem:[#allocation246_spill] sm:$0xff] %v12006_v39  ;;  %v12025_v55 = vmul.f32 %v3353_v36, %v11919_v10  ;;  %8296 = vtanh.f32 %v11996_v0  ;;  %v4034_v63 = vadd.f32 %v11610_v41, %v3554_v2  ;;  %v12038_v10 = vadd.f32 1.0, %v8291_v50  ;;  %v14310_v36 = vld [vmem:[#allocation351_spill] sm:$0xff]  ;;  %v3562_v35 = vld [vmem:[#allocation2 + $0xf0] sm:$0xff]  ;;  %v3563_v50 = vld [vmem:[#allocation2 + $0xf8] sm:$0xff] }
 0x2df   : > { %v11999_v33 = vpop.xlane.xlu0 %3818  ;;  %3962 = vadd.xlane.f32.xlu0 %v3507_v53  ;;  %v3559_v53 = vld [vmem:[#allocation2 + $0xd8] sm:$0xff]  ;;  %8298 = vtanh.f32 %v12006_v39  ;;  %v2862_v49 = vadd.f32 %v14310_v36, %v14309_v34  ;;  %4194 = vst.msk [vmem:[#allocation2 + $0xa8] sm:$0xff] %vm4172_vm3, %v4033_v40  ;;  %v4035_v27 = vadd.f32 %v11619_v21, %v3555_v18  ;;  %v3357_v41 = vadd.f32 1.0, %v8293_v19  ;;  %v14316_v43 = vld [vmem:[#allocation355_spill] sm:$0xff] }
 0x2e0   : > { %v12016_v29 = vpop.xlane.xlu1 %3820  ;;  %3964 = vadd.xlane.f32.xlu1 %v3508_v44  ;;  %v12045_v20 = vmul.f32 0.5, %v2849_v46  ;;  %v12047_v44 = vmul.f32 0.5, %v2870_v7  ;;  %4195 = vst.msk [vmem:[#allocation2 + $0xb0] sm:$0xff] %vm4172_vm3, %v4034_v63  ;;  %v4036_v2 = vadd.f32 %v11627_v54, %v3556_v26  ;;  %v14311_v40 = vld [vmem:[#allocation305_spill] sm:$0xff]  ;;  %v4037_v46 = vadd.f32 %v11635_v57, %v3557_v60  ;;  %v3566_v63 = vld [vmem:[#allocation2 + $0x110] sm:$0xff]  ;;  %v3568_v54 = vld [vmem:[#allocation2 + $0x120] sm:$0xff] }
 0x2e1   : > { %v14312_v21 = vld [vmem:[#allocation353_spill] sm:$0xff]  ;;  %4196 = vst.msk [vmem:[#allocation2 + $0xb8] sm:$0xff] %vm4172_vm3, %v4035_v27  ;;  %v14315_v26 = vld [vmem:[#allocation299_spill] sm:$0xff]  ;;  %v3570_v60 = vld [vmem:[#allocation2 + $0x130] sm:$0xff] }
 0x2e2   : > { %v2873_v18 = vadd.f32 %v14312_v21, %v14311_v40  ;;  %v14313_v19 = vld [vmem:[#allocation273_spill] sm:$0xff]  ;;  %v2865_v39 = vadd.f32 %v14316_v43, %v14315_v26  ;;  %4197 = vst.msk [vmem:[#allocation2 + $0xc0] sm:$0xff] %vm4172_vm3, %v4036_v2  ;;  %v4041_v21 = vadd.f32 %v11667_v58, %v3561_v31  ;;  %v14318_v27 = vld [vmem:[#allocation283_spill] sm:$0xff]  ;;  %4198 = vst.msk [vmem:[#allocation2 + $0xc8] sm:$0xff] %vm4172_vm3, %v4037_v46  ;;  %8300 = vtanh.f32 %v12045_v20 }
 0x2e3   : > { %v12036_v62 = vpop.xlane.xlu0 %3822  ;;  %3966 = vadd.xlane.f32.xlu0 %v3509_v48  ;;  %v4038_v7 = vadd.f32 %v14313_v19, %v3558_v9  ;;  %v14314_v16 = vld [vmem:[#allocation365_spill] sm:$0xff]  ;;  %v14317_v48 = vld [vmem:[#allocation366_spill] sm:$0xff]  ;;  %v4042_v40 = vadd.f32 %v14318_v27, %v3562_v35  ;;  %v3569_v57 = vld [vmem:[#allocation2 + $0x128] sm:$0xff]  ;;  %v4045_v58 = vadd.f32 %v11699_v30, %v3565_v12  ;;  %v8295_v19 = vpop.eup %8294  ;;  %8302 = vtanh.f32 %v12047_v44 }
 0x2e4   : > { %v12051_v36 = vpop.xlane.xlu1 %3824  ;;  %v4039_v34 = vadd.f32 %v14314_v16, %v3559_v53  ;;  %3968 = vadd.xlane.f32.xlu1 %v3510_v13  ;;  %v4040_v0 = vadd.f32 %v14317_v48, %v3560_v47  ;;  %v12067_v16 = vmul.f32 0.5, %v2862_v49  ;;  %v14319_v13 = vld [vmem:[#allocation286_spill] sm:$0xff]  ;;  %v14320_v53 = vld [vmem:[#allocation367_spill] sm:$0xff]  ;;  %v3571_v31 = vld [vmem:[#allocation2 + $0x138] sm:$0xff]  ;;  %4202 = vst.msk [vmem:[#allocation2 + $0xe8] sm:$0xff] %vm4172_vm3, %v4041_v21  ;;  %v4047_v49 = vadd.f32 %v11721_v38, %v3567_v28 }
 0x2e5   : > { %4199 = vst.msk [vmem:[#allocation2 + $0xd0] sm:$0xff] %vm4172_vm3, %v4038_v7  ;;  %v4043_v43 = vadd.f32 %v14319_v13, %v3563_v50  ;;  %v4044_v47 = vadd.f32 %v14320_v53, %v3564_v56  ;;  %v3572_v35 = vld [vmem:[#allocation2 + $0x140] sm:$0xff]  ;;  %v3573_v2 = vld [vmem:[#allocation2 + $0x148] sm:$0xff]  ;;  %4203 = vst.msk [vmem:[#allocation2 + $0xf0] sm:$0xff] %vm4172_vm3, %v4042_v40  ;;  %v4048_v50 = vadd.f32 %v11731_v24, %v3568_v54 }
 0x2e6   : > { %4200 = vst.msk [vmem:[#allocation2 + $0xd8] sm:$0xff] %vm4172_vm3, %v4039_v34  ;;  %4201 = vst.msk [vmem:[#allocation2 + $0xe0] sm:$0xff] %vm4172_vm3, %v4040_v0  ;;  %v4046_v34 = vadd.f32 %v11709_v17, %v3566_v63  ;;  %v3574_v56 = vld [vmem:[#allocation2 + $0x150] sm:$0xff]  ;;  %v3575_v30 = vld [vmem:[#allocation2 + $0x158] sm:$0xff]  ;;  %v12086_v7 = vmul.f32 %v3357_v41, %v11957_v51  ;;  %v12088_v0 = vmul.f32 0.5, %v2873_v18  ;;  %v4049_v17 = vadd.f32 %v11741_v6, %v3569_v57 }
 0x2e7   : > { %v12065_v9 = vpop.xlane.xlu0 %3826  ;;  %v3576_v12 = vld [vmem:[#allocation2 + $0x160] sm:$0xff]  ;;  %3970 = vadd.xlane.f32.xlu0 %v12004_v1  ;;  %4204 = vst.msk [vmem:[#allocation2 + $0xf8] sm:$0xff] %vm4172_vm3, %v4043_v43  ;;  %4205 = vst.msk [vmem:[#allocation2 + $0x100] sm:$0xff] %vm4172_vm3, %v4044_v47  ;;  %v4050_v38 = vadd.f32 %v11749_v37, %v3570_v60  ;;  %v3577_v24 = vld [vmem:[#allocation2 + $0x168] sm:$0xff]  ;;  %v12097_v51 = vmul.f32 0.5, %v2865_v39  ;;  %v4051_v1 = vadd.f32 %v11760_v61, %v3571_v31  ;;  %8304 = vtanh.f32 %v12067_v16 }
 0x2e8   : > { %v12082_v46 = vpop.xlane.xlu1 %3828  ;;  %4206 = vst.msk [vmem:[#allocation2 + $0x108] sm:$0xff] %vm4172_vm3, %v4045_v58  ;;  %v3578_v28 = vld [vmem:[#allocation2 + $0x170] sm:$0xff]  ;;  %v3579_v40 = vld [vmem:[#allocation2 + $0x178] sm:$0xff]  ;;  %3972 = vadd.xlane.f32.xlu1 %v12019_v22  ;;  %4207 = vst.msk [vmem:[#allocation2 + $0x110] sm:$0xff] %vm4172_vm3, %v4046_v34  ;;  %v4052_v6 = vadd.f32 %v11766_v23, %v3572_v35  ;;  %v12106_v22 = vadd.f32 1.0, %v8295_v19  ;;  %v4053_v39 = vadd.f32 %v11776_v14, %v3573_v2  ;;  %v12113_v21 = vpop.eup %8296  ;;  %8306 = vtanh.f32 %v12088_v0 }
 0x2e9   : > { %4208 = vst.msk [vmem:[#allocation2 + $0x118] sm:$0xff] %vm4172_vm3, %v4047_v49  ;;  %4209 = vst.msk [vmem:[#allocation2 + $0x120] sm:$0xff] %vm4172_vm3, %v4048_v50  ;;  %v3580_v37 = vld [vmem:[#allocation2 + $0x180] sm:$0xff]  ;;  %v3581_v41 = vld [vmem:[#allocation2 + $0x188] sm:$0xff]  ;;  %v4054_v54 = vadd.f32 %v11781_v8, %v3574_v56  ;;  %v4055_v13 = vadd.f32 %v11791_v52, %v3575_v30  ;;  %v4056_v43 = vadd.f32 %v11799_v3, %v3576_v12  ;;  %v12125_v31 = vpop.eup %8298  ;;  %8308 = vtanh.f32 %v12097_v51 }
 0x2ea   : > { %v3582_v18 = vld [vmem:[#allocation2 + $0x190] sm:$0xff]  ;;  %4210 = vst.msk [vmem:[#allocation2 + $0x128] sm:$0xff] %vm4172_vm3, %v4049_v17  ;;  %4211 = vst.msk [vmem:[#allocation2 + $0x130] sm:$0xff] %vm4172_vm3, %v4050_v38  ;;  %v3583_v61 = vld [vmem:[#allocation2 + $0x198] sm:$0xff]  ;;  %v4057_v14 = vadd.f32 %v11812_v5, %v3577_v24  ;;  %v4058_v52 = vadd.f32 %v11821_v4, %v3578_v28 }
 0x2eb   : > { %v12104_v63 = vpop.xlane.xlu0 %3830  ;;  %v3584_v48 = vld [vmem:[#allocation2 + $0x1a0] sm:$0xff]  ;;  %v3585_v23 = vld [vmem:[#allocation2 + $0x1a8] sm:$0xff]  ;;  %v14321_v27 = vld [vmem:[#allocation312_spill] sm:$0xff]  ;;  %4212 = vst.msk [vmem:[#allocation2 + $0x138] sm:$0xff] %vm4172_vm3, %v4051_v1  ;;  %3974 = vadd.xlane.f32.xlu0 %v12025_v55 }
 0x2ec   : > { %v14322_v57 = vld [vmem:[#allocation359_spill] sm:$0xff]  ;;  %4213 = vst.msk [vmem:[#allocation2 + $0x140] sm:$0xff] %vm4172_vm3, %v4052_v6  ;;  %v3586_v53 = vld [vmem:[#allocation2 + $0x1b0] sm:$0xff]  ;;  %v3587_v8 = vld [vmem:[#allocation2 + $0x1b8] sm:$0xff]  ;;  %v12122_v58 = vpop.xlane.xlu1 %3832  ;;  %3976 = vadd.xlane.f32.xlu1 %v12010_v25 }
 0x2ed   : > { %v2878_v60 = vadd.f32 %v14322_v57, %v14321_v27  ;;  %v3588_v47 = vld [vmem:[#allocation2 + $0x1c0] sm:$0xff]  ;;  %v14323_v35 = vld [vmem:[#allocation313_spill] sm:$0xff]  ;;  %v14324_v2 = vld [vmem:[#allocation364_spill] sm:$0xff]  ;;  %4214 = vst.msk [vmem:[#allocation2 + $0x148] sm:$0xff] %vm4172_vm3, %v4053_v39 }
 0x2ee   : > { %v2881_v19 = vadd.f32 %v14324_v2, %v14323_v35  ;;  %4215 = vst.msk [vmem:[#allocation2 + $0x150] sm:$0xff] %vm4172_vm3, %v4054_v54  ;;  %v14325_v3 = vld [vmem:[#allocation288_spill] sm:$0xff]  ;;  %v3589_v34 = vld [vmem:[#allocation2 + $0x1c8] sm:$0xff]  ;;  %v3591_v50 = vld [vmem:[#allocation2 + $0x1d8] sm:$0xff] }
 0x2ef   : > { %v4059_v5 = vadd.f32 %v14325_v3, %v3579_v40  ;;  %v3590_v49 = vld [vmem:[#allocation2 + $0x1d0] sm:$0xff]  ;;  %4216 = vst.msk [vmem:[#allocation2 + $0x158] sm:$0xff] %vm4172_vm3, %v4055_v13  ;;  %4217 = vst.msk [vmem:[#allocation2 + $0x160] sm:$0xff] %vm4172_vm3, %v4056_v43  ;;  %v14326_v55 = vld [vmem:[#allocation291_spill] sm:$0xff]  ;;  %v12142_v40 = vpop.xlane.xlu0 %3834  ;;  %v12156_v3 = vmul.f32 0.5, %v2878_v60  ;;  %3978 = vadd.xlane.f32.xlu0 %v12022_v11 }
 0x2f0   : > { %4218 = vst.msk [vmem:[#allocation2 + $0x168] sm:$0xff] %vm4172_vm3, %v4057_v14  ;;  %v4060_v56 = vadd.f32 %v14326_v55, %v3580_v37  ;;  %v14327_v30 = vld [vmem:[#allocation309_spill] sm:$0xff]  ;;  %v14328_v4 = vld [vmem:[#allocation315_spill] sm:$0xff]  ;;  %v3592_v38 = vld [vmem:[#allocation2 + $0x1e0] sm:$0xff]  ;;  %v12165_v60 = vmul.f32 0.5, %v2881_v19  ;;  %3980 = vadd.xlane.f32.xlu1 %v12032_v59 }
 0x2f1   : > { %v4061_v12 = vadd.f32 %v14327_v30, %v3581_v41  ;;  %v4062_v17 = vadd.f32 %v14328_v4, %v3582_v18  ;;  %v3593_v24 = vld [vmem:[#allocation2 + $0x1e8] sm:$0xff]  ;;  %v3594_v28 = vld [vmem:[#allocation2 + $0x1f0] sm:$0xff]  ;;  %v14331_v39 = vld [vmem:[#allocation322_spill] sm:$0xff]  ;;  %4219 = vst.msk [vmem:[#allocation2 + $0x170] sm:$0xff] %vm4172_vm3, %v4058_v52  ;;  %8310 = vtanh.f32 %v12156_v3 }
 0x2f2   : > { %v14329_v25 = vld [vmem:[#allocation320_spill] sm:$0xff]  ;;  %v14330_v1 = vld [vmem:[#allocation267_spill] sm:$0xff]  ;;  %v14332_v54 = vld [vmem:[#allocation362_spill] sm:$0xff]  ;;  %4220 = vst.msk [vmem:[#allocation2 + $0x178] sm:$0xff] %vm4172_vm3, %v4059_v5  ;;  %8312 = vtanh.f32 %v12165_v60 }
 0x2f3   : > { %v12146_v6 = vadd.f32 %v14330_v1, %v14329_v25  ;;  %v12150_v57 = vadd.f32 %v14332_v54, %v14331_v39  ;;  %v14333_v37 = vld [vmem:[#allocation317_spill] sm:$0xff]  ;;  %v14334_v18 = vld [vmem:[#allocation319_spill] sm:$0xff]  ;;  %v3596_v14 = vld [vmem:[#allocation2 + $0x200] sm:$0xff]  ;;  %4221 = vst.msk [vmem:[#allocation2 + $0x180] sm:$0xff] %vm4172_vm3, %v4060_v56  ;;  %3982 = vadd.xlane.f32.xlu0 %v12086_v7 }
 0x2f4   : > { %v4063_v41 = vadd.f32 %v14333_v37, %v3583_v61  ;;  %v4064_v13 = vadd.f32 %v14334_v18, %v3584_v48  ;;  %v3595_v43 = vld [vmem:[#allocation2 + $0x1f8] sm:$0xff]  ;;  %v3597_v2 = vld [vmem:[#allocation2 + $0x208] sm:$0xff]  ;;  %4222 = vst.msk [vmem:[#allocation2 + $0x188] sm:$0xff] %vm4172_vm3, %v4061_v12  ;;  %4223 = vst.msk [vmem:[#allocation2 + $0x190] sm:$0xff] %vm4172_vm3, %v4062_v17  ;;  %v3837_v37 = vpop.xlane.xlu1 %3836  ;;  %3984 = vadd.xlane.f32.xlu1 %v12029_v45 }
 0x2f5   : > { %v14335_v55 = vld [vmem:[#allocation323_spill] sm:$0xff]  ;;  %v14336_v52 = vld [vmem:[#allocation341_spill] sm:$0xff]  ;;  %v3598_v61 = vld [vmem:[#allocation2 + $0x210] sm:$0xff]  ;;  %v4075_v59 = vadd.f32 %v11999_v33, %v3595_v43 }
 0x2f6   : > { %v4065_v30 = vadd.f32 %v14335_v55, %v3585_v23  ;;  %v4066_v4 = vadd.f32 %v14336_v52, %v3586_v53  ;;  %v14337_v5 = vld [vmem:[#allocation325_spill] sm:$0xff]  ;;  %v3600_v48 = vld [vmem:[#allocation2 + $0x220] sm:$0xff]  ;;  %4224 = vst.msk [vmem:[#allocation2 + $0x198] sm:$0xff] %vm4172_vm3, %v4063_v41  ;;  %4225 = vst.msk [vmem:[#allocation2 + $0x1a0] sm:$0xff] %vm4172_vm3, %v4064_v13 }
 0x2f7   : > { %v4067_v1 = vadd.f32 %v14337_v5, %v3587_v8  ;;  %v3599_v54 = vld [vmem:[#allocation2 + $0x218] sm:$0xff]  ;;  %v14338_v56 = vld [vmem:[#allocation327_spill] sm:$0xff]  ;;  %v14340_v18 = vld [vmem:[#allocation342_spill] sm:$0xff]  ;;  %v8301_v5 = vpop.eup %8300  ;;  %v4080_v33 = vadd.f32 %v12082_v46, %v3600_v48  ;;  %4236 = vst.msk [vmem:[#allocation2 + $0x1f8] sm:$0xff] %vm4172_vm3, %v4075_v59 }
 0x2f8   : > { %v4068_v12 = vadd.f32 %v14338_v56, %v3588_v47  ;;  %v14339_v17 = vld [vmem:[#allocation331_spill] sm:$0xff]  ;;  %v4070_v53 = vadd.f32 %v14340_v18, %v3590_v49  ;;  %v3602_v8 = vld [vmem:[#allocation2 + $0x230] sm:$0xff]  ;;  %v3603_v52 = vld [vmem:[#allocation2 + $0x238] sm:$0xff]  ;;  %4226 = vst.msk [vmem:[#allocation2 + $0x1a8] sm:$0xff] %vm4172_vm3, %v4065_v30  ;;  %v4074_v49 = vadd.f32 %v11992_v15, %v3594_v28  ;;  %v3839_v18 = vpop.xlane.xlu0 %3838  ;;  %v12187_v30 = vpop.eup %8302  ;;  %v4079_v15 = vadd.f32 %v12065_v9, %v3599_v54 }
 0x2f9   : > { %v4069_v23 = vadd.f32 %v14339_v17, %v3589_v34  ;;  %v3601_v55 = vld [vmem:[#allocation2 + $0x228] sm:$0xff]  ;;  %4227 = vst.msk [vmem:[#allocation2 + $0x1b0] sm:$0xff] %vm4172_vm3, %v4066_v4  ;;  %4228 = vst.msk [vmem:[#allocation2 + $0x1b8] sm:$0xff] %vm4172_vm3, %v4067_v1  ;;  %v14341_v11 = vld [vmem:[#allocation333_spill] sm:$0xff]  ;;  %v3841_v28 = vpop.xlane.xlu1 %3840  ;;  %v8305_v43 = vpop.eup %8304  ;;  %v4083_v9 = vadd.f32 %v12142_v40, %v3603_v52  ;;  %v12207_v4 = vmul.f32 0.5, %v12146_v6  ;;  %v3362_v1 = vadd.f32 1.0, %v12113_v21 }
 0x2fa   : > { %v4071_v19 = vadd.f32 %v14341_v11, %v3591_v50  ;;  %v14342_v41 = vld [vmem:[#allocation345_spill] sm:$0xff]  ;;  %v14343_v13 = vld [vmem:[#allocation335_spill] sm:$0xff]  ;;  %v3604_v56 = vld [vmem:[#allocation2 + $0x240] sm:$0xff]  ;;  %4229 = vst.msk [vmem:[#allocation2 + $0x1c0] sm:$0xff] %vm4172_vm3, %v4068_v12  ;;  %v4076_v50 = vadd.f32 %v12016_v29, %v3596_v14  ;;  %v4081_v29 = vadd.f32 %v12104_v63, %v3601_v55  ;;  %v8307_v45 = vpop.eup %8306  ;;  %v3363_v52 = vadd.f32 1.0, %v12125_v31 }
 0x2fb   : > { %v4072_v47 = vadd.f32 %v14342_v41, %v3592_v38  ;;  %v4073_v34 = vadd.f32 %v14343_v13, %v3593_v24  ;;  %v3605_v17 = vld [vmem:[#allocation2 + $0x248] sm:$0xff]  ;;  %v3606_v39 = vld [vmem:[#allocation2 + $0x250] sm:$0xff]  ;;  %4230 = vst.msk [vmem:[#allocation2 + $0x1c8] sm:$0xff] %vm4172_vm3, %v4069_v23  ;;  %4231 = vst.msk [vmem:[#allocation2 + $0x1d0] sm:$0xff] %vm4172_vm3, %v4070_v53  ;;  %v4077_v38 = vadd.f32 %v12036_v62, %v3597_v2  ;;  %v3361_v2 = vadd.f32 1.0, %v8301_v5 }
 0x2fc   : > { %v4078_v24 = vadd.f32 %v12051_v36, %v3598_v61  ;;  %4232 = vst.msk [vmem:[#allocation2 + $0x1d8] sm:$0xff] %vm4172_vm3, %v4071_v19  ;;  %4235 = vst.msk [vmem:[#allocation2 + $0x1f0] sm:$0xff] %vm4172_vm3, %v4074_v49  ;;  %v4082_v62 = vadd.f32 %v12122_v58, %v3602_v8  ;;  %v3607_v36 = vld [vmem:[#allocation2 + $0x258] sm:$0xff]  ;;  %v4084_v46 = vadd.f32 %v3837_v37, %v3604_v56  ;;  %v3843_v40 = vpop.xlane.xlu0 %3842  ;;  %v8309_v61 = vpop.eup %8308  ;;  %v14345_v54 = vld [vmem:[#allocation4_spill] sm:$0xff]  ;;  %v12231_v8 = vmul.f32 0.5, %v11990_v32 }
 0x2fd   : > { %4233 = vst.msk [vmem:[#allocation2 + $0x1e0] sm:$0xff] %vm4172_vm3, %v4072_v47  ;;  %4234 = vst.msk [vmem:[#allocation2 + $0x1e8] sm:$0xff] %vm4172_vm3, %v4073_v34  ;;  %v4085_v14 = vadd.f32 %v3839_v18, %v3605_v17  ;;  %v4086_v63 = vadd.f32 %v3841_v28, %v3606_v39  ;;  %v14344_v58 = vld [vmem:[#allocation329_spill] sm:$0xff]  ;;  %v3608_v39 = vld [vmem:[#allocation2 + $0x260] sm:$0xff]  ;;  %v4087_v6 = vadd.f32 %v3843_v40, %v3607_v36  ;;  %v3845_v12 = vpop.xlane.xlu1 %3844  ;;  %8314 = vtanh.f32 %v12207_v4 }
 0x2fe   : > { %4237 = vst.msk [vmem:[#allocation2 + $0x200] sm:$0xff] %vm4172_vm3, %v4076_v50  ;;  %4238 = vst.msk [vmem:[#allocation2 + $0x208] sm:$0xff] %vm4172_vm3, %v4077_v38  ;;  %v3519_v7 = vmul.f32 %v12038_v10, %v14344_v58  ;;  %v3520_v10 = vmul.f32 %v12106_v22, %v11979_v42  ;;  %v14346_v48 = vld [vmem:[#allocation50_spill] sm:$0xff]  ;;  %v3609_v23 = vld [vmem:[#allocation2 + $0x268] sm:$0xff]  ;;  %v12226_v42 = vmul.f32 0.5, %v12150_v57  ;;  %v4088_v22 = vadd.f32 %v3845_v12, %v3608_v39 }
 0x2ff   : > { %4239 = vst.msk [vmem:[#allocation2 + $0x210] sm:$0xff] %vm4172_vm3, %v4078_v24  ;;  %4240 = vst.msk [vmem:[#allocation2 + $0x218] sm:$0xff] %vm4172_vm3, %v4079_v15  ;;  %v4382_v37 = vadd.f32 %v14346_v48, %v14345_v54  ;;  %v14347_v21 = vld [vmem:[#allocation7_spill] sm:$0xff]  ;;  %v3521_v5 = vmul.f32 %v3361_v2, %v12045_v20  ;;  %v3610_v19 = vld [vmem:[#allocation2 + $0x270] sm:$0xff]  ;;  %v3364_v47 = vadd.f32 1.0, %v8305_v43  ;;  %v3366_v28 = vadd.f32 1.0, %v12187_v30 }
 0x300   : > { %4241 = vst.msk [vmem:[#allocation2 + $0x220] sm:$0xff] %vm4172_vm3, %v4080_v33  ;;  %4242 = vst.msk [vmem:[#allocation2 + $0x228] sm:$0xff] %vm4172_vm3, %v4081_v29  ;;  %3986 = vadd.xlane.f32.xlu0 %v3519_v7  ;;  %v14348_v53 = vld [vmem:[#allocation55_spill] sm:$0xff]  ;;  %3988 = vadd.xlane.f32.xlu1 %v3520_v10  ;;  %v3847_v11 = vpop.xlane.xlu0 %3846  ;;  %v14350_v34 = vld [vmem:[#allocation6_spill] sm:$0xff]  ;;  %8316 = vtanh.f32 %v12226_v42  ;;  %v3365_v33 = vadd.f32 1.0, %v8309_v61  ;;  %v3367_v10 = vadd.f32 1.0, %v8307_v45 }
 0x301   : > { %4243 = vst.msk [vmem:[#allocation2 + $0x230] sm:$0xff] %vm4172_vm3, %v4082_v62  ;;  %4244 = vst.msk [vmem:[#allocation2 + $0x238] sm:$0xff] %vm4172_vm3, %v4083_v9  ;;  %v4377_v55 = vadd.f32 %v14348_v53, %v14347_v21  ;;  %v14349_v41 = vld [vmem:[#allocation251_spill] sm:$0xff]  ;;  %v4089_v13 = vadd.f32 %v3847_v11, %v3609_v23  ;;  %v14351_v49 = vld [vmem:[#allocation52_spill] sm:$0xff]  ;;  %v3849_v17 = vpop.xlane.xlu1 %3848  ;;  %v12240_v18 = vmul.f32 0.5, %v4382_v37  ;;  %8318 = vtanh.f32 %v12231_v8  ;;  %v8311_v9 = vpop.eup %8310 }
 0x302   : > { %4245 = vst.msk [vmem:[#allocation2 + $0x240] sm:$0xff] %vm4172_vm3, %v4084_v46  ;;  %4246 = vst.msk [vmem:[#allocation2 + $0x248] sm:$0xff] %vm4172_vm3, %v4085_v14  ;;  %v3522_v57 = vmul.f32 %v3362_v1, %v14349_v41  ;;  %v4385_v56 = vadd.f32 %v14351_v49, %v14350_v34  ;;  %v3611_v32 = vld [vmem:[#allocation2 + $0x278] sm:$0xff]  ;;  %v4090_v20 = vadd.f32 %v3849_v17, %v3610_v19  ;;  %v14353_v50 = vld [vmem:[#allocation59_spill] sm:$0xff]  ;;  %v8313_v48 = vpop.eup %8312  ;;  %v3368_v12 = vadd.f32 1.0, %v8311_v9 }
 0x303   : > { %4247 = vst.msk [vmem:[#allocation2 + $0x250] sm:$0xff] %vm4172_vm3, %v4086_v63  ;;  %4248 = vst.msk [vmem:[#allocation2 + $0x258] sm:$0xff] %vm4172_vm3, %v4087_v6  ;;  %v12242_v31 = vmul.f32 0.5, %v4377_v55  ;;  %v14352_v59 = vld [vmem:[#allocation9_spill] sm:$0xff]  ;;  %v14354_v24 = vld [vmem:[#allocation246_spill] sm:$0xff]  ;;  %v3524_v36 = vmul.f32 %v3364_v47, %v12067_v16  ;;  %v3525_v6 = vmul.f32 %v3365_v33, %v12097_v51  ;;  %v3526_v37 = vmul.f32 %v3366_v28, %v12047_v44 }
 0x304   : > { %4249 = vst.msk [vmem:[#allocation2 + $0x260] sm:$0xff] %vm4172_vm3, %v4088_v22  ;;  %3990 = vadd.xlane.f32.xlu0 %v3521_v5  ;;  %4250 = vst.msk [vmem:[#allocation2 + $0x268] sm:$0xff] %vm4172_vm3, %v4089_v13  ;;  %3992 = vadd.xlane.f32.xlu1 %v3522_v57  ;;  %v4390_v38 = vadd.f32 %v14353_v50, %v14352_v59  ;;  %v3523_v15 = vmul.f32 %v3363_v52, %v14354_v24  ;;  %v3851_v29 = vpop.xlane.xlu0 %3850  ;;  %v3612_v62 = vld [vmem:[#allocation2 + $0x280] sm:$0xff]  ;;  %v12253_v46 = vmul.f32 0.5, %v4385_v56  ;;  %v3613_v63 = vld [vmem:[#allocation2 + $0x288] sm:$0xff] }
 0x305   : > { %4251 = vst.msk [vmem:[#allocation2 + $0x270] sm:$0xff] %vm4172_vm3, %v4090_v20  ;;  %v4091_v43 = vadd.f32 %v3851_v29, %v3611_v32  ;;  %v3853_v14 = vpop.xlane.xlu1 %3852  ;;  %8320 = vtanh.f32 %v12242_v31  ;;  %v14355_v58 = vld [vmem:[#allocation11_spill] sm:$0xff]  ;;  %v14356_v7 = vld [vmem:[#allocation58_spill] sm:$0xff]  ;;  %v14357_v40 = vld [vmem:[#allocation8_spill] sm:$0xff]  ;;  %v3527_v57 = vmul.f32 %v3367_v10, %v12088_v0  ;;  %v3369_v47 = vadd.f32 1.0, %v8313_v48 }
 0x306   : > { %v4398_v2 = vadd.f32 %v14356_v7, %v14355_v58  ;;  %v14358_v39 = vld [vmem:[#allocation63_spill] sm:$0xff]  ;;  %v4092_v16 = vadd.f32 %v3853_v14, %v3612_v62  ;;  %8322 = vtanh.f32 %v12240_v18  ;;  %v12262_v30 = vmul.f32 0.5, %v4390_v38  ;;  %v3614_v54 = vld [vmem:[#allocation2 + $0x290] sm:$0xff]  ;;  %v14359_v53 = vld [vmem:[#allocation10_spill] sm:$0xff] }
 0x307   : > { %v4393_v1 = vadd.f32 %v14358_v39, %v14357_v40  ;;  %4252 = vst.msk [vmem:[#allocation2 + $0x278] sm:$0xff] %vm4172_vm3, %v4091_v43  ;;  %v8315_v21 = vpop.eup %8314  ;;  %8324 = vtanh.f32 %v12253_v46  ;;  %v14360_v55 = vld [vmem:[#allocation60_spill] sm:$0xff]  ;;  %v3615_v45 = vld [vmem:[#allocation2 + $0x298] sm:$0xff]  ;;  %v14362_v19 = vld [vmem:[#allocation67_spill] sm:$0xff]  ;;  %v3528_v17 = vmul.f32 %v3368_v12, %v12156_v3  ;;  %v3529_v43 = vmul.f32 %v3369_v47, %v12165_v60 }
 0x308   : > { %3994 = vadd.xlane.f32.xlu0 %v3523_v15  ;;  %3996 = vadd.xlane.f32.xlu1 %v3524_v36  ;;  %v3855_v61 = vpop.xlane.xlu0 %3854  ;;  %4253 = vst.msk [vmem:[#allocation2 + $0x280] sm:$0xff] %vm4172_vm3, %v4092_v16  ;;  %v4401_v22 = vadd.f32 %v14360_v55, %v14359_v53  ;;  %v12270_v5 = vmul.f32 0.5, %v4398_v2  ;;  %8326 = vtanh.f32 %v12262_v30  ;;  %v14361_v11 = vld [vmem:[#allocation13_spill] sm:$0xff]  ;;  %v3616_v34 = vld [vmem:[#allocation2 + $0x2a0] sm:$0xff]  ;;  %v3370_v56 = vadd.f32 1.0, %v8315_v21  ;;  %v3617_v38 = vld [vmem:[#allocation2 + $0x2a8] sm:$0xff] }
 0x309   : > { %v4093_v23 = vadd.f32 %v3855_v61, %v3613_v63  ;;  %v3857_v52 = vpop.xlane.xlu1 %3856  ;;  %v12272_v51 = vmul.f32 0.5, %v4393_v1  ;;  %v4406_v41 = vadd.f32 %v14362_v19, %v14361_v11  ;;  %v14363_v24 = vld [vmem:[#allocation15_spill] sm:$0xff]  ;;  %v14364_v0 = vld [vmem:[#allocation66_spill] sm:$0xff]  ;;  %v14365_v33 = vld [vmem:[#allocation12_spill] sm:$0xff] }
 0x30a   : > { %v4094_v44 = vadd.f32 %v3857_v52, %v3614_v54  ;;  %v8317_v49 = vpop.eup %8316  ;;  %v12281_v59 = vmul.f32 0.5, %v4401_v22  ;;  %v4414_v15 = vadd.f32 %v14364_v0, %v14363_v24  ;;  %v14366_v29 = vld [vmem:[#allocation71_spill] sm:$0xff]  ;;  %v3618_v14 = vld [vmem:[#allocation2 + $0x2b0] sm:$0xff]  ;;  %v3530_v7 = vmul.f32 %v3370_v56, %v12207_v4  ;;  %v14367_v39 = vld [vmem:[#allocation14_spill] sm:$0xff] }
 0x30b   : > { %4254 = vst.msk [vmem:[#allocation2 + $0x288] sm:$0xff] %vm4172_vm3, %v4093_v23  ;;  %v8319_v20 = vpop.eup %8318  ;;  %8328 = vtanh.f32 %v12272_v51  ;;  %v4409_v62 = vadd.f32 %v14366_v29, %v14365_v33  ;;  %v12290_v28 = vmul.f32 0.5, %v4406_v41  ;;  %v3371_v36 = vadd.f32 1.0, %v8317_v49  ;;  %v14368_v1 = vld [vmem:[#allocation68_spill] sm:$0xff]  ;;  %v14370_v12 = vld [vmem:[#allocation75_spill] sm:$0xff]  ;;  %v3620_v55 = vld [vmem:[#allocation2 + $0x2c0] sm:$0xff] }
 0x30c   : > { %3998 = vadd.xlane.f32.xlu0 %v3525_v6  ;;  %4000 = vadd.xlane.f32.xlu1 %v3526_v37  ;;  %v3859_v13 = vpop.xlane.xlu0 %3858  ;;  %4255 = vst.msk [vmem:[#allocation2 + $0x290] sm:$0xff] %vm4172_vm3, %v4094_v44  ;;  %8330 = vtanh.f32 %v12270_v5  ;;  %v5332_v58 = vadd.f32 1.0, %v8319_v20  ;;  %v4417_v16 = vadd.f32 %v14368_v1, %v14367_v39  ;;  %v3619_v6 = vld [vmem:[#allocation2 + $0x2b8] sm:$0xff]  ;;  %v12298_v61 = vmul.f32 0.5, %v4414_v15  ;;  %v3621_v41 = vld [vmem:[#allocation2 + $0x2c8] sm:$0xff]  ;;  %v14371_v47 = vld [vmem:[#allocation16_spill] sm:$0xff] }
 0x30d   : > { %v4095_v32 = vadd.f32 %v3859_v13, %v3615_v45  ;;  %v3861_v50 = vpop.xlane.xlu1 %3860  ;;  %8332 = vtanh.f32 %v12281_v59  ;;  %v12300_v60 = vmul.f32 0.5, %v4409_v62  ;;  %v14369_v37 = vld [vmem:[#allocation17_spill] sm:$0xff]  ;;  %v3531_v21 = vmul.f32 %v3371_v36, %v12226_v42  ;;  %v14372_v13 = vld [vmem:[#allocation79_spill] sm:$0xff]  ;;  %v14374_v56 = vld [vmem:[#allocation74_spill] sm:$0xff] }
 0x30e   : > { %v4096_v3 = vadd.f32 %v3861_v50, %v3616_v34  ;;  %8334 = vtanh.f32 %v12290_v28  ;;  %v4422_v23 = vadd.f32 %v14370_v12, %v14369_v37  ;;  %v5492_v52 = vmul.f32 %v5332_v58, %v12231_v8  ;;  %v14373_v49 = vld [vmem:[#allocation19_spill] sm:$0xff]  ;;  %v3622_v50 = vld [vmem:[#allocation2 + $0x2d0] sm:$0xff]  ;;  %v3623_v36 = vld [vmem:[#allocation2 + $0x2d8] sm:$0xff] }
 0x30f   : > { %4256 = vst.msk [vmem:[#allocation2 + $0x298] sm:$0xff] %vm4172_vm3, %v4095_v32  ;;  %v8321_v63 = vpop.eup %8320  ;;  %v12309_v11 = vmul.f32 0.5, %v4417_v16  ;;  %8336 = vtanh.f32 %v12300_v60  ;;  %v4425_v42 = vadd.f32 %v14372_v13, %v14371_v47  ;;  %v14376_v29 = vld [vmem:[#allocation76_spill] sm:$0xff]  ;;  %v3624_v1 = vld [vmem:[#allocation2 + $0x2e0] sm:$0xff] }
 0x310   : > { %4002 = vadd.xlane.f32.xlu0 %v3527_v57  ;;  %4004 = vadd.xlane.f32.xlu1 %v3528_v17  ;;  %v3863_v9 = vpop.xlane.xlu0 %3862  ;;  %4257 = vst.msk [vmem:[#allocation2 + $0x2a0] sm:$0xff] %vm4172_vm3, %v4096_v3  ;;  %v8323_v40 = vpop.eup %8322  ;;  %v5333_v48 = vadd.f32 1.0, %v8321_v63  ;;  %8338 = vtanh.f32 %v12298_v61  ;;  %v4430_v17 = vadd.f32 %v14374_v56, %v14373_v49  ;;  %v12319_v32 = vmul.f32 0.5, %v4422_v23  ;;  %v14379_v12 = vld [vmem:[#allocation20_spill] sm:$0xff]  ;;  %v14380_v23 = vld [vmem:[#allocation87_spill] sm:$0xff]  ;;  %v3627_v56 = vld [vmem:[#allocation2 + $0x2f8] sm:$0xff] }
 0x311   : > { %v4097_v2 = vadd.f32 %v3863_v9, %v3617_v38  ;;  %v3865_v10 = vpop.xlane.xlu1 %3864  ;;  %v8325_v4 = vpop.eup %8324  ;;  %v5334_v22 = vadd.f32 1.0, %v8323_v40  ;;  %8340 = vtanh.f32 %v12309_v11  ;;  %v12327_v9 = vmul.f32 0.5, %v4425_v42 }
 0x312   : > { %v4098_v54 = vadd.f32 %v3865_v10, %v3618_v14  ;;  %v8327_v44 = vpop.eup %8326  ;;  %v5335_v57 = vadd.f32 1.0, %v8325_v4  ;;  %v5493_v8 = vmul.f32 %v5333_v48, %v12242_v31  ;;  %v14375_v31 = vld [vmem:[#allocation18_spill] sm:$0xff]  ;;  %v12330_v58 = vmul.f32 0.5, %v4430_v17  ;;  %v3625_v48 = vld [vmem:[#allocation2 + $0x2e8] sm:$0xff] }
 0x313   : > { %4258 = vst.msk [vmem:[#allocation2 + $0x2a8] sm:$0xff] %vm4172_vm3, %v4097_v2  ;;  %v5494_v24 = vmul.f32 %v5334_v22, %v12240_v18  ;;  %v5336_v0 = vadd.f32 1.0, %v8327_v44  ;;  %v4433_v62 = vadd.f32 %v14376_v29, %v14375_v31  ;;  %8342 = vtanh.f32 %v12319_v32  ;;  %v14378_v2 = vld [vmem:[#allocation83_spill] sm:$0xff]  ;;  %v14382_v22 = vld [vmem:[#allocation82_spill] sm:$0xff] }
 0x314   : > { %4006 = vadd.xlane.f32.xlu0 %v3529_v43  ;;  %4008 = vadd.xlane.f32.xlu1 %v3530_v7  ;;  %v3867_v53 = vpop.xlane.xlu0 %3866  ;;  %4259 = vst.msk [vmem:[#allocation2 + $0x2b0] sm:$0xff] %vm4172_vm3, %v4098_v54  ;;  %v5495_v43 = vmul.f32 %v5335_v57, %v12253_v46  ;;  %v14377_v7 = vld [vmem:[#allocation21_spill] sm:$0xff]  ;;  %8344 = vtanh.f32 %v12327_v9  ;;  %v3628_v29 = vld [vmem:[#allocation2 + $0x300] sm:$0xff] }
 0x315   : > { %v4099_v45 = vadd.f32 %v3867_v53, %v3619_v6  ;;  %v3869_v19 = vpop.xlane.xlu1 %3868  ;;  %v8329_v38 = vpop.eup %8328  ;;  %v4438_v40 = vadd.f32 %v14378_v2, %v14377_v7  ;;  %v5496_v46 = vmul.f32 %v5336_v0, %v12262_v30  ;;  %v12337_v54 = vmul.f32 0.5, %v4433_v62  ;;  %v14385_v0 = vld [vmem:[#allocation25_spill] sm:$0xff]  ;;  %v14387_v7 = vld [vmem:[#allocation24_spill] sm:$0xff]  ;;  %v14388_v2 = vld [vmem:[#allocation95_spill] sm:$0xff] }
 0x316   : > { %v4100_v34 = vadd.f32 %v3869_v19, %v3620_v55  ;;  %v8331_v33 = vpop.eup %8330  ;;  %v5337_v63 = vadd.f32 1.0, %v8329_v38  ;;  %8346 = vtanh.f32 %v12330_v58  ;;  %v14381_v55 = vld [vmem:[#allocation23_spill] sm:$0xff]  ;;  %v3626_v19 = vld [vmem:[#allocation2 + $0x2f0] sm:$0xff] }
 0x317   : > { %4260 = vst.msk [vmem:[#allocation2 + $0x2b8] sm:$0xff] %vm4172_vm3, %v4099_v45  ;;  %v8333_v14 = vpop.eup %8332  ;;  %v5338_v16 = vadd.f32 1.0, %v8331_v33  ;;  %v12347_v45 = vmul.f32 0.5, %v4438_v40  ;;  %8348 = vtanh.f32 %v12337_v54  ;;  %v4457_v40 = vadd.f32 %v14388_v2, %v14387_v7 }
 0x318   : > { %4010 = vadd.xlane.f32.xlu0 %v3531_v21  ;;  %5812 = vadd.xlane.f32.xlu1 %v5492_v52  ;;  %v3871_v20 = vpop.xlane.xlu0 %3870  ;;  %4261 = vst.msk [vmem:[#allocation2 + $0x2c0] sm:$0xff] %vm4172_vm3, %v4100_v34  ;;  %v8335_v6 = vpop.eup %8334  ;;  %v5339_v37 = vadd.f32 1.0, %v8333_v14  ;;  %v4441_v21 = vadd.f32 %v14380_v23, %v14379_v12  ;;  %v5497_v30 = vmul.f32 %v5337_v63, %v12272_v51  ;;  %v14383_v51 = vld [vmem:[#allocation22_spill] sm:$0xff]  ;;  %v14384_v34 = vld [vmem:[#allocation84_spill] sm:$0xff]  ;;  %v3629_v14 = vld [vmem:[#allocation2 + $0x308] sm:$0xff] }
 0x319   : > { %v4101_v15 = vadd.f32 %v3871_v20, %v3621_v41  ;;  %v3873_v3 = vpop.xlane.xlu1 %3872  ;;  %v4446_v52 = vadd.f32 %v14382_v22, %v14381_v55  ;;  %v8337_v41 = vpop.eup %8336  ;;  %v5498_v57 = vmul.f32 %v5338_v16, %v12270_v5  ;;  %v5340_v47 = vadd.f32 1.0, %v8335_v6  ;;  %v14390_v16 = vld [vmem:[#allocation90_spill] sm:$0xff]  ;;  %v3631_v22 = vld [vmem:[#allocation2 + $0x318] sm:$0xff] }
 0x31a   : > { %v4102_v18 = vadd.f32 %v3873_v3, %v3622_v50  ;;  %v8339_v42 = vpop.eup %8338  ;;  %v5499_v17 = vmul.f32 %v5339_v37, %v12281_v59  ;;  %v12355_v20 = vmul.f32 0.5, %v4441_v21  ;;  %v5341_v38 = vadd.f32 1.0, %v8337_v41 }
 0x31b   : > { %4262 = vst.msk [vmem:[#allocation2 + $0x2c8] sm:$0xff] %vm4172_vm3, %v4101_v15  ;;  %v8341_v50 = vpop.eup %8340  ;;  %8350 = vtanh.f32 %v12347_v45  ;;  %v14386_v15 = vld [vmem:[#allocation91_spill] sm:$0xff]  ;;  %v5342_v62 = vadd.f32 1.0, %v8339_v42  ;;  %v5500_v59 = vmul.f32 %v5340_v47, %v12290_v28  ;;  %v14393_v47 = vld [vmem:[#allocation29_spill] sm:$0xff] }
 0x31c   : > { %5814 = vadd.xlane.f32.xlu0 %v5493_v8  ;;  %5816 = vadd.xlane.f32.xlu1 %v5494_v24  ;;  %v3875_v39 = vpop.xlane.xlu0 %3874  ;;  %4263 = vst.msk [vmem:[#allocation2 + $0x2d0] sm:$0xff] %vm4172_vm3, %v4102_v18  ;;  %v4449_v8 = vadd.f32 %v14384_v34, %v14383_v51  ;;  %v12358_v24 = vmul.f32 0.5, %v4446_v52  ;;  %v4454_v33 = vadd.f32 %v14386_v15, %v14385_v0  ;;  %v5343_v63 = vadd.f32 1.0, %v8341_v50  ;;  %v3632_v34 = vld [vmem:[#allocation2 + $0x320] sm:$0xff]  ;;  %v3633_v50 = vld [vmem:[#allocation2 + $0x328] sm:$0xff]  ;;  %v14395_v0 = vld [vmem:[#allocation28_spill] sm:$0xff] }
 0x31d   : > { %v4103_v10 = vadd.f32 %v3875_v39, %v3623_v36  ;;  %v3877_v4 = vpop.xlane.xlu1 %3876  ;;  %v8343_v36 = vpop.eup %8342  ;;  %8352 = vtanh.f32 %v12355_v20  ;;  %v5501_v28 = vmul.f32 %v5341_v38, %v12300_v60  ;;  %v5502_v37 = vmul.f32 %v5342_v62, %v12298_v61  ;;  %v14391_v60 = vld [vmem:[#allocation26_spill] sm:$0xff]  ;;  %v14396_v15 = vld [vmem:[#allocation105_spill] sm:$0xff]  ;;  %v14398_v62 = vld [vmem:[#allocation99_spill] sm:$0xff] }
 0x31e   : > { %v4104_v53 = vadd.f32 %v3877_v4, %v3624_v1  ;;  %8354 = vtanh.f32 %v12358_v24  ;;  %v14389_v1 = vld [vmem:[#allocation27_spill] sm:$0xff]  ;;  %v3630_v4 = vld [vmem:[#allocation2 + $0x310] sm:$0xff]  ;;  %v5344_v12 = vadd.f32 1.0, %v8343_v36  ;;  %v5503_v52 = vmul.f32 %v5343_v63, %v12309_v11 }
 0x31f   : > { %4264 = vst.msk [vmem:[#allocation2 + $0x2d8] sm:$0xff] %vm4172_vm3, %v4103_v10  ;;  %v12375_v10 = vmul.f32 0.5, %v4454_v33  ;;  %v4473_v33 = vadd.f32 %v14396_v15, %v14395_v0 }
 0x320   : > { %5818 = vadd.xlane.f32.xlu0 %v5495_v43  ;;  %5820 = vadd.xlane.f32.xlu1 %v5496_v46  ;;  %v3879_v44 = vpop.xlane.xlu0 %3878  ;;  %4265 = vst.msk [vmem:[#allocation2 + $0x2e0] sm:$0xff] %vm4172_vm3, %v4104_v53  ;;  %v12365_v43 = vmul.f32 0.5, %v4449_v8  ;;  %v4462_v46 = vadd.f32 %v14390_v16, %v14389_v1  ;;  %v14392_v53 = vld [vmem:[#allocation92_spill] sm:$0xff]  ;;  %v5504_v11 = vmul.f32 %v5344_v12, %v12319_v32  ;;  %v3635_v16 = vld [vmem:[#allocation2 + $0x338] sm:$0xff] }
 0x321   : > { %v4105_v13 = vadd.f32 %v3879_v44, %v3625_v48  ;;  %v3881_v49 = vpop.xlane.xlu1 %3880  ;;  %v8345_v48 = vpop.eup %8344  ;;  %v12383_v44 = vmul.f32 0.5, %v4457_v40  ;;  %v14401_v12 = vld [vmem:[#allocation33_spill] sm:$0xff] }
 0x322   : > { %v4106_v5 = vadd.f32 %v3881_v49, %v3626_v19  ;;  %v8347_v21 = vpop.eup %8346  ;;  %8356 = vtanh.f32 %v12365_v43  ;;  %v5345_v41 = vadd.f32 1.0, %v8345_v48 }
 0x323   : > { %4266 = vst.msk [vmem:[#allocation2 + $0x2e8] sm:$0xff] %vm4172_vm3, %v4105_v13  ;;  %v8349_v19 = vpop.eup %8348  ;;  %8358 = vtanh.f32 %v12375_v10  ;;  %v14394_v13 = vld [vmem:[#allocation100_spill] sm:$0xff]  ;;  %v5346_v8 = vadd.f32 1.0, %v8347_v21 }
 0x324   : > { %5822 = vadd.xlane.f32.xlu0 %v5497_v30  ;;  %5824 = vadd.xlane.f32.xlu1 %v5498_v57  ;;  %v3883_v31 = vpop.xlane.xlu0 %3882  ;;  %4267 = vst.msk [vmem:[#allocation2 + $0x2f0] sm:$0xff] %vm4172_vm3, %v4106_v5  ;;  %v4465_v30 = vadd.f32 %v14392_v53, %v14391_v60  ;;  %v12386_v57 = vmul.f32 0.5, %v4462_v46  ;;  %v4470_v42 = vadd.f32 %v14394_v13, %v14393_v47  ;;  %v5347_v38 = vadd.f32 1.0, %v8349_v19  ;;  %v3636_v53 = vld [vmem:[#allocation2 + $0x340] sm:$0xff]  ;;  %v3637_v19 = vld [vmem:[#allocation2 + $0x348] sm:$0xff]  ;;  %v14403_v47 = vld [vmem:[#allocation32_spill] sm:$0xff] }
 0x325   : > { %v4107_v3 = vadd.f32 %v3883_v31, %v3627_v56  ;;  %v3885_v18 = vpop.xlane.xlu1 %3884  ;;  %v8351_v56 = vpop.eup %8350  ;;  %8360 = vtanh.f32 %v12383_v44  ;;  %v5505_v32 = vmul.f32 %v5345_v41, %v12327_v9  ;;  %v5506_v63 = vmul.f32 %v5346_v8, %v12330_v58  ;;  %v14399_v9 = vld [vmem:[#allocation30_spill] sm:$0xff]  ;;  %v14404_v13 = vld [vmem:[#allocation117_spill] sm:$0xff] }
 0x326   : > { %v4108_v39 = vadd.f32 %v3885_v18, %v3628_v29  ;;  %8362 = vtanh.f32 %v12386_v57  ;;  %v14397_v29 = vld [vmem:[#allocation31_spill] sm:$0xff]  ;;  %v3634_v18 = vld [vmem:[#allocation2 + $0x330] sm:$0xff]  ;;  %v5348_v7 = vadd.f32 1.0, %v8351_v56  ;;  %v5507_v46 = vmul.f32 %v5347_v38, %v12337_v54  ;;  %v14406_v8 = vld [vmem:[#allocation109_spill] sm:$0xff] }
 0x327   : > { %4268 = vst.msk [vmem:[#allocation2 + $0x2f8] sm:$0xff] %vm4172_vm3, %v4107_v3  ;;  %v12403_v3 = vmul.f32 0.5, %v4470_v42  ;;  %v4489_v42 = vadd.f32 %v14404_v13, %v14403_v47 }
 0x328   : > { %5826 = vadd.xlane.f32.xlu0 %v5499_v17  ;;  %5828 = vadd.xlane.f32.xlu1 %v5500_v59  ;;  %v3887_v6 = vpop.xlane.xlu0 %3886  ;;  %4269 = vst.msk [vmem:[#allocation2 + $0x300] sm:$0xff] %vm4172_vm3, %v4108_v39  ;;  %v12393_v17 = vmul.f32 0.5, %v4465_v30  ;;  %v4478_v59 = vadd.f32 %v14398_v62, %v14397_v29  ;;  %v14400_v39 = vld [vmem:[#allocation102_spill] sm:$0xff]  ;;  %v5508_v54 = vmul.f32 %v5348_v7, %v12347_v45  ;;  %v3639_v62 = vld [vmem:[#allocation2 + $0x358] sm:$0xff] }
 0x329   : > { %v4109_v23 = vadd.f32 %v3887_v6, %v3629_v14  ;;  %v3889_v55 = vpop.xlane.xlu1 %3888  ;;  %v8353_v14 = vpop.eup %8352  ;;  %v12411_v6 = vmul.f32 0.5, %v4473_v33  ;;  %v14409_v7 = vld [vmem:[#allocation37_spill] sm:$0xff] }
 0x32a   : > { %v4110_v61 = vadd.f32 %v3889_v55, %v3630_v4  ;;  %v8355_v40 = vpop.eup %8354  ;;  %8364 = vtanh.f32 %v12393_v17  ;;  %v5349_v48 = vadd.f32 1.0, %v8353_v14 }
 0x32b   : > { %4270 = vst.msk [vmem:[#allocation2 + $0x308] sm:$0xff] %vm4172_vm3, %v4109_v23  ;;  %8366 = vtanh.f32 %v12403_v3  ;;  %v14402_v23 = vld [vmem:[#allocation111_spill] sm:$0xff]  ;;  %v5350_v30 = vadd.f32 1.0, %v8355_v40 }
 0x32c   : > { %5830 = vadd.xlane.f32.xlu0 %v5501_v28  ;;  %5832 = vadd.xlane.f32.xlu1 %v5502_v37  ;;  %v3891_v51 = vpop.xlane.xlu0 %3890  ;;  %4271 = vst.msk [vmem:[#allocation2 + $0x310] sm:$0xff] %vm4172_vm3, %v4110_v61  ;;  %v4481_v28 = vadd.f32 %v14400_v39, %v14399_v9  ;;  %v8357_v4 = vpop.eup %8356  ;;  %v12414_v37 = vmul.f32 0.5, %v4478_v59  ;;  %v4486_v21 = vadd.f32 %v14402_v23, %v14401_v12  ;;  %8368 = vtanh.f32 %v12411_v6  ;;  %v3640_v39 = vld [vmem:[#allocation2 + $0x360] sm:$0xff]  ;;  %v14411_v12 = vld [vmem:[#allocation36_spill] sm:$0xff]  ;;  %v14412_v23 = vld [vmem:[#allocation129_spill] sm:$0xff] }
 0x32d   : > { %v4111_v49 = vadd.f32 %v3891_v51, %v3631_v22  ;;  %v3893_v5 = vpop.xlane.xlu1 %3892  ;;  %v8359_v22 = vpop.eup %8358  ;;  %v5351_v41 = vadd.f32 1.0, %v8357_v4  ;;  %v5509_v45 = vmul.f32 %v5349_v48, %v12355_v20  ;;  %v5510_v38 = vmul.f32 %v5350_v30, %v12358_v24  ;;  %v14407_v20 = vld [vmem:[#allocation34_spill] sm:$0xff]  ;;  %v3641_v4 = vld [vmem:[#allocation2 + $0x368] sm:$0xff]  ;;  %v14414_v30 = vld [vmem:[#allocation121_spill] sm:$0xff] }
 0x32e   : > { %v4112_v31 = vadd.f32 %v3893_v5, %v3632_v34  ;;  %8370 = vtanh.f32 %v12414_v37  ;;  %v14405_v34 = vld [vmem:[#allocation35_spill] sm:$0xff]  ;;  %v3638_v5 = vld [vmem:[#allocation2 + $0x350] sm:$0xff]  ;;  %v5352_v0 = vadd.f32 1.0, %v8359_v22 }
 0x32f   : > { %4272 = vst.msk [vmem:[#allocation2 + $0x318] sm:$0xff] %vm4172_vm3, %v4111_v49  ;;  %v12431_v49 = vmul.f32 0.5, %v4486_v21  ;;  %v5511_v59 = vmul.f32 %v5351_v41, %v12365_v43  ;;  %v4505_v21 = vadd.f32 %v14412_v23, %v14411_v12 }
 0x330   : > { %5834 = vadd.xlane.f32.xlu0 %v5503_v52  ;;  %5836 = vadd.xlane.f32.xlu1 %v5504_v11  ;;  %v3895_v36 = vpop.xlane.xlu0 %3894  ;;  %4273 = vst.msk [vmem:[#allocation2 + $0x320] sm:$0xff] %vm4172_vm3, %v4112_v31  ;;  %v12421_v52 = vmul.f32 0.5, %v4481_v28  ;;  %v4494_v11 = vadd.f32 %v14406_v8, %v14405_v34  ;;  %v14408_v31 = vld [vmem:[#allocation113_spill] sm:$0xff]  ;;  %v5512_v43 = vmul.f32 %v5352_v0, %v12375_v10 }
 0x331   : > { %v4113_v2 = vadd.f32 %v3895_v36, %v3633_v50  ;;  %v3897_v1 = vpop.xlane.xlu1 %3896  ;;  %v8361_v50 = vpop.eup %8360  ;;  %v12439_v36 = vmul.f32 0.5, %v4489_v42  ;;  %v3643_v8 = vld [vmem:[#allocation2 + $0x378] sm:$0xff] }
 0x332   : > { %v4114_v58 = vadd.f32 %v3897_v1, %v3634_v18  ;;  %v8363_v33 = vpop.eup %8362  ;;  %8372 = vtanh.f32 %v12421_v52  ;;  %v5353_v14 = vadd.f32 1.0, %v8361_v50  ;;  %v14417_v0 = vld [vmem:[#allocation41_spill] sm:$0xff] }
 0x333   : > { %4274 = vst.msk [vmem:[#allocation2 + $0x328] sm:$0xff] %vm4172_vm3, %v4113_v2  ;;  %8374 = vtanh.f32 %v12431_v49  ;;  %v14410_v2 = vld [vmem:[#allocation123_spill] sm:$0xff]  ;;  %v5354_v28 = vadd.f32 1.0, %v8363_v33 }
 0x334   : > { %5838 = vadd.xlane.f32.xlu0 %v5505_v32  ;;  %5840 = vadd.xlane.f32.xlu1 %v5506_v63  ;;  %v3899_v60 = vpop.xlane.xlu0 %3898  ;;  %4275 = vst.msk [vmem:[#allocation2 + $0x330] sm:$0xff] %vm4172_vm3, %v4114_v58  ;;  %v4497_v32 = vadd.f32 %v14408_v31, %v14407_v20  ;;  %v8365_v18 = vpop.eup %8364  ;;  %v12442_v63 = vmul.f32 0.5, %v4494_v11  ;;  %v4502_v40 = vadd.f32 %v14410_v2, %v14409_v7  ;;  %8376 = vtanh.f32 %v12439_v36  ;;  %v3644_v31 = vld [vmem:[#allocation2 + $0x380] sm:$0xff]  ;;  %v14419_v7 = vld [vmem:[#allocation40_spill] sm:$0xff]  ;;  %v14420_v2 = vld [vmem:[#allocation141_spill] sm:$0xff] }
 0x335   : > { %v4115_v55 = vadd.f32 %v3899_v60, %v3635_v16  ;;  %v3901_v61 = vpop.xlane.xlu1 %3900  ;;  %v8367_v16 = vpop.eup %8366  ;;  %v5355_v48 = vadd.f32 1.0, %v8365_v18  ;;  %v5513_v10 = vmul.f32 %v5353_v14, %v12383_v44  ;;  %v5514_v41 = vmul.f32 %v5354_v28, %v12386_v57  ;;  %v14415_v44 = vld [vmem:[#allocation38_spill] sm:$0xff]  ;;  %v3645_v18 = vld [vmem:[#allocation2 + $0x388] sm:$0xff]  ;;  %v14422_v28 = vld [vmem:[#allocation133_spill] sm:$0xff] }
 0x336   : > { %v4116_v51 = vadd.f32 %v3901_v61, %v3636_v53  ;;  %8378 = vtanh.f32 %v12442_v63  ;;  %v14413_v53 = vld [vmem:[#allocation39_spill] sm:$0xff]  ;;  %v3642_v61 = vld [vmem:[#allocation2 + $0x370] sm:$0xff]  ;;  %v5356_v47 = vadd.f32 1.0, %v8367_v16 }
 0x337   : > { %4276 = vst.msk [vmem:[#allocation2 + $0x338] sm:$0xff] %vm4172_vm3, %v4115_v55  ;;  %v12459_v55 = vmul.f32 0.5, %v4502_v40  ;;  %v5515_v11 = vmul.f32 %v5355_v48, %v12393_v17  ;;  %v4521_v40 = vadd.f32 %v14420_v2, %v14419_v7 }
 0x338   : > { %5842 = vadd.xlane.f32.xlu0 %v5507_v46  ;;  %5844 = vadd.xlane.f32.xlu1 %v5508_v54  ;;  %v3903_v56 = vpop.xlane.xlu0 %3902  ;;  %4277 = vst.msk [vmem:[#allocation2 + $0x340] sm:$0xff] %vm4172_vm3, %v4116_v51  ;;  %v12449_v46 = vmul.f32 0.5, %v4497_v32  ;;  %v4510_v54 = vadd.f32 %v14414_v30, %v14413_v53  ;;  %v14416_v51 = vld [vmem:[#allocation125_spill] sm:$0xff]  ;;  %v5516_v17 = vmul.f32 %v5356_v47, %v12403_v3 }
 0x339   : > { %v4117_v15 = vadd.f32 %v3903_v56, %v3637_v19  ;;  %v3905_v29 = vpop.xlane.xlu1 %3904  ;;  %v8369_v19 = vpop.eup %8368  ;;  %v12467_v56 = vmul.f32 0.5, %v4505_v21  ;;  %v3647_v30 = vld [vmem:[#allocation2 + $0x398] sm:$0xff] }
 0x33a   : > { %v4118_v24 = vadd.f32 %v3905_v29, %v3638_v5  ;;  %v8371_v42 = vpop.eup %8370  ;;  %8380 = vtanh.f32 %v12449_v46  ;;  %v5357_v50 = vadd.f32 1.0, %v8369_v19  ;;  %v14425_v47 = vld [vmem:[#allocation45_spill] sm:$0xff] }
 0x33b   : > { %4278 = vst.msk [vmem:[#allocation2 + $0x348] sm:$0xff] %vm4172_vm3, %v4117_v15  ;;  %8382 = vtanh.f32 %v12459_v55  ;;  %v14418_v15 = vld [vmem:[#allocation135_spill] sm:$0xff]  ;;  %v5358_v32 = vadd.f32 1.0, %v8371_v42 }
 0x33c   : > { %5846 = vadd.xlane.f32.xlu0 %v5509_v45  ;;  %5848 = vadd.xlane.f32.xlu1 %v5510_v38  ;;  %v3907_v9 = vpop.xlane.xlu0 %3906  ;;  %4279 = vst.msk [vmem:[#allocation2 + $0x350] sm:$0xff] %vm4172_vm3, %v4118_v24  ;;  %v4513_v45 = vadd.f32 %v14416_v51, %v14415_v44  ;;  %v8373_v5 = vpop.eup %8372  ;;  %v12470_v38 = vmul.f32 0.5, %v4510_v54  ;;  %v4518_v33 = vadd.f32 %v14418_v15, %v14417_v0  ;;  %8384 = vtanh.f32 %v12467_v56  ;;  %v3648_v51 = vld [vmem:[#allocation2 + $0x3a0] sm:$0xff]  ;;  %v14427_v0 = vld [vmem:[#allocation44_spill] sm:$0xff]  ;;  %v14428_v15 = vld [vmem:[#allocation153_spill] sm:$0xff] }
 0x33d   : > { %v4119_v1 = vadd.f32 %v3907_v9, %v3639_v62  ;;  %v3909_v58 = vpop.xlane.xlu1 %3908  ;;  %v8375_v62 = vpop.eup %8374  ;;  %v5359_v14 = vadd.f32 1.0, %v8373_v5  ;;  %v5517_v3 = vmul.f32 %v5357_v50, %v12411_v6  ;;  %v5518_v48 = vmul.f32 %v5358_v32, %v12414_v37  ;;  %v14423_v6 = vld [vmem:[#allocation42_spill] sm:$0xff]  ;;  %v3649_v5 = vld [vmem:[#allocation2 + $0x3a8] sm:$0xff]  ;;  %v14430_v32 = vld [vmem:[#allocation145_spill] sm:$0xff] }
 0x33e   : > { %v4120_v60 = vadd.f32 %v3909_v58, %v3640_v39  ;;  %8386 = vtanh.f32 %v12470_v38  ;;  %v14421_v39 = vld [vmem:[#allocation43_spill] sm:$0xff]  ;;  %v3646_v58 = vld [vmem:[#allocation2 + $0x390] sm:$0xff]  ;;  %v5360_v12 = vadd.f32 1.0, %v8375_v62 }
 0x33f   : > { %4280 = vst.msk [vmem:[#allocation2 + $0x358] sm:$0xff] %vm4172_vm3, %v4119_v1  ;;  %v12487_v1 = vmul.f32 0.5, %v4518_v33  ;;  %v5519_v54 = vmul.f32 %v5359_v14, %v12421_v52  ;;  %v4537_v33 = vadd.f32 %v14428_v15, %v14427_v0 }
 0x340   : > { %5850 = vadd.xlane.f32.xlu0 %v5511_v59  ;;  %5852 = vadd.xlane.f32.xlu1 %v5512_v43  ;;  %v3911_v22 = vpop.xlane.xlu0 %3910  ;;  %4281 = vst.msk [vmem:[#allocation2 + $0x360] sm:$0xff] %vm4172_vm3, %v4120_v60  ;;  %v12477_v59 = vmul.f32 0.5, %v4513_v45  ;;  %v4526_v43 = vadd.f32 %v14422_v28, %v14421_v39  ;;  %v14424_v60 = vld [vmem:[#allocation137_spill] sm:$0xff]  ;;  %v5520_v52 = vmul.f32 %v5360_v12, %v12431_v49 }
 0x341   : > { %v4121_v13 = vadd.f32 %v3911_v22, %v3641_v4  ;;  %v3913_v34 = vpop.xlane.xlu1 %3912  ;;  %v8377_v4 = vpop.eup %8376  ;;  %v12495_v22 = vmul.f32 0.5, %v4521_v40  ;;  %v3651_v28 = vld [vmem:[#allocation2 + $0x3b8] sm:$0xff] }
 0x342   : > { %v4122_v57 = vadd.f32 %v3913_v34, %v3642_v61  ;;  %v8379_v21 = vpop.eup %8378  ;;  %8388 = vtanh.f32 %v12477_v59  ;;  %v5361_v19 = vadd.f32 1.0, %v8377_v4  ;;  %v14433_v12 = vld [vmem:[#allocation49_spill] sm:$0xff] }
 0x343   : > { %4282 = vst.msk [vmem:[#allocation2 + $0x368] sm:$0xff] %vm4172_vm3, %v4121_v13  ;;  %8390 = vtanh.f32 %v12487_v1  ;;  %v14426_v13 = vld [vmem:[#allocation147_spill] sm:$0xff]  ;;  %v5362_v45 = vadd.f32 1.0, %v8379_v21 }
 0x344   : > { %5854 = vadd.xlane.f32.xlu0 %v5513_v10  ;;  %5856 = vadd.xlane.f32.xlu1 %v5514_v41  ;;  %v3915_v20 = vpop.xlane.xlu0 %3914  ;;  %4283 = vst.msk [vmem:[#allocation2 + $0x370] sm:$0xff] %vm4172_vm3, %v4122_v57  ;;  %v4529_v10 = vadd.f32 %v14424_v60, %v14423_v6  ;;  %v8381_v61 = vpop.eup %8380  ;;  %v12498_v41 = vmul.f32 0.5, %v4526_v43  ;;  %v4534_v42 = vadd.f32 %v14426_v13, %v14425_v47  ;;  %8392 = vtanh.f32 %v12495_v22  ;;  %v3652_v60 = vld [vmem:[#allocation2 + $0x3c0] sm:$0xff]  ;;  %v14435_v47 = vld [vmem:[#allocation48_spill] sm:$0xff]  ;;  %v14436_v13 = vld [vmem:[#allocation165_spill] sm:$0xff] }
 0x345   : > { %v4123_v29 = vadd.f32 %v3915_v20, %v3643_v8  ;;  %v3917_v24 = vpop.xlane.xlu1 %3916  ;;  %v8383_v8 = vpop.eup %8382  ;;  %v5363_v50 = vadd.f32 1.0, %v8381_v61  ;;  %v5521_v49 = vmul.f32 %v5361_v19, %v12439_v36  ;;  %v5522_v14 = vmul.f32 %v5362_v45, %v12442_v63  ;;  %v14431_v36 = vld [vmem:[#allocation46_spill] sm:$0xff]  ;;  %v3653_v61 = vld [vmem:[#allocation2 + $0x3c8] sm:$0xff]  ;;  %v14438_v45 = vld [vmem:[#allocation157_spill] sm:$0xff] }
 0x346   : > { %v4124_v9 = vadd.f32 %v3917_v24, %v3644_v31  ;;  %8394 = vtanh.f32 %v12498_v41  ;;  %v14429_v31 = vld [vmem:[#allocation47_spill] sm:$0xff]  ;;  %v3650_v24 = vld [vmem:[#allocation2 + $0x3b0] sm:$0xff]  ;;  %v5364_v7 = vadd.f32 1.0, %v8383_v8 }
 0x347   : > { %4284 = vst.msk [vmem:[#allocation2 + $0x378] sm:$0xff] %vm4172_vm3, %v4123_v29  ;;  %v12515_v29 = vmul.f32 0.5, %v4534_v42  ;;  %v5523_v43 = vmul.f32 %v5363_v50, %v12449_v46  ;;  %v4553_v42 = vadd.f32 %v14436_v13, %v14435_v47 }
 0x348   : > { %5858 = vadd.xlane.f32.xlu0 %v5515_v11  ;;  %5860 = vadd.xlane.f32.xlu1 %v5516_v17  ;;  %v3919_v16 = vpop.xlane.xlu0 %3918  ;;  %4285 = vst.msk [vmem:[#allocation2 + $0x380] sm:$0xff] %vm4172_vm3, %v4124_v9  ;;  %v12505_v11 = vmul.f32 0.5, %v4529_v10  ;;  %v4542_v17 = vadd.f32 %v14430_v32, %v14429_v31  ;;  %v14432_v9 = vld [vmem:[#allocation149_spill] sm:$0xff]  ;;  %v5524_v46 = vmul.f32 %v5364_v7, %v12459_v55 }
 0x349   : > { %v4125_v23 = vadd.f32 %v3919_v16, %v3645_v18  ;;  %v3921_v53 = vpop.xlane.xlu1 %3920  ;;  %v8385_v18 = vpop.eup %8384  ;;  %v12523_v16 = vmul.f32 0.5, %v4537_v33  ;;  %v3655_v32 = vld [vmem:[#allocation2 + $0x3d8] sm:$0xff] }
 0x34a   : > { %v4126_v37 = vadd.f32 %v3921_v53, %v3646_v58  ;;  %v8387_v40 = vpop.eup %8386  ;;  %8396 = vtanh.f32 %v12505_v11  ;;  %v5365_v4 = vadd.f32 1.0, %v8385_v18  ;;  %v14441_v7 = vld [vmem:[#allocation57_spill] sm:$0xff] }
 0x34b   : > { %4286 = vst.msk [vmem:[#allocation2 + $0x388] sm:$0xff] %vm4172_vm3, %v4125_v23  ;;  %8398 = vtanh.f32 %v12515_v29  ;;  %v14434_v23 = vld [vmem:[#allocation159_spill] sm:$0xff]  ;;  %v5366_v10 = vadd.f32 1.0, %v8387_v40 }
 0x34c   : > { %5862 = vadd.xlane.f32.xlu0 %v5517_v3  ;;  %5864 = vadd.xlane.f32.xlu1 %v5518_v48  ;;  %v3923_v44 = vpop.xlane.xlu0 %3922  ;;  %4287 = vst.msk [vmem:[#allocation2 + $0x390] sm:$0xff] %vm4172_vm3, %v4126_v37  ;;  %v4545_v3 = vadd.f32 %v14432_v9, %v14431_v36  ;;  %v8389_v58 = vpop.eup %8388  ;;  %v12526_v48 = vmul.f32 0.5, %v4542_v17  ;;  %v4550_v21 = vadd.f32 %v14434_v23, %v14433_v12  ;;  %8400 = vtanh.f32 %v12523_v16  ;;  %v3656_v9 = vld [vmem:[#allocation2 + $0x3e0] sm:$0xff]  ;;  %v14443_v12 = vld [vmem:[#allocation56_spill] sm:$0xff] }
 0x34d   : > { %v4127_v34 = vadd.f32 %v3923_v44, %v3647_v30  ;;  %v3925_v57 = vpop.xlane.xlu1 %3924  ;;  %v8391_v30 = vpop.eup %8390  ;;  %v5367_v19 = vadd.f32 1.0, %v8389_v58  ;;  %v5525_v55 = vmul.f32 %v5365_v4, %v12467_v56  ;;  %v5526_v50 = vmul.f32 %v5366_v10, %v12470_v38  ;;  %v14439_v56 = vld [vmem:[#allocation53_spill] sm:$0xff]  ;;  %v3657_v58 = vld [vmem:[#allocation2 + $0x3e8] sm:$0xff]  ;;  %v14444_v23 = vld [vmem:[#allocation176_spill] sm:$0xff] }
 0x34e   : > { %v4128_v20 = vadd.f32 %v3925_v57, %v3648_v51  ;;  %8402 = vtanh.f32 %v12526_v48  ;;  %v14437_v51 = vld [vmem:[#allocation54_spill] sm:$0xff]  ;;  %v3654_v57 = vld [vmem:[#allocation2 + $0x3d0] sm:$0xff]  ;;  %v5368_v0 = vadd.f32 1.0, %v8391_v30  ;;  %v14446_v10 = vld [vmem:[#allocation169_spill] sm:$0xff] }
 0x34f   : > { %4288 = vst.msk [vmem:[#allocation2 + $0x398] sm:$0xff] %vm4172_vm3, %v4127_v34  ;;  %v12543_v34 = vmul.f32 0.5, %v4550_v21  ;;  %v5527_v17 = vmul.f32 %v5367_v19, %v12477_v59  ;;  %v4569_v21 = vadd.f32 %v14444_v23, %v14443_v12 }
 0x350   : > { %5866 = vadd.xlane.f32.xlu0 %v5519_v54  ;;  %5868 = vadd.xlane.f32.xlu1 %v5520_v52  ;;  %v3927_v62 = vpop.xlane.xlu0 %3926  ;;  %4289 = vst.msk [vmem:[#allocation2 + $0x3a0] sm:$0xff] %vm4172_vm3, %v4128_v20  ;;  %v12533_v54 = vmul.f32 0.5, %v4545_v3  ;;  %v4558_v52 = vadd.f32 %v14438_v45, %v14437_v51  ;;  %v14440_v20 = vld [vmem:[#allocation161_spill] sm:$0xff]  ;;  %v5528_v59 = vmul.f32 %v5368_v0, %v12487_v1 }
 0x351   : > { %v4129_v2 = vadd.f32 %v3927_v62, %v3649_v5  ;;  %v3929_v39 = vpop.xlane.xlu1 %3928  ;;  %v8393_v5 = vpop.eup %8392  ;;  %v12551_v62 = vmul.f32 0.5, %v4553_v42  ;;  %v3659_v45 = vld [vmem:[#allocation2 + $0x3f8] sm:$0xff] }
 0x352   : > { %v4130_v63 = vadd.f32 %v3929_v39, %v3650_v24  ;;  %v8395_v33 = vpop.eup %8394  ;;  %8404 = vtanh.f32 %v12533_v54  ;;  %v5369_v18 = vadd.f32 1.0, %v8393_v5  ;;  %v14449_v0 = vld [vmem:[#allocation65_spill] sm:$0xff] }
 0x353   : > { %4290 = vst.msk [vmem:[#allocation2 + $0x3a8] sm:$0xff] %vm4172_vm3, %v4129_v2  ;;  %8406 = vtanh.f32 %v12543_v34  ;;  %v14442_v2 = vld [vmem:[#allocation171_spill] sm:$0xff]  ;;  %v5370_v3 = vadd.f32 1.0, %v8395_v33 }
 0x354   : > { %5870 = vadd.xlane.f32.xlu0 %v5521_v49  ;;  %5872 = vadd.xlane.f32.xlu1 %v5522_v14  ;;  %v3931_v6 = vpop.xlane.xlu0 %3930  ;;  %4291 = vst.msk [vmem:[#allocation2 + $0x3b0] sm:$0xff] %vm4172_vm3, %v4130_v63  ;;  %v4561_v49 = vadd.f32 %v14440_v20, %v14439_v56  ;;  %v8397_v24 = vpop.eup %8396  ;;  %v12554_v14 = vmul.f32 0.5, %v4558_v52  ;;  %v4566_v40 = vadd.f32 %v14442_v2, %v14441_v7  ;;  %8408 = vtanh.f32 %v12551_v62  ;;  %v3660_v20 = vld [vmem:[#allocation2 + $0x400] sm:$0xff]  ;;  %v14451_v7 = vld [vmem:[#allocation64_spill] sm:$0xff]  ;;  %v14452_v2 = vld [vmem:[#allocation185_spill] sm:$0xff] }
 0x355   : > { %v4131_v53 = vadd.f32 %v3931_v6, %v3651_v28  ;;  %v3933_v37 = vpop.xlane.xlu1 %3932  ;;  %v8399_v28 = vpop.eup %8398  ;;  %v5371_v4 = vadd.f32 1.0, %v8397_v24  ;;  %v5529_v1 = vmul.f32 %v5369_v18, %v12495_v22  ;;  %v5530_v19 = vmul.f32 %v5370_v3, %v12498_v41  ;;  %v14447_v22 = vld [vmem:[#allocation61_spill] sm:$0xff]  ;;  %v3661_v24 = vld [vmem:[#allocation2 + $0x408] sm:$0xff]  ;;  %v14454_v3 = vld [vmem:[#allocation180_spill] sm:$0xff] }
 0x356   : > { %v4132_v44 = vadd.f32 %v3933_v37, %v3652_v60  ;;  %8410 = vtanh.f32 %v12554_v14  ;;  %v14445_v60 = vld [vmem:[#allocation62_spill] sm:$0xff]  ;;  %v3658_v37 = vld [vmem:[#allocation2 + $0x3f0] sm:$0xff]  ;;  %v5372_v47 = vadd.f32 1.0, %v8399_v28 }
 0x357   : > { %4292 = vst.msk [vmem:[#allocation2 + $0x3b8] sm:$0xff] %vm4172_vm3, %v4131_v53  ;;  %v12571_v53 = vmul.f32 0.5, %v4566_v40  ;;  %v5531_v52 = vmul.f32 %v5371_v4, %v12505_v11  ;;  %v4585_v40 = vadd.f32 %v14452_v2, %v14451_v7 }
 0x358   : > { %5874 = vadd.xlane.f32.xlu0 %v5523_v43  ;;  %5876 = vadd.xlane.f32.xlu1 %v5524_v46  ;;  %v3935_v8 = vpop.xlane.xlu0 %3934  ;;  %4293 = vst.msk [vmem:[#allocation2 + $0x3c0] sm:$0xff] %vm4172_vm3, %v4132_v44  ;;  %v12561_v43 = vmul.f32 0.5, %v4561_v49  ;;  %v4574_v46 = vadd.f32 %v14446_v10, %v14445_v60  ;;  %v14448_v44 = vld [vmem:[#allocation173_spill] sm:$0xff]  ;;  %v5532_v11 = vmul.f32 %v5372_v47, %v12515_v29 }
 0x359   : > { %v4133_v15 = vadd.f32 %v3935_v8, %v3653_v61  ;;  %v3937_v31 = vpop.xlane.xlu1 %3936  ;;  %v8401_v61 = vpop.eup %8400  ;;  %v12579_v8 = vmul.f32 0.5, %v4569_v21  ;;  %v3663_v10 = vld [vmem:[#allocation2 + $0x418] sm:$0xff] }
 0x35a   : > { %v4134_v38 = vadd.f32 %v3937_v31, %v3654_v57  ;;  %v8403_v42 = vpop.eup %8402  ;;  %8412 = vtanh.f32 %v12561_v43  ;;  %v5373_v5 = vadd.f32 1.0, %v8401_v61  ;;  %v14457_v47 = vld [vmem:[#allocation73_spill] sm:$0xff] }
 0x35b   : > { %4294 = vst.msk [vmem:[#allocation2 + $0x3c8] sm:$0xff] %vm4172_vm3, %v4133_v15  ;;  %8414 = vtanh.f32 %v12571_v53  ;;  %v14450_v15 = vld [vmem:[#allocation181_spill] sm:$0xff]  ;;  %v5374_v49 = vadd.f32 1.0, %v8403_v42 }
 0x35c   : > { %5878 = vadd.xlane.f32.xlu0 %v5525_v55  ;;  %5880 = vadd.xlane.f32.xlu1 %v5526_v50  ;;  %v3939_v36 = vpop.xlane.xlu0 %3938  ;;  %4295 = vst.msk [vmem:[#allocation2 + $0x3d0] sm:$0xff] %vm4172_vm3, %v4134_v38  ;;  %v4577_v55 = vadd.f32 %v14448_v44, %v14447_v22  ;;  %v8405_v57 = vpop.eup %8404  ;;  %v12582_v50 = vmul.f32 0.5, %v4574_v46  ;;  %v4582_v33 = vadd.f32 %v14450_v15, %v14449_v0  ;;  %8416 = vtanh.f32 %v12579_v8  ;;  %v3664_v44 = vld [vmem:[#allocation2 + $0x420] sm:$0xff]  ;;  %v14459_v0 = vld [vmem:[#allocation72_spill] sm:$0xff]  ;;  %v14460_v15 = vld [vmem:[#allocation193_spill] sm:$0xff] }
 0x35d   : > { %v4135_v39 = vadd.f32 %v3939_v36, %v3655_v32  ;;  %v3941_v63 = vpop.xlane.xlu1 %3940  ;;  %v8407_v32 = vpop.eup %8406  ;;  %v5375_v18 = vadd.f32 1.0, %v8405_v57  ;;  %v5533_v29 = vmul.f32 %v5373_v5, %v12523_v16  ;;  %v5534_v4 = vmul.f32 %v5374_v49, %v12526_v48  ;;  %v14455_v16 = vld [vmem:[#allocation69_spill] sm:$0xff]  ;;  %v3665_v57 = vld [vmem:[#allocation2 + $0x428] sm:$0xff]  ;;  %v14462_v49 = vld [vmem:[#allocation188_spill] sm:$0xff] }
 0x35e   : > { %v4136_v6 = vadd.f32 %v3941_v63, %v3656_v9  ;;  %8418 = vtanh.f32 %v12582_v50  ;;  %v14453_v9 = vld [vmem:[#allocation70_spill] sm:$0xff]  ;;  %v3662_v63 = vld [vmem:[#allocation2 + $0x410] sm:$0xff]  ;;  %v5376_v12 = vadd.f32 1.0, %v8407_v32 }
 0x35f   : > { %4296 = vst.msk [vmem:[#allocation2 + $0x3d8] sm:$0xff] %vm4172_vm3, %v4135_v39  ;;  %v12599_v39 = vmul.f32 0.5, %v4582_v33  ;;  %v5535_v46 = vmul.f32 %v5375_v18, %v12533_v54  ;;  %v4601_v33 = vadd.f32 %v14460_v15, %v14459_v0 }
 0x360   : > { %5882 = vadd.xlane.f32.xlu0 %v5527_v17  ;;  %5884 = vadd.xlane.f32.xlu1 %v5528_v59  ;;  %v3943_v30 = vpop.xlane.xlu0 %3942  ;;  %4297 = vst.msk [vmem:[#allocation2 + $0x3e0] sm:$0xff] %vm4172_vm3, %v4136_v6  ;;  %v12589_v17 = vmul.f32 0.5, %v4577_v55  ;;  %v4590_v59 = vadd.f32 %v14454_v3, %v14453_v9  ;;  %v14456_v6 = vld [vmem:[#allocation182_spill] sm:$0xff]  ;;  %v5536_v54 = vmul.f32 %v5376_v12, %v12543_v34  ;;  %v3667_v3 = vld [vmem:[#allocation2 + $0x438] sm:$0xff] }
 0x361   : > { %v4137_v13 = vadd.f32 %v3943_v30, %v3657_v58  ;;  %v3945_v51 = vpop.xlane.xlu1 %3944  ;;  %v8409_v58 = vpop.eup %8408  ;;  %v12607_v30 = vmul.f32 0.5, %v4585_v40  ;;  %v14465_v12 = vld [vmem:[#allocation81_spill] sm:$0xff] }
 0x362   : > { %v4138_v41 = vadd.f32 %v3945_v51, %v3658_v37  ;;  %v8411_v21 = vpop.eup %8410  ;;  %8420 = vtanh.f32 %v12589_v17  ;;  %v5377_v61 = vadd.f32 1.0, %v8409_v58 }
 0x363   : > { %4298 = vst.msk [vmem:[#allocation2 + $0x3e8] sm:$0xff] %vm4172_vm3, %v4137_v13  ;;  %8422 = vtanh.f32 %v12599_v39  ;;  %v14458_v13 = vld [vmem:[#allocation189_spill] sm:$0xff]  ;;  %v5378_v55 = vadd.f32 1.0, %v8411_v21 }
 0x364   : > { %5886 = vadd.xlane.f32.xlu0 %v5529_v1  ;;  %5888 = vadd.xlane.f32.xlu1 %v5530_v19  ;;  %v3947_v56 = vpop.xlane.xlu0 %3946  ;;  %4299 = vst.msk [vmem:[#allocation2 + $0x3f0] sm:$0xff] %vm4172_vm3, %v4138_v41  ;;  %v4593_v1 = vadd.f32 %v14456_v6, %v14455_v16  ;;  %v8413_v37 = vpop.eup %8412  ;;  %v12610_v19 = vmul.f32 0.5, %v4590_v59  ;;  %v4598_v42 = vadd.f32 %v14458_v13, %v14457_v47  ;;  %8424 = vtanh.f32 %v12607_v30  ;;  %v3668_v6 = vld [vmem:[#allocation2 + $0x440] sm:$0xff]  ;;  %v14467_v47 = vld [vmem:[#allocation80_spill] sm:$0xff] }
 0x365   : > { %v4139_v31 = vadd.f32 %v3947_v56, %v3659_v45  ;;  %v3949_v38 = vpop.xlane.xlu1 %3948  ;;  %v8415_v45 = vpop.eup %8414  ;;  %v5379_v5 = vadd.f32 1.0, %v8413_v37  ;;  %v5537_v34 = vmul.f32 %v5377_v61, %v12551_v62  ;;  %v5538_v18 = vmul.f32 %v5378_v55, %v12554_v14  ;;  %v14463_v62 = vld [vmem:[#allocation77_spill] sm:$0xff]  ;;  %v3669_v37 = vld [vmem:[#allocation2 + $0x448] sm:$0xff]  ;;  %v14468_v13 = vld [vmem:[#allocation204_spill] sm:$0xff] }
 0x366   : > { %v4140_v36 = vadd.f32 %v3949_v38, %v3660_v20  ;;  %8426 = vtanh.f32 %v12610_v19  ;;  %v14461_v20 = vld [vmem:[#allocation78_spill] sm:$0xff]  ;;  %v3666_v38 = vld [vmem:[#allocation2 + $0x430] sm:$0xff]  ;;  %v5380_v7 = vadd.f32 1.0, %v8415_v45  ;;  %v14470_v55 = vld [vmem:[#allocation197_spill] sm:$0xff] }
 0x367   : > { %4300 = vst.msk [vmem:[#allocation2 + $0x3f8] sm:$0xff] %vm4172_vm3, %v4139_v31  ;;  %v12627_v31 = vmul.f32 0.5, %v4598_v42  ;;  %v5539_v59 = vmul.f32 %v5379_v5, %v12561_v43  ;;  %v4617_v42 = vadd.f32 %v14468_v13, %v14467_v47 }
 0x368   : > { %5890 = vadd.xlane.f32.xlu0 %v5531_v52  ;;  %5892 = vadd.xlane.f32.xlu1 %v5532_v11  ;;  %v3951_v28 = vpop.xlane.xlu0 %3950  ;;  %4301 = vst.msk [vmem:[#allocation2 + $0x400] sm:$0xff] %vm4172_vm3, %v4140_v36  ;;  %v12617_v52 = vmul.f32 0.5, %v4593_v1  ;;  %v4606_v11 = vadd.f32 %v14462_v49, %v14461_v20  ;;  %v14464_v36 = vld [vmem:[#allocation190_spill] sm:$0xff]  ;;  %v5540_v43 = vmul.f32 %v5380_v7, %v12571_v53  ;;  %v3671_v49 = vld [vmem:[#allocation2 + $0x458] sm:$0xff] }
 0x369   : > { %v4141_v23 = vadd.f32 %v3951_v28, %v3661_v24  ;;  %v3953_v60 = vpop.xlane.xlu1 %3952  ;;  %v8417_v24 = vpop.eup %8416  ;;  %v12635_v28 = vmul.f32 0.5, %v4601_v33  ;;  %v14473_v7 = vld [vmem:[#allocation89_spill] sm:$0xff] }
 0x36a   : > { %v4142_v48 = vadd.f32 %v3953_v60, %v3662_v63  ;;  %v8419_v40 = vpop.eup %8418  ;;  %8428 = vtanh.f32 %v12617_v52  ;;  %v5381_v58 = vadd.f32 1.0, %v8417_v24 }
 0x36b   : > { %4302 = vst.msk [vmem:[#allocation2 + $0x408] sm:$0xff] %vm4172_vm3, %v4141_v23  ;;  %8430 = vtanh.f32 %v12627_v31  ;;  %v14466_v23 = vld [vmem:[#allocation198_spill] sm:$0xff]  ;;  %v5382_v1 = vadd.f32 1.0, %v8419_v40 }
 0x36c   : > { %5894 = vadd.xlane.f32.xlu0 %v5533_v29  ;;  %5896 = vadd.xlane.f32.xlu1 %v5534_v4  ;;  %v3955_v22 = vpop.xlane.xlu0 %3954  ;;  %4303 = vst.msk [vmem:[#allocation2 + $0x410] sm:$0xff] %vm4172_vm3, %v4142_v48  ;;  %v4609_v29 = vadd.f32 %v14464_v36, %v14463_v62  ;;  %v8421_v63 = vpop.eup %8420  ;;  %v12638_v4 = vmul.f32 0.5, %v4606_v11  ;;  %v4614_v21 = vadd.f32 %v14466_v23, %v14465_v12  ;;  %8432 = vtanh.f32 %v12635_v28  ;;  %v3672_v36 = vld [vmem:[#allocation2 + $0x460] sm:$0xff]  ;;  %v14475_v12 = vld [vmem:[#allocation88_spill] sm:$0xff]  ;;  %v14476_v23 = vld [vmem:[#allocation213_spill] sm:$0xff] }
 0x36d   : > { %v4143_v51 = vadd.f32 %v3955_v22, %v3663_v10  ;;  %v3957_v41 = vpop.xlane.xlu1 %3956  ;;  %v8423_v10 = vpop.eup %8422  ;;  %v5383_v61 = vadd.f32 1.0, %v8421_v63  ;;  %v5541_v53 = vmul.f32 %v5381_v58, %v12579_v8  ;;  %v5542_v5 = vmul.f32 %v5382_v1, %v12582_v50  ;;  %v14471_v8 = vld [vmem:[#allocation85_spill] sm:$0xff]  ;;  %v3673_v63 = vld [vmem:[#allocation2 + $0x468] sm:$0xff]  ;;  %v14478_v1 = vld [vmem:[#allocation208_spill] sm:$0xff] }
 0x36e   : > { %v4144_v56 = vadd.f32 %v3957_v41, %v3664_v44  ;;  %8434 = vtanh.f32 %v12638_v4  ;;  %v14469_v44 = vld [vmem:[#allocation86_spill] sm:$0xff]  ;;  %v3670_v41 = vld [vmem:[#allocation2 + $0x450] sm:$0xff]  ;;  %v5384_v0 = vadd.f32 1.0, %v8423_v10 }
 0x36f   : > { %4304 = vst.msk [vmem:[#allocation2 + $0x418] sm:$0xff] %vm4172_vm3, %v4143_v51  ;;  %v12655_v51 = vmul.f32 0.5, %v4614_v21  ;;  %v5543_v11 = vmul.f32 %v5383_v61, %v12589_v17  ;;  %v4633_v21 = vadd.f32 %v14476_v23, %v14475_v12 }
 0x370   : > { %5898 = vadd.xlane.f32.xlu0 %v5535_v46  ;;  %5900 = vadd.xlane.f32.xlu1 %v5536_v54  ;;  %v3959_v32 = vpop.xlane.xlu0 %3958  ;;  %4305 = vst.msk [vmem:[#allocation2 + $0x420] sm:$0xff] %vm4172_vm3, %v4144_v56  ;;  %v12645_v46 = vmul.f32 0.5, %v4609_v29  ;;  %v4622_v54 = vadd.f32 %v14470_v55, %v14469_v44  ;;  %v14472_v56 = vld [vmem:[#allocation200_spill] sm:$0xff]  ;;  %v5544_v17 = vmul.f32 %v5384_v0, %v12599_v39  ;;  %v3675_v55 = vld [vmem:[#allocation2 + $0x478] sm:$0xff] }
 0x371   : > { %v4145_v2 = vadd.f32 %v3959_v32, %v3665_v57  ;;  %v3961_v9 = vpop.xlane.xlu1 %3960  ;;  %v8425_v57 = vpop.eup %8424  ;;  %v12663_v32 = vmul.f32 0.5, %v4617_v42  ;;  %v14481_v0 = vld [vmem:[#allocation97_spill] sm:$0xff] }
 0x372   : > { %v4146_v14 = vadd.f32 %v3961_v9, %v3666_v38  ;;  %v8427_v33 = vpop.eup %8426  ;;  %8436 = vtanh.f32 %v12645_v46  ;;  %v5385_v24 = vadd.f32 1.0, %v8425_v57 }
 0x373   : > { %4306 = vst.msk [vmem:[#allocation2 + $0x428] sm:$0xff] %vm4172_vm3, %v4145_v2  ;;  %8438 = vtanh.f32 %v12655_v51  ;;  %v14474_v2 = vld [vmem:[#allocation209_spill] sm:$0xff]  ;;  %v5386_v29 = vadd.f32 1.0, %v8427_v33 }
 0x374   : > { %5902 = vadd.xlane.f32.xlu0 %v5537_v34  ;;  %5904 = vadd.xlane.f32.xlu1 %v5538_v18  ;;  %v3963_v16 = vpop.xlane.xlu0 %3962  ;;  %4307 = vst.msk [vmem:[#allocation2 + $0x430] sm:$0xff] %vm4172_vm3, %v4146_v14  ;;  %v4625_v34 = vadd.f32 %v14472_v56, %v14471_v8  ;;  %v8429_v38 = vpop.eup %8428  ;;  %v12666_v18 = vmul.f32 0.5, %v4622_v54  ;;  %v4630_v40 = vadd.f32 %v14474_v2, %v14473_v7  ;;  %8440 = vtanh.f32 %v12663_v32  ;;  %v3676_v56 = vld [vmem:[#allocation2 + $0x480] sm:$0xff]  ;;  %v14483_v7 = vld [vmem:[#allocation96_spill] sm:$0xff]  ;;  %v14484_v2 = vld [vmem:[#allocation221_spill] sm:$0xff] }
 0x375   : > { %v4147_v60 = vadd.f32 %v3963_v16, %v3667_v3  ;;  %v3965_v48 = vpop.xlane.xlu1 %3964  ;;  %v8431_v3 = vpop.eup %8430  ;;  %v5387_v58 = vadd.f32 1.0, %v8429_v38  ;;  %v5545_v39 = vmul.f32 %v5385_v24, %v12607_v30  ;;  %v5546_v61 = vmul.f32 %v5386_v29, %v12610_v19  ;;  %v14479_v30 = vld [vmem:[#allocation93_spill] sm:$0xff]  ;;  %v3677_v38 = vld [vmem:[#allocation2 + $0x488] sm:$0xff]  ;;  %v14486_v29 = vld [vmem:[#allocation216_spill] sm:$0xff] }
 0x376   : > { %v4148_v22 = vadd.f32 %v3965_v48, %v3668_v6  ;;  %8442 = vtanh.f32 %v12666_v18  ;;  %v14477_v6 = vld [vmem:[#allocation94_spill] sm:$0xff]  ;;  %v3674_v48 = vld [vmem:[#allocation2 + $0x470] sm:$0xff]  ;;  %v5388_v47 = vadd.f32 1.0, %v8431_v3 }
 0x377   : > { %4308 = vst.msk [vmem:[#allocation2 + $0x438] sm:$0xff] %vm4172_vm3, %v4147_v60  ;;  %v12683_v60 = vmul.f32 0.5, %v4630_v40  ;;  %v5547_v54 = vmul.f32 %v5387_v58, %v12617_v52  ;;  %v4649_v40 = vadd.f32 %v14484_v2, %v14483_v7 }
 0x378   : > { %5906 = vadd.xlane.f32.xlu0 %v5539_v59  ;;  %5908 = vadd.xlane.f32.xlu1 %v5540_v43  ;;  %v3967_v45 = vpop.xlane.xlu0 %3966  ;;  %4309 = vst.msk [vmem:[#allocation2 + $0x440] sm:$0xff] %vm4172_vm3, %v4148_v22  ;;  %v12673_v59 = vmul.f32 0.5, %v4625_v34  ;;  %v4638_v43 = vadd.f32 %v14478_v1, %v14477_v6  ;;  %v14480_v22 = vld [vmem:[#allocation210_spill] sm:$0xff]  ;;  %v5548_v52 = vmul.f32 %v5388_v47, %v12627_v31  ;;  %v3679_v1 = vld [vmem:[#allocation2 + $0x498] sm:$0xff]  ;;  %v14489_v47 = vld [vmem:[#allocation107_spill] sm:$0xff] }
 0x379   : > { %v4149_v15 = vadd.f32 %v3967_v45, %v3669_v37  ;;  %v3969_v20 = vpop.xlane.xlu1 %3968  ;;  %v8433_v37 = vpop.eup %8432  ;;  %v12691_v45 = vmul.f32 0.5, %v4633_v21 }
 0x37a   : > { %v4150_v50 = vadd.f32 %v3969_v20, %v3670_v41  ;;  %v8435_v42 = vpop.eup %8434  ;;  %8444 = vtanh.f32 %v12673_v59  ;;  %v5389_v57 = vadd.f32 1.0, %v8433_v37 }
 0x37b   : > { %4310 = vst.msk [vmem:[#allocation2 + $0x448] sm:$0xff] %vm4172_vm3, %v4149_v15  ;;  %8446 = vtanh.f32 %v12683_v60  ;;  %v14482_v15 = vld [vmem:[#allocation217_spill] sm:$0xff]  ;;  %v5390_v34 = vadd.f32 1.0, %v8435_v42 }
 0x37c   : > { %5910 = vadd.xlane.f32.xlu0 %v5541_v53  ;;  %5912 = vadd.xlane.f32.xlu1 %v5542_v5  ;;  %v3971_v62 = vpop.xlane.xlu0 %3970  ;;  %4311 = vst.msk [vmem:[#allocation2 + $0x450] sm:$0xff] %vm4172_vm3, %v4150_v50  ;;  %v4641_v53 = vadd.f32 %v14480_v22, %v14479_v30  ;;  %v8437_v41 = vpop.eup %8436  ;;  %v12694_v5 = vmul.f32 0.5, %v4638_v43  ;;  %v4646_v33 = vadd.f32 %v14482_v15, %v14481_v0  ;;  %8448 = vtanh.f32 %v12691_v45  ;;  %v3680_v22 = vld [vmem:[#allocation2 + $0x4a0] sm:$0xff]  ;;  %v14492_v15 = vld [vmem:[#allocation229_spill] sm:$0xff] }
 0x37d   : > { %v4151_v9 = vadd.f32 %v3971_v62, %v3671_v49  ;;  %v3973_v14 = vpop.xlane.xlu1 %3972  ;;  %v8439_v49 = vpop.eup %8438  ;;  %v5391_v24 = vadd.f32 1.0, %v8437_v41  ;;  %v5549_v31 = vmul.f32 %v5389_v57, %v12635_v28  ;;  %v5550_v58 = vmul.f32 %v5390_v34, %v12638_v4  ;;  %v14487_v28 = vld [vmem:[#allocation103_spill] sm:$0xff]  ;;  %v14491_v0 = vld [vmem:[#allocation106_spill] sm:$0xff]  ;;  %v14494_v34 = vld [vmem:[#allocation224_spill] sm:$0xff] }
 0x37e   : > { %v4152_v16 = vadd.f32 %v3973_v14, %v3672_v36  ;;  %8450 = vtanh.f32 %v12694_v5  ;;  %v14485_v36 = vld [vmem:[#allocation104_spill] sm:$0xff]  ;;  %v5392_v12 = vadd.f32 1.0, %v8439_v49  ;;  %v3681_v41 = vld [vmem:[#allocation2 + $0x4a8] sm:$0xff] }
 0x37f   : > { %4312 = vst.msk [vmem:[#allocation2 + $0x458] sm:$0xff] %vm4172_vm3, %v4151_v9  ;;  %v12711_v9 = vmul.f32 0.5, %v4646_v33  ;;  %v3678_v14 = vld [vmem:[#allocation2 + $0x490] sm:$0xff]  ;;  %v5551_v43 = vmul.f32 %v5391_v24, %v12645_v46  ;;  %v4665_v33 = vadd.f32 %v14492_v15, %v14491_v0 }
 0x380   : > { %5914 = vadd.xlane.f32.xlu0 %v5543_v11  ;;  %5916 = vadd.xlane.f32.xlu1 %v5544_v17  ;;  %v3975_v10 = vpop.xlane.xlu0 %3974  ;;  %4313 = vst.msk [vmem:[#allocation2 + $0x460] sm:$0xff] %vm4172_vm3, %v4152_v16  ;;  %v12701_v11 = vmul.f32 0.5, %v4641_v53  ;;  %v4654_v17 = vadd.f32 %v14486_v29, %v14485_v36  ;;  %v14488_v16 = vld [vmem:[#allocation218_spill] sm:$0xff]  ;;  %v5552_v46 = vmul.f32 %v5392_v12, %v12655_v51  ;;  %v3683_v29 = vld [vmem:[#allocation2 + $0x4b8] sm:$0xff]  ;;  %v14497_v12 = vld [vmem:[#allocation119_spill] sm:$0xff] }
 0x381   : > { %v4153_v13 = vadd.f32 %v3975_v10, %v3673_v63  ;;  %v3977_v44 = vpop.xlane.xlu1 %3976  ;;  %v8441_v63 = vpop.eup %8440  ;;  %v12719_v10 = vmul.f32 0.5, %v4649_v40 }
 0x382   : > { %v4154_v19 = vadd.f32 %v3977_v44, %v3674_v48  ;;  %v8443_v21 = vpop.eup %8442  ;;  %8452 = vtanh.f32 %v12701_v11  ;;  %v5393_v37 = vadd.f32 1.0, %v8441_v63 }
 0x383   : > { %4314 = vst.msk [vmem:[#allocation2 + $0x468] sm:$0xff] %vm4172_vm3, %v4153_v13  ;;  %8454 = vtanh.f32 %v12711_v9  ;;  %v14490_v13 = vld [vmem:[#allocation225_spill] sm:$0xff]  ;;  %v5394_v53 = vadd.f32 1.0, %v8443_v21 }
 0x384   : > { %5918 = vadd.xlane.f32.xlu0 %v5545_v39  ;;  %5920 = vadd.xlane.f32.xlu1 %v5546_v61  ;;  %v3979_v8 = vpop.xlane.xlu0 %3978  ;;  %4315 = vst.msk [vmem:[#allocation2 + $0x470] sm:$0xff] %vm4172_vm3, %v4154_v19  ;;  %v4657_v39 = vadd.f32 %v14488_v16, %v14487_v28  ;;  %v8445_v48 = vpop.eup %8444  ;;  %v12722_v61 = vmul.f32 0.5, %v4654_v17  ;;  %v4662_v42 = vadd.f32 %v14490_v13, %v14489_v47  ;;  %8456 = vtanh.f32 %v12719_v10  ;;  %v3684_v16 = vld [vmem:[#allocation2 + $0x4c0] sm:$0xff] }
 0x385   : > { %v4155_v20 = vadd.f32 %v3979_v8, %v3675_v55  ;;  %v3981_v50 = vpop.xlane.xlu1 %3980  ;;  %v8447_v55 = vpop.eup %8446  ;;  %v5395_v57 = vadd.f32 1.0, %v8445_v48  ;;  %v5553_v51 = vmul.f32 %v5393_v37, %v12663_v32  ;;  %v5554_v24 = vmul.f32 %v5394_v53, %v12666_v18  ;;  %v14495_v32 = vld [vmem:[#allocation114_spill] sm:$0xff]  ;;  %v3685_v48 = vld [vmem:[#allocation2 + $0x4c8] sm:$0xff]  ;;  %v14502_v53 = vld [vmem:[#allocation232_spill] sm:$0xff] }
 0x386   : > { %v4156_v62 = vadd.f32 %v3981_v50, %v3676_v56  ;;  %8458 = vtanh.f32 %v12722_v61  ;;  %v14493_v56 = vld [vmem:[#allocation115_spill] sm:$0xff]  ;;  %v3682_v50 = vld [vmem:[#allocation2 + $0x4b0] sm:$0xff]  ;;  %v5396_v7 = vadd.f32 1.0, %v8447_v55  ;;  %v14499_v47 = vld [vmem:[#allocation118_spill] sm:$0xff] }
 0x387   : > { %4316 = vst.msk [vmem:[#allocation2 + $0x478] sm:$0xff] %vm4172_vm3, %v4155_v20  ;;  %v12739_v20 = vmul.f32 0.5, %v4662_v42  ;;  %v5555_v17 = vmul.f32 %v5395_v57, %v12673_v59  ;;  %v14500_v13 = vld [vmem:[#allocation98_spill] sm:$0xff] }
 0x388   : > { %5922 = vadd.xlane.f32.xlu0 %v5547_v54  ;;  %5924 = vadd.xlane.f32.xlu1 %v5548_v52  ;;  %v3983_v3 = vpop.xlane.xlu0 %3982  ;;  %4317 = vst.msk [vmem:[#allocation2 + $0x480] sm:$0xff] %vm4172_vm3, %v4156_v62  ;;  %v12729_v54 = vmul.f32 0.5, %v4657_v39  ;;  %v4670_v52 = vadd.f32 %v14494_v34, %v14493_v56  ;;  %v14496_v62 = vld [vmem:[#allocation226_spill] sm:$0xff]  ;;  %v5556_v59 = vmul.f32 %v5396_v7, %v12683_v60  ;;  %v3687_v34 = vld [vmem:[#allocation2 + $0x4d8] sm:$0xff]  ;;  %v14505_v7 = vld [vmem:[#allocation131_spill] sm:$0xff] }
 0x389   : > { %v4157_v23 = vadd.f32 %v3983_v3, %v3677_v38  ;;  %v3985_v6 = vpop.xlane.xlu1 %3984  ;;  %v8449_v38 = vpop.eup %8448  ;;  %v12747_v3 = vmul.f32 0.5, %v4665_v33  ;;  %v4681_v42 = vadd.f32 %v14500_v13, %v14499_v47 }
 0x38a   : > { %v4158_v4 = vadd.f32 %v3985_v6, %v3678_v14  ;;  %v8451_v40 = vpop.eup %8450  ;;  %8460 = vtanh.f32 %v12729_v54  ;;  %v5397_v63 = vadd.f32 1.0, %v8449_v38 }
 0x38b   : > { %4318 = vst.msk [vmem:[#allocation2 + $0x488] sm:$0xff] %vm4172_vm3, %v4157_v23  ;;  %8462 = vtanh.f32 %v12739_v20  ;;  %v14498_v23 = vld [vmem:[#allocation233_spill] sm:$0xff]  ;;  %v5398_v39 = vadd.f32 1.0, %v8451_v40 }
 0x38c   : > { %5926 = vadd.xlane.f32.xlu0 %v5549_v31  ;;  %5928 = vadd.xlane.f32.xlu1 %v5550_v58  ;;  %4319 = vst.msk [vmem:[#allocation2 + $0x490] sm:$0xff] %vm4172_vm3, %v4158_v4  ;;  %v4673_v31 = vadd.f32 %v14496_v62, %v14495_v32  ;;  %v8453_v14 = vpop.eup %8452  ;;  %v12750_v58 = vmul.f32 0.5, %v4670_v52  ;;  %v4678_v21 = vadd.f32 %v14498_v23, %v14497_v12  ;;  %8464 = vtanh.f32 %v12747_v3  ;;  %v3688_v62 = vld [vmem:[#allocation2 + $0x4e0] sm:$0xff]  ;;  %v14508_v23 = vld [vmem:[#allocation108_spill] sm:$0xff] }
 0x38d   : > { %v3987_v30 = vpop.xlane.xlu0 %3986  ;;  %v3989_v19 = vpop.xlane.xlu1 %3988  ;;  %v5399_v37 = vadd.f32 1.0, %v8453_v14  ;;  %v5557_v60 = vmul.f32 %v5397_v63, %v12691_v45  ;;  %v5558_v57 = vmul.f32 %v5398_v39, %v12694_v5  ;;  %v14503_v45 = vld [vmem:[#allocation126_spill] sm:$0xff]  ;;  %v3689_v14 = vld [vmem:[#allocation2 + $0x4e8] sm:$0xff] }
 0x38e   : > { %v4159_v44 = vadd.f32 %v3987_v30, %v3679_v1  ;;  %v4160_v8 = vadd.f32 %v3989_v19, %v3680_v22  ;;  %v8455_v1 = vpop.eup %8454  ;;  %8466 = vtanh.f32 %v12750_v58  ;;  %v14501_v22 = vld [vmem:[#allocation127_spill] sm:$0xff]  ;;  %v3686_v19 = vld [vmem:[#allocation2 + $0x4d0] sm:$0xff]  ;;  %v14507_v12 = vld [vmem:[#allocation130_spill] sm:$0xff] }
 0x38f   : > { %v5400_v0 = vadd.f32 1.0, %v8455_v1  ;;  %v5559_v52 = vmul.f32 %v5399_v37, %v12701_v11  ;;  %v14510_v39 = vld [vmem:[#allocation110_spill] sm:$0xff] }
 0x390   : > { %5930 = vadd.xlane.f32.xlu0 %v5551_v43  ;;  %4320 = vst.msk [vmem:[#allocation2 + $0x498] sm:$0xff] %vm4172_vm3, %v4159_v44  ;;  %5932 = vadd.xlane.f32.xlu1 %v5552_v46  ;;  %4321 = vst.msk [vmem:[#allocation2 + $0x4a0] sm:$0xff] %vm4172_vm3, %v4160_v8  ;;  %v12757_v43 = vmul.f32 0.5, %v4673_v31  ;;  %v4686_v46 = vadd.f32 %v14502_v53, %v14501_v22  ;;  %v12767_v44 = vmul.f32 0.5, %v4678_v21  ;;  %v14504_v8 = vld [vmem:[#allocation234_spill] sm:$0xff]  ;;  %v3691_v53 = vld [vmem:[#allocation2 + $0x4f8] sm:$0xff] }
 0x391   : > { %v3991_v49 = vpop.xlane.xlu0 %3990  ;;  %v3993_v36 = vpop.xlane.xlu1 %3992  ;;  %v5560_v11 = vmul.f32 %v5400_v0, %v12711_v9  ;;  %v4697_v21 = vadd.f32 %v14508_v23, %v14507_v12  ;;  %v14513_v0 = vld [vmem:[#allocation143_spill] sm:$0xff] }
 0x392   : > { %v4161_v2 = vadd.f32 %v3991_v49, %v3681_v41  ;;  %v4162_v18 = vadd.f32 %v3993_v36, %v3682_v50  ;;  %v8457_v41 = vpop.eup %8456  ;;  %8468 = vtanh.f32 %v12757_v43  ;;  %v12775_v49 = vmul.f32 0.5, %v4681_v42 }
 0x393   : > { %v8459_v33 = vpop.eup %8458  ;;  %v5401_v38 = vadd.f32 1.0, %v8457_v41  ;;  %8470 = vtanh.f32 %v12767_v44 }
 0x394   : > { %5934 = vadd.xlane.f32.xlu0 %v5553_v51  ;;  %4322 = vst.msk [vmem:[#allocation2 + $0x4a8] sm:$0xff] %vm4172_vm3, %v4161_v2  ;;  %5936 = vadd.xlane.f32.xlu1 %v5554_v24  ;;  %4323 = vst.msk [vmem:[#allocation2 + $0x4b0] sm:$0xff] %vm4172_vm3, %v4162_v18  ;;  %v4689_v51 = vadd.f32 %v14504_v8, %v14503_v45  ;;  %v8461_v50 = vpop.eup %8460  ;;  %v12778_v24 = vmul.f32 0.5, %v4686_v46  ;;  %v14506_v2 = vld [vmem:[#allocation238_spill] sm:$0xff]  ;;  %v5402_v31 = vadd.f32 1.0, %v8459_v33  ;;  %8472 = vtanh.f32 %v12775_v49 }
 0x395   : > { %v3995_v28 = vpop.xlane.xlu0 %3994  ;;  %v3997_v4 = vpop.xlane.xlu1 %3996  ;;  %v4694_v40 = vadd.f32 %v14506_v2, %v14505_v7  ;;  %v5403_v63 = vadd.f32 1.0, %v8461_v50  ;;  %v5561_v9 = vmul.f32 %v5401_v38, %v12719_v10  ;;  %v14511_v10 = vld [vmem:[#allocation138_spill] sm:$0xff]  ;;  %v14516_v7 = vld [vmem:[#allocation120_spill] sm:$0xff] }
 0x396   : > { %v4163_v6 = vadd.f32 %v3995_v28, %v3683_v29  ;;  %v4164_v30 = vadd.f32 %v3997_v4, %v3684_v16  ;;  %v8463_v29 = vpop.eup %8462  ;;  %8474 = vtanh.f32 %v12778_v24  ;;  %v14509_v16 = vld [vmem:[#allocation139_spill] sm:$0xff]  ;;  %v3690_v4 = vld [vmem:[#allocation2 + $0x4f0] sm:$0xff]  ;;  %v5562_v37 = vmul.f32 %v5402_v31, %v12722_v61  ;;  %v14515_v38 = vld [vmem:[#allocation142_spill] sm:$0xff] }
 0x397   : > { %v5404_v47 = vadd.f32 1.0, %v8463_v29  ;;  %v5563_v46 = vmul.f32 %v5403_v63, %v12729_v54  ;;  %v4713_v2 = vadd.f32 %v14516_v7, %v14515_v38 }
 0x398   : > { %5938 = vadd.xlane.f32.xlu0 %v5555_v17  ;;  %4324 = vst.msk [vmem:[#allocation2 + $0x4b8] sm:$0xff] %vm4172_vm3, %v4163_v6  ;;  %5940 = vadd.xlane.f32.xlu1 %v5556_v59  ;;  %4325 = vst.msk [vmem:[#allocation2 + $0x4c0] sm:$0xff] %vm4172_vm3, %v4164_v30  ;;  %v12785_v17 = vmul.f32 0.5, %v4689_v51  ;;  %v4702_v59 = vadd.f32 %v14510_v39, %v14509_v16  ;;  %v12795_v6 = vmul.f32 0.5, %v4694_v40  ;;  %v14512_v30 = vld [vmem:[#allocation239_spill] sm:$0xff]  ;;  %v5654_v16 = vld [vmem:[#allocation2 + $0x10] sm:$0xff] }
 0x399   : > { %v3999_v55 = vpop.xlane.xlu0 %3998  ;;  %v4001_v56 = vpop.xlane.xlu1 %4000  ;;  %v5564_v51 = vmul.f32 %v5404_v47, %v12739_v20  ;;  %v14522_v47 = vld [vmem:[#allocation247_spill] sm:$0xff] }
 0x39a   : > { %v4165_v15 = vadd.f32 %v3999_v55, %v3685_v48  ;;  %v4166_v5 = vadd.f32 %v4001_v56, %v3686_v19  ;;  %v8465_v48 = vpop.eup %8464  ;;  %8476 = vtanh.f32 %v12785_v17  ;;  %v12803_v55 = vmul.f32 0.5, %v4697_v21  ;;  %v14520_v21 = vld [vmem:[#allocation243_spill] sm:$0xff] }
 0x39b   : > { %v8467_v42 = vpop.eup %8466  ;;  %v5405_v41 = vadd.f32 1.0, %v8465_v48  ;;  %8478 = vtanh.f32 %v12795_v6 }
 0x39c   : > { %5942 = vadd.xlane.f32.xlu0 %v5557_v60  ;;  %4326 = vst.msk [vmem:[#allocation2 + $0x4c8] sm:$0xff] %vm4172_vm3, %v4165_v15  ;;  %5944 = vadd.xlane.f32.xlu1 %v5558_v57  ;;  %4327 = vst.msk [vmem:[#allocation2 + $0x4d0] sm:$0xff] %vm4172_vm3, %v4166_v5  ;;  %v4705_v60 = vadd.f32 %v14512_v30, %v14511_v10  ;;  %v8469_v19 = vpop.eup %8468  ;;  %v12806_v57 = vmul.f32 0.5, %v4702_v59  ;;  %v14514_v15 = vld [vmem:[#allocation242_spill] sm:$0xff]  ;;  %v5406_v8 = vadd.f32 1.0, %v8467_v42  ;;  %8480 = vtanh.f32 %v12803_v55  ;;  %v5655_v42 = vld [vmem:[#allocation2 + $0x18] sm:$0xff] }
 0x39d   : > { %v4003_v32 = vpop.xlane.xlu0 %4002  ;;  %v4005_v18 = vpop.xlane.xlu1 %4004  ;;  %v4710_v33 = vadd.f32 %v14514_v15, %v14513_v0  ;;  %v5652_v5 = vld [vmem:[#allocation2] sm:$0xff]  ;;  %v5407_v50 = vadd.f32 1.0, %v8469_v19  ;;  %v5565_v20 = vmul.f32 %v5405_v41, %v12747_v3  ;;  %v12831_v59 = vmul.f32 0.5, %v4713_v2  ;;  %v14524_v0 = vld [vmem:[#allocation132_spill] sm:$0xff] }
 0x39e   : > { %v4167_v36 = vadd.f32 %v4003_v32, %v3687_v34  ;;  %v4168_v28 = vadd.f32 %v4005_v18, %v3688_v62  ;;  %v8471_v56 = vpop.eup %8470  ;;  %v12813_v34 = vmul.f32 0.5, %v4705_v60  ;;  %8482 = vtanh.f32 %v12806_v57  ;;  %v14517_v32 = vld [vmem:[#allocation151_spill] sm:$0xff]  ;;  %v14518_v62 = vld [vmem:[#allocation122_spill] sm:$0xff] }
 0x39f   : > { %v4718_v31 = vadd.f32 %v14518_v62, %v14517_v32  ;;  %v8473_v18 = vpop.eup %8472  ;;  %v5408_v63 = vadd.f32 1.0, %v8471_v56  ;;  %v14519_v3 = vld [vmem:[#allocation150_spill] sm:$0xff]  ;;  %v5567_v39 = vmul.f32 %v5407_v50, %v12757_v43  ;;  %v5657_v56 = vld [vmem:[#allocation2 + $0x28] sm:$0xff]  ;;  %v5658_v32 = vld [vmem:[#allocation2 + $0x30] sm:$0xff] }
 0x3a0   : > { %5946 = vadd.xlane.f32.xlu0 %v5559_v52  ;;  %4328 = vst.msk [vmem:[#allocation2 + $0x4d8] sm:$0xff] %vm4172_vm3, %v4167_v36  ;;  %5948 = vadd.xlane.f32.xlu1 %v5560_v11  ;;  %4329 = vst.msk [vmem:[#allocation2 + $0x4e0] sm:$0xff] %vm4172_vm3, %v4168_v28  ;;  %v12823_v11 = vmul.f32 0.5, %v4710_v33  ;;  %v5653_v36 = vld [vmem:[#allocation2 + $0x8] sm:$0xff]  ;;  %v8475_v23 = vpop.eup %8474  ;;  %8484 = vtanh.f32 %v12813_v34  ;;  %v4721_v28 = vadd.f32 %v14520_v21, %v14519_v3  ;;  %v14523_v41 = vld [vmem:[#allocation154_spill] sm:$0xff] }
 0x3a1   : > { %v4007_v1 = vpop.xlane.xlu0 %4006  ;;  %v4009_v22 = vpop.xlane.xlu1 %4008  ;;  %v12834_v48 = vmul.f32 0.5, %v4718_v31  ;;  %v5410_v30 = vadd.f32 1.0, %v8475_v23  ;;  %v5568_v43 = vmul.f32 %v5408_v63, %v12767_v44  ;;  %v4729_v15 = vadd.f32 %v14524_v0, %v14523_v41  ;;  %v14529_v63 = vld [vmem:[#allocation167_spill] sm:$0xff]  ;;  %v5659_v3 = vld [vmem:[#allocation2 + $0x38] sm:$0xff] }
 0x3a2   : > { %v4169_v13 = vadd.f32 %v4007_v1, %v3689_v14  ;;  %v4170_v61 = vadd.f32 %v4009_v22, %v3690_v4  ;;  %v5566_v14 = vmul.f32 %v5406_v8, %v12750_v58  ;;  %v5409_v4 = vadd.f32 1.0, %v8473_v18  ;;  %v14526_v8 = vld [vmem:[#allocation134_spill] sm:$0xff] }
 0x3a3   : > { %8486 = vtanh.f32 %v12823_v11  ;;  %v5570_v50 = vmul.f32 %v5410_v30, %v12778_v24  ;;  %v14534_v30 = vld [vmem:[#allocation146_spill] sm:$0xff] }
 0x3a4   : > { %5950 = vadd.xlane.f32.xlu0 %v5561_v9  ;;  %4330 = vst.msk [vmem:[#allocation2 + $0x4e8] sm:$0xff] %vm4172_vm3, %v4169_v13  ;;  %5952 = vadd.xlane.f32.xlu1 %v5562_v37  ;;  %4331 = vst.msk [vmem:[#allocation2 + $0x4f0] sm:$0xff] %vm4172_vm3, %v4170_v61  ;;  %v8477_v1 = vpop.eup %8476  ;;  %v14521_v37 = vld [vmem:[#allocation155_spill] sm:$0xff]  ;;  %8488 = vtanh.f32 %v12831_v59  ;;  %v5569_v44 = vmul.f32 %v5409_v4, %v12775_v49  ;;  %v14527_v49 = vld [vmem:[#allocation162_spill] sm:$0xff] }
 0x3a5   : > { %v4011_v45 = vpop.xlane.xlu0 %4010  ;;  %v5813_v52 = vpop.xlane.xlu1 %5812  ;;  %v4726_v13 = vadd.f32 %v14522_v47, %v14521_v37  ;;  %v5411_v19 = vadd.f32 1.0, %v8477_v1  ;;  %8490 = vtanh.f32 %v12834_v48  ;;  %v14531_v37 = vld [vmem:[#allocation166_spill] sm:$0xff]  ;;  %v14532_v47 = vld [vmem:[#allocation144_spill] sm:$0xff] }
 0x3a6   : > { %v4171_v54 = vadd.f32 %v4011_v45, %v3691_v53  ;;  %v6132_v40 = vadd.f32 %v5813_v52, %v5652_v5  ;;  %v8479_v22 = vpop.eup %8478  ;;  %v12841_v53 = vmul.f32 0.5, %v4721_v28  ;;  %v14525_v45 = vld [vmem:[#allocation163_spill] sm:$0xff] }
 0x3a7   : > { %v8481_v5 = vpop.eup %8480  ;;  %v5412_v38 = vadd.f32 1.0, %v8479_v22  ;;  %v5571_v31 = vmul.f32 %v5411_v19, %v12785_v17  ;;  %v5661_v22 = vld [vmem:[#allocation2 + $0x48] sm:$0xff] }
 0x3a8   : > { %5954 = vadd.xlane.f32.xlu0 %v5563_v46  ;;  %4332 = vst.msk [vmem:[#allocation2 + $0x4f8] sm:$0xff] %vm4172_vm3, %v4171_v54  ;;  %5956 = vadd.xlane.f32.xlu1 %v5564_v51  ;;  %v5656_v46 = vld [vmem:[#allocation2 + $0x20] sm:$0xff]  ;;  %v4734_v51 = vadd.f32 %v14526_v8, %v14525_v45  ;;  %v12851_v54 = vmul.f32 0.5, %v4726_v13  ;;  %v8483_v2 = vpop.eup %8482  ;;  %8492 = vtanh.f32 %v12841_v53  ;;  %v5413_v18 = vadd.f32 1.0, %v8481_v5  ;;  %v5662_v45 = vld [vmem:[#allocation2 + $0x50] sm:$0xff] }
 0x3a9   : > { %v5815_v29 = vpop.xlane.xlu0 %5814  ;;  %6293 = vst.msk [vmem:[#allocation2] sm:$0xff] %vm6292_vm4, %v6132_v40  ;;  %v5817_v9 = vpop.xlane.xlu1 %5816  ;;  %v14528_v40 = vld [vmem:[#allocation249_spill] sm:$0xff]  ;;  %v5414_v28 = vadd.f32 1.0, %v8483_v2  ;;  %v5572_v17 = vmul.f32 %v5412_v38, %v12795_v6  ;;  %v4745_v13 = vadd.f32 %v14532_v47, %v14531_v37  ;;  %v14537_v38 = vld [vmem:[#allocation178_spill] sm:$0xff] }
 0x3aa   : > { %v6133_v12 = vadd.f32 %v5815_v29, %v5653_v36  ;;  %v6134_v58 = vadd.f32 %v5817_v9, %v5654_v16  ;;  %v12859_v36 = vmul.f32 0.5, %v4729_v15  ;;  %v8485_v29 = vpop.eup %8484  ;;  %8494 = vtanh.f32 %v12851_v54 }
 0x3ab   : > { %v5415_v4 = vadd.f32 1.0, %v8485_v29  ;;  %v5573_v6 = vmul.f32 %v5413_v18, %v12803_v55  ;;  %v5574_v19 = vmul.f32 %v5414_v28, %v12806_v57  ;;  %v14535_v55 = vld [vmem:[#allocation174_spill] sm:$0xff] }
 0x3ac   : > { %5958 = vadd.xlane.f32.xlu0 %v5565_v20  ;;  %6294 = vst.msk [vmem:[#allocation2 + $0x8] sm:$0xff] %vm6292_vm4, %v6133_v12  ;;  %5960 = vadd.xlane.f32.xlu1 %v5566_v14  ;;  %6295 = vst.msk [vmem:[#allocation2 + $0x10] sm:$0xff] %vm6292_vm4, %v6134_v58  ;;  %v4737_v20 = vadd.f32 %v14528_v40, %v14527_v49  ;;  %v12862_v14 = vmul.f32 0.5, %v4734_v51  ;;  %v14530_v12 = vld [vmem:[#allocation255_spill] sm:$0xff]  ;;  %v5660_v58 = vld [vmem:[#allocation2 + $0x40] sm:$0xff]  ;;  %8496 = vtanh.f32 %v12859_v36 }
 0x3ad   : > { %v5819_v10 = vpop.xlane.xlu0 %5818  ;;  %v5821_v61 = vpop.xlane.xlu1 %5820  ;;  %v4742_v23 = vadd.f32 %v14530_v12, %v14529_v63  ;;  %v5575_v51 = vmul.f32 %v5415_v4, %v12813_v34  ;;  %v5663_v49 = vld [vmem:[#allocation2 + $0x58] sm:$0xff]  ;;  %v14540_v12 = vld [vmem:[#allocation164_spill] sm:$0xff]  ;;  %v14542_v28 = vld [vmem:[#allocation158_spill] sm:$0xff] }
 0x3ae   : > { %v6135_v60 = vadd.f32 %v5819_v10, %v5655_v42  ;;  %v6136_v33 = vadd.f32 %v5821_v61, %v5656_v46  ;;  %v8487_v16 = vpop.eup %8486  ;;  %8498 = vtanh.f32 %v12862_v14  ;;  %v14533_v10 = vld [vmem:[#allocation175_spill] sm:$0xff]  ;;  %v14539_v63 = vld [vmem:[#allocation177_spill] sm:$0xff] }
 0x3af   : > { %v8489_v61 = vpop.eup %8488  ;;  %v5416_v41 = vadd.f32 1.0, %v8487_v16  ;;  %v5665_v16 = vld [vmem:[#allocation2 + $0x68] sm:$0xff] }
 0x3b0   : > { %5962 = vadd.xlane.f32.xlu0 %v5567_v39  ;;  %6296 = vst.msk [vmem:[#allocation2 + $0x18] sm:$0xff] %vm6292_vm4, %v6135_v60  ;;  %5964 = vadd.xlane.f32.xlu1 %v5568_v43  ;;  %6297 = vst.msk [vmem:[#allocation2 + $0x20] sm:$0xff] %vm6292_vm4, %v6136_v33  ;;  %v12869_v39 = vmul.f32 0.5, %v4737_v20  ;;  %v4750_v43 = vadd.f32 %v14534_v30, %v14533_v10  ;;  %v12879_v60 = vmul.f32 0.5, %v4742_v23  ;;  %v8491_v15 = vpop.eup %8490  ;;  %v14536_v33 = vld [vmem:[#allocation257_spill] sm:$0xff]  ;;  %v5417_v5 = vadd.f32 1.0, %v8489_v61 }
 0x3b1   : > { %v5823_v52 = vpop.xlane.xlu0 %5822  ;;  %v5825_v62 = vpop.xlane.xlu1 %5824  ;;  %v5418_v20 = vadd.f32 1.0, %v8491_v15  ;;  %v5576_v34 = vmul.f32 %v5416_v41, %v12823_v11  ;;  %v4761_v23 = vadd.f32 %v14540_v12, %v14539_v63  ;;  %v5666_v10 = vld [vmem:[#allocation2 + $0x70] sm:$0xff]  ;;  %v14545_v41 = vld [vmem:[#allocation187_spill] sm:$0xff] }
 0x3b2   : > { %v6137_v7 = vadd.f32 %v5823_v52, %v5657_v56  ;;  %v6138_v24 = vadd.f32 %v5825_v62, %v5658_v32  ;;  %8500 = vtanh.f32 %v12869_v39  ;;  %v12887_v56 = vmul.f32 0.5, %v4745_v13  ;;  %v8493_v52 = vpop.eup %8492 }
 0x3b3   : > { %8502 = vtanh.f32 %v12879_v60  ;;  %v5419_v18 = vadd.f32 1.0, %v8493_v52  ;;  %v5577_v11 = vmul.f32 %v5417_v5, %v12831_v59  ;;  %v5578_v4 = vmul.f32 %v5418_v20, %v12834_v48  ;;  %v14543_v59 = vld [vmem:[#allocation183_spill] sm:$0xff]  ;;  %v14550_v20 = vld [vmem:[#allocation170_spill] sm:$0xff] }
 0x3b4   : > { %5966 = vadd.xlane.f32.xlu0 %v5569_v44  ;;  %6298 = vst.msk [vmem:[#allocation2 + $0x28] sm:$0xff] %vm6292_vm4, %v6137_v7  ;;  %5968 = vadd.xlane.f32.xlu1 %v5570_v50  ;;  %6299 = vst.msk [vmem:[#allocation2 + $0x30] sm:$0xff] %vm6292_vm4, %v6138_v24  ;;  %v4753_v44 = vadd.f32 %v14536_v33, %v14535_v55  ;;  %v12890_v50 = vmul.f32 0.5, %v4750_v43  ;;  %v14538_v7 = vld [vmem:[#allocation261_spill] sm:$0xff]  ;;  %v8495_v62 = vpop.eup %8494  ;;  %v5664_v24 = vld [vmem:[#allocation2 + $0x60] sm:$0xff]  ;;  %8504 = vtanh.f32 %v12887_v56 }
 0x3b5   : > { %v5827_v21 = vpop.xlane.xlu0 %5826  ;;  %v5829_v1 = vpop.xlane.xlu1 %5828  ;;  %v4758_v2 = vadd.f32 %v14538_v7, %v14537_v38  ;;  %v5420_v37 = vadd.f32 1.0, %v8495_v62  ;;  %v5579_v43 = vmul.f32 %v5419_v18, %v12841_v53  ;;  %v5667_v55 = vld [vmem:[#allocation2 + $0x78] sm:$0xff]  ;;  %v14547_v38 = vld [vmem:[#allocation186_spill] sm:$0xff]  ;;  %v14548_v7 = vld [vmem:[#allocation168_spill] sm:$0xff] }
 0x3b6   : > { %v6139_v9 = vadd.f32 %v5827_v21, %v5659_v3  ;;  %v6140_v42 = vadd.f32 %v5829_v1, %v5660_v58  ;;  %8506 = vtanh.f32 %v12890_v50  ;;  %v14541_v21 = vld [vmem:[#allocation184_spill] sm:$0xff]  ;;  %v8497_v1 = vpop.eup %8496  ;;  %v5669_v62 = vld [vmem:[#allocation2 + $0x88] sm:$0xff] }
 0x3b7   : > { %v5421_v61 = vadd.f32 1.0, %v8497_v1  ;;  %v5580_v53 = vmul.f32 %v5420_v37, %v12851_v54  ;;  %v14553_v37 = vld [vmem:[#allocation195_spill] sm:$0xff] }
 0x3b8   : > { %5970 = vadd.xlane.f32.xlu0 %v5571_v31  ;;  %6300 = vst.msk [vmem:[#allocation2 + $0x38] sm:$0xff] %vm6292_vm4, %v6139_v9  ;;  %5972 = vadd.xlane.f32.xlu1 %v5572_v17  ;;  %6301 = vst.msk [vmem:[#allocation2 + $0x40] sm:$0xff] %vm6292_vm4, %v6140_v42  ;;  %v12897_v31 = vmul.f32 0.5, %v4753_v44  ;;  %v4766_v17 = vadd.f32 %v14542_v28, %v14541_v21  ;;  %v12907_v9 = vmul.f32 0.5, %v4758_v2  ;;  %v8499_v13 = vpop.eup %8498  ;;  %v14544_v42 = vld [vmem:[#allocation263_spill] sm:$0xff]  ;;  %v5670_v21 = vld [vmem:[#allocation2 + $0x90] sm:$0xff] }
 0x3b9   : > { %v5831_v46 = vpop.xlane.xlu0 %5830  ;;  %v5833_v8 = vpop.xlane.xlu1 %5832  ;;  %v5422_v44 = vadd.f32 1.0, %v8499_v13  ;;  %v4777_v2 = vadd.f32 %v14548_v7, %v14547_v38  ;;  %v5581_v54 = vmul.f32 %v5421_v61, %v12859_v36  ;;  %v14551_v36 = vld [vmem:[#allocation191_spill] sm:$0xff] }
 0x3ba   : > { %v6141_v0 = vadd.f32 %v5831_v46, %v5661_v22  ;;  %v6142_v57 = vadd.f32 %v5833_v8, %v5662_v45  ;;  %8508 = vtanh.f32 %v12897_v31  ;;  %v12915_v22 = vmul.f32 0.5, %v4761_v23 }
 0x3bb   : > { %8510 = vtanh.f32 %v12907_v9  ;;  %v5582_v18 = vmul.f32 %v5422_v44, %v12862_v14  ;;  %v14558_v44 = vld [vmem:[#allocation271_spill] sm:$0xff] }
 0x3bc   : > { %5974 = vadd.xlane.f32.xlu0 %v5573_v6  ;;  %6302 = vst.msk [vmem:[#allocation2 + $0x48] sm:$0xff] %vm6292_vm4, %v6141_v0  ;;  %5976 = vadd.xlane.f32.xlu1 %v5574_v19  ;;  %6303 = vst.msk [vmem:[#allocation2 + $0x50] sm:$0xff] %vm6292_vm4, %v6142_v57  ;;  %v4769_v6 = vadd.f32 %v14544_v42, %v14543_v59  ;;  %v8501_v46 = vpop.eup %8500  ;;  %v12918_v19 = vmul.f32 0.5, %v4766_v17  ;;  %v14546_v0 = vld [vmem:[#allocation266_spill] sm:$0xff]  ;;  %8512 = vtanh.f32 %v12915_v22  ;;  %v5671_v59 = vld [vmem:[#allocation2 + $0x98] sm:$0xff] }
 0x3bd   : > { %v5835_v40 = vpop.xlane.xlu0 %5834  ;;  %v5837_v29 = vpop.xlane.xlu1 %5836  ;;  %v4774_v15 = vadd.f32 %v14546_v0, %v14545_v41  ;;  %v5668_v57 = vld [vmem:[#allocation2 + $0x80] sm:$0xff]  ;;  %v5423_v5 = vadd.f32 1.0, %v8501_v46  ;;  %v14556_v0 = vld [vmem:[#allocation179_spill] sm:$0xff] }
 0x3be   : > { %v6143_v32 = vadd.f32 %v5835_v40, %v5663_v49  ;;  %v6144_v3 = vadd.f32 %v5837_v29, %v5664_v24  ;;  %v8503_v8 = vpop.eup %8502  ;;  %8514 = vtanh.f32 %v12918_v19  ;;  %v14549_v40 = vld [vmem:[#allocation192_spill] sm:$0xff]  ;;  %v14555_v41 = vld [vmem:[#allocation194_spill] sm:$0xff] }
 0x3bf   : > { %v8505_v29 = vpop.eup %8504  ;;  %v5424_v63 = vadd.f32 1.0, %v8503_v8  ;;  %v5583_v17 = vmul.f32 %v5423_v5, %v12869_v39  ;;  %v5673_v8 = vld [vmem:[#allocation2 + $0xa8] sm:$0xff] }
 0x3c0   : > { %5978 = vadd.xlane.f32.xlu0 %v5575_v51  ;;  %6304 = vst.msk [vmem:[#allocation2 + $0x58] sm:$0xff] %vm6292_vm4, %v6143_v32  ;;  %5980 = vadd.xlane.f32.xlu1 %v5576_v34  ;;  %6305 = vst.msk [vmem:[#allocation2 + $0x60] sm:$0xff] %vm6292_vm4, %v6144_v3  ;;  %v12925_v51 = vmul.f32 0.5, %v4769_v6  ;;  %v4782_v34 = vadd.f32 %v14550_v20, %v14549_v40  ;;  %v12935_v32 = vmul.f32 0.5, %v4774_v15  ;;  %v8507_v23 = vpop.eup %8506  ;;  %v14552_v3 = vld [vmem:[#allocation268_spill] sm:$0xff]  ;;  %v5425_v1 = vadd.f32 1.0, %v8505_v29 }
 0x3c1   : > { %v5839_v58 = vpop.xlane.xlu0 %5838  ;;  %v5841_v30 = vpop.xlane.xlu1 %5840  ;;  %v5426_v6 = vadd.f32 1.0, %v8507_v23  ;;  %v5584_v39 = vmul.f32 %v5424_v63, %v12879_v60  ;;  %v4793_v15 = vadd.f32 %v14556_v0, %v14555_v41  ;;  %v5674_v40 = vld [vmem:[#allocation2 + $0xb0] sm:$0xff]  ;;  %v14561_v63 = vld [vmem:[#allocation206_spill] sm:$0xff] }
 0x3c2   : > { %v6145_v47 = vadd.f32 %v5839_v58, %v5665_v16  ;;  %v6146_v48 = vadd.f32 %v5841_v30, %v5666_v10  ;;  %8516 = vtanh.f32 %v12925_v51  ;;  %v12943_v16 = vmul.f32 0.5, %v4777_v2 }
 0x3c3   : > { %8518 = vtanh.f32 %v12935_v32  ;;  %v5585_v60 = vmul.f32 %v5425_v1, %v12887_v56  ;;  %v5586_v5 = vmul.f32 %v5426_v6, %v12890_v50  ;;  %v14559_v56 = vld [vmem:[#allocation201_spill] sm:$0xff] }
 0x3c4   : > { %5982 = vadd.xlane.f32.xlu0 %v5577_v11  ;;  %6306 = vst.msk [vmem:[#allocation2 + $0x68] sm:$0xff] %vm6292_vm4, %v6145_v47  ;;  %5984 = vadd.xlane.f32.xlu1 %v5578_v4  ;;  %6307 = vst.msk [vmem:[#allocation2 + $0x70] sm:$0xff] %vm6292_vm4, %v6146_v48  ;;  %v4785_v11 = vadd.f32 %v14552_v3, %v14551_v36  ;;  %v8509_v58 = vpop.eup %8508  ;;  %v12946_v4 = vmul.f32 0.5, %v4782_v34  ;;  %v14554_v47 = vld [vmem:[#allocation272_spill] sm:$0xff]  ;;  %v5672_v48 = vld [vmem:[#allocation2 + $0xa0] sm:$0xff]  ;;  %8520 = vtanh.f32 %v12943_v16 }
 0x3c5   : > { %v5843_v33 = vpop.xlane.xlu0 %5842  ;;  %v5845_v52 = vpop.xlane.xlu1 %5844  ;;  %v4790_v13 = vadd.f32 %v14554_v47, %v14553_v37  ;;  %v5427_v61 = vadd.f32 1.0, %v8509_v58  ;;  %v5675_v36 = vld [vmem:[#allocation2 + $0xb8] sm:$0xff]  ;;  %v14564_v47 = vld [vmem:[#allocation280_spill] sm:$0xff] }
 0x3c6   : > { %v6147_v45 = vadd.f32 %v5843_v33, %v5667_v55  ;;  %v6148_v49 = vadd.f32 %v5845_v52, %v5668_v57  ;;  %v8511_v30 = vpop.eup %8510  ;;  %8522 = vtanh.f32 %v12946_v4  ;;  %v14557_v33 = vld [vmem:[#allocation202_spill] sm:$0xff]  ;;  %v14563_v37 = vld [vmem:[#allocation205_spill] sm:$0xff] }
 0x3c7   : > { %v8513_v52 = vpop.eup %8512  ;;  %v5428_v38 = vadd.f32 1.0, %v8511_v30  ;;  %v5587_v34 = vmul.f32 %v5427_v61, %v12897_v31  ;;  %v14566_v6 = vld [vmem:[#allocation277_spill] sm:$0xff]  ;;  %v5677_v30 = vld [vmem:[#allocation2 + $0xc8] sm:$0xff] }
 0x3c8   : > { %5986 = vadd.xlane.f32.xlu0 %v5579_v43  ;;  %6308 = vst.msk [vmem:[#allocation2 + $0x78] sm:$0xff] %vm6292_vm4, %v6147_v45  ;;  %5988 = vadd.xlane.f32.xlu1 %v5580_v53  ;;  %6309 = vst.msk [vmem:[#allocation2 + $0x80] sm:$0xff] %vm6292_vm4, %v6148_v49  ;;  %v12953_v43 = vmul.f32 0.5, %v4785_v11  ;;  %v4798_v53 = vadd.f32 %v14558_v44, %v14557_v33  ;;  %v12963_v45 = vmul.f32 0.5, %v4790_v13  ;;  %v8515_v2 = vpop.eup %8514  ;;  %v14560_v49 = vld [vmem:[#allocation274_spill] sm:$0xff]  ;;  %v5429_v29 = vadd.f32 1.0, %v8513_v52 }
 0x3c9   : > { %v5847_v24 = vpop.xlane.xlu0 %5846  ;;  %v5849_v28 = vpop.xlane.xlu1 %5848  ;;  %v5430_v11 = vadd.f32 1.0, %v8515_v2  ;;  %v5588_v31 = vmul.f32 %v5428_v38, %v12907_v9  ;;  %v4809_v13 = vadd.f32 %v14564_v47, %v14563_v37  ;;  %v5678_v33 = vld [vmem:[#allocation2 + $0xd0] sm:$0xff]  ;;  %v14569_v38 = vld [vmem:[#allocation215_spill] sm:$0xff] }
 0x3ca   : > { %v6149_v12 = vadd.f32 %v5847_v24, %v5669_v62  ;;  %v6150_v14 = vadd.f32 %v5849_v28, %v5670_v21  ;;  %8524 = vtanh.f32 %v12953_v43  ;;  %v12971_v62 = vmul.f32 0.5, %v4793_v15  ;;  %v14575_v47 = vld [vmem:[#allocation219_spill] sm:$0xff] }
 0x3cb   : > { %8526 = vtanh.f32 %v12963_v45  ;;  %v5589_v9 = vmul.f32 %v5429_v29, %v12915_v22  ;;  %v5590_v61 = vmul.f32 %v5430_v11, %v12918_v19  ;;  %v14567_v22 = vld [vmem:[#allocation211_spill] sm:$0xff]  ;;  %v14574_v11 = vld [vmem:[#allocation284_spill] sm:$0xff] }
 0x3cc   : > { %5990 = vadd.xlane.f32.xlu0 %v5581_v54  ;;  %6310 = vst.msk [vmem:[#allocation2 + $0x88] sm:$0xff] %vm6292_vm4, %v6149_v12  ;;  %5992 = vadd.xlane.f32.xlu1 %v5582_v18  ;;  %6311 = vst.msk [vmem:[#allocation2 + $0x90] sm:$0xff] %vm6292_vm4, %v6150_v14  ;;  %v4801_v54 = vadd.f32 %v14560_v49, %v14559_v56  ;;  %v8517_v24 = vpop.eup %8516  ;;  %v12974_v18 = vmul.f32 0.5, %v4798_v53  ;;  %v14562_v12 = vld [vmem:[#allocation278_spill] sm:$0xff]  ;;  %8528 = vtanh.f32 %v12971_v62  ;;  %v5679_v56 = vld [vmem:[#allocation2 + $0xd8] sm:$0xff] }
 0x3cd   : > { %v5851_v42 = vpop.xlane.xlu0 %5850  ;;  %v5853_v46 = vpop.xlane.xlu1 %5852  ;;  %v4806_v23 = vadd.f32 %v14562_v12, %v14561_v63  ;;  %v5676_v14 = vld [vmem:[#allocation2 + $0xc0] sm:$0xff]  ;;  %v5431_v1 = vadd.f32 1.0, %v8517_v24  ;;  %v14572_v12 = vld [vmem:[#allocation203_spill] sm:$0xff] }
 0x3ce   : > { %v6151_v10 = vadd.f32 %v5851_v42, %v5671_v59  ;;  %v6152_v55 = vadd.f32 %v5853_v46, %v5672_v48  ;;  %v8519_v28 = vpop.eup %8518  ;;  %8530 = vtanh.f32 %v12974_v18  ;;  %v14565_v42 = vld [vmem:[#allocation212_spill] sm:$0xff]  ;;  %v14571_v63 = vld [vmem:[#allocation214_spill] sm:$0xff] }
 0x3cf   : > { %v8521_v46 = vpop.eup %8520  ;;  %v5432_v41 = vadd.f32 1.0, %v8519_v28  ;;  %v5591_v53 = vmul.f32 %v5431_v1, %v12925_v51  ;;  %v5681_v28 = vld [vmem:[#allocation2 + $0xe8] sm:$0xff] }
 0x3d0   : > { %5994 = vadd.xlane.f32.xlu0 %v5583_v17  ;;  %6312 = vst.msk [vmem:[#allocation2 + $0x98] sm:$0xff] %vm6292_vm4, %v6151_v10  ;;  %5996 = vadd.xlane.f32.xlu1 %v5584_v39  ;;  %6313 = vst.msk [vmem:[#allocation2 + $0xa0] sm:$0xff] %vm6292_vm4, %v6152_v55  ;;  %v12981_v17 = vmul.f32 0.5, %v4801_v54  ;;  %v4814_v39 = vadd.f32 %v14566_v6, %v14565_v42  ;;  %v12991_v10 = vmul.f32 0.5, %v4806_v23  ;;  %v8523_v15 = vpop.eup %8522  ;;  %v14568_v55 = vld [vmem:[#allocation279_spill] sm:$0xff]  ;;  %v5433_v52 = vadd.f32 1.0, %v8521_v46 }
 0x3d1   : > { %v5855_v57 = vpop.xlane.xlu0 %5854  ;;  %v5857_v20 = vpop.xlane.xlu1 %5856  ;;  %v5434_v54 = vadd.f32 1.0, %v8523_v15  ;;  %v5592_v51 = vmul.f32 %v5432_v41, %v12935_v32  ;;  %v4825_v23 = vadd.f32 %v14572_v12, %v14571_v63  ;;  %v5682_v42 = vld [vmem:[#allocation2 + $0xf0] sm:$0xff]  ;;  %v14577_v41 = vld [vmem:[#allocation223_spill] sm:$0xff] }
 0x3d2   : > { %v6153_v7 = vadd.f32 %v5855_v57, %v5673_v8  ;;  %v6154_v50 = vadd.f32 %v5857_v20, %v5674_v40  ;;  %8532 = vtanh.f32 %v12981_v17  ;;  %v12999_v8 = vmul.f32 0.5, %v4809_v13  ;;  %v14576_v13 = vld [vmem:[#allocation287_spill] sm:$0xff] }
 0x3d3   : > { %8534 = vtanh.f32 %v12991_v10  ;;  %v5593_v32 = vmul.f32 %v5433_v52, %v12943_v16  ;;  %v5594_v1 = vmul.f32 %v5434_v54, %v12946_v4  ;;  %v14582_v54 = vld [vmem:[#allocation289_spill] sm:$0xff] }
 0x3d4   : > { %5998 = vadd.xlane.f32.xlu0 %v5585_v60  ;;  %6314 = vst.msk [vmem:[#allocation2 + $0xa8] sm:$0xff] %vm6292_vm4, %v6153_v7  ;;  %6000 = vadd.xlane.f32.xlu1 %v5586_v5  ;;  %6315 = vst.msk [vmem:[#allocation2 + $0xb0] sm:$0xff] %vm6292_vm4, %v6154_v50  ;;  %v4817_v60 = vadd.f32 %v14568_v55, %v14567_v22  ;;  %v8525_v57 = vpop.eup %8524  ;;  %v13002_v5 = vmul.f32 0.5, %v4814_v39  ;;  %v14570_v7 = vld [vmem:[#allocation285_spill] sm:$0xff]  ;;  %v5680_v50 = vld [vmem:[#allocation2 + $0xe0] sm:$0xff]  ;;  %8536 = vtanh.f32 %v12999_v8 }
 0x3d5   : > { %v5859_v3 = vpop.xlane.xlu0 %5858  ;;  %v5861_v58 = vpop.xlane.xlu1 %5860  ;;  %v4822_v2 = vadd.f32 %v14570_v7, %v14569_v38  ;;  %v5435_v29 = vadd.f32 1.0, %v8525_v57  ;;  %v5683_v22 = vld [vmem:[#allocation2 + $0xf8] sm:$0xff]  ;;  %v14579_v38 = vld [vmem:[#allocation222_spill] sm:$0xff] }
 0x3d6   : > { %v6155_v21 = vadd.f32 %v5859_v3, %v5675_v36  ;;  %v6156_v59 = vadd.f32 %v5861_v58, %v5676_v14  ;;  %v8527_v20 = vpop.eup %8526  ;;  %8538 = vtanh.f32 %v13002_v5  ;;  %v14573_v3 = vld [vmem:[#allocation220_spill] sm:$0xff]  ;;  %v14580_v7 = vld [vmem:[#allocation293_spill] sm:$0xff] }
 0x3d7   : > { %v8529_v58 = vpop.eup %8528  ;;  %v5436_v37 = vadd.f32 1.0, %v8527_v20  ;;  %v5595_v39 = vmul.f32 %v5435_v29, %v12953_v43  ;;  %v5685_v20 = vld [vmem:[#allocation2 + $0x108] sm:$0xff] }
 0x3d8   : > { %6002 = vadd.xlane.f32.xlu0 %v5587_v34  ;;  %6316 = vst.msk [vmem:[#allocation2 + $0xb8] sm:$0xff] %vm6292_vm4, %v6155_v21  ;;  %6004 = vadd.xlane.f32.xlu1 %v5588_v31  ;;  %6317 = vst.msk [vmem:[#allocation2 + $0xc0] sm:$0xff] %vm6292_vm4, %v6156_v59  ;;  %v13009_v34 = vmul.f32 0.5, %v4817_v60  ;;  %v4830_v31 = vadd.f32 %v14574_v11, %v14573_v3  ;;  %v13019_v21 = vmul.f32 0.5, %v4822_v2  ;;  %v8531_v16 = vpop.eup %8530  ;;  %v5437_v46 = vadd.f32 1.0, %v8529_v58  ;;  %v5686_v3 = vld [vmem:[#allocation2 + $0x110] sm:$0xff] }
 0x3d9   : > { %v5863_v48 = vpop.xlane.xlu0 %5862  ;;  %v5865_v44 = vpop.xlane.xlu1 %5864  ;;  %v4833_v59 = vadd.f32 %v14576_v13, %v14575_v47  ;;  %v5438_v60 = vadd.f32 1.0, %v8531_v16  ;;  %v5596_v43 = vmul.f32 %v5436_v37, %v12963_v45  ;;  %v4841_v2 = vadd.f32 %v14580_v7, %v14579_v38  ;;  %v14585_v37 = vld [vmem:[#allocation231_spill] sm:$0xff]  ;;  %v14586_v47 = vld [vmem:[#allocation296_spill] sm:$0xff] }
 0x3da   : > { %v6157_v0 = vadd.f32 %v5863_v48, %v5677_v30  ;;  %v6158_v19 = vadd.f32 %v5865_v44, %v5678_v33  ;;  %8540 = vtanh.f32 %v13009_v34  ;;  %v13027_v30 = vmul.f32 0.5, %v4825_v23 }
 0x3db   : > { %8542 = vtanh.f32 %v13019_v21  ;;  %v13036_v33 = vmul.f32 0.5, %v4833_v59  ;;  %v5597_v45 = vmul.f32 %v5437_v46, %v12971_v62  ;;  %v5598_v29 = vmul.f32 %v5438_v60, %v12974_v18  ;;  %v14583_v62 = vld [vmem:[#allocation227_spill] sm:$0xff]  ;;  %v5687_v59 = vld [vmem:[#allocation2 + $0x118] sm:$0xff] }
 0x3dc   : > { %6006 = vadd.xlane.f32.xlu0 %v5589_v9  ;;  %6318 = vst.msk [vmem:[#allocation2 + $0xc8] sm:$0xff] %vm6292_vm4, %v6157_v0  ;;  %6008 = vadd.xlane.f32.xlu1 %v5590_v61  ;;  %6319 = vst.msk [vmem:[#allocation2 + $0xd0] sm:$0xff] %vm6292_vm4, %v6158_v19  ;;  %v8533_v48 = vpop.eup %8532  ;;  %v13030_v61 = vmul.f32 0.5, %v4830_v31  ;;  %v14578_v0 = vld [vmem:[#allocation290_spill] sm:$0xff]  ;;  %8544 = vtanh.f32 %v13027_v30  ;;  %v4854_v13 = vadd.f32 %v14586_v47, %v14585_v37  ;;  %v14590_v60 = vld [vmem:[#allocation295_spill] sm:$0xff] }
 0x3dd   : > { %v5867_v49 = vpop.xlane.xlu0 %5866  ;;  %v5869_v24 = vpop.xlane.xlu1 %5868  ;;  %v4838_v15 = vadd.f32 %v14578_v0, %v14577_v41  ;;  %v5684_v19 = vld [vmem:[#allocation2 + $0x100] sm:$0xff]  ;;  %v5439_v52 = vadd.f32 1.0, %v8533_v48  ;;  %v14595_v37 = vld [vmem:[#allocation101_spill] sm:$0xff]  ;;  %v14596_v47 = vld [vmem:[#allocation304_spill] sm:$0xff] }
 0x3de   : > { %v6159_v40 = vadd.f32 %v5867_v49, %v5679_v56  ;;  %v6160_v36 = vadd.f32 %v5869_v24, %v5680_v50  ;;  %8546 = vtanh.f32 %v13030_v61  ;;  %v14581_v49 = vld [vmem:[#allocation228_spill] sm:$0xff]  ;;  %v14587_v41 = vld [vmem:[#allocation230_spill] sm:$0xff] }
 0x3df   : > { %8548 = vtanh.f32 %v13036_v33  ;;  %v5599_v31 = vmul.f32 %v5439_v52, %v12981_v17  ;;  %v14588_v0 = vld [vmem:[#allocation298_spill] sm:$0xff] }
 0x3e0   : > { %6010 = vadd.xlane.f32.xlu0 %v5591_v53  ;;  %6320 = vst.msk [vmem:[#allocation2 + $0xd8] sm:$0xff] %vm6292_vm4, %v6159_v40  ;;  %6012 = vadd.xlane.f32.xlu1 %v5592_v51  ;;  %6321 = vst.msk [vmem:[#allocation2 + $0xe0] sm:$0xff] %vm6292_vm4, %v6160_v36  ;;  %v8535_v53 = vpop.eup %8534  ;;  %v4846_v51 = vadd.f32 %v14582_v54, %v14581_v49  ;;  %v13047_v40 = vmul.f32 0.5, %v4838_v15  ;;  %v14584_v36 = vld [vmem:[#allocation292_spill] sm:$0xff]  ;;  %v4857_v15 = vadd.f32 %v14588_v0, %v14587_v41  ;;  %v14591_v54 = vld [vmem:[#allocation235_spill] sm:$0xff] }
 0x3e1   : > { %v5871_v14 = vpop.xlane.xlu0 %5870  ;;  %v5873_v6 = vpop.xlane.xlu1 %5872  ;;  %v5440_v63 = vadd.f32 1.0, %v8535_v53  ;;  %v5689_v53 = vld [vmem:[#allocation2 + $0x128] sm:$0xff] }
 0x3e2   : > { %v6161_v9 = vadd.f32 %v5871_v14, %v5681_v28  ;;  %v6162_v4 = vadd.f32 %v5873_v6, %v5682_v42  ;;  %v8537_v24 = vpop.eup %8536  ;;  %v13055_v28 = vmul.f32 0.5, %v4841_v2  ;;  %8550 = vtanh.f32 %v13047_v40 }
 0x3e3   : > { %v8539_v23 = vpop.eup %8538  ;;  %v5441_v58 = vadd.f32 1.0, %v8537_v24  ;;  %v5600_v17 = vmul.f32 %v5440_v63, %v12991_v10  ;;  %v14593_v63 = vld [vmem:[#allocation237_spill] sm:$0xff] }
 0x3e4   : > { %6014 = vadd.xlane.f32.xlu0 %v5593_v32  ;;  %6322 = vst.msk [vmem:[#allocation2 + $0xe8] sm:$0xff] %vm6292_vm4, %v6161_v9  ;;  %6016 = vadd.xlane.f32.xlu1 %v5594_v1  ;;  %6323 = vst.msk [vmem:[#allocation2 + $0xf0] sm:$0xff] %vm6292_vm4, %v6162_v4  ;;  %v4849_v32 = vadd.f32 %v14584_v36, %v14583_v62  ;;  %v8541_v14 = vpop.eup %8540  ;;  %v13058_v1 = vmul.f32 0.5, %v4846_v51  ;;  %v5442_v16 = vadd.f32 1.0, %v8539_v23  ;;  %v5688_v4 = vld [vmem:[#allocation2 + $0x120] sm:$0xff]  ;;  %8552 = vtanh.f32 %v13055_v28  ;;  %v14592_v51 = vld [vmem:[#allocation297_spill] sm:$0xff] }
 0x3e5   : > { %v5875_v55 = vpop.xlane.xlu0 %5874  ;;  %v5877_v57 = vpop.xlane.xlu1 %5876  ;;  %v5443_v46 = vadd.f32 1.0, %v8541_v14  ;;  %v5601_v10 = vmul.f32 %v5441_v58, %v12999_v8  ;;  %v5690_v8 = vld [vmem:[#allocation2 + $0x130] sm:$0xff]  ;;  %v5691_v62 = vld [vmem:[#allocation2 + $0x138] sm:$0xff] }
 0x3e6   : > { %v6163_v44 = vadd.f32 %v5875_v55, %v5683_v22  ;;  %v6164_v56 = vadd.f32 %v5877_v57, %v5684_v19  ;;  %v8543_v6 = vpop.eup %8542  ;;  %8554 = vtanh.f32 %v13058_v1  ;;  %v14589_v55 = vld [vmem:[#allocation236_spill] sm:$0xff]  ;;  %v5602_v52 = vmul.f32 %v5442_v16, %v13002_v5  ;;  %v14598_v16 = vld [vmem:[#allocation301_spill] sm:$0xff] }
 0x3e7   : > { %v8545_v57 = vpop.eup %8544  ;;  %v5444_v38 = vadd.f32 1.0, %v8543_v6  ;;  %v5603_v49 = vmul.f32 %v5443_v46, %v13009_v34  ;;  %v5693_v6 = vld [vmem:[#allocation2 + $0x148] sm:$0xff] }
 0x3e8   : > { %6018 = vadd.xlane.f32.xlu0 %v5595_v39  ;;  %6324 = vst.msk [vmem:[#allocation2 + $0xf8] sm:$0xff] %vm6292_vm4, %v6163_v44  ;;  %6020 = vadd.xlane.f32.xlu1 %v5596_v43  ;;  %6325 = vst.msk [vmem:[#allocation2 + $0x100] sm:$0xff] %vm6292_vm4, %v6164_v56  ;;  %v13065_v39 = vmul.f32 0.5, %v4849_v32  ;;  %v4862_v43 = vadd.f32 %v14590_v60, %v14589_v55  ;;  %v13075_v44 = vmul.f32 0.5, %v4854_v13  ;;  %v8547_v2 = vpop.eup %8546  ;;  %v5445_v24 = vadd.f32 1.0, %v8545_v57  ;;  %v5694_v55 = vld [vmem:[#allocation2 + $0x150] sm:$0xff] }
 0x3e9   : > { %v5879_v50 = vpop.xlane.xlu0 %5878  ;;  %v5881_v11 = vpop.xlane.xlu1 %5880  ;;  %v5446_v34 = vadd.f32 1.0, %v8547_v2  ;;  %v5604_v32 = vmul.f32 %v5444_v38, %v13019_v21  ;;  %v4873_v13 = vadd.f32 %v14596_v47, %v14595_v37  ;;  %v14601_v38 = vld [vmem:[#allocation241_spill] sm:$0xff] }
 0x3ea   : > { %v6165_v12 = vadd.f32 %v5879_v50, %v5685_v20  ;;  %v6166_v18 = vadd.f32 %v5881_v11, %v5686_v3  ;;  %8556 = vtanh.f32 %v13065_v39  ;;  %v4865_v20 = vadd.f32 %v14592_v51, %v14591_v54 }
 0x3eb   : > { %v13083_v50 = vmul.f32 0.5, %v4857_v15  ;;  %8558 = vtanh.f32 %v13075_v44  ;;  %v5605_v21 = vmul.f32 %v5445_v24, %v13027_v30  ;;  %v5606_v46 = vmul.f32 %v5446_v34, %v13030_v61  ;;  %v14606_v34 = vld [vmem:[#allocation307_spill] sm:$0xff] }
 0x3ec   : > { %6022 = vadd.xlane.f32.xlu0 %v5597_v45  ;;  %6326 = vst.msk [vmem:[#allocation2 + $0x108] sm:$0xff] %vm6292_vm4, %v6165_v12  ;;  %6024 = vadd.xlane.f32.xlu1 %v5598_v29  ;;  %6327 = vst.msk [vmem:[#allocation2 + $0x110] sm:$0xff] %vm6292_vm4, %v6166_v18  ;;  %v8549_v45 = vpop.eup %8548  ;;  %v13086_v29 = vmul.f32 0.5, %v4862_v43  ;;  %v14594_v12 = vld [vmem:[#allocation302_spill] sm:$0xff]  ;;  %v13093_v58 = vmul.f32 0.5, %v4865_v20 }
 0x3ed   : > { %v5883_v9 = vpop.xlane.xlu0 %5882  ;;  %v5885_v48 = vpop.xlane.xlu1 %5884  ;;  %v4870_v23 = vadd.f32 %v14594_v12, %v14593_v63  ;;  %v5692_v18 = vld [vmem:[#allocation2 + $0x140] sm:$0xff]  ;;  %8560 = vtanh.f32 %v13083_v50  ;;  %v14603_v63 = vld [vmem:[#allocation112_spill] sm:$0xff]  ;;  %v14604_v12 = vld [vmem:[#allocation311_spill] sm:$0xff] }
 0x3ee   : > { %v6167_v42 = vadd.f32 %v5883_v9, %v5687_v59  ;;  %v6168_v22 = vadd.f32 %v5885_v48, %v5688_v4  ;;  %v8551_v11 = vpop.eup %8550  ;;  %8562 = vtanh.f32 %v13086_v29  ;;  %v14597_v9 = vld [vmem:[#allocation116_spill] sm:$0xff]  ;;  %v5696_v20 = vld [vmem:[#allocation2 + $0x160] sm:$0xff] }
 0x3ef   : > { %v8553_v48 = vpop.eup %8552  ;;  %v5448_v41 = vadd.f32 1.0, %v8551_v11  ;;  %8564 = vtanh.f32 %v13093_v58  ;;  %v5697_v11 = vld [vmem:[#allocation2 + $0x168] sm:$0xff] }
 0x3f0   : > { %6026 = vadd.xlane.f32.xlu0 %v5599_v31  ;;  %6328 = vst.msk [vmem:[#allocation2 + $0x118] sm:$0xff] %vm6292_vm4, %v6167_v42  ;;  %6028 = vadd.xlane.f32.xlu1 %v5600_v17  ;;  %6329 = vst.msk [vmem:[#allocation2 + $0x120] sm:$0xff] %vm6292_vm4, %v6168_v22  ;;  %v5447_v31 = vadd.f32 1.0, %v8549_v45  ;;  %v4878_v17 = vadd.f32 %v14598_v16, %v14597_v9  ;;  %v13103_v42 = vmul.f32 0.5, %v4870_v23  ;;  %v8555_v15 = vpop.eup %8554  ;;  %v14599_v22 = vld [vmem:[#allocation240_spill] sm:$0xff]  ;;  %v5449_v57 = vadd.f32 1.0, %v8553_v48 }
 0x3f1   : > { %v5887_v19 = vpop.xlane.xlu0 %5886  ;;  %v5889_v56 = vpop.xlane.xlu1 %5888  ;;  %v5608_v45 = vmul.f32 %v5448_v41, %v13047_v40  ;;  %v4889_v23 = vadd.f32 %v14604_v12, %v14603_v63  ;;  %v5698_v9 = vld [vmem:[#allocation2 + $0x170] sm:$0xff] }
 0x3f2   : > { %v6169_v7 = vadd.f32 %v5887_v19, %v5689_v53  ;;  %v6170_v5 = vadd.f32 %v5889_v56, %v5690_v8  ;;  %v5607_v43 = vmul.f32 %v5447_v31, %v13036_v33  ;;  %v13111_v53 = vmul.f32 0.5, %v4873_v13  ;;  %v5695_v8 = vld [vmem:[#allocation2 + $0x158] sm:$0xff]  ;;  %v14610_v41 = vld [vmem:[#allocation316_spill] sm:$0xff] }
 0x3f3   : > { %8566 = vtanh.f32 %v13103_v42  ;;  %v5450_v33 = vadd.f32 1.0, %v8555_v15  ;;  %v5609_v40 = vmul.f32 %v5449_v57, %v13055_v28  ;;  %v14607_v28 = vld [vmem:[#allocation244_spill] sm:$0xff]  ;;  %v5699_v15 = vld [vmem:[#allocation2 + $0x178] sm:$0xff] }
 0x3f4   : > { %6030 = vadd.xlane.f32.xlu0 %v5601_v10  ;;  %6330 = vst.msk [vmem:[#allocation2 + $0x128] sm:$0xff] %vm6292_vm4, %v6169_v7  ;;  %6032 = vadd.xlane.f32.xlu1 %v5602_v52  ;;  %6331 = vst.msk [vmem:[#allocation2 + $0x130] sm:$0xff] %vm6292_vm4, %v6170_v5  ;;  %v14600_v10 = vld [vmem:[#allocation303_spill] sm:$0xff]  ;;  %v8557_v19 = vpop.eup %8556  ;;  %v13114_v52 = vmul.f32 0.5, %v4878_v17  ;;  %v14602_v7 = vld [vmem:[#allocation308_spill] sm:$0xff]  ;;  %8568 = vtanh.f32 %v13111_v53 }
 0x3f5   : > { %v5891_v36 = vpop.xlane.xlu0 %5890  ;;  %v5893_v14 = vpop.xlane.xlu1 %5892  ;;  %v4881_v30 = vadd.f32 %v14600_v10, %v14599_v22  ;;  %v4886_v2 = vadd.f32 %v14602_v7, %v14601_v38  ;;  %v5451_v24 = vadd.f32 1.0, %v8557_v19  ;;  %v5700_v38 = vld [vmem:[#allocation2 + $0x180] sm:$0xff] }
 0x3f6   : > { %v6171_v3 = vadd.f32 %v5891_v36, %v5691_v62  ;;  %v6172_v59 = vadd.f32 %v5893_v14, %v5692_v18  ;;  %v8559_v54 = vpop.eup %8558  ;;  %8570 = vtanh.f32 %v13114_v52  ;;  %v14605_v36 = vld [vmem:[#allocation128_spill] sm:$0xff]  ;;  %v5610_v14 = vmul.f32 %v5450_v33, %v13058_v1 }
 0x3f7   : > { %v13121_v51 = vmul.f32 0.5, %v4881_v30  ;;  %v8561_v18 = vpop.eup %8560  ;;  %v5452_v37 = vadd.f32 1.0, %v8559_v54  ;;  %v5611_v17 = vmul.f32 %v5451_v24, %v13065_v39  ;;  %v5701_v54 = vld [vmem:[#allocation2 + $0x188] sm:$0xff] }
 0x3f8   : > { %6034 = vadd.xlane.f32.xlu0 %v5603_v49  ;;  %6332 = vst.msk [vmem:[#allocation2 + $0x138] sm:$0xff] %vm6292_vm4, %v6171_v3  ;;  %6036 = vadd.xlane.f32.xlu1 %v5604_v32  ;;  %6333 = vst.msk [vmem:[#allocation2 + $0x140] sm:$0xff] %vm6292_vm4, %v6172_v59  ;;  %v4894_v32 = vadd.f32 %v14606_v34, %v14605_v36  ;;  %v13131_v3 = vmul.f32 0.5, %v4886_v2  ;;  %v8563_v13 = vpop.eup %8562  ;;  %v14608_v59 = vld [vmem:[#allocation310_spill] sm:$0xff]  ;;  %v14613_v2 = vld [vmem:[#allocation124_spill] sm:$0xff] }
 0x3f9   : > { %v5895_v4 = vpop.xlane.xlu0 %5894  ;;  %v5897_v60 = vpop.xlane.xlu1 %5896  ;;  %8572 = vtanh.f32 %v13121_v51  ;;  %v5454_v30 = vadd.f32 1.0, %v8563_v13  ;;  %v5612_v39 = vmul.f32 %v5452_v37, %v13075_v44  ;;  %v5702_v34 = vld [vmem:[#allocation2 + $0x190] sm:$0xff] }
 0x3fa   : > { %v6173_v0 = vadd.f32 %v5895_v4, %v5693_v6  ;;  %v6174_v61 = vadd.f32 %v5897_v60, %v5694_v55  ;;  %v13139_v6 = vmul.f32 0.5, %v4889_v23  ;;  %v5453_v4 = vadd.f32 1.0, %v8561_v18  ;;  %v8565_v10 = vpop.eup %8564  ;;  %v14611_v55 = vld [vmem:[#allocation140_spill] sm:$0xff]  ;;  %v14612_v60 = vld [vmem:[#allocation314_spill] sm:$0xff] }
 0x3fb   : > { %v13142_v48 = vmul.f32 0.5, %v4894_v32  ;;  %8574 = vtanh.f32 %v13131_v3  ;;  %v5455_v33 = vadd.f32 1.0, %v8565_v10  ;;  %v5614_v24 = vmul.f32 %v5454_v30, %v13086_v29  ;;  %v14617_v37 = vld [vmem:[#allocation252_spill] sm:$0xff]  ;;  %v14621_v10 = vld [vmem:[#allocation258_spill] sm:$0xff] }
 0x3fc   : > { %6038 = vadd.xlane.f32.xlu0 %v5605_v21  ;;  %6334 = vst.msk [vmem:[#allocation2 + $0x148] sm:$0xff] %vm6292_vm4, %v6173_v0  ;;  %6040 = vadd.xlane.f32.xlu1 %v5606_v46  ;;  %6335 = vst.msk [vmem:[#allocation2 + $0x150] sm:$0xff] %vm6292_vm4, %v6174_v61  ;;  %v4897_v21 = vadd.f32 %v14608_v59, %v14607_v28  ;;  %v14609_v46 = vld [vmem:[#allocation245_spill] sm:$0xff]  ;;  %8576 = vtanh.f32 %v13139_v6  ;;  %v14622_v30 = vld [vmem:[#allocation324_spill] sm:$0xff] }
 0x3fd   : > { %v5899_v56 = vpop.xlane.xlu0 %5898  ;;  %v5901_v5 = vpop.xlane.xlu1 %5900  ;;  %v4902_v0 = vadd.f32 %v14610_v41, %v14609_v46  ;;  %8578 = vtanh.f32 %v13142_v48  ;;  %v5615_v18 = vmul.f32 %v5455_v33, %v13093_v58  ;;  %v5703_v28 = vld [vmem:[#allocation2 + $0x198] sm:$0xff]  ;;  %v5704_v58 = vld [vmem:[#allocation2 + $0x1a0] sm:$0xff]  ;;  %v14619_v41 = vld [vmem:[#allocation136_spill] sm:$0xff] }
 0x3fe   : > { %v6175_v49 = vadd.f32 %v5899_v56, %v5695_v8  ;;  %v6176_v62 = vadd.f32 %v5901_v5, %v5696_v20  ;;  %v8567_v19 = vpop.eup %8566  ;;  %v13151_v57 = vmul.f32 0.5, %v4897_v21  ;;  %v14614_v8 = vld [vmem:[#allocation321_spill] sm:$0xff] }
 0x3ff   : > { %v4905_v56 = vadd.f32 %v14614_v8, %v14613_v2  ;;  %v8569_v5 = vpop.eup %8568  ;;  %v5456_v63 = vadd.f32 1.0, %v8567_v19  ;;  %v14623_v8 = vld [vmem:[#allocation148_spill] sm:$0xff] }
 0x400   : > { %6042 = vadd.xlane.f32.xlu0 %v5607_v43  ;;  %6336 = vst.msk [vmem:[#allocation2 + $0x158] sm:$0xff] %vm6292_vm4, %v6175_v49  ;;  %6044 = vadd.xlane.f32.xlu1 %v5608_v45  ;;  %6337 = vst.msk [vmem:[#allocation2 + $0x160] sm:$0xff] %vm6292_vm4, %v6176_v62  ;;  %v4910_v43 = vadd.f32 %v14612_v60, %v14611_v55  ;;  %v5613_v45 = vmul.f32 %v5453_v4, %v13083_v50  ;;  %v13159_v49 = vmul.f32 0.5, %v4902_v0  ;;  %v8571_v62 = vpop.eup %8570  ;;  %v14616_v50 = vld [vmem:[#allocation318_spill] sm:$0xff]  ;;  %v5705_v60 = vld [vmem:[#allocation2 + $0x1a8] sm:$0xff] }
 0x401   : > { %v5903_v31 = vpop.xlane.xlu0 %5902  ;;  %v5905_v16 = vpop.xlane.xlu1 %5904  ;;  %8580 = vtanh.f32 %v13151_v57  ;;  %v5458_v21 = vadd.f32 1.0, %v8571_v62  ;;  %v14620_v0 = vld [vmem:[#allocation330_spill] sm:$0xff] }
 0x402   : > { %v6177_v47 = vadd.f32 %v5903_v31, %v5697_v11  ;;  %v6178_v1 = vadd.f32 %v5905_v16, %v5698_v9  ;;  %v13162_v12 = vmul.f32 0.5, %v4910_v43  ;;  %v13168_v11 = vmul.f32 0.5, %v4905_v56  ;;  %v14624_v56 = vld [vmem:[#allocation328_spill] sm:$0xff] }
 0x403   : > { %v8573_v31 = vpop.eup %8572  ;;  %8582 = vtanh.f32 %v13159_v49  ;;  %v5616_v9 = vmul.f32 %v5456_v63, %v13103_v42  ;;  %v5618_v19 = vmul.f32 %v5458_v21, %v13114_v52  ;;  %v14625_v63 = vld [vmem:[#allocation160_spill] sm:$0xff]  ;;  %v14629_v21 = vld [vmem:[#allocation269_spill] sm:$0xff] }
 0x404   : > { %6046 = vadd.xlane.f32.xlu0 %v5609_v40  ;;  %6338 = vst.msk [vmem:[#allocation2 + $0x168] sm:$0xff] %vm6292_vm4, %v6177_v47  ;;  %6048 = vadd.xlane.f32.xlu1 %v5610_v14  ;;  %6339 = vst.msk [vmem:[#allocation2 + $0x170] sm:$0xff] %vm6292_vm4, %v6178_v1  ;;  %v14615_v40 = vld [vmem:[#allocation250_spill] sm:$0xff]  ;;  %v5457_v14 = vadd.f32 1.0, %v8569_v5  ;;  %8584 = vtanh.f32 %v13162_v12  ;;  %v5459_v46 = vadd.f32 1.0, %v8573_v31 }
 0x405   : > { %v5907_v22 = vpop.xlane.xlu0 %5906  ;;  %v5909_v7 = vpop.xlane.xlu1 %5908  ;;  %v4913_v36 = vadd.f32 %v14616_v50, %v14615_v40  ;;  %v14618_v47 = vld [vmem:[#allocation326_spill] sm:$0xff]  ;;  %8586 = vtanh.f32 %v13168_v11  ;;  %v5707_v40 = vld [vmem:[#allocation2 + $0x1b8] sm:$0xff] }
 0x406   : > { %v6179_v61 = vadd.f32 %v5907_v22, %v5699_v15  ;;  %v6180_v44 = vadd.f32 %v5909_v7, %v5700_v38  ;;  %v4918_v13 = vadd.f32 %v14618_v47, %v14617_v37  ;;  %v4921_v15 = vadd.f32 %v14620_v0, %v14619_v41  ;;  %v5708_v31 = vld [vmem:[#allocation2 + $0x1c0] sm:$0xff]  ;;  %v14627_v47 = vld [vmem:[#allocation156_spill] sm:$0xff] }
 0x407   : > { %v13178_v1 = vmul.f32 0.5, %v4913_v36  ;;  %v5617_v22 = vmul.f32 %v5457_v14, %v13111_v53  ;;  %v4929_v53 = vadd.f32 %v14624_v56, %v14623_v8  ;;  %v5711_v56 = vld [vmem:[#allocation2 + $0x1d8] sm:$0xff] }
 0x408   : > { %6050 = vadd.xlane.f32.xlu0 %v5611_v17  ;;  %6340 = vst.msk [vmem:[#allocation2 + $0x178] sm:$0xff] %vm6292_vm4, %v6179_v61  ;;  %6052 = vadd.xlane.f32.xlu1 %v5612_v39  ;;  %6341 = vst.msk [vmem:[#allocation2 + $0x180] sm:$0xff] %vm6292_vm4, %v6180_v44  ;;  %v8575_v17 = vpop.eup %8574  ;;  %v4926_v39 = vadd.f32 %v14622_v30, %v14621_v10  ;;  %v13187_v55 = vmul.f32 0.5, %v4918_v13  ;;  %v5706_v44 = vld [vmem:[#allocation2 + $0x1b0] sm:$0xff]  ;;  %v14628_v13 = vld [vmem:[#allocation337_spill] sm:$0xff] }
 0x409   : > { %v5911_v20 = vpop.xlane.xlu0 %5910  ;;  %v5913_v32 = vpop.xlane.xlu1 %5912  ;;  %v5460_v38 = vadd.f32 1.0, %v8575_v17  ;;  %8588 = vtanh.f32 %v13178_v1  ;;  %v5710_v30 = vld [vmem:[#allocation2 + $0x1d0] sm:$0xff] }
 0x40a   : > { %v6181_v23 = vadd.f32 %v5911_v20, %v5701_v54  ;;  %v6182_v29 = vadd.f32 %v5913_v32, %v5702_v34  ;;  %v8577_v61 = vpop.eup %8576  ;;  %v13195_v54 = vmul.f32 0.5, %v4921_v15  ;;  %8590 = vtanh.f32 %v13187_v55  ;;  %v14631_v15 = vld [vmem:[#allocation172_spill] sm:$0xff] }
 0x40b   : > { %v8579_v2 = vpop.eup %8578  ;;  %v5461_v5 = vadd.f32 1.0, %v8577_v61 }
 0x40c   : > { %6054 = vadd.xlane.f32.xlu0 %v5613_v45  ;;  %6342 = vst.msk [vmem:[#allocation2 + $0x188] sm:$0xff] %vm6292_vm4, %v6181_v23  ;;  %6056 = vadd.xlane.f32.xlu1 %v5614_v24  ;;  %6343 = vst.msk [vmem:[#allocation2 + $0x190] sm:$0xff] %vm6292_vm4, %v6182_v29  ;;  %v5619_v45 = vmul.f32 %v5459_v46, %v13121_v51  ;;  %v8581_v20 = vpop.eup %8580  ;;  %v13198_v24 = vmul.f32 0.5, %v4926_v39  ;;  %v14626_v23 = vld [vmem:[#allocation334_spill] sm:$0xff]  ;;  %v5462_v36 = vadd.f32 1.0, %v8579_v2  ;;  %v13205_v29 = vmul.f32 0.5, %v4929_v53 }
 0x40d   : > { %v5915_v59 = vpop.xlane.xlu0 %5914  ;;  %v5917_v4 = vpop.xlane.xlu1 %5916  ;;  %v4934_v62 = vadd.f32 %v14626_v23, %v14625_v63  ;;  %v5620_v51 = vmul.f32 %v5460_v38, %v13131_v3  ;;  %v5463_v37 = vadd.f32 1.0, %v8581_v20  ;;  %8592 = vtanh.f32 %v13195_v54  ;;  %v14634_v2 = vld [vmem:[#allocation338_spill] sm:$0xff]  ;;  %v14635_v23 = vld [vmem:[#allocation275_spill] sm:$0xff] }
 0x40e   : > { %v6183_v16 = vadd.f32 %v5915_v59, %v5703_v28  ;;  %v6184_v42 = vadd.f32 %v5917_v4, %v5704_v58  ;;  %v8583_v32 = vpop.eup %8582  ;;  %v4937_v28 = vadd.f32 %v14628_v13, %v14627_v47  ;;  %v5621_v3 = vmul.f32 %v5461_v5, %v13139_v6  ;;  %v5709_v58 = vld [vmem:[#allocation2 + $0x1c8] sm:$0xff]  ;;  %v5712_v20 = vld [vmem:[#allocation2 + $0x1e0] sm:$0xff]  ;;  %v14640_v47 = vld [vmem:[#allocation152_spill] sm:$0xff] }
 0x40f   : > { %v8585_v14 = vpop.eup %8584  ;;  %8594 = vtanh.f32 %v13198_v24  ;;  %v13215_v17 = vmul.f32 0.5, %v4934_v62  ;;  %v5622_v41 = vmul.f32 %v5462_v36, %v13142_v48  ;;  %v5464_v0 = vadd.f32 1.0, %v8583_v32  ;;  %v14636_v62 = vld [vmem:[#allocation253_spill] sm:$0xff]  ;;  %v14637_v36 = vld [vmem:[#allocation282_spill] sm:$0xff]  ;;  %v5713_v32 = vld [vmem:[#allocation2 + $0x1e8] sm:$0xff] }
 0x410   : > { %6058 = vadd.xlane.f32.xlu0 %v5615_v18  ;;  %6344 = vst.msk [vmem:[#allocation2 + $0x198] sm:$0xff] %vm6292_vm4, %v6183_v16  ;;  %6060 = vadd.xlane.f32.xlu1 %v5616_v9  ;;  %6345 = vst.msk [vmem:[#allocation2 + $0x1a0] sm:$0xff] %vm6292_vm4, %v6184_v42  ;;  %v14630_v9 = vld [vmem:[#allocation332_spill] sm:$0xff]  ;;  %v8587_v46 = vpop.eup %8586  ;;  %v5466_v6 = vadd.f32 1.0, %v8585_v14  ;;  %8596 = vtanh.f32 %v13205_v29 }
 0x411   : > { %v5919_v43 = vpop.xlane.xlu0 %5918  ;;  %v5921_v33 = vpop.xlane.xlu1 %5920  ;;  %v4942_v16 = vadd.f32 %v14630_v9, %v14629_v21  ;;  %v14632_v42 = vld [vmem:[#allocation336_spill] sm:$0xff]  ;;  %8598 = vtanh.f32 %v13215_v17 }
 0x412   : > { %v6185_v7 = vadd.f32 %v5919_v43, %v5705_v60  ;;  %v6186_v52 = vadd.f32 %v5921_v33, %v5706_v44  ;;  %v5623_v60 = vmul.f32 %v5463_v37, %v13151_v57  ;;  %v13223_v43 = vmul.f32 0.5, %v4937_v28  ;;  %v14639_v37 = vld [vmem:[#allocation281_spill] sm:$0xff] }
 0x413   : > { %v8589_v61 = vpop.eup %8588  ;;  %v13226_v38 = vmul.f32 0.5, %v4942_v16  ;;  %v5624_v44 = vmul.f32 %v5464_v0, %v13159_v49  ;;  %v4961_v13 = vadd.f32 %v14640_v47, %v14639_v37  ;;  %v14642_v0 = vld [vmem:[#allocation344_spill] sm:$0xff] }
 0x414   : > { %6062 = vadd.xlane.f32.xlu0 %v5617_v22  ;;  %6346 = vst.msk [vmem:[#allocation2 + $0x1a8] sm:$0xff] %vm6292_vm4, %v6185_v7  ;;  %6064 = vadd.xlane.f32.xlu1 %v5618_v19  ;;  %6347 = vst.msk [vmem:[#allocation2 + $0x1b0] sm:$0xff] %vm6292_vm4, %v6186_v52  ;;  %v4945_v22 = vadd.f32 %v14632_v42, %v14631_v15  ;;  %v5465_v19 = vadd.f32 1.0, %v8587_v46  ;;  %v14633_v7 = vld [vmem:[#allocation276_spill] sm:$0xff]  ;;  %v5626_v52 = vmul.f32 %v5466_v6, %v13162_v12  ;;  %v5715_v42 = vld [vmem:[#allocation2 + $0x1f8] sm:$0xff] }
 0x415   : > { %v5923_v50 = vpop.xlane.xlu0 %5922  ;;  %v5925_v18 = vpop.xlane.xlu1 %5924  ;;  %v4950_v8 = vadd.f32 %v14634_v2, %v14633_v7  ;;  %v5467_v63 = vadd.f32 1.0, %v8589_v61  ;;  %8600 = vtanh.f32 %v13223_v43  ;;  %v13260_v6 = vmul.f32 0.5, %v4961_v13  ;;  %v14644_v7 = vld [vmem:[#allocation259_spill] sm:$0xff]  ;;  %v14650_v37 = vld [vmem:[#allocation352_spill] sm:$0xff]  ;;  %v5719_v13 = vld [vmem:[#allocation2 + $0x218] sm:$0xff] }
 0x416   : > { %v6187_v34 = vadd.f32 %v5923_v50, %v5707_v40  ;;  %v6188_v59 = vadd.f32 %v5925_v18, %v5708_v31  ;;  %v13232_v57 = vmul.f32 0.5, %v4945_v22  ;;  %v4953_v40 = vadd.f32 %v14636_v62, %v14635_v23 }
 0x417   : > { %v5625_v50 = vmul.f32 %v5465_v19, %v13168_v11  ;;  %8602 = vtanh.f32 %v13226_v38  ;;  %v5627_v21 = vmul.f32 %v5467_v63, %v13178_v1  ;;  %v14643_v19 = vld [vmem:[#allocation196_spill] sm:$0xff] }
 0x418   : > { %6066 = vadd.xlane.f32.xlu0 %v5619_v45  ;;  %6348 = vst.msk [vmem:[#allocation2 + $0x1b8] sm:$0xff] %vm6292_vm4, %v6187_v34  ;;  %6068 = vadd.xlane.f32.xlu1 %v5620_v51  ;;  %6349 = vst.msk [vmem:[#allocation2 + $0x1c0] sm:$0xff] %vm6292_vm4, %v6188_v59  ;;  %v8591_v45 = vpop.eup %8590  ;;  %v14638_v51 = vld [vmem:[#allocation248_spill] sm:$0xff]  ;;  %v13244_v34 = vmul.f32 0.5, %v4950_v8  ;;  %8604 = vtanh.f32 %v13232_v57  ;;  %v13251_v9 = vmul.f32 0.5, %v4953_v40  ;;  %v4969_v2 = vadd.f32 %v14644_v7, %v14643_v19 }
 0x419   : > { %v5927_v4 = vpop.xlane.xlu0 %5926  ;;  %v5929_v39 = vpop.xlane.xlu1 %5928  ;;  %v4958_v12 = vadd.f32 %v14638_v51, %v14637_v36  ;;  %v5468_v14 = vadd.f32 1.0, %v8591_v45  ;;  %v5714_v59 = vld [vmem:[#allocation2 + $0x1f0] sm:$0xff]  ;;  %v5717_v45 = vld [vmem:[#allocation2 + $0x208] sm:$0xff] }
 0x41a   : > { %v6189_v10 = vadd.f32 %v5927_v4, %v5709_v58  ;;  %v6190_v48 = vadd.f32 %v5929_v39, %v5710_v30  ;;  %v8593_v18 = vpop.eup %8592  ;;  %8606 = vtanh.f32 %v13244_v34  ;;  %v14647_v36 = vld [vmem:[#allocation207_spill] sm:$0xff] }
 0x41b   : > { %v8595_v11 = vpop.eup %8594  ;;  %v5469_v4 = vadd.f32 1.0, %v8593_v18  ;;  %v13254_v46 = vmul.f32 0.5, %v4958_v12  ;;  %v5628_v1 = vmul.f32 %v5468_v14, %v13187_v55  ;;  %8608 = vtanh.f32 %v13251_v9  ;;  %v14648_v51 = vld [vmem:[#allocation347_spill] sm:$0xff]  ;;  %v14649_v14 = vld [vmem:[#allocation300_spill] sm:$0xff] }
 0x41c   : > { %6070 = vadd.xlane.f32.xlu0 %v5621_v3  ;;  %6350 = vst.msk [vmem:[#allocation2 + $0x1c8] sm:$0xff] %vm6292_vm4, %v6189_v10  ;;  %6072 = vadd.xlane.f32.xlu1 %v5622_v41  ;;  %6351 = vst.msk [vmem:[#allocation2 + $0x1d0] sm:$0xff] %vm6292_vm4, %v6190_v48  ;;  %v8597_v58 = vpop.eup %8596  ;;  %v14641_v41 = vld [vmem:[#allocation199_spill] sm:$0xff]  ;;  %v5470_v10 = vadd.f32 1.0, %v8595_v11  ;;  %v4977_v12 = vadd.f32 %v14648_v51, %v14647_v36  ;;  %v4982_v47 = vadd.f32 %v14650_v37, %v14649_v14 }
 0x41d   : > { %v5931_v53 = vpop.xlane.xlu0 %5930  ;;  %v5933_v5 = vpop.xlane.xlu1 %5932  ;;  %v4966_v15 = vadd.f32 %v14642_v0, %v14641_v41  ;;  %v5471_v61 = vadd.f32 1.0, %v8597_v58  ;;  %v5629_v55 = vmul.f32 %v5469_v4, %v13195_v54  ;;  %8610 = vtanh.f32 %v13254_v46  ;;  %v5718_v54 = vld [vmem:[#allocation2 + $0x210] sm:$0xff] }
 0x41e   : > { %v6191_v33 = vadd.f32 %v5931_v53, %v5711_v56  ;;  %v6192_v49 = vadd.f32 %v5933_v5, %v5712_v20  ;;  %v8599_v39 = vpop.eup %8598  ;;  %v14645_v56 = vld [vmem:[#allocation294_spill] sm:$0xff]  ;;  %v14646_v53 = vld [vmem:[#allocation260_spill] sm:$0xff]  ;;  %v5630_v5 = vmul.f32 %v5470_v10, %v13198_v24  ;;  %8612 = vtanh.f32 %v13260_v6 }
 0x41f   : > { %v8601_v20 = vpop.eup %8600  ;;  %v5472_v63 = vadd.f32 1.0, %v8599_v39  ;;  %v13289_v4 = vmul.f32 0.5, %v4977_v12  ;;  %v14651_v41 = vld [vmem:[#allocation264_spill] sm:$0xff]  ;;  %v14657_v12 = vld [vmem:[#allocation270_spill] sm:$0xff] }
 0x420   : > { %6074 = vadd.xlane.f32.xlu0 %v5623_v60  ;;  %6352 = vst.msk [vmem:[#allocation2 + $0x1d8] sm:$0xff] %vm6292_vm4, %v6191_v33  ;;  %6076 = vadd.xlane.f32.xlu1 %v5624_v44  ;;  %6353 = vst.msk [vmem:[#allocation2 + $0x1e0] sm:$0xff] %vm6292_vm4, %v6192_v49  ;;  %v5716_v60 = vld [vmem:[#allocation2 + $0x200] sm:$0xff]  ;;  %v4974_v44 = vadd.f32 %v14646_v53, %v14645_v56  ;;  %v13271_v33 = vmul.f32 0.5, %v4966_v15  ;;  %v4985_v0 = vadd.f32 %v14651_v41, %v14315_v26 }
 0x421   : > { %v5935_v31 = vpop.xlane.xlu0 %5934  ;;  %v5937_v3 = vpop.xlane.xlu1 %5936  ;;  %v5632_v11 = vmul.f32 %v5472_v63, %v13215_v17  ;;  %v14655_v56 = vld [vmem:[#allocation354_spill] sm:$0xff] }
 0x422   : > { %v6193_v28 = vadd.f32 %v5935_v31, %v5713_v32  ;;  %v6194_v16 = vadd.f32 %v5937_v3, %v5714_v59  ;;  %v8603_v62 = vpop.eup %8602  ;;  %v13279_v32 = vmul.f32 0.5, %v4969_v2  ;;  %v5473_v31 = vadd.f32 1.0, %v8601_v20 }
 0x423   : > { %v8605_v49 = vpop.eup %8604  ;;  %v13282_v18 = vmul.f32 0.5, %v4974_v44  ;;  %8614 = vtanh.f32 %v13271_v33  ;;  %v13307_v44 = vmul.f32 0.5, %v4985_v0 }
 0x424   : > { %6078 = vadd.xlane.f32.xlu0 %v5625_v50  ;;  %6354 = vst.msk [vmem:[#allocation2 + $0x1e8] sm:$0xff] %vm6292_vm4, %v6193_v28  ;;  %6080 = vadd.xlane.f32.xlu1 %v5626_v52  ;;  %6355 = vst.msk [vmem:[#allocation2 + $0x1f0] sm:$0xff] %vm6292_vm4, %v6194_v16  ;;  %v5631_v50 = vmul.f32 %v5471_v61, %v13205_v29  ;;  %v5474_v29 = vadd.f32 1.0, %v8603_v62  ;;  %v8607_v3 = vpop.eup %8606  ;;  %v5720_v16 = vld [vmem:[#allocation2 + $0x220] sm:$0xff]  ;;  %8616 = vtanh.f32 %v13279_v32 }
 0x425   : > { %v5939_v22 = vpop.xlane.xlu0 %5938  ;;  %v5941_v48 = vpop.xlane.xlu1 %5940  ;;  %v5633_v17 = vmul.f32 %v5473_v31, %v13223_v43  ;;  %8618 = vtanh.f32 %v13282_v18  ;;  %v5476_v61 = vadd.f32 1.0, %v8607_v3  ;;  %v5722_v43 = vld [vmem:[#allocation2 + $0x230] sm:$0xff]  ;;  %v14658_v31 = vld [vmem:[#allocation358_spill] sm:$0xff] }
 0x426   : > { %v6195_v30 = vadd.f32 %v5939_v22, %v5715_v42  ;;  %v6196_v8 = vadd.f32 %v5941_v48, %v5716_v60  ;;  %v14652_v42 = vld [vmem:[#allocation306_spill] sm:$0xff]  ;;  %v14653_v22 = vld [vmem:[#allocation265_spill] sm:$0xff]  ;;  %v8609_v60 = vpop.eup %8608  ;;  %v5634_v48 = vmul.f32 %v5474_v29, %v13226_v38  ;;  %8620 = vtanh.f32 %v13289_v4  ;;  %v5726_v3 = vld [vmem:[#allocation2 + $0x250] sm:$0xff] }
 0x427   : > { %v4990_v10 = vadd.f32 %v14653_v22, %v14652_v42  ;;  %v8611_v19 = vpop.eup %8610  ;;  %v5636_v62 = vmul.f32 %v5476_v61, %v13244_v34  ;;  %v5006_v14 = vadd.f32 %v14658_v31, %v14329_v25 }
 0x428   : > { %6082 = vadd.xlane.f32.xlu0 %v5627_v21  ;;  %6356 = vst.msk [vmem:[#allocation2 + $0x1f8] sm:$0xff] %vm6292_vm4, %v6195_v30  ;;  %6084 = vadd.xlane.f32.xlu1 %v5628_v1  ;;  %6357 = vst.msk [vmem:[#allocation2 + $0x200] sm:$0xff] %vm6292_vm4, %v6196_v8  ;;  %v5475_v21 = vadd.f32 1.0, %v8605_v49  ;;  %v13299_v1 = vmul.f32 0.5, %v4982_v47  ;;  %v5721_v30 = vld [vmem:[#allocation2 + $0x228] sm:$0xff]  ;;  %v8613_v8 = vpop.eup %8612 }
 0x429   : > { %v5943_v52 = vpop.xlane.xlu0 %5942  ;;  %v5945_v40 = vpop.xlane.xlu1 %5944  ;;  %v5479_v49 = vadd.f32 1.0, %v8613_v8  ;;  %v5725_v47 = vld [vmem:[#allocation2 + $0x248] sm:$0xff] }
 0x42a   : > { %v6197_v23 = vadd.f32 %v5943_v52, %v5717_v45  ;;  %v6198_v24 = vadd.f32 %v5945_v40, %v5718_v54  ;;  %v5635_v7 = vmul.f32 %v5475_v21, %v13232_v57  ;;  %v5477_v45 = vadd.f32 1.0, %v8609_v60  ;;  %v14656_v57 = vld [vmem:[#allocation360_spill] sm:$0xff] }
 0x42b   : > { %v13310_v52 = vmul.f32 0.5, %v4990_v10  ;;  %8622 = vtanh.f32 %v13299_v1  ;;  %v4998_v20 = vadd.f32 %v14656_v57, %v14321_v27  ;;  %v5001_v27 = vadd.f32 %v14657_v12, %v14323_v35 }
 0x42c   : > { %6086 = vadd.xlane.f32.xlu0 %v5629_v55  ;;  %6358 = vst.msk [vmem:[#allocation2 + $0x208] sm:$0xff] %vm6292_vm4, %v6197_v23  ;;  %6088 = vadd.xlane.f32.xlu1 %v5630_v5  ;;  %6359 = vst.msk [vmem:[#allocation2 + $0x210] sm:$0xff] %vm6292_vm4, %v6198_v24  ;;  %v14654_v55 = vld [vmem:[#allocation305_spill] sm:$0xff]  ;;  %v5478_v23 = vadd.f32 1.0, %v8611_v19  ;;  %8624 = vtanh.f32 %v13307_v44  ;;  %v5637_v34 = vmul.f32 %v5477_v45, %v13251_v9  ;;  %v14659_v9 = vld [vmem:[#allocation322_spill] sm:$0xff] }
 0x42d   : > { %v5947_v28 = vpop.xlane.xlu0 %5946  ;;  %v5949_v58 = vpop.xlane.xlu1 %5948  ;;  %v4993_v53 = vadd.f32 %v14655_v56, %v14654_v55  ;;  %v5723_v5 = vld [vmem:[#allocation2 + $0x238] sm:$0xff]  ;;  %8626 = vtanh.f32 %v13310_v52  ;;  %v13327_v37 = vmul.f32 0.5, %v4998_v20 }
 0x42e   : > { %v6199_v59 = vadd.f32 %v5947_v28, %v5719_v13  ;;  %v6200_v15 = vadd.f32 %v5949_v58, %v5720_v16  ;;  %v8615_v40 = vpop.eup %8614  ;;  %v5638_v29 = vmul.f32 %v5478_v23, %v13254_v46  ;;  %v14660_v16 = vld [vmem:[#allocation363_spill] sm:$0xff]  ;;  %v13334_v58 = vmul.f32 0.5, %v5001_v27 }
 0x42f   : > { %v13317_v51 = vmul.f32 0.5, %v4993_v53  ;;  %v8617_v28 = vpop.eup %8616  ;;  %v5009_v25 = vadd.f32 %v14660_v16, %v14659_v9  ;;  %v5639_v46 = vmul.f32 %v5479_v49, %v13260_v6  ;;  %v5732_v49 = vld [vmem:[#allocation2 + $0x280] sm:$0xff]  ;;  %v5733_v27 = vld [vmem:[#allocation2 + $0x288] sm:$0xff] }
 0x430   : > { %6090 = vadd.xlane.f32.xlu0 %v5631_v50  ;;  %6360 = vst.msk [vmem:[#allocation2 + $0x218] sm:$0xff] %vm6292_vm4, %v6199_v59  ;;  %6092 = vadd.xlane.f32.xlu1 %v5632_v11  ;;  %6361 = vst.msk [vmem:[#allocation2 + $0x220] sm:$0xff] %vm6292_vm4, %v6200_v15  ;;  %v5724_v50 = vld [vmem:[#allocation2 + $0x240] sm:$0xff]  ;;  %v5480_v11 = vadd.f32 1.0, %v8615_v40  ;;  %v8619_v59 = vpop.eup %8618  ;;  %v5481_v0 = vadd.f32 1.0, %v8617_v28  ;;  %v13338_v15 = vmul.f32 0.5, %v5006_v14 }
 0x431   : > { %v5951_v39 = vpop.xlane.xlu0 %5950  ;;  %v5953_v2 = vpop.xlane.xlu1 %5952  ;;  %8628 = vtanh.f32 %v13317_v51  ;;  %v5482_v10 = vadd.f32 1.0, %v8619_v59  ;;  %v5736_v16 = vld [vmem:[#allocation2 + $0x2a0] sm:$0xff] }
 0x432   : > { %v6201_v26 = vadd.f32 %v5951_v39, %v5721_v30  ;;  %v6202_v38 = vadd.f32 %v5953_v2, %v5722_v43  ;;  %8630 = vtanh.f32 %v13327_v37  ;;  %v8621_v22 = vpop.eup %8620  ;;  %v5640_v30 = vmul.f32 %v5480_v11, %v13271_v33  ;;  %v5729_v33 = vld [vmem:[#allocation2 + $0x268] sm:$0xff] }
 0x433   : > { %8632 = vtanh.f32 %v13334_v58  ;;  %v5483_v19 = vadd.f32 1.0, %v8621_v22  ;;  %v5642_v8 = vmul.f32 %v5482_v10, %v13282_v18  ;;  %v5738_v22 = vld [vmem:[#allocation2 + $0x2b0] sm:$0xff] }
 0x434   : > { %6094 = vadd.xlane.f32.xlu0 %v5633_v17  ;;  %6362 = vst.msk [vmem:[#allocation2 + $0x228] sm:$0xff] %vm6292_vm4, %v6201_v26  ;;  %6096 = vadd.xlane.f32.xlu1 %v5634_v48  ;;  %6363 = vst.msk [vmem:[#allocation2 + $0x230] sm:$0xff] %vm6292_vm4, %v6202_v38  ;;  %v5727_v17 = vld [vmem:[#allocation2 + $0x258] sm:$0xff]  ;;  %v5728_v48 = vld [vmem:[#allocation2 + $0x260] sm:$0xff]  ;;  %v13343_v26 = vmul.f32 0.5, %v5009_v25  ;;  %8634 = vtanh.f32 %v13338_v15 }
 0x435   : > { %v5955_v63 = vpop.xlane.xlu0 %5954  ;;  %v5957_v36 = vpop.xlane.xlu1 %5956  ;;  %v5730_v38 = vld [vmem:[#allocation2 + $0x270] sm:$0xff]  ;;  %v5643_v57 = vmul.f32 %v5483_v19, %v13289_v4  ;;  %v5741_v19 = vld [vmem:[#allocation2 + $0x2c8] sm:$0xff] }
 0x436   : > { %v6203_v54 = vadd.f32 %v5955_v63, %v5723_v5  ;;  %v6204_v24 = vadd.f32 %v5957_v36, %v5724_v50  ;;  %v8623_v60 = vpop.eup %8622  ;;  %8636 = vtanh.f32 %v13343_v26  ;;  %v5731_v5 = vld [vmem:[#allocation2 + $0x278] sm:$0xff] }
 0x437   : > { %v8625_v2 = vpop.eup %8624  ;;  %v5484_v55 = vadd.f32 1.0, %v8623_v60  ;;  %v5739_v60 = vld [vmem:[#allocation2 + $0x2b8] sm:$0xff] }
 0x438   : > { %6098 = vadd.xlane.f32.xlu0 %v5635_v7  ;;  %6364 = vst.msk [vmem:[#allocation2 + $0x238] sm:$0xff] %vm6292_vm4, %v6203_v54  ;;  %6100 = vadd.xlane.f32.xlu1 %v5636_v62  ;;  %6365 = vst.msk [vmem:[#allocation2 + $0x240] sm:$0xff] %vm6292_vm4, %v6204_v24  ;;  %v5641_v7 = vmul.f32 %v5481_v0, %v13279_v32  ;;  %v8627_v53 = vpop.eup %8626  ;;  %v5485_v20 = vadd.f32 1.0, %v8625_v2  ;;  %v5737_v0 = vld [vmem:[#allocation2 + $0x2a8] sm:$0xff] }
 0x439   : > { %v5959_v13 = vpop.xlane.xlu0 %5958  ;;  %v5961_v21 = vpop.xlane.xlu1 %5960  ;;  %v5486_v23 = vadd.f32 1.0, %v8627_v53  ;;  %v5644_v62 = vmul.f32 %v5484_v55, %v13299_v1  ;;  %v5744_v53 = vld [vmem:[#allocation2 + $0x2e0] sm:$0xff] }
 0x43a   : > { %v6205_v35 = vadd.f32 %v5959_v13, %v5725_v47  ;;  %v6206_v41 = vadd.f32 %v5961_v21, %v5726_v3  ;;  %v5645_v4 = vmul.f32 %v5485_v20, %v13307_v44  ;;  %v5734_v13 = vld [vmem:[#allocation2 + $0x290] sm:$0xff] }
 0x43b   : > { %v8629_v18 = vpop.eup %8628  ;;  %v5646_v31 = vmul.f32 %v5486_v23, %v13310_v52  ;;  %v5747_v23 = vld [vmem:[#allocation2 + $0x2f8] sm:$0xff] }
 0x43c   : > { %6102 = vadd.xlane.f32.xlu0 %v5637_v34  ;;  %6366 = vst.msk [vmem:[#allocation2 + $0x248] sm:$0xff] %vm6292_vm4, %v6205_v35  ;;  %6104 = vadd.xlane.f32.xlu1 %v5638_v29  ;;  %6367 = vst.msk [vmem:[#allocation2 + $0x250] sm:$0xff] %vm6292_vm4, %v6206_v41  ;;  %v8631_v40 = vpop.eup %8630  ;;  %v5487_v12 = vadd.f32 1.0, %v8629_v18  ;;  %v5735_v35 = vld [vmem:[#allocation2 + $0x298] sm:$0xff] }
 0x43d   : > { %v5963_v42 = vpop.xlane.xlu0 %5962  ;;  %v5965_v61 = vpop.xlane.xlu1 %5964  ;;  %v5488_v1 = vadd.f32 1.0, %v8631_v40  ;;  %v5748_v40 = vld [vmem:[#allocation2 + $0x300] sm:$0xff] }
 0x43e   : > { %v6207_v39 = vadd.f32 %v5963_v42, %v5727_v17  ;;  %v6208_v6 = vadd.f32 %v5965_v61, %v5728_v48  ;;  %v8633_v34 = vpop.eup %8632  ;;  %v5647_v11 = vmul.f32 %v5487_v12, %v13317_v51  ;;  %v5740_v61 = vld [vmem:[#allocation2 + $0x2c0] sm:$0xff] }
 0x43f   : > { %v8635_v47 = vpop.eup %8634  ;;  %v5489_v44 = vadd.f32 1.0, %v8633_v34  ;;  %v5648_v52 = vmul.f32 %v5488_v1, %v13327_v37 }
 0x440   : > { %6106 = vadd.xlane.f32.xlu0 %v5639_v46  ;;  %6368 = vst.msk [vmem:[#allocation2 + $0x258] sm:$0xff] %vm6292_vm4, %v6207_v39  ;;  %6108 = vadd.xlane.f32.xlu1 %v5640_v30  ;;  %6369 = vst.msk [vmem:[#allocation2 + $0x260] sm:$0xff] %vm6292_vm4, %v6208_v6  ;;  %v8637_v3 = vpop.eup %8636  ;;  %v5490_v21 = vadd.f32 1.0, %v8635_v47  ;;  %v5752_v47 = vld [vmem:[#allocation2 + $0x320] sm:$0xff] }
 0x441   : > { %v5967_v43 = vpop.xlane.xlu0 %5966  ;;  %v5969_v45 = vpop.xlane.xlu1 %5968  ;;  %v5491_v46 = vadd.f32 1.0, %v8637_v3  ;;  %v5649_v51 = vmul.f32 %v5489_v44, %v13334_v58 }
 0x442   : > { %v6209_v56 = vadd.f32 %v5967_v43, %v5729_v33  ;;  %v6210_v32 = vadd.f32 %v5969_v45, %v5730_v38  ;;  %v5650_v42 = vmul.f32 %v5490_v21, %v13338_v15  ;;  %v5742_v43 = vld [vmem:[#allocation2 + $0x2d0] sm:$0xff]  ;;  %v5755_v21 = vld [vmem:[#allocation2 + $0x338] sm:$0xff] }
 0x443   : > { %v5651_v39 = vmul.f32 %v5491_v46, %v13343_v26  ;;  %v5757_v46 = vld [vmem:[#allocation2 + $0x348] sm:$0xff] }
 0x444   : > { %6110 = vadd.xlane.f32.xlu0 %v5641_v7  ;;  %6370 = vst.msk [vmem:[#allocation2 + $0x268] sm:$0xff] %vm6292_vm4, %v6209_v56  ;;  %6112 = vadd.xlane.f32.xlu1 %v5642_v8  ;;  %6371 = vst.msk [vmem:[#allocation2 + $0x270] sm:$0xff] %vm6292_vm4, %v6210_v32  ;;  %v5743_v8 = vld [vmem:[#allocation2 + $0x2d8] sm:$0xff]  ;;  %v5745_v32 = vld [vmem:[#allocation2 + $0x2e8] sm:$0xff] }
 0x445   : > { %v5971_v63 = vpop.xlane.xlu0 %5970  ;;  %v5973_v50 = vpop.xlane.xlu1 %5972 }
 0x446   : > { %v6211_v54 = vadd.f32 %v5971_v63, %v5731_v5  ;;  %v6212_v36 = vadd.f32 %v5973_v50, %v5732_v49  ;;  %v5746_v5 = vld [vmem:[#allocation2 + $0x2f0] sm:$0xff] }
 0x448   : > { %6114 = vadd.xlane.f32.xlu0 %v5643_v57  ;;  %6372 = vst.msk [vmem:[#allocation2 + $0x278] sm:$0xff] %vm6292_vm4, %v6211_v54  ;;  %6116 = vadd.xlane.f32.xlu1 %v5644_v62  ;;  %6373 = vst.msk [vmem:[#allocation2 + $0x280] sm:$0xff] %vm6292_vm4, %v6212_v36  ;;  %v5749_v36 = vld [vmem:[#allocation2 + $0x308] sm:$0xff] }
 0x449   : > { %v5975_v24 = vpop.xlane.xlu0 %5974  ;;  %v5977_v28 = vpop.xlane.xlu1 %5976 }
 0x44a   : > { %v6213_v14 = vadd.f32 %v5975_v24, %v5733_v27  ;;  %v6214_v29 = vadd.f32 %v5977_v28, %v5734_v13  ;;  %v5750_v27 = vld [vmem:[#allocation2 + $0x310] sm:$0xff] }
 0x44c   : > { %6118 = vadd.xlane.f32.xlu0 %v5645_v4  ;;  %6374 = vst.msk [vmem:[#allocation2 + $0x288] sm:$0xff] %vm6292_vm4, %v6213_v14  ;;  %6120 = vadd.xlane.f32.xlu1 %v5646_v31  ;;  %6375 = vst.msk [vmem:[#allocation2 + $0x290] sm:$0xff] %vm6292_vm4, %v6214_v29  ;;  %v5751_v31 = vld [vmem:[#allocation2 + $0x318] sm:$0xff]  ;;  %v5753_v29 = vld [vmem:[#allocation2 + $0x328] sm:$0xff] }
 0x44d   : > { %v5979_v59 = vpop.xlane.xlu0 %5978  ;;  %v5981_v25 = vpop.xlane.xlu1 %5980 }
 0x44e   : > { %v6215_v9 = vadd.f32 %v5979_v59, %v5735_v35  ;;  %v6216_v41 = vadd.f32 %v5981_v25, %v5736_v16  ;;  %v5754_v35 = vld [vmem:[#allocation2 + $0x330] sm:$0xff]  ;;  %v5756_v16 = vld [vmem:[#allocation2 + $0x340] sm:$0xff] }
 0x450   : > { %6122 = vadd.xlane.f32.xlu0 %v5647_v11  ;;  %6376 = vst.msk [vmem:[#allocation2 + $0x298] sm:$0xff] %vm6292_vm4, %v6215_v9  ;;  %6124 = vadd.xlane.f32.xlu1 %v5648_v52  ;;  %6377 = vst.msk [vmem:[#allocation2 + $0x2a0] sm:$0xff] %vm6292_vm4, %v6216_v41 }
 0x451   : > { %v5983_v17 = vpop.xlane.xlu0 %5982  ;;  %v5985_v10 = vpop.xlane.xlu1 %5984 }
 0x452   : > { %v6217_v37 = vadd.f32 %v5983_v17, %v5737_v0  ;;  %v6218_v30 = vadd.f32 %v5985_v10, %v5738_v22  ;;  %v5758_v17 = vld [vmem:[#allocation2 + $0x350] sm:$0xff]  ;;  %v5759_v22 = vld [vmem:[#allocation2 + $0x358] sm:$0xff] }
 0x454   : > { %6126 = vadd.xlane.f32.xlu0 %v5649_v51  ;;  %6378 = vst.msk [vmem:[#allocation2 + $0x2a8] sm:$0xff] %vm6292_vm4, %v6217_v37  ;;  %6128 = vadd.xlane.f32.xlu1 %v5650_v42  ;;  %6379 = vst.msk [vmem:[#allocation2 + $0x2b0] sm:$0xff] %vm6292_vm4, %v6218_v30 }
 0x455   : > { %v5987_v48 = vpop.xlane.xlu0 %5986  ;;  %v5989_v6 = vpop.xlane.xlu1 %5988 }
 0x456   : > { %v6219_v58 = vadd.f32 %v5987_v48, %v5739_v60  ;;  %v6220_v15 = vadd.f32 %v5989_v6, %v5740_v61 }
 0x458   : > { %6130 = vadd.xlane.f32.xlu0 %v5651_v39  ;;  %6380 = vst.msk [vmem:[#allocation2 + $0x2b8] sm:$0xff] %vm6292_vm4, %v6219_v58  ;;  %6381 = vst.msk [vmem:[#allocation2 + $0x2c0] sm:$0xff] %vm6292_vm4, %v6220_v15  ;;  %v5760_v39 = vld [vmem:[#allocation2 + $0x360] sm:$0xff]  ;;  %v5761_v58 = vld [vmem:[#allocation2 + $0x368] sm:$0xff] }
 0x459   : > { %v5991_v7 = vpop.xlane.xlu0 %5990  ;;  %v5993_v2 = vpop.xlane.xlu1 %5992  ;;  %v5762_v15 = vld [vmem:[#allocation2 + $0x370] sm:$0xff] }
 0x45a   : > { %v6221_v33 = vadd.f32 %v5991_v7, %v5741_v19  ;;  %v6222_v26 = vadd.f32 %v5993_v2, %v5742_v43 }
 0x45c   : > { %6382 = vst.msk [vmem:[#allocation2 + $0x2c8] sm:$0xff] %vm6292_vm4, %v6221_v33  ;;  %6383 = vst.msk [vmem:[#allocation2 + $0x2d0] sm:$0xff] %vm6292_vm4, %v6222_v26  ;;  %v5763_v33 = vld [vmem:[#allocation2 + $0x378] sm:$0xff]  ;;  %v5764_v26 = vld [vmem:[#allocation2 + $0x380] sm:$0xff] }
 0x45d   : > { %v5995_v55 = vpop.xlane.xlu0 %5994  ;;  %v5997_v38 = vpop.xlane.xlu1 %5996 }
 0x45e   : > { %v6223_v56 = vadd.f32 %v5995_v55, %v5743_v8  ;;  %v6224_v45 = vadd.f32 %v5997_v38, %v5744_v53 }
 0x460   : > { %6384 = vst.msk [vmem:[#allocation2 + $0x2d8] sm:$0xff] %vm6292_vm4, %v6223_v56  ;;  %6385 = vst.msk [vmem:[#allocation2 + $0x2e0] sm:$0xff] %vm6292_vm4, %v6224_v45  ;;  %v5765_v56 = vld [vmem:[#allocation2 + $0x388] sm:$0xff]  ;;  %v5766_v45 = vld [vmem:[#allocation2 + $0x390] sm:$0xff] }
 0x461   : > { %v5999_v57 = vpop.xlane.xlu0 %5998  ;;  %v6001_v63 = vpop.xlane.xlu1 %6000 }
 0x462   : > { %v6225_v20 = vadd.f32 %v5999_v57, %v5745_v32  ;;  %v6226_v18 = vadd.f32 %v6001_v63, %v5746_v5 }
 0x464   : > { %6386 = vst.msk [vmem:[#allocation2 + $0x2e8] sm:$0xff] %vm6292_vm4, %v6225_v20  ;;  %6387 = vst.msk [vmem:[#allocation2 + $0x2f0] sm:$0xff] %vm6292_vm4, %v6226_v18  ;;  %v5767_v20 = vld [vmem:[#allocation2 + $0x398] sm:$0xff]  ;;  %v5768_v18 = vld [vmem:[#allocation2 + $0x3a0] sm:$0xff] }
 0x465   : > { %v6003_v62 = vpop.xlane.xlu0 %6002  ;;  %v6005_v49 = vpop.xlane.xlu1 %6004 }
 0x466   : > { %v6227_v54 = vadd.f32 %v6003_v62, %v5747_v23  ;;  %v6228_v50 = vadd.f32 %v6005_v49, %v5748_v40 }
 0x468   : > { %6388 = vst.msk [vmem:[#allocation2 + $0x2f8] sm:$0xff] %vm6292_vm4, %v6227_v54  ;;  %6389 = vst.msk [vmem:[#allocation2 + $0x300] sm:$0xff] %vm6292_vm4, %v6228_v50  ;;  %v5769_v54 = vld [vmem:[#allocation2 + $0x3a8] sm:$0xff]  ;;  %v5770_v50 = vld [vmem:[#allocation2 + $0x3b0] sm:$0xff] }
 0x469   : > { %v6007_v12 = vpop.xlane.xlu0 %6006  ;;  %v6009_v24 = vpop.xlane.xlu1 %6008 }
 0x46a   : > { %v6229_v4 = vadd.f32 %v6007_v12, %v5749_v36  ;;  %v6230_v34 = vadd.f32 %v6009_v24, %v5750_v27 }
 0x46c   : > { %6390 = vst.msk [vmem:[#allocation2 + $0x308] sm:$0xff] %vm6292_vm4, %v6229_v4  ;;  %6391 = vst.msk [vmem:[#allocation2 + $0x310] sm:$0xff] %vm6292_vm4, %v6230_v34  ;;  %v5771_v4 = vld [vmem:[#allocation2 + $0x3b8] sm:$0xff]  ;;  %v5772_v34 = vld [vmem:[#allocation2 + $0x3c0] sm:$0xff] }
 0x46d   : > { %v6011_v1 = vpop.xlane.xlu0 %6010  ;;  %v6013_v13 = vpop.xlane.xlu1 %6012 }
 0x46e   : > { %v6231_v14 = vadd.f32 %v6011_v1, %v5751_v31  ;;  %v6232_v28 = vadd.f32 %v6013_v13, %v5752_v47 }
 0x470   : > { %6392 = vst.msk [vmem:[#allocation2 + $0x318] sm:$0xff] %vm6292_vm4, %v6231_v14  ;;  %6393 = vst.msk [vmem:[#allocation2 + $0x320] sm:$0xff] %vm6292_vm4, %v6232_v28  ;;  %v5773_v14 = vld [vmem:[#allocation2 + $0x3c8] sm:$0xff]  ;;  %v5774_v28 = vld [vmem:[#allocation2 + $0x3d0] sm:$0xff] }
 0x471   : > { %v6015_v11 = vpop.xlane.xlu0 %6014  ;;  %v6017_v59 = vpop.xlane.xlu1 %6016 }
 0x472   : > { %v6233_v44 = vadd.f32 %v6015_v11, %v5753_v29  ;;  %v6234_v3 = vadd.f32 %v6017_v59, %v5754_v35 }
 0x474   : > { %6394 = vst.msk [vmem:[#allocation2 + $0x328] sm:$0xff] %vm6292_vm4, %v6233_v44  ;;  %6395 = vst.msk [vmem:[#allocation2 + $0x330] sm:$0xff] %vm6292_vm4, %v6234_v3  ;;  %v5775_v44 = vld [vmem:[#allocation2 + $0x3d8] sm:$0xff]  ;;  %v5776_v3 = vld [vmem:[#allocation2 + $0x3e0] sm:$0xff] }
 0x475   : > { %v6019_v52 = vpop.xlane.xlu0 %6018  ;;  %v6021_v25 = vpop.xlane.xlu1 %6020 }
 0x476   : > { %v6235_v9 = vadd.f32 %v6019_v52, %v5755_v21  ;;  %v6236_v41 = vadd.f32 %v6021_v25, %v5756_v16 }
 0x478   : > { %6396 = vst.msk [vmem:[#allocation2 + $0x338] sm:$0xff] %vm6292_vm4, %v6235_v9  ;;  %6397 = vst.msk [vmem:[#allocation2 + $0x340] sm:$0xff] %vm6292_vm4, %v6236_v41  ;;  %v5777_v9 = vld [vmem:[#allocation2 + $0x3e8] sm:$0xff]  ;;  %v5778_v41 = vld [vmem:[#allocation2 + $0x3f0] sm:$0xff] }
 0x479   : > { %v6023_v51 = vpop.xlane.xlu0 %6022  ;;  %v6025_v42 = vpop.xlane.xlu1 %6024 }
 0x47a   : > { %v6237_v0 = vadd.f32 %v6023_v51, %v5757_v46  ;;  %v6238_v37 = vadd.f32 %v6025_v42, %v5758_v17 }
 0x47c   : > { %6398 = vst.msk [vmem:[#allocation2 + $0x348] sm:$0xff] %vm6292_vm4, %v6237_v0  ;;  %6399 = vst.msk [vmem:[#allocation2 + $0x350] sm:$0xff] %vm6292_vm4, %v6238_v37  ;;  %v5779_v0 = vld [vmem:[#allocation2 + $0x3f8] sm:$0xff]  ;;  %v5780_v37 = vld [vmem:[#allocation2 + $0x400] sm:$0xff] }
 0x47d   : > { %v6027_v10 = vpop.xlane.xlu0 %6026  ;;  %v6029_v60 = vpop.xlane.xlu1 %6028 }
 0x47e   : > { %v6239_v30 = vadd.f32 %v6027_v10, %v5759_v22  ;;  %v6240_v48 = vadd.f32 %v6029_v60, %v5760_v39 }
 0x480   : > { %6400 = vst.msk [vmem:[#allocation2 + $0x358] sm:$0xff] %vm6292_vm4, %v6239_v30  ;;  %6401 = vst.msk [vmem:[#allocation2 + $0x360] sm:$0xff] %vm6292_vm4, %v6240_v48  ;;  %v5781_v30 = vld [vmem:[#allocation2 + $0x408] sm:$0xff]  ;;  %v5782_v48 = vld [vmem:[#allocation2 + $0x410] sm:$0xff] }
 0x481   : > { %v6031_v61 = vpop.xlane.xlu0 %6030  ;;  %v6033_v19 = vpop.xlane.xlu1 %6032 }
 0x482   : > { %v6241_v6 = vadd.f32 %v6031_v61, %v5761_v58  ;;  %v6242_v7 = vadd.f32 %v6033_v19, %v5762_v15 }
 0x484   : > { %6402 = vst.msk [vmem:[#allocation2 + $0x368] sm:$0xff] %vm6292_vm4, %v6241_v6  ;;  %6403 = vst.msk [vmem:[#allocation2 + $0x370] sm:$0xff] %vm6292_vm4, %v6242_v7  ;;  %v5783_v6 = vld [vmem:[#allocation2 + $0x418] sm:$0xff]  ;;  %v5784_v7 = vld [vmem:[#allocation2 + $0x420] sm:$0xff] }
 0x485   : > { %v6035_v43 = vpop.xlane.xlu0 %6034  ;;  %v6037_v8 = vpop.xlane.xlu1 %6036 }
 0x486   : > { %v6243_v2 = vadd.f32 %v6035_v43, %v5763_v33  ;;  %v6244_v55 = vadd.f32 %v6037_v8, %v5764_v26 }
 0x488   : > { %6404 = vst.msk [vmem:[#allocation2 + $0x378] sm:$0xff] %vm6292_vm4, %v6243_v2  ;;  %6405 = vst.msk [vmem:[#allocation2 + $0x380] sm:$0xff] %vm6292_vm4, %v6244_v55  ;;  %v5785_v2 = vld [vmem:[#allocation2 + $0x428] sm:$0xff]  ;;  %v5786_v55 = vld [vmem:[#allocation2 + $0x430] sm:$0xff] }
 0x489   : > { %v6039_v53 = vpop.xlane.xlu0 %6038  ;;  %v6041_v32 = vpop.xlane.xlu1 %6040 }
 0x48a   : > { %v6245_v38 = vadd.f32 %v6039_v53, %v5765_v56  ;;  %v6246_v57 = vadd.f32 %v6041_v32, %v5766_v45 }
 0x48c   : > { %6406 = vst.msk [vmem:[#allocation2 + $0x388] sm:$0xff] %vm6292_vm4, %v6245_v38  ;;  %6407 = vst.msk [vmem:[#allocation2 + $0x390] sm:$0xff] %vm6292_vm4, %v6246_v57  ;;  %v5787_v38 = vld [vmem:[#allocation2 + $0x438] sm:$0xff]  ;;  %v5788_v57 = vld [vmem:[#allocation2 + $0x440] sm:$0xff] }
 0x48d   : > { %v6043_v5 = vpop.xlane.xlu0 %6042  ;;  %v6045_v23 = vpop.xlane.xlu1 %6044 }
 0x48e   : > { %v6247_v63 = vadd.f32 %v6043_v5, %v5767_v20  ;;  %v6248_v62 = vadd.f32 %v6045_v23, %v5768_v18 }
 0x490   : > { %6408 = vst.msk [vmem:[#allocation2 + $0x398] sm:$0xff] %vm6292_vm4, %v6247_v63  ;;  %6409 = vst.msk [vmem:[#allocation2 + $0x3a0] sm:$0xff] %vm6292_vm4, %v6248_v62  ;;  %v5789_v63 = vld [vmem:[#allocation2 + $0x448] sm:$0xff]  ;;  %v5790_v62 = vld [vmem:[#allocation2 + $0x450] sm:$0xff] }
 0x491   : > { %v6047_v40 = vpop.xlane.xlu0 %6046  ;;  %v6049_v36 = vpop.xlane.xlu1 %6048 }
 0x492   : > { %v6249_v49 = vadd.f32 %v6047_v40, %v5769_v54  ;;  %v6250_v12 = vadd.f32 %v6049_v36, %v5770_v50 }
 0x494   : > { %6410 = vst.msk [vmem:[#allocation2 + $0x3a8] sm:$0xff] %vm6292_vm4, %v6249_v49  ;;  %6411 = vst.msk [vmem:[#allocation2 + $0x3b0] sm:$0xff] %vm6292_vm4, %v6250_v12  ;;  %v5791_v49 = vld [vmem:[#allocation2 + $0x458] sm:$0xff]  ;;  %v5792_v12 = vld [vmem:[#allocation2 + $0x460] sm:$0xff] }
 0x495   : > { %v6051_v27 = vpop.xlane.xlu0 %6050  ;;  %v6053_v31 = vpop.xlane.xlu1 %6052 }
 0x496   : > { %v6251_v24 = vadd.f32 %v6051_v27, %v5771_v4  ;;  %v6252_v1 = vadd.f32 %v6053_v31, %v5772_v34 }
 0x498   : > { %6412 = vst.msk [vmem:[#allocation2 + $0x3b8] sm:$0xff] %vm6292_vm4, %v6251_v24  ;;  %6413 = vst.msk [vmem:[#allocation2 + $0x3c0] sm:$0xff] %vm6292_vm4, %v6252_v1  ;;  %v5793_v24 = vld [vmem:[#allocation2 + $0x468] sm:$0xff]  ;;  %v5794_v1 = vld [vmem:[#allocation2 + $0x470] sm:$0xff] }
 0x499   : > { %v6055_v47 = vpop.xlane.xlu0 %6054  ;;  %v6057_v29 = vpop.xlane.xlu1 %6056 }
 0x49a   : > { %v6253_v13 = vadd.f32 %v6055_v47, %v5773_v14  ;;  %v6254_v11 = vadd.f32 %v6057_v29, %v5774_v28 }
 0x49c   : > { %6414 = vst.msk [vmem:[#allocation2 + $0x3c8] sm:$0xff] %vm6292_vm4, %v6253_v13  ;;  %6415 = vst.msk [vmem:[#allocation2 + $0x3d0] sm:$0xff] %vm6292_vm4, %v6254_v11  ;;  %v5795_v13 = vld [vmem:[#allocation2 + $0x478] sm:$0xff]  ;;  %v5796_v11 = vld [vmem:[#allocation2 + $0x480] sm:$0xff] }
 0x49d   : > { %v6059_v35 = vpop.xlane.xlu0 %6058  ;;  %v6061_v21 = vpop.xlane.xlu1 %6060 }
 0x49e   : > { %v6255_v59 = vadd.f32 %v6059_v35, %v5775_v44  ;;  %v6256_v52 = vadd.f32 %v6061_v21, %v5776_v3 }
 0x4a0   : > { %6416 = vst.msk [vmem:[#allocation2 + $0x3d8] sm:$0xff] %vm6292_vm4, %v6255_v59  ;;  %6417 = vst.msk [vmem:[#allocation2 + $0x3e0] sm:$0xff] %vm6292_vm4, %v6256_v52  ;;  %v5797_v59 = vld [vmem:[#allocation2 + $0x488] sm:$0xff]  ;;  %v5798_v52 = vld [vmem:[#allocation2 + $0x490] sm:$0xff] }
 0x4a1   : > { %v6063_v16 = vpop.xlane.xlu0 %6062  ;;  %v6065_v46 = vpop.xlane.xlu1 %6064 }
 0x4a2   : > { %v6257_v25 = vadd.f32 %v6063_v16, %v5777_v9  ;;  %v6258_v51 = vadd.f32 %v6065_v46, %v5778_v41 }
 0x4a4   : > { %6418 = vst.msk [vmem:[#allocation2 + $0x3e8] sm:$0xff] %vm6292_vm4, %v6257_v25  ;;  %6419 = vst.msk [vmem:[#allocation2 + $0x3f0] sm:$0xff] %vm6292_vm4, %v6258_v51  ;;  %v5799_v25 = vld [vmem:[#allocation2 + $0x498] sm:$0xff]  ;;  %v5800_v51 = vld [vmem:[#allocation2 + $0x4a0] sm:$0xff] }
 0x4a5   : > { %v6067_v17 = vpop.xlane.xlu0 %6066  ;;  %v6069_v22 = vpop.xlane.xlu1 %6068 }
 0x4a6   : > { %v6259_v42 = vadd.f32 %v6067_v17, %v5779_v0  ;;  %v6260_v10 = vadd.f32 %v6069_v22, %v5780_v37 }
 0x4a8   : > { %6420 = vst.msk [vmem:[#allocation2 + $0x3f8] sm:$0xff] %vm6292_vm4, %v6259_v42  ;;  %6421 = vst.msk [vmem:[#allocation2 + $0x400] sm:$0xff] %vm6292_vm4, %v6260_v10  ;;  %v5801_v42 = vld [vmem:[#allocation2 + $0x4a8] sm:$0xff]  ;;  %v5802_v10 = vld [vmem:[#allocation2 + $0x4b0] sm:$0xff] }
 0x4a9   : > { %v6071_v39 = vpop.xlane.xlu0 %6070  ;;  %v6073_v58 = vpop.xlane.xlu1 %6072 }
 0x4aa   : > { %v6261_v60 = vadd.f32 %v6071_v39, %v5781_v30  ;;  %v6262_v61 = vadd.f32 %v6073_v58, %v5782_v48 }
 0x4ac   : > { %6422 = vst.msk [vmem:[#allocation2 + $0x408] sm:$0xff] %vm6292_vm4, %v6261_v60  ;;  %6423 = vst.msk [vmem:[#allocation2 + $0x410] sm:$0xff] %vm6292_vm4, %v6262_v61  ;;  %v5803_v60 = vld [vmem:[#allocation2 + $0x4b8] sm:$0xff]  ;;  %v5804_v61 = vld [vmem:[#allocation2 + $0x4c0] sm:$0xff] }
 0x4ad   : > { %v6075_v15 = vpop.xlane.xlu0 %6074  ;;  %v6077_v33 = vpop.xlane.xlu1 %6076 }
 0x4ae   : > { %v6263_v19 = vadd.f32 %v6075_v15, %v5783_v6  ;;  %v6264_v43 = vadd.f32 %v6077_v33, %v5784_v7 }
 0x4b0   : > { %6424 = vst.msk [vmem:[#allocation2 + $0x418] sm:$0xff] %vm6292_vm4, %v6263_v19  ;;  %6425 = vst.msk [vmem:[#allocation2 + $0x420] sm:$0xff] %vm6292_vm4, %v6264_v43  ;;  %v5805_v19 = vld [vmem:[#allocation2 + $0x4c8] sm:$0xff]  ;;  %v5806_v43 = vld [vmem:[#allocation2 + $0x4d0] sm:$0xff] }
 0x4b1   : > { %v6079_v26 = vpop.xlane.xlu0 %6078  ;;  %v6081_v56 = vpop.xlane.xlu1 %6080 }
 0x4b2   : > { %v6265_v8 = vadd.f32 %v6079_v26, %v5785_v2  ;;  %v6266_v53 = vadd.f32 %v6081_v56, %v5786_v55 }
 0x4b4   : > { %6426 = vst.msk [vmem:[#allocation2 + $0x428] sm:$0xff] %vm6292_vm4, %v6265_v8  ;;  %6427 = vst.msk [vmem:[#allocation2 + $0x430] sm:$0xff] %vm6292_vm4, %v6266_v53  ;;  %v5807_v8 = vld [vmem:[#allocation2 + $0x4d8] sm:$0xff]  ;;  %v5808_v53 = vld [vmem:[#allocation2 + $0x4e0] sm:$0xff] }
 0x4b5   : > { %v6083_v45 = vpop.xlane.xlu0 %6082  ;;  %v6085_v20 = vpop.xlane.xlu1 %6084 }
 0x4b6   : > { %v6267_v32 = vadd.f32 %v6083_v45, %v5787_v38  ;;  %v6268_v5 = vadd.f32 %v6085_v20, %v5788_v57 }
 0x4b8   : > { %6428 = vst.msk [vmem:[#allocation2 + $0x438] sm:$0xff] %vm6292_vm4, %v6267_v32  ;;  %6429 = vst.msk [vmem:[#allocation2 + $0x440] sm:$0xff] %vm6292_vm4, %v6268_v5  ;;  %v5809_v32 = vld [vmem:[#allocation2 + $0x4e8] sm:$0xff]  ;;  %v5810_v5 = vld [vmem:[#allocation2 + $0x4f0] sm:$0xff] }
 0x4b9   : > { %v6087_v18 = vpop.xlane.xlu0 %6086  ;;  %v6089_v54 = vpop.xlane.xlu1 %6088 }
 0x4ba   : > { %v6269_v23 = vadd.f32 %v6087_v18, %v5789_v63  ;;  %v6270_v40 = vadd.f32 %v6089_v54, %v5790_v62 }
 0x4bc   : > { %6430 = vst.msk [vmem:[#allocation2 + $0x448] sm:$0xff] %vm6292_vm4, %v6269_v23  ;;  %6431 = vst.msk [vmem:[#allocation2 + $0x450] sm:$0xff] %vm6292_vm4, %v6270_v40  ;;  %v5811_v23 = vld [vmem:[#allocation2 + $0x4f8] sm:$0xff]  ;;  %v6473_v40 = vld [vmem:[#allocation2 + $0x80] sm:$0xff] (!%p7261_p10) }
 0x4bd   : > { %v6091_v50 = vpop.xlane.xlu0 %6090  ;;  %v6093_v4 = vpop.xlane.xlu1 %6092 }
 0x4be   : > { %v6271_v36 = vadd.f32 %v6091_v50, %v5791_v49  ;;  %v6272_v27 = vadd.f32 %v6093_v4, %v5792_v12  ;;  %v6474_v49 = vld [vmem:[#allocation2 + $0x88] sm:$0xff] (!%p7261_p10)  ;;  %v6457_v50 = vld [vmem:[#allocation2] sm:$0xff] (!%p7261_p10) }
 0x4bf   : > { %v6458_v12 = vld [vmem:[#allocation2 + $0x8] sm:$0xff] (!%p7261_p10)  ;;  %v6505_v4 = vld [vmem:[#allocation2 + $0x180] sm:$0xff] (!%p7261_p10) }
 0x4c0   : > { %6432 = vst.msk [vmem:[#allocation2 + $0x458] sm:$0xff] %vm6292_vm4, %v6271_v36  ;;  %6433 = vst.msk [vmem:[#allocation2 + $0x460] sm:$0xff] %vm6292_vm4, %v6272_v27  ;;  %v6625_v36 = vpack.c.bf16 (!%p7261_p10), %v6474_v49, %v6473_v40  ;;  %v6506_v27 = vld [vmem:[#allocation2 + $0x188] sm:$0xff] (!%p7261_p10) }
 0x4c1   : > { %v6095_v34 = vpop.xlane.xlu0 %6094  ;;  %v6097_v14 = vpop.xlane.xlu1 %6096 }
 0x4c2   : > { %v6273_v31 = vadd.f32 %v6095_v34, %v5793_v24  ;;  %v6274_v47 = vadd.f32 %v6097_v14, %v5794_v1  ;;  %v8691_v24 = vmov (!%p7261_p10), 0   ;;  %v6617_v34 = vpack.c.bf16 (!%p7261_p10), %v6458_v12, %v6457_v50  ;;  %v6489_v1 = vld [vmem:[#allocation2 + $0x100] sm:$0xff] (!%p7261_p10)  ;;  %v6490_v14 = vld [vmem:[#allocation2 + $0x108] sm:$0xff] (!%p7261_p10)  ;;  %7437 = vmatprep.subr.bf16.mxu0 (!%p7261_p10), %v6625_v36  ;;  %v6467_v50 = vld [vmem:[#allocation2 + $0x50] sm:$0xff] (!%p7261_p10) }
 0x4c3   : > { %8638 = vset.pattern.permute.xlu0 (!%p7261_p10), %v8691_v24  ;;  %v6468_v36 = vld [vmem:[#allocation2 + $0x58] sm:$0xff] (!%p7261_p10)  ;;  %v6499_v12 = vld [vmem:[#allocation2 + $0x150] sm:$0xff] (!%p7261_p10)  ;;  %v6485_v24 = vld [vmem:[#allocation2 + $0xe0] sm:$0xff] (!%p7261_p10) }
 0x4c4   : > { %6434 = vst.msk [vmem:[#allocation2 + $0x468] sm:$0xff] %vm6292_vm4, %v6273_v31  ;;  %6435 = vst.msk [vmem:[#allocation2 + $0x470] sm:$0xff] %vm6292_vm4, %v6274_v47  ;;  %v6641_v31 = vpack.c.bf16 (!%p7261_p10), %v6506_v27, %v6505_v4  ;;  %v6475_v47 = vld [vmem:[#allocation2 + $0x90] sm:$0xff] (!%p7261_p10)  ;;  %7438 = vmatpush3.bf16.msra.mxu0 (!%p7261_p10), %v6617_v34  ;;  %v6500_v27 = vld [vmem:[#allocation2 + $0x158] sm:$0xff] (!%p7261_p10) }
 0x4c5   : > { %v6099_v28 = vpop.xlane.xlu0 %6098  ;;  %v6101_v44 = vpop.xlane.xlu1 %6100  ;;  %v6486_v34 = vld [vmem:[#allocation2 + $0xe8] sm:$0xff] (!%p7261_p10) }
 0x4c6   : > { %v6275_v29 = vadd.f32 %v6099_v28, %v5795_v13  ;;  %v6276_v35 = vadd.f32 %v6101_v44, %v5796_v11  ;;  %v6633_v13 = vpack.c.bf16 (!%p7261_p10), %v6490_v14, %v6489_v1  ;;  %v6476_v28 = vld [vmem:[#allocation2 + $0x98] sm:$0xff] (!%p7261_p10)  ;;  %7459 = vmatprep.subr.bf16.mxu1 (!%p7261_p10), %v6641_v31  ;;  %v6517_v31 = vld [vmem:[#allocation2 + $0x1e0] sm:$0xff] (!%p7261_p10)  ;;  %v6518_v1 = vld [vmem:[#allocation2 + $0x1e8] sm:$0xff] (!%p7261_p10)  ;;  %v6622_v14 = vpack.c.bf16 (!%p7261_p10), %v6468_v36, %v6467_v50 }
 0x4c7   : > { %v6460_v11 = vld [vmem:[#allocation2 + $0x18] sm:$0xff] (!%p7261_p10)  ;;  %v6626_v44 = vpack.c.bf16 (!%p7261_p10), %v6476_v28, %v6475_v47  ;;  %v6469_v47 = vld [vmem:[#allocation2 + $0x60] sm:$0xff] (!%p7261_p10)  ;;  %v6638_v28 = vpack.c.bf16 (!%p7261_p10), %v6500_v27, %v6499_v12 }
 0x4c8   : > { %6436 = vst.msk [vmem:[#allocation2 + $0x478] sm:$0xff] %vm6292_vm4, %v6275_v29  ;;  %6437 = vst.msk [vmem:[#allocation2 + $0x480] sm:$0xff] %vm6292_vm4, %v6276_v35  ;;  %v6459_v29 = vld [vmem:[#allocation2 + $0x10] sm:$0xff] (!%p7261_p10)  ;;  %7460 = vmatpush3.bf16.msra.mxu1 (!%p7261_p10), %v6633_v13  ;;  %v13448_v13 = vld [vmem:[%s13508_s3] sm:$0xff] (!%p7261_p10) }
 0x4c9   : > { %v6103_v3 = vpop.xlane.xlu0 %6102  ;;  %v6105_v9 = vpop.xlane.xlu1 %6104  ;;  %v6618_v35 = vpack.c.bf16 (!%p7261_p10), %v6460_v11, %v6459_v29  ;;  %7439 = vmatprep.subr.bf16.mxu0 (!%p7261_p10), %v6626_v44  ;;  %v6631_v29 = vpack.c.bf16 (!%p7261_p10), %v6486_v34, %v6485_v24  ;;  %v6470_v11 = vld [vmem:[#allocation2 + $0x68] sm:$0xff] (!%p7261_p10)  ;;  %v6501_v44 = vld [vmem:[#allocation2 + $0x160] sm:$0xff] (!%p7261_p10) }
 0x4ca   : > { %v6277_v21 = vadd.f32 %v6103_v3, %v5797_v59  ;;  %v6278_v16 = vadd.f32 %v6105_v9, %v5798_v52  ;;  %v6507_v59 = vld [vmem:[#allocation2 + $0x190] sm:$0xff] (!%p7261_p10)  ;;  %v6508_v3 = vld [vmem:[#allocation2 + $0x198] sm:$0xff] (!%p7261_p10)  ;;  %v6525_v12 = vld [vmem:[#allocation2 + $0x220] sm:$0xff] (!%p7261_p10) }
 0x4cb   : > { %v6642_v52 = vpack.c.bf16 (!%p7261_p10), %v6508_v3, %v6507_v59  ;;  %v6492_v9 = vld [vmem:[#allocation2 + $0x118] sm:$0xff] (!%p7261_p10)  ;;  %7440 = vmatpush3.bf16.msra.mxu0 (!%p7261_p10), %v6618_v35  ;;  %v6502_v35 = vld [vmem:[#allocation2 + $0x168] sm:$0xff] (!%p7261_p10)  ;;  %v7263_v59 = vcombine.high (!%p7261_p10), %v13448_v13, %v13448_v13  ;;  %v6647_v3 = vpack.c.bf16 (!%p7261_p10), %v6518_v1, %v6517_v31  ;;  %v6557_v27 = vld [vmem:[#allocation2 + $0x320] sm:$0xff] (!%p7261_p10) }
 0x4cc   : > { %6438 = vst.msk [vmem:[#allocation2 + $0x488] sm:$0xff] %vm6292_vm4, %v6277_v21  ;;  %6439 = vst.msk [vmem:[#allocation2 + $0x490] sm:$0xff] %vm6292_vm4, %v6278_v16  ;;  %v6491_v21 = vld [vmem:[#allocation2 + $0x110] sm:$0xff] (!%p7261_p10)  ;;  %v6477_v16 = vld [vmem:[#allocation2 + $0xa0] sm:$0xff] (!%p7261_p10) }
 0x4cd   : > { %v6107_v41 = vpop.xlane.xlu0 %6106  ;;  %v6109_v0 = vpop.xlane.xlu1 %6108  ;;  %7461 = vmatprep.subr.bf16.mxu1 (!%p7261_p10), %v6642_v52  ;;  %v6488_v52 = vld [vmem:[#allocation2 + $0xf8] sm:$0xff] (!%p7261_p10)  ;;  %6775 = vmatprep.mubr.bf16.mxu0 (!%p7261_p10), %v7263_v59  ;;  %v6558_v34 = vld [vmem:[#allocation2 + $0x328] sm:$0xff] (!%p7261_p10)  ;;  %v6543_v31 = vld [vmem:[#allocation2 + $0x2b0] sm:$0xff] (!%p7261_p10) }
 0x4ce   : > { %v6279_v46 = vadd.f32 %v6107_v41, %v5799_v25  ;;  %v6280_v17 = vadd.f32 %v6109_v0, %v5800_v51  ;;  %v6478_v25 = vld [vmem:[#allocation2 + $0xa8] sm:$0xff] (!%p7261_p10)  ;;  %v6634_v41 = vpack.c.bf16 (!%p7261_p10), %v6492_v9, %v6491_v21  ;;  %v6461_v51 = vld [vmem:[#allocation2 + $0x20] sm:$0xff] (!%p7261_p10)  ;;  %v6487_v21 = vld [vmem:[#allocation2 + $0xf0] sm:$0xff] (!%p7261_p10) }
 0x4cf   : > { %v6462_v0 = vld [vmem:[#allocation2 + $0x28] sm:$0xff] (!%p7261_p10)  ;;  %v6544_v1 = vld [vmem:[#allocation2 + $0x2b8] sm:$0xff] (!%p7261_p10) }
 0x4d0   : > { %6440 = vst.msk [vmem:[#allocation2 + $0x498] sm:$0xff] %vm6292_vm4, %v6279_v46  ;;  %6441 = vst.msk [vmem:[#allocation2 + $0x4a0] sm:$0xff] %vm6292_vm4, %v6280_v17  ;;  %v6627_v46 = vpack.c.bf16 (!%p7261_p10), %v6478_v25, %v6477_v16  ;;  %v6509_v17 = vld [vmem:[#allocation2 + $0x1a0] sm:$0xff] (!%p7261_p10)  ;;  %7462 = vmatpush3.bf16.msra.mxu1 (!%p7261_p10), %v6634_v41  ;;  %v6698_v9 = vld [vmem:[%s13508_s3 + $0x8] sm:$0xff] (!%p7261_p10) }
 0x4d1   : > { %v6111_v37 = vpop.xlane.xlu0 %6110  ;;  %v6113_v30 = vpop.xlane.xlu1 %6112  ;;  %v6519_v16 = vld [vmem:[#allocation2 + $0x1f0] sm:$0xff] (!%p7261_p10)  ;;  %v6520_v25 = vld [vmem:[#allocation2 + $0x1f8] sm:$0xff] (!%p7261_p10)  ;;  %v7265_v41 = vcombine.high (!%p7261_p10), %v6698_v9, %v6698_v9 }
 0x4d2   : > { %v6281_v22 = vadd.f32 %v6111_v37, %v5801_v42  ;;  %v6282_v39 = vadd.f32 %v6113_v30, %v5802_v10  ;;  %v6510_v42 = vld [vmem:[#allocation2 + $0x1a8] sm:$0xff] (!%p7261_p10)  ;;  %v6493_v37 = vld [vmem:[#allocation2 + $0x120] sm:$0xff] (!%p7261_p10)  ;;  %v6619_v10 = vpack.c.bf16 (!%p7261_p10), %v6462_v0, %v6461_v51  ;;  %7441 = vmatprep.subr.bf16.mxu0 (!%p7261_p10), %v6627_v46  ;;  %v6623_v46 = vpack.c.bf16 (!%p7261_p10), %v6470_v11, %v6469_v47  ;;  %v6576_v47 = vld [vmem:[#allocation2 + $0x3b8] sm:$0xff] (!%p7261_p10) }
 0x4d3   : > { %v6643_v30 = vpack.c.bf16 (!%p7261_p10), %v6510_v42, %v6509_v17  ;;  %v6639_v51 = vpack.c.bf16 (!%p7261_p10), %v6502_v35, %v6501_v44  ;;  %v6632_v0 = vpack.c.bf16 (!%p7261_p10), %v6488_v52, %v6487_v21  ;;  %v6471_v17 = vld [vmem:[#allocation2 + $0x70] sm:$0xff] (!%p7261_p10)  ;;  %v6472_v42 = vld [vmem:[#allocation2 + $0x78] sm:$0xff] (!%p7261_p10)  ;;  %6815 = vmatprep.mubr.bf16.mxu1 (!%p7261_p10), %v7265_v41  ;;  %v6660_v11 = vpack.c.bf16 (!%p7261_p10), %v6544_v1, %v6543_v31  ;;  %v6545_v21 = vld [vmem:[#allocation2 + $0x2c0] sm:$0xff] (!%p7261_p10) }
 0x4d4   : > { %6442 = vst.msk [vmem:[#allocation2 + $0x4a8] sm:$0xff] %vm6292_vm4, %v6281_v22  ;;  %6443 = vst.msk [vmem:[#allocation2 + $0x4b0] sm:$0xff] %vm6292_vm4, %v6282_v39  ;;  %v6494_v22 = vld [vmem:[#allocation2 + $0x128] sm:$0xff] (!%p7261_p10)  ;;  %v6479_v39 = vld [vmem:[#allocation2 + $0xb0] sm:$0xff] (!%p7261_p10)  ;;  %7442 = vmatpush3.bf16.msra.mxu0 (!%p7261_p10), %v6619_v10 }
 0x4d5   : > { %v6115_v48 = vpop.xlane.xlu0 %6114  ;;  %v6117_v6 = vpop.xlane.xlu1 %6116  ;;  %7463 = vmatprep.subr.bf16.mxu1 (!%p7261_p10), %v6643_v30  ;;  %v6504_v10 = vld [vmem:[#allocation2 + $0x178] sm:$0xff] (!%p7261_p10)  ;;  %v6537_v30 = vld [vmem:[#allocation2 + $0x280] sm:$0xff] (!%p7261_p10)  ;;  %v6559_v35 = vld [vmem:[#allocation2 + $0x330] sm:$0xff] (!%p7261_p10) }
 0x4d6   : > { %v6283_v58 = vadd.f32 %v6115_v48, %v5803_v60  ;;  %v6284_v15 = vadd.f32 %v6117_v6, %v5804_v61  ;;  %v6480_v60 = vld [vmem:[#allocation2 + $0xb8] sm:$0xff] (!%p7261_p10)  ;;  %v6463_v48 = vld [vmem:[#allocation2 + $0x30] sm:$0xff] (!%p7261_p10)  ;;  %v6546_v52 = vld [vmem:[#allocation2 + $0x2c8] sm:$0xff] (!%p7261_p10) }
 0x4d7   : > { %v6628_v61 = vpack.c.bf16 (!%p7261_p10), %v6480_v60, %v6479_v39  ;;  %v6464_v6 = vld [vmem:[#allocation2 + $0x38] sm:$0xff] (!%p7261_p10)  ;;  %v6538_v39 = vld [vmem:[#allocation2 + $0x288] sm:$0xff] (!%p7261_p10)  ;;  %v6569_v60 = vld [vmem:[#allocation2 + $0x380] sm:$0xff] (!%p7261_p10) }
 0x4d8   : > { %6444 = vst.msk [vmem:[#allocation2 + $0x4b8] sm:$0xff] %vm6292_vm4, %v6283_v58  ;;  %6445 = vst.msk [vmem:[#allocation2 + $0x4c0] sm:$0xff] %vm6292_vm4, %v6284_v15  ;;  %v6635_v58 = vpack.c.bf16 (!%p7261_p10), %v6494_v22, %v6493_v37  ;;  %v6511_v15 = vld [vmem:[#allocation2 + $0x1b0] sm:$0xff] (!%p7261_p10)  ;;  %v6648_v22 = vpack.c.bf16 (!%p7261_p10), %v6520_v25, %v6519_v16  ;;  %v6528_v44 = vld [vmem:[#allocation2 + $0x238] sm:$0xff] (!%p7261_p10) }
 0x4d9   : > { %v6119_v7 = vpop.xlane.xlu0 %6118  ;;  %v6121_v2 = vpop.xlane.xlu1 %6120  ;;  %7443 = vmatprep.subr.bf16.mxu0 (!%p7261_p10), %v6628_v61  ;;  %v6503_v37 = vld [vmem:[#allocation2 + $0x170] sm:$0xff] (!%p7261_p10)  ;;  %v6560_v59 = vld [vmem:[#allocation2 + $0x338] sm:$0xff] (!%p7261_p10)  ;;  %v6577_v16 = vld [vmem:[#allocation2 + $0x3c0] sm:$0xff] (!%p7261_p10) }
 0x4da   : > { %v6285_v33 = vadd.f32 %v6119_v7, %v5805_v19  ;;  %v6286_v26 = vadd.f32 %v6121_v2, %v5806_v43  ;;  %v6512_v19 = vld [vmem:[#allocation2 + $0x1b8] sm:$0xff] (!%p7261_p10)  ;;  %v6481_v2 = vld [vmem:[#allocation2 + $0xc0] sm:$0xff] (!%p7261_p10)  ;;  %7464 = vmatpush3.bf16.msra.mxu1 (!%p7261_p10), %v6635_v58  ;;  %v6624_v58 = vpack.c.bf16 (!%p7261_p10), %v6472_v42, %v6471_v17  ;;  %v6640_v61 = vpack.c.bf16 (!%p7261_p10), %v6504_v10, %v6503_v37  ;;  %v6578_v25 = vld [vmem:[#allocation2 + $0x3c8] sm:$0xff] (!%p7261_p10) }
 0x4db   : > { %v6644_v7 = vpack.c.bf16 (!%p7261_p10), %v6512_v19, %v6511_v15  ;;  %v6496_v43 = vld [vmem:[#allocation2 + $0x138] sm:$0xff] (!%p7261_p10)  ;;  %v6521_v15 = vld [vmem:[#allocation2 + $0x200] sm:$0xff] (!%p7261_p10)  ;;  %v6522_v19 = vld [vmem:[#allocation2 + $0x208] sm:$0xff] (!%p7261_p10)  ;;  %v6661_v17 = vpack.c.bf16 (!%p7261_p10), %v6546_v52, %v6545_v21 }
 0x4dc   : > { %6446 = vst.msk [vmem:[#allocation2 + $0x4c8] sm:$0xff] %vm6292_vm4, %v6285_v33  ;;  %6447 = vst.msk [vmem:[#allocation2 + $0x4d0] sm:$0xff] %vm6292_vm4, %v6286_v26  ;;  %v6495_v33 = vld [vmem:[#allocation2 + $0x130] sm:$0xff] (!%p7261_p10)  ;;  %v6482_v26 = vld [vmem:[#allocation2 + $0xc8] sm:$0xff] (!%p7261_p10) }
 0x4dd   : > { %v6123_v55 = vpop.xlane.xlu0 %6122  ;;  %v6125_v38 = vpop.xlane.xlu1 %6124  ;;  %7465 = vmatprep.subr.bf16.mxu1 (!%p7261_p10), %v6644_v7  ;;  %v6553_v7 = vld [vmem:[#allocation2 + $0x300] sm:$0xff] (!%p7261_p10)  ;;  %v6530_v37 = vld [vmem:[#allocation2 + $0x248] sm:$0xff] (!%p7261_p10)  ;;  %v6568_v31 = vld [vmem:[#allocation2 + $0x378] sm:$0xff] (!%p7261_p10) }
 0x4de   : > { %v6287_v56 = vadd.f32 %v6123_v55, %v5807_v8  ;;  %v6288_v45 = vadd.f32 %v6125_v38, %v5808_v53  ;;  %v6620_v8 = vpack.c.bf16 (!%p7261_p10), %v6464_v6, %v6463_v48  ;;  %v6513_v55 = vld [vmem:[#allocation2 + $0x1c0] sm:$0xff] (!%p7261_p10)  ;;  %v6636_v53 = vpack.c.bf16 (!%p7261_p10), %v6496_v43, %v6495_v33  ;;  %v6570_v48 = vld [vmem:[#allocation2 + $0x388] sm:$0xff] (!%p7261_p10) }
 0x4df   : > { %v6629_v38 = vpack.c.bf16 (!%p7261_p10), %v6482_v26, %v6481_v2  ;;  %v6657_v6 = vpack.c.bf16 (!%p7261_p10), %v6538_v39, %v6537_v30  ;;  %v6673_v33 = vpack.c.bf16 (!%p7261_p10), %v6570_v48, %v6569_v60  ;;  %v6554_v43 = vld [vmem:[#allocation2 + $0x308] sm:$0xff] (!%p7261_p10)  ;;  %v6539_v2 = vld [vmem:[#allocation2 + $0x290] sm:$0xff] (!%p7261_p10)  ;;  %v6540_v26 = vld [vmem:[#allocation2 + $0x298] sm:$0xff] (!%p7261_p10)  ;;  %v6677_v30 = vpack.c.bf16 (!%p7261_p10), %v6578_v25, %v6577_v16 }
 0x4e0   : > { %6448 = vst.msk [vmem:[#allocation2 + $0x4d8] sm:$0xff] %vm6292_vm4, %v6287_v56  ;;  %6449 = vst.msk [vmem:[#allocation2 + $0x4e0] sm:$0xff] %vm6292_vm4, %v6288_v45  ;;  %v6514_v56 = vld [vmem:[#allocation2 + $0x1c8] sm:$0xff] (!%p7261_p10)  ;;  %v6465_v45 = vld [vmem:[#allocation2 + $0x40] sm:$0xff] (!%p7261_p10)  ;;  %7444 = vmatpush3.bf16.msra.mxu0 (!%p7261_p10), %v6620_v8  ;;  %7466 = vmatpush3.bf16.msra.mxu1 (!%p7261_p10), %v6636_v53  ;;  %v7262_v8 = vcombine.low (!%p7261_p10), %v13448_v13, %v13448_v13  ;;  %v7264_v53 = vcombine.low (!%p7261_p10), %v6698_v9, %v6698_v9 }
 0x4e1   : > { %v6127_v57 = vpop.xlane.xlu0 %6126  ;;  %v6129_v63 = vpop.xlane.xlu1 %6128  ;;  %7445 = vmatprep.subr.bf16.mxu0 (!%p7261_p10), %v6629_v38  ;;  %v6649_v38 = vpack.c.bf16 (!%p7261_p10), %v6522_v19, %v6521_v15  ;;  %v13460_v9 = vld [vmem:[%s13508_s3 + $0x10] sm:$0xff] (!%p7261_p10)  ;;  %v6529_v42 = vld [vmem:[#allocation2 + $0x240] sm:$0xff] (!%p7261_p10)  ;;  %v6562_v39 = vld [vmem:[#allocation2 + $0x348] sm:$0xff] (!%p7261_p10) }
 0x4e2   : > { %v6289_v20 = vadd.f32 %v6127_v57, %v5809_v32  ;;  %v6290_v18 = vadd.f32 %v6129_v63, %v5810_v5  ;;  %6456 = sbr.rel (%p7261_p10) target bundleno = 1555 (0x613), region = 89  ;;  %v6466_v32 = vld [vmem:[#allocation2 + $0x48] sm:$0xff] (!%p7261_p10)  ;;  %v6497_v57 = vld [vmem:[#allocation2 + $0x140] sm:$0xff] (!%p7261_p10)  ;;  %v6483_v63 = vld [vmem:[#allocation2 + $0xd0] sm:$0xff] (!%p7261_p10)  ;;  %v7267_v41 = vcombine.high (!%p7261_p10), %v13460_v9, %v13460_v9 }
 0x4e3   : > { %v6498_v5 = vld [vmem:[#allocation2 + $0x148] sm:$0xff] (!%p7261_p10)  ;;  %v6547_v60 = vld [vmem:[#allocation2 + $0x2d0] sm:$0xff] (!%p7261_p10)  ;;  %v6548_v48 = vld [vmem:[#allocation2 + $0x2d8] sm:$0xff] (!%p7261_p10) }
 0x4e4   : > { %6450 = vst.msk [vmem:[#allocation2 + $0x4e8] sm:$0xff] %vm6292_vm4, %v6289_v20  ;;  %6451 = vst.msk [vmem:[#allocation2 + $0x4f0] sm:$0xff] %vm6292_vm4, %v6290_v18  ;;  %v6645_v20 = vpack.c.bf16 (!%p7261_p10), %v6514_v56, %v6513_v55  ;;  %v6484_v18 = vld [vmem:[#allocation2 + $0xd8] sm:$0xff] (!%p7261_p10)  ;;  %v6637_v40 = vpack.c.bf16 (!%p7261_p10), %v6498_v5, %v6497_v57  ;;  %v6571_v55 = vld [vmem:[#allocation2 + $0x390] sm:$0xff] (!%p7261_p10)  ;;  %v6662_v19 = vpack.c.bf16 (!%p7261_p10), %v6548_v48, %v6547_v60 }
 0x4e5   : > { %v6131_v62 = vpop.xlane.xlu0 %6130  ;;  %v6630_v49 = vpack.c.bf16 (!%p7261_p10), %v6484_v18, %v6483_v63  ;;  %v6572_v56 = vld [vmem:[#allocation2 + $0x398] sm:$0xff] (!%p7261_p10)  ;;  %v6523_v57 = vld [vmem:[#allocation2 + $0x210] sm:$0xff] (!%p7261_p10)  ;;  %v6601_v1 = vld [vmem:[#allocation2 + $0x480] sm:$0xff] (!%p7261_p10) }
 0x4e6   : > { %v6291_v54 = vadd.f32 %v6131_v62, %v5811_v23  ;;  %v6515_v23 = vld [vmem:[#allocation2 + $0x1d0] sm:$0xff] (!%p7261_p10)  ;;  %v6516_v62 = vld [vmem:[#allocation2 + $0x1d8] sm:$0xff] (!%p7261_p10)  ;;  %7467 = vmatprep.subr.bf16.mxu1 (!%p7261_p10), %v6645_v20  ;;  %v6674_v63 = vpack.c.bf16 (!%p7261_p10), %v6572_v56, %v6571_v55  ;;  %v6550_v55 = vld [vmem:[#allocation2 + $0x2e8] sm:$0xff] (!%p7261_p10) }
 0x4e7   : > { %v6646_v4 = vpack.c.bf16 (!%p7261_p10), %v6516_v62, %v6515_v23  ;;  %7468 = vmatpush3.bf16.msra.mxu1 (!%p7261_p10), %v6637_v40  ;;  %v6524_v20 = vld [vmem:[#allocation2 + $0x218] sm:$0xff] (!%p7261_p10)  ;;  %v6555_v5 = vld [vmem:[#allocation2 + $0x310] sm:$0xff] (!%p7261_p10)  ;;  %v6541_v23 = vld [vmem:[#allocation2 + $0x2a0] sm:$0xff] (!%p7261_p10) }
 0x4e8   : > { %6452 = vst.msk [vmem:[#allocation2 + $0x4f8] sm:$0xff] %vm6292_vm4, %v6291_v54  ;;  %v6621_v54 = vpack.c.bf16 (!%p7261_p10), %v6466_v32, %v6465_v45  ;;  %v6665_v45 = vpack.c.bf16 (!%p7261_p10), %v6554_v43, %v6553_v7  ;;  %v6658_v32 = vpack.c.bf16 (!%p7261_p10), %v6540_v26, %v6539_v2  ;;  %v6556_v18 = vld [vmem:[#allocation2 + $0x318] sm:$0xff] (!%p7261_p10)  ;;  %v6542_v62 = vld [vmem:[#allocation2 + $0x2a8] sm:$0xff] (!%p7261_p10)  ;;  %v6531_v7 = vld [vmem:[#allocation2 + $0x250] sm:$0xff] (!%p7261_p10) }
 0x4e9   : > { %7469 = vmatprep.subr.bf16.mxu1 %v6646_v4  ;;  %v6574_v40 = vld [vmem:[#allocation2 + $0x3a8] sm:$0xff]  ;;  %v6666_v50 = vpack.c.bf16 %v6556_v18, %v6555_v5  ;;  %v6659_v36 = vpack.c.bf16 %v6542_v62, %v6541_v23  ;;  %v6563_v43 = vld [vmem:[#allocation2 + $0x350] sm:$0xff]  ;;  %v6564_v26 = vld [vmem:[#allocation2 + $0x358] sm:$0xff] }
 0x4ea   : > { %7446 = vmatpush3.bf16.msra.mxu0 %v6621_v54  ;;  %v6573_v54 = vld [vmem:[#allocation2 + $0x3a0] sm:$0xff]  ;;  %v6526_v4 = vld [vmem:[#allocation2 + $0x228] sm:$0xff]  ;;  %v6551_v23 = vld [vmem:[#allocation2 + $0x2f0] sm:$0xff] }
 0x4eb   : > { %7447 = vmatprep.subr.bf16.mxu0 %v6630_v49  ;;  %7470 = vmatpush3.bf16.msra.mxu1 %v6638_v28  ;;  %v6650_v49 = vpack.c.bf16 %v6524_v20, %v6523_v57  ;;  %v6675_v24 = vpack.c.bf16 %v6574_v40, %v6573_v54  ;;  %v6651_v13 = vpack.c.bf16 %v6526_v4, %v6525_v12  ;;  %v6527_v28 = vld [vmem:[#allocation2 + $0x230] sm:$0xff]  ;;  %v6581_v56 = vld [vmem:[#allocation2 + $0x3e0] sm:$0xff]  ;;  %v6534_v20 = vld [vmem:[#allocation2 + $0x268] sm:$0xff] }
 0x4ec   : > { %7471 = vmatprep.subr.bf16.mxu1 %v6647_v3  ;;  %v6533_v57 = vld [vmem:[#allocation2 + $0x260] sm:$0xff]  ;;  %v6566_v18 = vld [vmem:[#allocation2 + $0x368] sm:$0xff]  ;;  %v6552_v62 = vld [vmem:[#allocation2 + $0x2f8] sm:$0xff] }
 0x4ed   : > { %v6565_v5 = vld [vmem:[#allocation2 + $0x360] sm:$0xff]  ;;  %v6583_v54 = vld [vmem:[#allocation2 + $0x3f0] sm:$0xff]  ;;  %v6584_v40 = vld [vmem:[#allocation2 + $0x3f8] sm:$0xff]  ;;  %v6664_v12 = vpack.c.bf16 %v6552_v62, %v6551_v23 }
 0x4ee   : > { %7448 = vmatpush3.bf16.msra.mxu0 %v6622_v14  ;;  %v6575_v14 = vld [vmem:[#allocation2 + $0x3b0] sm:$0xff]  ;;  %v6592_v48 = vld [vmem:[#allocation2 + $0x438] sm:$0xff] }
 0x4ef   : > { %7449 = vmatprep.subr.bf16.mxu0 %v6631_v29  ;;  %7472 = vmatpush3.bf16.msra.mxu1 %v6639_v51  ;;  %v6667_v29 = vpack.c.bf16 %v6558_v34, %v6557_v27  ;;  %v6676_v3 = vpack.c.bf16 %v6576_v47, %v6575_v14  ;;  %v13467_v51 = vld [vmem:[%s13508_s3 + $0x18] sm:$0xff]  ;;  %v6535_v4 = vld [vmem:[#allocation2 + $0x270] sm:$0xff]  ;;  %v6680_v34 = vpack.c.bf16 %v6584_v40, %v6583_v54  ;;  %v6602_v14 = vld [vmem:[#allocation2 + $0x488] sm:$0xff] }
 0x4f0   : > { %7473 = vmatprep.subr.bf16.mxu1 %v6648_v22  ;;  %v6561_v22 = vld [vmem:[#allocation2 + $0x340] sm:$0xff]  ;;  %v7269_v10 = vcombine.high %v13467_v51, %v13467_v51  ;;  %v6536_v27 = vld [vmem:[#allocation2 + $0x278] sm:$0xff]  ;;  %v7268_v21 = vcombine.low %v13467_v51, %v13467_v51  ;;  %v6587_v25 = vld [vmem:[#allocation2 + $0x410] sm:$0xff] }
 0x4f1   : > { %v6669_v15 = vpack.c.bf16 %v6562_v39, %v6561_v22  ;;  %v6656_v47 = vpack.c.bf16 %v6536_v27, %v6535_v4  ;;  %v6590_v22 = vld [vmem:[#allocation2 + $0x428] sm:$0xff]  ;;  %v6607_v51 = vld [vmem:[#allocation2 + $0x4b0] sm:$0xff]  ;;  %v6600_v62 = vld [vmem:[#allocation2 + $0x478] sm:$0xff] }
 0x4f2   : > { %7450 = vmatpush3.bf16.msra.mxu0 %v6623_v46  ;;  %v6652_v46 = vpack.c.bf16 %v6528_v44, %v6527_v28  ;;  %v6689_v28 = vpack.c.bf16 %v6602_v14, %v6601_v1  ;;  %v6603_v44 = vld [vmem:[#allocation2 + $0x490] sm:$0xff] }
 0x4f3   : > { %7451 = vmatprep.subr.bf16.mxu0 %v6632_v0  ;;  %7474 = vmatpush3.bf16.msra.mxu1 %v6640_v61  ;;  %v6668_v0 = vpack.c.bf16 %v6560_v59, %v6559_v35  ;;  %v6580_v61 = vld [vmem:[#allocation2 + $0x3d8] sm:$0xff]  ;;  %v13477_v59 = vld [vmem:[%s13508_s3 + $0x20] sm:$0xff]  ;;  %v6591_v60 = vld [vmem:[#allocation2 + $0x430] sm:$0xff] }
 0x4f4   : > { %7503 = vmatprep.subr.bf16.mxu1 %v6673_v33  ;;  %v6532_v33 = vld [vmem:[#allocation2 + $0x258] sm:$0xff]  ;;  %v6599_v23 = vld [vmem:[#allocation2 + $0x470] sm:$0xff]  ;;  %v7270_v40 = vcombine.low %v13477_v59, %v13477_v59 }
 0x4f5   : > { %v6604_v35 = vld [vmem:[#allocation2 + $0x498] sm:$0xff]  ;;  %v6688_v54 = vpack.c.bf16 %v6600_v62, %v6599_v23 }
 0x4f6   : > { %7452 = vmatpush3.bf16.msra.mxu0 %v6624_v58  ;;  %6816 = vmatmul.mubr.bf16.vlgmr.msra.gmra.mrb[0].mxu1 %v7264_v53  ;;  %v6579_v58 = vld [vmem:[#allocation2 + $0x3d0] sm:$0xff]  ;;  %v6582_v53 = vld [vmem:[#allocation2 + $0x3e8] sm:$0xff]  ;;  %v6690_v16 = vpack.c.bf16 %v6604_v35, %v6603_v44 }
 0x4f7   : > { %7481 = vmatprep.subr.bf16.mxu0 %v6657_v6  ;;  %7504 = vmatpush3.bf16.msra.mxu1 %v6665_v45  ;;  %v6653_v6 = vpack.c.bf16 %v6530_v37, %v6529_v42  ;;  %v6678_v2 = vpack.c.bf16 %v6580_v61, %v6579_v58  ;;  %v6670_v45 = vpack.c.bf16 %v6564_v26, %v6563_v43  ;;  %v6589_v37 = vld [vmem:[#allocation2 + $0x420] sm:$0xff]  ;;  %v6610_v61 = vld [vmem:[#allocation2 + $0x4c8] sm:$0xff]  ;;  %v6612_v43 = vld [vmem:[#allocation2 + $0x4d8] sm:$0xff] }
 0x4f8   : > { %7505 = vmatprep.subr.bf16.mxu1 %v6674_v63  ;;  %6895 = vmatprep.mubr.bf16.mxu1 %v7269_v10  ;;  %v6679_v63 = vpack.c.bf16 %v6582_v53, %v6581_v56  ;;  %v6608_v10 = vld [vmem:[#allocation2 + $0x4b8] sm:$0xff]  ;;  %v6609_v58 = vld [vmem:[#allocation2 + $0x4c0] sm:$0xff]  ;;  %v6614_v53 = vld [vmem:[#allocation2 + $0x4e8] sm:$0xff] }
 0x4f9   : > { %6776 = vmatmul.mubr.bf16.vlgmr.msra.gmra.mrb[0].mxu0 %v7262_v8  ;;  %v6549_v8 = vld [vmem:[#allocation2 + $0x2e0] sm:$0xff]  ;;  %v6692_v39 = vpack.c.bf16 %v6608_v10, %v6607_v51 }
 0x4fa   : > { %7482 = vmatpush3.bf16.msra.mxu0 %v6649_v38  ;;  %6855 = vmatprep.mubr.bf16.mxu0 %v7267_v41  ;;  %v6654_v38 = vpack.c.bf16 %v6532_v33, %v6531_v7  ;;  %v6588_v41 = vld [vmem:[#allocation2 + $0x418] sm:$0xff]  ;;  %v6594_v7 = vld [vmem:[#allocation2 + $0x448] sm:$0xff]  ;;  %v6611_v33 = vld [vmem:[#allocation2 + $0x4d0] sm:$0xff] }
 0x4fb   : > { %7483 = vmatprep.subr.bf16.mxu0 %v6658_v32  ;;  %7506 = vmatpush3.bf16.msra.mxu1 %v6666_v50  ;;  %v6663_v32 = vpack.c.bf16 %v6550_v55, %v6549_v8  ;;  %v6655_v50 = vpack.c.bf16 %v6534_v20, %v6533_v57  ;;  %v6682_v42 = vpack.c.bf16 %v6588_v41, %v6587_v25  ;;  %v6595_v8 = vld [vmem:[#allocation2 + $0x450] sm:$0xff]  ;;  %v6596_v55 = vld [vmem:[#allocation2 + $0x458] sm:$0xff]  ;;  %v6613_v56 = vld [vmem:[#allocation2 + $0x4e0] sm:$0xff] }
 0x4fc   : > { %7507 = vmatprep.subr.bf16.mxu1 %v6675_v24  ;;  %v6567_v24 = vld [vmem:[#allocation2 + $0x370] sm:$0xff]  ;;  %v6694_v26 = vpack.c.bf16 %v6612_v43, %v6611_v33  ;;  %v6598_v57 = vld [vmem:[#allocation2 + $0x468] sm:$0xff] }
 0x4fd   : > { %v6615_v20 = vld [vmem:[#allocation2 + $0x4f0] sm:$0xff] }
 0x4fe   : > { %7484 = vmatpush3.bf16.msra.mxu0 %v6650_v49  ;;  %v6702_v49 = vld [vmem:[%s13509_s4] sm:$0xff] }
 0x4ff   : > { %7485 = vmatprep.subr.bf16.mxu0 %v6659_v36  ;;  %7508 = vmatpush3.bf16.msra.mxu1 %v6667_v29  ;;  %v6671_v36 = vpack.c.bf16 %v6566_v18, %v6565_v5  ;;  %v6585_v29 = vld [vmem:[#allocation2 + $0x400] sm:$0xff]  ;;  %v6616_v5 = vld [vmem:[#allocation2 + $0x4f8] sm:$0xff] }
 0x500   : > { %7509 = vmatprep.subr.bf16.mxu1 %v6676_v3  ;;  %6705 = vperm.xlu0 %8638, %v6702_v49   ;;  %v7266_v3 = vcombine.low %v13460_v9, %v13460_v9  ;;  %v6696_v18 = vpack.c.bf16 %v6616_v5, %v6615_v20 }
 0x502   : > { %7486 = vmatpush3.bf16.msra.mxu0 %v6651_v13  ;;  %v6672_v13 = vpack.c.bf16 %v6568_v31, %v6567_v24 }
 0x503   : > { %7487 = vmatprep.subr.bf16.mxu0 %v6660_v11  ;;  %7510 = vmatpush3.bf16.msra.mxu1 %v6668_v0  ;;  %v6586_v11 = vld [vmem:[#allocation2 + $0x408] sm:$0xff]  ;;  %v6605_v0 = vld [vmem:[#allocation2 + $0x4a0] sm:$0xff] }
 0x504   : > { %7511 = vmatprep.subr.bf16.mxu1 %v6677_v30  ;;  %v6681_v52 = vpack.c.bf16 %v6586_v11, %v6585_v29  ;;  %v6683_v30 = vpack.c.bf16 %v6590_v22, %v6589_v37 }
 0x506   : > { %7488 = vmatpush3.bf16.msra.mxu0 %v6652_v46  ;;  %v7271_v46 = vcombine.high %v13477_v59, %v13477_v59 }
 0x507   : > { %7489 = vmatprep.subr.bf16.mxu0 %v6661_v17  ;;  %7512 = vmatpush3.bf16.msra.mxu1 %v6669_v15  ;;  %v6606_v17 = vld [vmem:[#allocation2 + $0x4a8] sm:$0xff]  ;;  %v6693_v15 = vpack.c.bf16 %v6610_v61, %v6609_v58 }
 0x508   : > { %7513 = vmatprep.subr.bf16.mxu1 %v6678_v2  ;;  %v6691_v9 = vpack.c.bf16 %v6606_v17, %v6605_v0 }
 0x50a   : > { %7490 = vmatpush3.bf16.msra.mxu0 %v6653_v6  ;;  %v6684_v6 = vpack.c.bf16 %v6592_v48, %v6591_v60 }
 0x50b   : > { %7491 = vmatprep.subr.bf16.mxu0 %v6662_v19  ;;  %7514 = vmatpush3.bf16.msra.mxu1 %v6670_v45  ;;  %v6593_v19 = vld [vmem:[#allocation2 + $0x440] sm:$0xff]  ;;  %v6695_v45 = vpack.c.bf16 %v6614_v53, %v6613_v56 }
 0x50c   : > { %7515 = vmatprep.subr.bf16.mxu1 %v6679_v63  ;;  %v6685_v2 = vpack.c.bf16 %v6594_v7, %v6593_v19 }
 0x50e   : > { %7492 = vmatpush3.bf16.msra.mxu0 %v6654_v38  ;;  %v6686_v38 = vpack.c.bf16 %v6596_v55, %v6595_v8 }
 0x50f   : > { %7493 = vmatprep.subr.bf16.mxu0 %v6663_v32  ;;  %7516 = vmatpush3.bf16.msra.mxu1 %v6671_v36  ;;  %v6597_v32 = vld [vmem:[#allocation2 + $0x460] sm:$0xff] }
 0x510   : > { %7517 = vmatprep.subr.bf16.mxu1 %v6680_v34  ;;  %v6687_v63 = vpack.c.bf16 %v6598_v57, %v6597_v32 }
 0x512   : > { %7494 = vmatpush3.bf16.msra.mxu0 %v6655_v50 }
 0x513   : > { %7495 = vmatprep.subr.bf16.mxu0 %v6664_v12  ;;  %7518 = vmatpush3.bf16.msra.mxu1 %v6672_v13 }
 0x516   : > { %7496 = vmatpush3.bf16.msra.mxu0 %v6656_v47  ;;  %6896 = vmatmul.mubr.bf16.vlgmr.msra.gmra.mrb[4].mxu1 %v7268_v21 }
 0x517   : > { %7525 = vmatprep.subr.bf16.mxu0 %v6689_v28 }
 0x519   : > { %6856 = vmatmul.mubr.bf16.vlgmr.msra.gmra.mrb[4].mxu0 %v7266_v3 }
 0x51a   : > { %7526 = vmatpush3.bf16.msra.mxu0 %v6681_v52  ;;  %6935 = vmatprep.mubr.bf16.mxu0 %v7271_v46 }
 0x51b   : > { %7527 = vmatprep.subr.bf16.mxu0 %v6690_v16 }
 0x51e   : > { %7528 = vmatpush3.bf16.msra.mxu0 %v6682_v42 }
 0x51f   : > { %7529 = vmatprep.subr.bf16.mxu0 %v6691_v9 }
 0x522   : > { %7530 = vmatpush3.bf16.msra.mxu0 %v6683_v30 }
 0x523   : > { %7531 = vmatprep.subr.bf16.mxu0 %v6692_v39 }
 0x526   : > { %7532 = vmatpush3.bf16.msra.mxu0 %v6684_v6 }
 0x527   : > { %7533 = vmatprep.subr.bf16.mxu0 %v6693_v15 }
 0x52a   : > { %7534 = vmatpush3.bf16.msra.mxu0 %v6685_v2 }
 0x52b   : > { %7535 = vmatprep.subr.bf16.mxu0 %v6694_v26 }
 0x52e   : > { %7536 = vmatpush3.bf16.msra.mxu0 %v6686_v38 }
 0x52f   : > { %7537 = vmatprep.subr.bf16.mxu0 %v6695_v45 }
 0x532   : > { %7538 = vmatpush3.bf16.msra.mxu0 %v6687_v63 }
 0x533   : > { %7539 = vmatprep.subr.bf16.mxu0 %v6696_v18 }
 0x536   : > { %7540 = vmatpush3.bf16.msra.mxu0 %v6688_v54 }
 0x539   : > { %6936 = vmatmul.mubr.bf16.vlgmr.msra.gmra.mrb[8].mxu0 %v7270_v40 }
 0x57f   : > { %v6706_v50 = vpop.permute.xlu0 %6705 }
 0x5c9   : > { %v7475_v12 = vpop.f32.mrb[0].mxu1 }
 0x5ca   : > { %v7476_v24 = vpop.f32.mrb[1].mxu1 }
 0x5cb   : > { %v7477_v31 = vadd.f32 %v7476_v24, %v7475_v12  ;;  %v7478_v1 = vpop.f32.mrb[2].mxu1 }
 0x5cc   : > { %v7453_v49 = vpop.f32.mrb[0].mxu0  ;;  %v7479_v47 = vpop.f32.mrb[3].mxu1 }
 0x5cd   : > { %v7454_v36 = vpop.f32.mrb[1].mxu0 }
 0x5ce   : > { %v7455_v4 = vadd.f32 %v7454_v36, %v7453_v49  ;;  %v7456_v27 = vpop.f32.mrb[2].mxu0 }
 0x5cf   : > { %v7457_v34 = vpop.f32.mrb[3].mxu0 }
 0x5d0   : > { %v6778_v14 = vadd.f32 %v7455_v4, %v6706_v50 }
 0x5d2   : > { %v6818_v13 = vadd.f32 %v7477_v31, %v6778_v14 }
 0x5e9   : > { %v7519_v11 = vpop.f32.mrb[4].mxu1 }
 0x5ea   : > { %v7520_v59 = vpop.f32.mrb[5].mxu1 }
 0x5eb   : > { %v7521_v21 = vadd.f32 %v7520_v59, %v7519_v11  ;;  %v7522_v52 = vpop.f32.mrb[6].mxu1 }
 0x5ec   : > { %v7497_v28 = vpop.f32.mrb[4].mxu0  ;;  %v7523_v25 = vpop.f32.mrb[7].mxu1 }
 0x5ed   : > { %v7498_v29 = vpop.f32.mrb[5].mxu0 }
 0x5ee   : > { %v7499_v44 = vadd.f32 %v7498_v29, %v7497_v28  ;;  %v7500_v35 = vpop.f32.mrb[6].mxu0 }
 0x5ef   : > { %v7501_v3 = vpop.f32.mrb[7].mxu0 }
 0x5f0   : > { %v6858_v16 = vadd.f32 %v7499_v44, %v6818_v13 }
 0x5f2   : > { %v6898_v41 = vadd.f32 %v7521_v21, %v6858_v16 }
 0x60c   : > { %v7541_v46 = vpop.f32.mrb[8].mxu0 }
 0x60d   : > { %v7542_v0 = vpop.f32.mrb[9].mxu0 }
 0x60e   : > { %v7543_v17 = vadd.f32 %v7542_v0, %v7541_v46  ;;  %v7544_v42 = vpop.f32.mrb[10].mxu0 }
 0x60f   : > { %v7545_v9 = vpop.f32.mrb[11].mxu0 }
 0x610   : > { %v6938_v37 = vadd.f32 %v7543_v17, %v6898_v41 }
 0x612   : > { %6944 = vst.msk [vmem:[%s13510_s5] sm:$0xff] %vm6943_vm5, %v6938_v37 }
 0x613 PF: > { %s15_s22 = sadd.s32 1, %s8687_s22   ;;  %s14661_s18 = smov %s8675_s19 }
 0x614   : > { %p12_p11 = scmp.ge.s32.totalorder %s15_s22, 4   ;;  %s14662_s19 = smov %s8757_s26 }
 0x615   : > { %s14663_s20 = smov %s8683_s21  ;;  %s14664_s21 = smov %s14666_s23 }
 0x616   :  { %14 = sbr.rel (!%p12_p11) target bundleno = 3 (0x3), region = 125 }

</bundles_post_ra>
